<compile_context>
chip_gen: v5e
topology: v5e:2x2
jax: 0.10.0
libtpu: 0.0.40
codegen_flags: <defaults>
</compile_context>

<pallas_src>
import math
import functools

import jax
import jax.numpy as jnp
from jax import lax
from jax.experimental import pallas as pl
from jax.experimental.pallas import tpu as pltpu

BN_EPS = 1e-5


def _fold_bn(w, b, bn_scale, bn_shift):
    """Fold the inference-mode BatchNorm affine into the FC weight/bias."""
    w_f = w * bn_scale[None, :]
    b_f = b * bn_scale + bn_shift
    return w_f, b_f


# ---------------------------------------------------------------------------
# Fused kernel: one batch element per grid step.
#   inputs (channels-last): STE_pred (1,P,N,D), STE_his (1,H,N,D), X (1,H,N,D)
#   weights (BN folded):    wq/wk/wv are (D, Din) (pre-transposed), wo is (Din, D)
#   scratch (channel-major, vertices on lanes):
#       q_scr (P,D,N), k_scr/v_scr (H,D,N), att_scr (D,P,N)
#   output (channels-last): (1, P, N, D)
# ---------------------------------------------------------------------------
def _fused_transform_attention_kernel(
        ste_pred_ref, ste_his_ref, x_ref,
        wq_ref, bq_ref, wk_ref, bk_ref, wv_ref, bv_ref, wo_ref, bo_ref,
        o_ref,
        q_scr, k_scr, v_scr, att_scr,
        *, n_heads, head_dim):
    P = ste_pred_ref.shape[1]
    H = ste_his_ref.shape[1]

    # ---- Q/K/V FC (MXU): relu(W'^T @ x_t^T + b'), channel-major scratch ----
    def fc_to_cm(in_ref, wt_ref, b_ref, out_scr, n_time):
        wt = wt_ref[...]                        # (Dout, Din)
        b = b_ref[...]                          # (Dout, 1)
        for t in range(n_time):                 # static, unrolled
            x = in_ref[0, t]                    # (N, Din)
            y = lax.dot_general(wt, x, (((1,), (1,)), ((), ())),
                                preferred_element_type=jnp.float32)  # (Dout, N)
            out_scr[t] = jnp.maximum(y + b, 0.0)

    fc_to_cm(ste_pred_ref, wq_ref, bq_ref, q_scr, P)
    fc_to_cm(ste_his_ref, wk_ref, bk_ref, k_scr, H)
    fc_to_cm(x_ref, wv_ref, bv_ref, v_scr, H)

    # ---- multi-head attention over the time axis (VPU/XLU/EUP) ----
    #   scores[p, h, n] = 1/sqrt(d) * sum_k q[p, k, n] * k[h, k, n]
    #   out[c, p, n]    = sum_h softmax_h(scores)[p, h, n] * v[h, c, n]
    inv_sqrt_d = 1.0 / math.sqrt(n_heads)
    for h in range(n_heads):                    # static, unrolled
        s = None
        for kk in range(head_dim):              # contraction over head channels
            c = h * head_dim + kk
            qc = q_scr[:, c, :]                 # (P, N)
            kc = k_scr[:, c, :]                 # (H, N)
            term = qc[:, None, :] * kc[None, :, :]            # (P, H, N)
            s = term if s is None else s + term
        s = s * inv_sqrt_d

        m = jnp.max(s, axis=1, keepdims=True)                 # (P, 1, N)
        e = jnp.exp(s - m)
        denom = jnp.sum(e, axis=1, keepdims=True)             # (P, 1, N)
        att = e * pl.reciprocal(denom, approx=True)           # (P, H, N)

        for kk in range(head_dim):              # contraction over num_his
            c = h * head_dim + kk
            vc = v_scr[:, c, :]                 # (H, N)
            att_scr[c] = jnp.sum(att * vc[None, :, :], axis=1)  # (P, N)

    # ---- output FC (MXU): relu(att_p^T @ W' + b'), channels-last output ----
    wo = wo_ref[...]                            # (Din, Dout)
    bo = bo_ref[...]                            # (1, Dout)
    for p in range(P):                          # static, unrolled
        xp = att_scr[:, p, :]                   # (Din, N)
        y = lax.dot_general(xp, wo, (((0,), (0,)), ((), ())),
                            preferred_element_type=jnp.float32)  # (N, Dout)
        o_ref[0, p] = jnp.maximum(y + bo, 0.0).astype(o_ref.dtype)


def transform_attention_forward(params, X, STE_his, STE_pred, K, d):
    """transformAttention forward.

    X, STE_his: [B, H, N, D];  STE_pred: [B, P, N, D];  D = K * d.
    Returns [B, P, N, D].
    """
    B, H, N, D = X.shape
    P = STE_pred.shape[1]
    assert D == K * d

    wq, bq = _fold_bn(*params['q'])
    wk, bk = _fold_bn(*params['k'])
    wv, bv = _fold_bn(*params['v'])
    wo, bo = _fold_bn(*params['o'])

    wq_t, wk_t, wv_t = wq.T, wk.T, wv.T          # (Dout, Din) for q/k/v
    bq2 = bq.reshape(D, 1)
    bk2 = bk.reshape(D, 1)
    bv2 = bv.reshape(D, 1)
    bo2 = bo.reshape(1, D)

    kern = functools.partial(_fused_transform_attention_kernel,
                             n_heads=d, head_dim=K)

    w_spec = pl.BlockSpec((D, D), lambda b: (0, 0))
    bcol_spec = pl.BlockSpec((D, 1), lambda b: (0, 0))

    return pl.pallas_call(
        kern,
        out_shape=jax.ShapeDtypeStruct((B, P, N, D), X.dtype),
        grid_spec=pltpu.PrefetchScalarGridSpec(
            num_scalar_prefetch=0,
            grid=(B,),
            in_specs=[
                pl.BlockSpec((1, P, N, D), lambda b: (b, 0, 0, 0)),  # STE_pred
                pl.BlockSpec((1, H, N, D), lambda b: (b, 0, 0, 0)),  # STE_his
                pl.BlockSpec((1, H, N, D), lambda b: (b, 0, 0, 0)),  # X
                w_spec, bcol_spec,                                   # q FC
                w_spec, bcol_spec,                                   # k FC
                w_spec, bcol_spec,                                   # v FC
                w_spec, pl.BlockSpec((1, D), lambda b: (0, 0)),      # out FC
            ],
            out_specs=pl.BlockSpec((1, P, N, D), lambda b: (b, 0, 0, 0)),
            scratch_shapes=[
                pltpu.VMEM((P, D, N), jnp.float32),   # q (channel-major)
                pltpu.VMEM((H, D, N), jnp.float32),   # k
                pltpu.VMEM((H, D, N), jnp.float32),   # v
                pltpu.VMEM((D, P, N), jnp.float32),   # attention output
            ],
        ),
        compiler_params=pltpu.CompilerParams(
            dimension_semantics=("parallel",)),
    )(STE_pred, STE_his, X, wq_t, bq2, wk_t, bk2, wv_t, bv2, wo, bo2)


# ---------------------------------------------------------------------------
# Pure-JAX reference (mirrors the PyTorch code literally)
# ---------------------------------------------------------------------------
def reference_forward(params, X, STE_his, STE_pred, K, d):
    B = X.shape[0]

    def fc_ref(x, p):
        w, b, scale, shift = p
        return jnp.maximum((x @ w + b) * scale + shift, 0.0)

    query = fc_ref(STE_pred, params['q'])
    key = fc_ref(STE_his, params['k'])
    value = fc_ref(X, params['v'])

    def split_cat(t):
        chunks = jnp.split(t, t.shape[-1] // K, axis=-1)
        return jnp.concatenate(chunks, axis=0)

    query = split_cat(query)
    key = split_cat(key)
    value = split_cat(value)
    query = jnp.transpose(query, (0, 2, 1, 3))
    key = jnp.transpose(key, (0, 2, 3, 1))
    value = jnp.transpose(value, (0, 2, 1, 3))
    att = jnp.matmul(query, key) / math.sqrt(d)
    att = jax.nn.softmax(att, axis=-1)
    out = jnp.matmul(att, value)
    out = jnp.transpose(out, (0, 2, 1, 3))
    chunks = jnp.split(out, out.shape[0] // B, axis=0)
    out = jnp.concatenate(chunks, axis=-1)
    return fc_ref(out, params['o'])


# ---------------------------------------------------------------------------
# Deterministic parameter init (matches the PyTorch __init__ shapes/inits)
# ---------------------------------------------------------------------------
def init_params(key, D):
    names = ['q', 'k', 'v', 'o']
    keys = jax.random.split(key, len(names))
    bound = math.sqrt(6.0 / (D + D))          # xavier_uniform on a [D, D] 1x1 conv
    bn_scale = jnp.full((D,), 1.0 / math.sqrt(1.0 + BN_EPS), jnp.float32)
    bn_shift = jnp.zeros((D,), jnp.float32)
    params = {}
    for name, k in zip(names, keys):
        w = jax.random.uniform(k, (D, D), jnp.float32, -bound, bound)
        b = jnp.zeros((D,), jnp.float32)      # conv bias init: zeros_
        params[name] = (w, b, bn_scale, bn_shift)
    return params


if __name__ == "__main__":
    # Small shapes: K=8 (head dim), d=4 heads -> D=32; batch=2, num_his=8,
    # num_pred=4, num_vertex=16.
    K, d = 8, 4
    D = K * d
    B, num_his, num_pred, N = 2, 8, 4, 16

    root = jax.random.PRNGKey(0)
    kx, kh, kp, kw = jax.random.split(root, 4)
    X = jax.random.normal(kx, (B, num_his, N, D), jnp.float32)
    STE_his = jax.random.normal(kh, (B, num_his, N, D), jnp.float32)
    STE_pred = jax.random.normal(kp, (B, num_pred, N, D), jnp.float32)
    params = init_params(kw, D)

    out = transform_attention_forward(params, X, STE_his, STE_pred, K, d)
    out = jax.block_until_ready(out)
    assert out.shape == (B, num_pred, N, D), out.shape

    ref = reference_forward(params, X, STE_his, STE_pred, K, d)
    ref = jax.block_until_ready(ref)
    assert jnp.allclose(out, ref, rtol=1e-2, atol=1e-2), (
        float(jnp.max(jnp.abs(out - ref))))

    print("KERNEL_OK")
</pallas_src>

<mosaic_0001>
module attributes {stable_mosaic.version = 11 : i64} {
  func.func @_fused_transform_attention_kernel(%arg0: i32, %arg1: memref<1x4x16x32xf32, #tpu.memory_space<vmem>>, %arg2: memref<1x8x16x32xf32, #tpu.memory_space<vmem>>, %arg3: memref<1x8x16x32xf32, #tpu.memory_space<vmem>>, %arg4: memref<32x32xf32, #tpu.memory_space<vmem>>, %arg5: memref<32x1xf32, #tpu.memory_space<vmem>>, %arg6: memref<32x32xf32, #tpu.memory_space<vmem>>, %arg7: memref<32x1xf32, #tpu.memory_space<vmem>>, %arg8: memref<32x32xf32, #tpu.memory_space<vmem>>, %arg9: memref<32x1xf32, #tpu.memory_space<vmem>>, %arg10: memref<32x32xf32, #tpu.memory_space<vmem>>, %arg11: memref<1x32xf32, #tpu.memory_space<vmem>>, %arg12: memref<1x4x16x32xf32, #tpu.memory_space<vmem>>, %arg13: memref<4x32x16xf32, #tpu.memory_space<vmem>>, %arg14: memref<8x32x16xf32, #tpu.memory_space<vmem>>, %arg15: memref<8x32x16xf32, #tpu.memory_space<vmem>>, %arg16: memref<32x4x16xf32, #tpu.memory_space<vmem>>) attributes {dimension_semantics = [#tpu.dimension_semantics<parallel>], iteration_bounds = array<i64: 2>, scalar_prefetch = 0 : i64, scratch_operands = 4 : i64, tpu.core_type = #tpu.core_type<tc>, window_params = [{transform_indices = @transform_0, window_bounds = array<i64: 1, 4, 16, 32>}, {transform_indices = @transform_1, window_bounds = array<i64: 1, 8, 16, 32>}, {transform_indices = @transform_2, window_bounds = array<i64: 1, 8, 16, 32>}, {pipeline_mode = #tpu.pipeline_mode<synchronous>, transform_indices = @transform_3, window_bounds = array<i64: 32, 32>}, {pipeline_mode = #tpu.pipeline_mode<synchronous>, transform_indices = @transform_4, window_bounds = array<i64: 32, 1>}, {pipeline_mode = #tpu.pipeline_mode<synchronous>, transform_indices = @transform_5, window_bounds = array<i64: 32, 32>}, {pipeline_mode = #tpu.pipeline_mode<synchronous>, transform_indices = @transform_6, window_bounds = array<i64: 32, 1>}, {pipeline_mode = #tpu.pipeline_mode<synchronous>, transform_indices = @transform_7, window_bounds = array<i64: 32, 32>}, {pipeline_mode = #tpu.pipeline_mode<synchronous>, transform_indices = @transform_8, window_bounds = array<i64: 32, 1>}, {pipeline_mode = #tpu.pipeline_mode<synchronous>, transform_indices = @transform_9, window_bounds = array<i64: 32, 32>}, {pipeline_mode = #tpu.pipeline_mode<synchronous>, transform_indices = @transform_10, window_bounds = array<i64: 1, 32>}, {transform_indices = @transform_11, window_bounds = array<i64: 1, 4, 16, 32>}]} {
    %c0 = arith.constant 0 : index
    %c0_0 = arith.constant 0 : index
    %0 = vector.load %arg4[%c0, %c0_0] : memref<32x32xf32, #tpu.memory_space<vmem>>, vector<32x32xf32>
    %c0_1 = arith.constant 0 : index
    %c0_2 = arith.constant 0 : index
    %1 = vector.load %arg5[%c0_1, %c0_2] : memref<32x1xf32, #tpu.memory_space<vmem>>, vector<32x1xf32>
    %c0_3 = arith.constant 0 : index
    %c0_4 = arith.constant 0 : index
    %c0_5 = arith.constant 0 : index
    %c0_6 = arith.constant 0 : index
    %2 = vector.load %arg1[%c0_3, %c0_4, %c0_5, %c0_6] : memref<1x4x16x32xf32, #tpu.memory_space<vmem>>, vector<1x1x16x32xf32>
    %3 = vector.shape_cast %2 : vector<1x1x16x32xf32> to vector<16x32xf32>
    %cst = arith.constant dense<0.000000e+00> : vector<32x16xf32>
    %4 = tpu.matmul %0, %3, %cst {dimension_numbers = #tpu.dot_dimension_numbers<[1], [1], [0], [0], [0, 0, 1, 0], [], []>} : vector<32x32xf32>, vector<16x32xf32>, vector<32x16xf32> -> vector<32x16xf32>
    %5 = vector.broadcast %1 : vector<32x1xf32> to vector<32x16xf32>
    %6 = arith.addf %4, %5 : vector<32x16xf32>
    %cst_7 = arith.constant 0.000000e+00 : f32
    %7 = vector.broadcast %cst_7 : f32 to vector<32x16xf32>
    %8 = arith.maximumf %6, %7 : vector<32x16xf32>
    %c0_8 = arith.constant 0 : index
    %c0_9 = arith.constant 0 : index
    %c0_10 = arith.constant 0 : index
    %9 = vector.load %arg13[%c0_8, %c0_9, %c0_10] : memref<4x32x16xf32, #tpu.memory_space<vmem>>, vector<1x32x16xf32>
    %10 = vector.shape_cast %9 : vector<1x32x16xf32> to vector<32x16xf32>
    %11 = vector.shape_cast %8 : vector<32x16xf32> to vector<1x32x16xf32>
    tpu.vector_store %arg13[%c0_8, %c0_9, %c0_10], %11 {strides = array<i32>} : memref<4x32x16xf32, #tpu.memory_space<vmem>>, vector<1x32x16xf32>,
    %c0_11 = arith.constant 0 : index
    %c1 = arith.constant 1 : index
    %c0_12 = arith.constant 0 : index
    %c0_13 = arith.constant 0 : index
    %12 = vector.load %arg1[%c0_11, %c1, %c0_12, %c0_13] : memref<1x4x16x32xf32, #tpu.memory_space<vmem>>, vector<1x1x16x32xf32>
    %13 = vector.shape_cast %12 : vector<1x1x16x32xf32> to vector<16x32xf32>
    %cst_14 = arith.constant dense<0.000000e+00> : vector<32x16xf32>
    %14 = tpu.matmul %0, %13, %cst_14 {dimension_numbers = #tpu.dot_dimension_numbers<[1], [1], [0], [0], [0, 0, 1, 0], [], []>} : vector<32x32xf32>, vector<16x32xf32>, vector<32x16xf32> -> vector<32x16xf32>
    %15 = vector.broadcast %1 : vector<32x1xf32> to vector<32x16xf32>
    %16 = arith.addf %14, %15 : vector<32x16xf32>
    %cst_15 = arith.constant 0.000000e+00 : f32
    %17 = vector.broadcast %cst_15 : f32 to vector<32x16xf32>
    %18 = arith.maximumf %16, %17 : vector<32x16xf32>
    %c1_16 = arith.constant 1 : index
    %c0_17 = arith.constant 0 : index
    %c0_18 = arith.constant 0 : index
    %19 = vector.load %arg13[%c1_16, %c0_17, %c0_18] : memref<4x32x16xf32, #tpu.memory_space<vmem>>, vector<1x32x16xf32>
    %20 = vector.shape_cast %19 : vector<1x32x16xf32> to vector<32x16xf32>
    %21 = vector.shape_cast %18 : vector<32x16xf32> to vector<1x32x16xf32>
    tpu.vector_store %arg13[%c1_16, %c0_17, %c0_18], %21 {strides = array<i32>} : memref<4x32x16xf32, #tpu.memory_space<vmem>>, vector<1x32x16xf32>,
    %c0_19 = arith.constant 0 : index
    %c2 = arith.constant 2 : index
    %c0_20 = arith.constant 0 : index
    %c0_21 = arith.constant 0 : index
    %22 = vector.load %arg1[%c0_19, %c2, %c0_20, %c0_21] : memref<1x4x16x32xf32, #tpu.memory_space<vmem>>, vector<1x1x16x32xf32>
    %23 = vector.shape_cast %22 : vector<1x1x16x32xf32> to vector<16x32xf32>
    %cst_22 = arith.constant dense<0.000000e+00> : vector<32x16xf32>
    %24 = tpu.matmul %0, %23, %cst_22 {dimension_numbers = #tpu.dot_dimension_numbers<[1], [1], [0], [0], [0, 0, 1, 0], [], []>} : vector<32x32xf32>, vector<16x32xf32>, vector<32x16xf32> -> vector<32x16xf32>
    %25 = vector.broadcast %1 : vector<32x1xf32> to vector<32x16xf32>
    %26 = arith.addf %24, %25 : vector<32x16xf32>
    %cst_23 = arith.constant 0.000000e+00 : f32
    %27 = vector.broadcast %cst_23 : f32 to vector<32x16xf32>
    %28 = arith.maximumf %26, %27 : vector<32x16xf32>
    %c2_24 = arith.constant 2 : index
    %c0_25 = arith.constant 0 : index
    %c0_26 = arith.constant 0 : index
    %29 = vector.load %arg13[%c2_24, %c0_25, %c0_26] : memref<4x32x16xf32, #tpu.memory_space<vmem>>, vector<1x32x16xf32>
    %30 = vector.shape_cast %29 : vector<1x32x16xf32> to vector<32x16xf32>
    %31 = vector.shape_cast %28 : vector<32x16xf32> to vector<1x32x16xf32>
    tpu.vector_store %arg13[%c2_24, %c0_25, %c0_26], %31 {strides = array<i32>} : memref<4x32x16xf32, #tpu.memory_space<vmem>>, vector<1x32x16xf32>,
    %c0_27 = arith.constant 0 : index
    %c3 = arith.constant 3 : index
    %c0_28 = arith.constant 0 : index
    %c0_29 = arith.constant 0 : index
    %32 = vector.load %arg1[%c0_27, %c3, %c0_28, %c0_29] : memref<1x4x16x32xf32, #tpu.memory_space<vmem>>, vector<1x1x16x32xf32>
    %33 = vector.shape_cast %32 : vector<1x1x16x32xf32> to vector<16x32xf32>
    %cst_30 = arith.constant dense<0.000000e+00> : vector<32x16xf32>
    %34 = tpu.matmul %0, %33, %cst_30 {dimension_numbers = #tpu.dot_dimension_numbers<[1], [1], [0], [0], [0, 0, 1, 0], [], []>} : vector<32x32xf32>, vector<16x32xf32>, vector<32x16xf32> -> vector<32x16xf32>
    %35 = vector.broadcast %1 : vector<32x1xf32> to vector<32x16xf32>
    %36 = arith.addf %34, %35 : vector<32x16xf32>
    %cst_31 = arith.constant 0.000000e+00 : f32
    %37 = vector.broadcast %cst_31 : f32 to vector<32x16xf32>
    %38 = arith.maximumf %36, %37 : vector<32x16xf32>
    %c3_32 = arith.constant 3 : index
    %c0_33 = arith.constant 0 : index
    %c0_34 = arith.constant 0 : index
    %39 = vector.load %arg13[%c3_32, %c0_33, %c0_34] : memref<4x32x16xf32, #tpu.memory_space<vmem>>, vector<1x32x16xf32>
    %40 = vector.shape_cast %39 : vector<1x32x16xf32> to vector<32x16xf32>
    %41 = vector.shape_cast %38 : vector<32x16xf32> to vector<1x32x16xf32>
    tpu.vector_store %arg13[%c3_32, %c0_33, %c0_34], %41 {strides = array<i32>} : memref<4x32x16xf32, #tpu.memory_space<vmem>>, vector<1x32x16xf32>,
    %c0_35 = arith.constant 0 : index
    %c0_36 = arith.constant 0 : index
    %42 = vector.load %arg6[%c0_35, %c0_36] : memref<32x32xf32, #tpu.memory_space<vmem>>, vector<32x32xf32>
    %c0_37 = arith.constant 0 : index
    %c0_38 = arith.constant 0 : index
    %43 = vector.load %arg7[%c0_37, %c0_38] : memref<32x1xf32, #tpu.memory_space<vmem>>, vector<32x1xf32>
    %c0_39 = arith.constant 0 : index
    %c0_40 = arith.constant 0 : index
    %c0_41 = arith.constant 0 : index
    %c0_42 = arith.constant 0 : index
    %44 = vector.load %arg2[%c0_39, %c0_40, %c0_41, %c0_42] : memref<1x8x16x32xf32, #tpu.memory_space<vmem>>, vector<1x1x16x32xf32>
    %45 = vector.shape_cast %44 : vector<1x1x16x32xf32> to vector<16x32xf32>
    %cst_43 = arith.constant dense<0.000000e+00> : vector<32x16xf32>
    %46 = tpu.matmul %42, %45, %cst_43 {dimension_numbers = #tpu.dot_dimension_numbers<[1], [1], [0], [0], [0, 0, 1, 0], [], []>} : vector<32x32xf32>, vector<16x32xf32>, vector<32x16xf32> -> vector<32x16xf32>
    %47 = vector.broadcast %43 : vector<32x1xf32> to vector<32x16xf32>
    %48 = arith.addf %46, %47 : vector<32x16xf32>
    %cst_44 = arith.constant 0.000000e+00 : f32
    %49 = vector.broadcast %cst_44 : f32 to vector<32x16xf32>
    %50 = arith.maximumf %48, %49 : vector<32x16xf32>
    %c0_45 = arith.constant 0 : index
    %c0_46 = arith.constant 0 : index
    %c0_47 = arith.constant 0 : index
    %51 = vector.load %arg14[%c0_45, %c0_46, %c0_47] : memref<8x32x16xf32, #tpu.memory_space<vmem>>, vector<1x32x16xf32>
    %52 = vector.shape_cast %51 : vector<1x32x16xf32> to vector<32x16xf32>
    %53 = vector.shape_cast %50 : vector<32x16xf32> to vector<1x32x16xf32>
    tpu.vector_store %arg14[%c0_45, %c0_46, %c0_47], %53 {strides = array<i32>} : memref<8x32x16xf32, #tpu.memory_space<vmem>>, vector<1x32x16xf32>,
    %c0_48 = arith.constant 0 : index
    %c1_49 = arith.constant 1 : index
    %c0_50 = arith.constant 0 : index
    %c0_51 = arith.constant 0 : index
    %54 = vector.load %arg2[%c0_48, %c1_49, %c0_50, %c0_51] : memref<1x8x16x32xf32, #tpu.memory_space<vmem>>, vector<1x1x16x32xf32>
    %55 = vector.shape_cast %54 : vector<1x1x16x32xf32> to vector<16x32xf32>
    %cst_52 = arith.constant dense<0.000000e+00> : vector<32x16xf32>
    %56 = tpu.matmul %42, %55, %cst_52 {dimension_numbers = #tpu.dot_dimension_numbers<[1], [1], [0], [0], [0, 0, 1, 0], [], []>} : vector<32x32xf32>, vector<16x32xf32>, vector<32x16xf32> -> vector<32x16xf32>
    %57 = vector.broadcast %43 : vector<32x1xf32> to vector<32x16xf32>
    %58 = arith.addf %56, %57 : vector<32x16xf32>
    %cst_53 = arith.constant 0.000000e+00 : f32
    %59 = vector.broadcast %cst_53 : f32 to vector<32x16xf32>
    %60 = arith.maximumf %58, %59 : vector<32x16xf32>
    %c1_54 = arith.constant 1 : index
    %c0_55 = arith.constant 0 : index
    %c0_56 = arith.constant 0 : index
    %61 = vector.load %arg14[%c1_54, %c0_55, %c0_56] : memref<8x32x16xf32, #tpu.memory_space<vmem>>, vector<1x32x16xf32>
    %62 = vector.shape_cast %61 : vector<1x32x16xf32> to vector<32x16xf32>
    %63 = vector.shape_cast %60 : vector<32x16xf32> to vector<1x32x16xf32>
    tpu.vector_store %arg14[%c1_54, %c0_55, %c0_56], %63 {strides = array<i32>} : memref<8x32x16xf32, #tpu.memory_space<vmem>>, vector<1x32x16xf32>,
    %c0_57 = arith.constant 0 : index
    %c2_58 = arith.constant 2 : index
    %c0_59 = arith.constant 0 : index
    %c0_60 = arith.constant 0 : index
    %64 = vector.load %arg2[%c0_57, %c2_58, %c0_59, %c0_60] : memref<1x8x16x32xf32, #tpu.memory_space<vmem>>, vector<1x1x16x32xf32>
    %65 = vector.shape_cast %64 : vector<1x1x16x32xf32> to vector<16x32xf32>
    %cst_61 = arith.constant dense<0.000000e+00> : vector<32x16xf32>
    %66 = tpu.matmul %42, %65, %cst_61 {dimension_numbers = #tpu.dot_dimension_numbers<[1], [1], [0], [0], [0, 0, 1, 0], [], []>} : vector<32x32xf32>, vector<16x32xf32>, vector<32x16xf32> -> vector<32x16xf32>
    %67 = vector.broadcast %43 : vector<32x1xf32> to vector<32x16xf32>
    %68 = arith.addf %66, %67 : vector<32x16xf32>
    %cst_62 = arith.constant 0.000000e+00 : f32
    %69 = vector.broadcast %cst_62 : f32 to vector<32x16xf32>
    %70 = arith.maximumf %68, %69 : vector<32x16xf32>
    %c2_63 = arith.constant 2 : index
    %c0_64 = arith.constant 0 : index
    %c0_65 = arith.constant 0 : index
    %71 = vector.load %arg14[%c2_63, %c0_64, %c0_65] : memref<8x32x16xf32, #tpu.memory_space<vmem>>, vector<1x32x16xf32>
    %72 = vector.shape_cast %71 : vector<1x32x16xf32> to vector<32x16xf32>
    %73 = vector.shape_cast %70 : vector<32x16xf32> to vector<1x32x16xf32>
    tpu.vector_store %arg14[%c2_63, %c0_64, %c0_65], %73 {strides = array<i32>} : memref<8x32x16xf32, #tpu.memory_space<vmem>>, vector<1x32x16xf32>,
    %c0_66 = arith.constant 0 : index
    %c3_67 = arith.constant 3 : index
    %c0_68 = arith.constant 0 : index
    %c0_69 = arith.constant 0 : index
    %74 = vector.load %arg2[%c0_66, %c3_67, %c0_68, %c0_69] : memref<1x8x16x32xf32, #tpu.memory_space<vmem>>, vector<1x1x16x32xf32>
    %75 = vector.shape_cast %74 : vector<1x1x16x32xf32> to vector<16x32xf32>
    %cst_70 = arith.constant dense<0.000000e+00> : vector<32x16xf32>
    %76 = tpu.matmul %42, %75, %cst_70 {dimension_numbers = #tpu.dot_dimension_numbers<[1], [1], [0], [0], [0, 0, 1, 0], [], []>} : vector<32x32xf32>, vector<16x32xf32>, vector<32x16xf32> -> vector<32x16xf32>
    %77 = vector.broadcast %43 : vector<32x1xf32> to vector<32x16xf32>
    %78 = arith.addf %76, %77 : vector<32x16xf32>
    %cst_71 = arith.constant 0.000000e+00 : f32
    %79 = vector.broadcast %cst_71 : f32 to vector<32x16xf32>
    %80 = arith.maximumf %78, %79 : vector<32x16xf32>
    %c3_72 = arith.constant 3 : index
    %c0_73 = arith.constant 0 : index
    %c0_74 = arith.constant 0 : index
    %81 = vector.load %arg14[%c3_72, %c0_73, %c0_74] : memref<8x32x16xf32, #tpu.memory_space<vmem>>, vector<1x32x16xf32>
    %82 = vector.shape_cast %81 : vector<1x32x16xf32> to vector<32x16xf32>
    %83 = vector.shape_cast %80 : vector<32x16xf32> to vector<1x32x16xf32>
    tpu.vector_store %arg14[%c3_72, %c0_73, %c0_74], %83 {strides = array<i32>} : memref<8x32x16xf32, #tpu.memory_space<vmem>>, vector<1x32x16xf32>,
    %c0_75 = arith.constant 0 : index
    %c4 = arith.constant 4 : index
    %c0_76 = arith.constant 0 : index
    %c0_77 = arith.constant 0 : index
    %84 = vector.load %arg2[%c0_75, %c4, %c0_76, %c0_77] : memref<1x8x16x32xf32, #tpu.memory_space<vmem>>, vector<1x1x16x32xf32>
    %85 = vector.shape_cast %84 : vector<1x1x16x32xf32> to vector<16x32xf32>
    %cst_78 = arith.constant dense<0.000000e+00> : vector<32x16xf32>
    %86 = tpu.matmul %42, %85, %cst_78 {dimension_numbers = #tpu.dot_dimension_numbers<[1], [1], [0], [0], [0, 0, 1, 0], [], []>} : vector<32x32xf32>, vector<16x32xf32>, vector<32x16xf32> -> vector<32x16xf32>
    %87 = vector.broadcast %43 : vector<32x1xf32> to vector<32x16xf32>
    %88 = arith.addf %86, %87 : vector<32x16xf32>
    %cst_79 = arith.constant 0.000000e+00 : f32
    %89 = vector.broadcast %cst_79 : f32 to vector<32x16xf32>
    %90 = arith.maximumf %88, %89 : vector<32x16xf32>
    %c4_80 = arith.constant 4 : index
    %c0_81 = arith.constant 0 : index
    %c0_82 = arith.constant 0 : index
    %91 = vector.load %arg14[%c4_80, %c0_81, %c0_82] : memref<8x32x16xf32, #tpu.memory_space<vmem>>, vector<1x32x16xf32>
    %92 = vector.shape_cast %91 : vector<1x32x16xf32> to vector<32x16xf32>
    %93 = vector.shape_cast %90 : vector<32x16xf32> to vector<1x32x16xf32>
    tpu.vector_store %arg14[%c4_80, %c0_81, %c0_82], %93 {strides = array<i32>} : memref<8x32x16xf32, #tpu.memory_space<vmem>>, vector<1x32x16xf32>,
    %c0_83 = arith.constant 0 : index
    %c5 = arith.constant 5 : index
    %c0_84 = arith.constant 0 : index
    %c0_85 = arith.constant 0 : index
    %94 = vector.load %arg2[%c0_83, %c5, %c0_84, %c0_85] : memref<1x8x16x32xf32, #tpu.memory_space<vmem>>, vector<1x1x16x32xf32>
    %95 = vector.shape_cast %94 : vector<1x1x16x32xf32> to vector<16x32xf32>
    %cst_86 = arith.constant dense<0.000000e+00> : vector<32x16xf32>
    %96 = tpu.matmul %42, %95, %cst_86 {dimension_numbers = #tpu.dot_dimension_numbers<[1], [1], [0], [0], [0, 0, 1, 0], [], []>} : vector<32x32xf32>, vector<16x32xf32>, vector<32x16xf32> -> vector<32x16xf32>
    %97 = vector.broadcast %43 : vector<32x1xf32> to vector<32x16xf32>
    %98 = arith.addf %96, %97 : vector<32x16xf32>
    %cst_87 = arith.constant 0.000000e+00 : f32
    %99 = vector.broadcast %cst_87 : f32 to vector<32x16xf32>
    %100 = arith.maximumf %98, %99 : vector<32x16xf32>
    %c5_88 = arith.constant 5 : index
    %c0_89 = arith.constant 0 : index
    %c0_90 = arith.constant 0 : index
    %101 = vector.load %arg14[%c5_88, %c0_89, %c0_90] : memref<8x32x16xf32, #tpu.memory_space<vmem>>, vector<1x32x16xf32>
    %102 = vector.shape_cast %101 : vector<1x32x16xf32> to vector<32x16xf32>
    %103 = vector.shape_cast %100 : vector<32x16xf32> to vector<1x32x16xf32>
    tpu.vector_store %arg14[%c5_88, %c0_89, %c0_90], %103 {strides = array<i32>} : memref<8x32x16xf32, #tpu.memory_space<vmem>>, vector<1x32x16xf32>,
    %c0_91 = arith.constant 0 : index
    %c6 = arith.constant 6 : index
    %c0_92 = arith.constant 0 : index
    %c0_93 = arith.constant 0 : index
    %104 = vector.load %arg2[%c0_91, %c6, %c0_92, %c0_93] : memref<1x8x16x32xf32, #tpu.memory_space<vmem>>, vector<1x1x16x32xf32>
    %105 = vector.shape_cast %104 : vector<1x1x16x32xf32> to vector<16x32xf32>
    %cst_94 = arith.constant dense<0.000000e+00> : vector<32x16xf32>
    %106 = tpu.matmul %42, %105, %cst_94 {dimension_numbers = #tpu.dot_dimension_numbers<[1], [1], [0], [0], [0, 0, 1, 0], [], []>} : vector<32x32xf32>, vector<16x32xf32>, vector<32x16xf32> -> vector<32x16xf32>
    %107 = vector.broadcast %43 : vector<32x1xf32> to vector<32x16xf32>
    %108 = arith.addf %106, %107 : vector<32x16xf32>
    %cst_95 = arith.constant 0.000000e+00 : f32
    %109 = vector.broadcast %cst_95 : f32 to vector<32x16xf32>
    %110 = arith.maximumf %108, %109 : vector<32x16xf32>
    %c6_96 = arith.constant 6 : index
    %c0_97 = arith.constant 0 : index
    %c0_98 = arith.constant 0 : index
    %111 = vector.load %arg14[%c6_96, %c0_97, %c0_98] : memref<8x32x16xf32, #tpu.memory_space<vmem>>, vector<1x32x16xf32>
    %112 = vector.shape_cast %111 : vector<1x32x16xf32> to vector<32x16xf32>
    %113 = vector.shape_cast %110 : vector<32x16xf32> to vector<1x32x16xf32>
    tpu.vector_store %arg14[%c6_96, %c0_97, %c0_98], %113 {strides = array<i32>} : memref<8x32x16xf32, #tpu.memory_space<vmem>>, vector<1x32x16xf32>,
    %c0_99 = arith.constant 0 : index
    %c7 = arith.constant 7 : index
    %c0_100 = arith.constant 0 : index
    %c0_101 = arith.constant 0 : index
    %114 = vector.load %arg2[%c0_99, %c7, %c0_100, %c0_101] : memref<1x8x16x32xf32, #tpu.memory_space<vmem>>, vector<1x1x16x32xf32>
    %115 = vector.shape_cast %114 : vector<1x1x16x32xf32> to vector<16x32xf32>
    %cst_102 = arith.constant dense<0.000000e+00> : vector<32x16xf32>
    %116 = tpu.matmul %42, %115, %cst_102 {dimension_numbers = #tpu.dot_dimension_numbers<[1], [1], [0], [0], [0, 0, 1, 0], [], []>} : vector<32x32xf32>, vector<16x32xf32>, vector<32x16xf32> -> vector<32x16xf32>
    %117 = vector.broadcast %43 : vector<32x1xf32> to vector<32x16xf32>
    %118 = arith.addf %116, %117 : vector<32x16xf32>
    %cst_103 = arith.constant 0.000000e+00 : f32
    %119 = vector.broadcast %cst_103 : f32 to vector<32x16xf32>
    %120 = arith.maximumf %118, %119 : vector<32x16xf32>
    %c7_104 = arith.constant 7 : index
    %c0_105 = arith.constant 0 : index
    %c0_106 = arith.constant 0 : index
    %121 = vector.load %arg14[%c7_104, %c0_105, %c0_106] : memref<8x32x16xf32, #tpu.memory_space<vmem>>, vector<1x32x16xf32>
    %122 = vector.shape_cast %121 : vector<1x32x16xf32> to vector<32x16xf32>
    %123 = vector.shape_cast %120 : vector<32x16xf32> to vector<1x32x16xf32>
    tpu.vector_store %arg14[%c7_104, %c0_105, %c0_106], %123 {strides = array<i32>} : memref<8x32x16xf32, #tpu.memory_space<vmem>>, vector<1x32x16xf32>,
    %c0_107 = arith.constant 0 : index
    %c0_108 = arith.constant 0 : index
    %124 = vector.load %arg8[%c0_107, %c0_108] : memref<32x32xf32, #tpu.memory_space<vmem>>, vector<32x32xf32>
    %c0_109 = arith.constant 0 : index
    %c0_110 = arith.constant 0 : index
    %125 = vector.load %arg9[%c0_109, %c0_110] : memref<32x1xf32, #tpu.memory_space<vmem>>, vector<32x1xf32>
    %c0_111 = arith.constant 0 : index
    %c0_112 = arith.constant 0 : index
    %c0_113 = arith.constant 0 : index
    %c0_114 = arith.constant 0 : index
    %126 = vector.load %arg3[%c0_111, %c0_112, %c0_113, %c0_114] : memref<1x8x16x32xf32, #tpu.memory_space<vmem>>, vector<1x1x16x32xf32>
    %127 = vector.shape_cast %126 : vector<1x1x16x32xf32> to vector<16x32xf32>
    %cst_115 = arith.constant dense<0.000000e+00> : vector<32x16xf32>
    %128 = tpu.matmul %124, %127, %cst_115 {dimension_numbers = #tpu.dot_dimension_numbers<[1], [1], [0], [0], [0, 0, 1, 0], [], []>} : vector<32x32xf32>, vector<16x32xf32>, vector<32x16xf32> -> vector<32x16xf32>
    %129 = vector.broadcast %125 : vector<32x1xf32> to vector<32x16xf32>
    %130 = arith.addf %128, %129 : vector<32x16xf32>
    %cst_116 = arith.constant 0.000000e+00 : f32
    %131 = vector.broadcast %cst_116 : f32 to vector<32x16xf32>
    %132 = arith.maximumf %130, %131 : vector<32x16xf32>
    %c0_117 = arith.constant 0 : index
    %c0_118 = arith.constant 0 : index
    %c0_119 = arith.constant 0 : index
    %133 = vector.load %arg15[%c0_117, %c0_118, %c0_119] : memref<8x32x16xf32, #tpu.memory_space<vmem>>, vector<1x32x16xf32>
    %134 = vector.shape_cast %133 : vector<1x32x16xf32> to vector<32x16xf32>
    %135 = vector.shape_cast %132 : vector<32x16xf32> to vector<1x32x16xf32>
    tpu.vector_store %arg15[%c0_117, %c0_118, %c0_119], %135 {strides = array<i32>} : memref<8x32x16xf32, #tpu.memory_space<vmem>>, vector<1x32x16xf32>,
    %c0_120 = arith.constant 0 : index
    %c1_121 = arith.constant 1 : index
    %c0_122 = arith.constant 0 : index
    %c0_123 = arith.constant 0 : index
    %136 = vector.load %arg3[%c0_120, %c1_121, %c0_122, %c0_123] : memref<1x8x16x32xf32, #tpu.memory_space<vmem>>, vector<1x1x16x32xf32>
    %137 = vector.shape_cast %136 : vector<1x1x16x32xf32> to vector<16x32xf32>
    %cst_124 = arith.constant dense<0.000000e+00> : vector<32x16xf32>
    %138 = tpu.matmul %124, %137, %cst_124 {dimension_numbers = #tpu.dot_dimension_numbers<[1], [1], [0], [0], [0, 0, 1, 0], [], []>} : vector<32x32xf32>, vector<16x32xf32>, vector<32x16xf32> -> vector<32x16xf32>
    %139 = vector.broadcast %125 : vector<32x1xf32> to vector<32x16xf32>
    %140 = arith.addf %138, %139 : vector<32x16xf32>
    %cst_125 = arith.constant 0.000000e+00 : f32
    %141 = vector.broadcast %cst_125 : f32 to vector<32x16xf32>
    %142 = arith.maximumf %140, %141 : vector<32x16xf32>
    %c1_126 = arith.constant 1 : index
    %c0_127 = arith.constant 0 : index
    %c0_128 = arith.constant 0 : index
    %143 = vector.load %arg15[%c1_126, %c0_127, %c0_128] : memref<8x32x16xf32, #tpu.memory_space<vmem>>, vector<1x32x16xf32>
    %144 = vector.shape_cast %143 : vector<1x32x16xf32> to vector<32x16xf32>
    %145 = vector.shape_cast %142 : vector<32x16xf32> to vector<1x32x16xf32>
    tpu.vector_store %arg15[%c1_126, %c0_127, %c0_128], %145 {strides = array<i32>} : memref<8x32x16xf32, #tpu.memory_space<vmem>>, vector<1x32x16xf32>,
    %c0_129 = arith.constant 0 : index
    %c2_130 = arith.constant 2 : index
    %c0_131 = arith.constant 0 : index
    %c0_132 = arith.constant 0 : index
    %146 = vector.load %arg3[%c0_129, %c2_130, %c0_131, %c0_132] : memref<1x8x16x32xf32, #tpu.memory_space<vmem>>, vector<1x1x16x32xf32>
    %147 = vector.shape_cast %146 : vector<1x1x16x32xf32> to vector<16x32xf32>
    %cst_133 = arith.constant dense<0.000000e+00> : vector<32x16xf32>
    %148 = tpu.matmul %124, %147, %cst_133 {dimension_numbers = #tpu.dot_dimension_numbers<[1], [1], [0], [0], [0, 0, 1, 0], [], []>} : vector<32x32xf32>, vector<16x32xf32>, vector<32x16xf32> -> vector<32x16xf32>
    %149 = vector.broadcast %125 : vector<32x1xf32> to vector<32x16xf32>
    %150 = arith.addf %148, %149 : vector<32x16xf32>
    %cst_134 = arith.constant 0.000000e+00 : f32
    %151 = vector.broadcast %cst_134 : f32 to vector<32x16xf32>
    %152 = arith.maximumf %150, %151 : vector<32x16xf32>
    %c2_135 = arith.constant 2 : index
    %c0_136 = arith.constant 0 : index
    %c0_137 = arith.constant 0 : index
    %153 = vector.load %arg15[%c2_135, %c0_136, %c0_137] : memref<8x32x16xf32, #tpu.memory_space<vmem>>, vector<1x32x16xf32>
    %154 = vector.shape_cast %153 : vector<1x32x16xf32> to vector<32x16xf32>
    %155 = vector.shape_cast %152 : vector<32x16xf32> to vector<1x32x16xf32>
    tpu.vector_store %arg15[%c2_135, %c0_136, %c0_137], %155 {strides = array<i32>} : memref<8x32x16xf32, #tpu.memory_space<vmem>>, vector<1x32x16xf32>,
    %c0_138 = arith.constant 0 : index
    %c3_139 = arith.constant 3 : index
    %c0_140 = arith.constant 0 : index
    %c0_141 = arith.constant 0 : index
    %156 = vector.load %arg3[%c0_138, %c3_139, %c0_140, %c0_141] : memref<1x8x16x32xf32, #tpu.memory_space<vmem>>, vector<1x1x16x32xf32>
    %157 = vector.shape_cast %156 : vector<1x1x16x32xf32> to vector<16x32xf32>
    %cst_142 = arith.constant dense<0.000000e+00> : vector<32x16xf32>
    %158 = tpu.matmul %124, %157, %cst_142 {dimension_numbers = #tpu.dot_dimension_numbers<[1], [1], [0], [0], [0, 0, 1, 0], [], []>} : vector<32x32xf32>, vector<16x32xf32>, vector<32x16xf32> -> vector<32x16xf32>
    %159 = vector.broadcast %125 : vector<32x1xf32> to vector<32x16xf32>
    %160 = arith.addf %158, %159 : vector<32x16xf32>
    %cst_143 = arith.constant 0.000000e+00 : f32
    %161 = vector.broadcast %cst_143 : f32 to vector<32x16xf32>
    %162 = arith.maximumf %160, %161 : vector<32x16xf32>
    %c3_144 = arith.constant 3 : index
    %c0_145 = arith.constant 0 : index
    %c0_146 = arith.constant 0 : index
    %163 = vector.load %arg15[%c3_144, %c0_145, %c0_146] : memref<8x32x16xf32, #tpu.memory_space<vmem>>, vector<1x32x16xf32>
    %164 = vector.shape_cast %163 : vector<1x32x16xf32> to vector<32x16xf32>
    %165 = vector.shape_cast %162 : vector<32x16xf32> to vector<1x32x16xf32>
    tpu.vector_store %arg15[%c3_144, %c0_145, %c0_146], %165 {strides = array<i32>} : memref<8x32x16xf32, #tpu.memory_space<vmem>>, vector<1x32x16xf32>,
    %c0_147 = arith.constant 0 : index
    %c4_148 = arith.constant 4 : index
    %c0_149 = arith.constant 0 : index
    %c0_150 = arith.constant 0 : index
    %166 = vector.load %arg3[%c0_147, %c4_148, %c0_149, %c0_150] : memref<1x8x16x32xf32, #tpu.memory_space<vmem>>, vector<1x1x16x32xf32>
    %167 = vector.shape_cast %166 : vector<1x1x16x32xf32> to vector<16x32xf32>
    %cst_151 = arith.constant dense<0.000000e+00> : vector<32x16xf32>
    %168 = tpu.matmul %124, %167, %cst_151 {dimension_numbers = #tpu.dot_dimension_numbers<[1], [1], [0], [0], [0, 0, 1, 0], [], []>} : vector<32x32xf32>, vector<16x32xf32>, vector<32x16xf32> -> vector<32x16xf32>
    %169 = vector.broadcast %125 : vector<32x1xf32> to vector<32x16xf32>
    %170 = arith.addf %168, %169 : vector<32x16xf32>
    %cst_152 = arith.constant 0.000000e+00 : f32
    %171 = vector.broadcast %cst_152 : f32 to vector<32x16xf32>
    %172 = arith.maximumf %170, %171 : vector<32x16xf32>
    %c4_153 = arith.constant 4 : index
    %c0_154 = arith.constant 0 : index
    %c0_155 = arith.constant 0 : index
    %173 = vector.load %arg15[%c4_153, %c0_154, %c0_155] : memref<8x32x16xf32, #tpu.memory_space<vmem>>, vector<1x32x16xf32>
    %174 = vector.shape_cast %173 : vector<1x32x16xf32> to vector<32x16xf32>
    %175 = vector.shape_cast %172 : vector<32x16xf32> to vector<1x32x16xf32>
    tpu.vector_store %arg15[%c4_153, %c0_154, %c0_155], %175 {strides = array<i32>} : memref<8x32x16xf32, #tpu.memory_space<vmem>>, vector<1x32x16xf32>,
    %c0_156 = arith.constant 0 : index
    %c5_157 = arith.constant 5 : index
    %c0_158 = arith.constant 0 : index
    %c0_159 = arith.constant 0 : index
    %176 = vector.load %arg3[%c0_156, %c5_157, %c0_158, %c0_159] : memref<1x8x16x32xf32, #tpu.memory_space<vmem>>, vector<1x1x16x32xf32>
    %177 = vector.shape_cast %176 : vector<1x1x16x32xf32> to vector<16x32xf32>
    %cst_160 = arith.constant dense<0.000000e+00> : vector<32x16xf32>
    %178 = tpu.matmul %124, %177, %cst_160 {dimension_numbers = #tpu.dot_dimension_numbers<[1], [1], [0], [0], [0, 0, 1, 0], [], []>} : vector<32x32xf32>, vector<16x32xf32>, vector<32x16xf32> -> vector<32x16xf32>
    %179 = vector.broadcast %125 : vector<32x1xf32> to vector<32x16xf32>
    %180 = arith.addf %178, %179 : vector<32x16xf32>
    %cst_161 = arith.constant 0.000000e+00 : f32
    %181 = vector.broadcast %cst_161 : f32 to vector<32x16xf32>
    %182 = arith.maximumf %180, %181 : vector<32x16xf32>
    %c5_162 = arith.constant 5 : index
    %c0_163 = arith.constant 0 : index
    %c0_164 = arith.constant 0 : index
    %183 = vector.load %arg15[%c5_162, %c0_163, %c0_164] : memref<8x32x16xf32, #tpu.memory_space<vmem>>, vector<1x32x16xf32>
    %184 = vector.shape_cast %183 : vector<1x32x16xf32> to vector<32x16xf32>
    %185 = vector.shape_cast %182 : vector<32x16xf32> to vector<1x32x16xf32>
    tpu.vector_store %arg15[%c5_162, %c0_163, %c0_164], %185 {strides = array<i32>} : memref<8x32x16xf32, #tpu.memory_space<vmem>>, vector<1x32x16xf32>,
    %c0_165 = arith.constant 0 : index
    %c6_166 = arith.constant 6 : index
    %c0_167 = arith.constant 0 : index
    %c0_168 = arith.constant 0 : index
    %186 = vector.load %arg3[%c0_165, %c6_166, %c0_167, %c0_168] : memref<1x8x16x32xf32, #tpu.memory_space<vmem>>, vector<1x1x16x32xf32>
    %187 = vector.shape_cast %186 : vector<1x1x16x32xf32> to vector<16x32xf32>
    %cst_169 = arith.constant dense<0.000000e+00> : vector<32x16xf32>
    %188 = tpu.matmul %124, %187, %cst_169 {dimension_numbers = #tpu.dot_dimension_numbers<[1], [1], [0], [0], [0, 0, 1, 0], [], []>} : vector<32x32xf32>, vector<16x32xf32>, vector<32x16xf32> -> vector<32x16xf32>
    %189 = vector.broadcast %125 : vector<32x1xf32> to vector<32x16xf32>
    %190 = arith.addf %188, %189 : vector<32x16xf32>
    %cst_170 = arith.constant 0.000000e+00 : f32
    %191 = vector.broadcast %cst_170 : f32 to vector<32x16xf32>
    %192 = arith.maximumf %190, %191 : vector<32x16xf32>
    %c6_171 = arith.constant 6 : index
    %c0_172 = arith.constant 0 : index
    %c0_173 = arith.constant 0 : index
    %193 = vector.load %arg15[%c6_171, %c0_172, %c0_173] : memref<8x32x16xf32, #tpu.memory_space<vmem>>, vector<1x32x16xf32>
    %194 = vector.shape_cast %193 : vector<1x32x16xf32> to vector<32x16xf32>
    %195 = vector.shape_cast %192 : vector<32x16xf32> to vector<1x32x16xf32>
    tpu.vector_store %arg15[%c6_171, %c0_172, %c0_173], %195 {strides = array<i32>} : memref<8x32x16xf32, #tpu.memory_space<vmem>>, vector<1x32x16xf32>,
    %c0_174 = arith.constant 0 : index
    %c7_175 = arith.constant 7 : index
    %c0_176 = arith.constant 0 : index
    %c0_177 = arith.constant 0 : index
    %196 = vector.load %arg3[%c0_174, %c7_175, %c0_176, %c0_177] : memref<1x8x16x32xf32, #tpu.memory_space<vmem>>, vector<1x1x16x32xf32>
    %197 = vector.shape_cast %196 : vector<1x1x16x32xf32> to vector<16x32xf32>
    %cst_178 = arith.constant dense<0.000000e+00> : vector<32x16xf32>
    %198 = tpu.matmul %124, %197, %cst_178 {dimension_numbers = #tpu.dot_dimension_numbers<[1], [1], [0], [0], [0, 0, 1, 0], [], []>} : vector<32x32xf32>, vector<16x32xf32>, vector<32x16xf32> -> vector<32x16xf32>
    %199 = vector.broadcast %125 : vector<32x1xf32> to vector<32x16xf32>
    %200 = arith.addf %198, %199 : vector<32x16xf32>
    %cst_179 = arith.constant 0.000000e+00 : f32
    %201 = vector.broadcast %cst_179 : f32 to vector<32x16xf32>
    %202 = arith.maximumf %200, %201 : vector<32x16xf32>
    %c7_180 = arith.constant 7 : index
    %c0_181 = arith.constant 0 : index
    %c0_182 = arith.constant 0 : index
    %203 = vector.load %arg15[%c7_180, %c0_181, %c0_182] : memref<8x32x16xf32, #tpu.memory_space<vmem>>, vector<1x32x16xf32>
    %204 = vector.shape_cast %203 : vector<1x32x16xf32> to vector<32x16xf32>
    %205 = vector.shape_cast %202 : vector<32x16xf32> to vector<1x32x16xf32>
    tpu.vector_store %arg15[%c7_180, %c0_181, %c0_182], %205 {strides = array<i32>} : memref<8x32x16xf32, #tpu.memory_space<vmem>>, vector<1x32x16xf32>,
    %c0_183 = arith.constant 0 : index
    %c0_184 = arith.constant 0 : index
    %c0_185 = arith.constant 0 : index
    %206 = vector.load %arg13[%c0_183, %c0_184, %c0_185] : memref<4x32x16xf32, #tpu.memory_space<vmem>>, vector<4x1x16xf32>
    %207 = vector.shape_cast %206 : vector<4x1x16xf32> to vector<4x16xf32>
    %c0_186 = arith.constant 0 : index
    %c0_187 = arith.constant 0 : index
    %c0_188 = arith.constant 0 : index
    %208 = vector.load %arg14[%c0_186, %c0_187, %c0_188] : memref<8x32x16xf32, #tpu.memory_space<vmem>>, vector<8x1x16xf32>
    %209 = vector.shape_cast %208 : vector<8x1x16xf32> to vector<8x16xf32>
    %210 = vector.shape_cast %207 : vector<4x16xf32> to vector<4x1x16xf32>
    %211 = vector.shape_cast %209 : vector<8x16xf32> to vector<1x8x16xf32>
    %212 = vector.broadcast %210 : vector<4x1x16xf32> to vector<4x8x16xf32>
    %213 = vector.broadcast %211 : vector<1x8x16xf32> to vector<4x8x16xf32>
    %214 = arith.mulf %212, %213 : vector<4x8x16xf32>
    %c0_189 = arith.constant 0 : index
    %c1_190 = arith.constant 1 : index
    %c0_191 = arith.constant 0 : index
    %215 = vector.load %arg13[%c0_189, %c1_190, %c0_191] : memref<4x32x16xf32, #tpu.memory_space<vmem>>, vector<4x1x16xf32>
    %216 = vector.shape_cast %215 : vector<4x1x16xf32> to vector<4x16xf32>
    %c0_192 = arith.constant 0 : index
    %c1_193 = arith.constant 1 : index
    %c0_194 = arith.constant 0 : index
    %217 = vector.load %arg14[%c0_192, %c1_193, %c0_194] : memref<8x32x16xf32, #tpu.memory_space<vmem>>, vector<8x1x16xf32>
    %218 = vector.shape_cast %217 : vector<8x1x16xf32> to vector<8x16xf32>
    %219 = vector.shape_cast %216 : vector<4x16xf32> to vector<4x1x16xf32>
    %220 = vector.shape_cast %218 : vector<8x16xf32> to vector<1x8x16xf32>
    %221 = vector.broadcast %219 : vector<4x1x16xf32> to vector<4x8x16xf32>
    %222 = vector.broadcast %220 : vector<1x8x16xf32> to vector<4x8x16xf32>
    %223 = arith.mulf %221, %222 : vector<4x8x16xf32>
    %224 = arith.addf %214, %223 : vector<4x8x16xf32>
    %c0_195 = arith.constant 0 : index
    %c2_196 = arith.constant 2 : index
    %c0_197 = arith.constant 0 : index
    %225 = vector.load %arg13[%c0_195, %c2_196, %c0_197] : memref<4x32x16xf32, #tpu.memory_space<vmem>>, vector<4x1x16xf32>
    %226 = vector.shape_cast %225 : vector<4x1x16xf32> to vector<4x16xf32>
    %c0_198 = arith.constant 0 : index
    %c2_199 = arith.constant 2 : index
    %c0_200 = arith.constant 0 : index
    %227 = vector.load %arg14[%c0_198, %c2_199, %c0_200] : memref<8x32x16xf32, #tpu.memory_space<vmem>>, vector<8x1x16xf32>
    %228 = vector.shape_cast %227 : vector<8x1x16xf32> to vector<8x16xf32>
    %229 = vector.shape_cast %226 : vector<4x16xf32> to vector<4x1x16xf32>
    %230 = vector.shape_cast %228 : vector<8x16xf32> to vector<1x8x16xf32>
    %231 = vector.broadcast %229 : vector<4x1x16xf32> to vector<4x8x16xf32>
    %232 = vector.broadcast %230 : vector<1x8x16xf32> to vector<4x8x16xf32>
    %233 = arith.mulf %231, %232 : vector<4x8x16xf32>
    %234 = arith.addf %224, %233 : vector<4x8x16xf32>
    %c0_201 = arith.constant 0 : index
    %c3_202 = arith.constant 3 : index
    %c0_203 = arith.constant 0 : index
    %235 = vector.load %arg13[%c0_201, %c3_202, %c0_203] : memref<4x32x16xf32, #tpu.memory_space<vmem>>, vector<4x1x16xf32>
    %236 = vector.shape_cast %235 : vector<4x1x16xf32> to vector<4x16xf32>
    %c0_204 = arith.constant 0 : index
    %c3_205 = arith.constant 3 : index
    %c0_206 = arith.constant 0 : index
    %237 = vector.load %arg14[%c0_204, %c3_205, %c0_206] : memref<8x32x16xf32, #tpu.memory_space<vmem>>, vector<8x1x16xf32>
    %238 = vector.shape_cast %237 : vector<8x1x16xf32> to vector<8x16xf32>
    %239 = vector.shape_cast %236 : vector<4x16xf32> to vector<4x1x16xf32>
    %240 = vector.shape_cast %238 : vector<8x16xf32> to vector<1x8x16xf32>
    %241 = vector.broadcast %239 : vector<4x1x16xf32> to vector<4x8x16xf32>
    %242 = vector.broadcast %240 : vector<1x8x16xf32> to vector<4x8x16xf32>
    %243 = arith.mulf %241, %242 : vector<4x8x16xf32>
    %244 = arith.addf %234, %243 : vector<4x8x16xf32>
    %c0_207 = arith.constant 0 : index
    %c4_208 = arith.constant 4 : index
    %c0_209 = arith.constant 0 : index
    %245 = vector.load %arg13[%c0_207, %c4_208, %c0_209] : memref<4x32x16xf32, #tpu.memory_space<vmem>>, vector<4x1x16xf32>
    %246 = vector.shape_cast %245 : vector<4x1x16xf32> to vector<4x16xf32>
    %c0_210 = arith.constant 0 : index
    %c4_211 = arith.constant 4 : index
    %c0_212 = arith.constant 0 : index
    %247 = vector.load %arg14[%c0_210, %c4_211, %c0_212] : memref<8x32x16xf32, #tpu.memory_space<vmem>>, vector<8x1x16xf32>
    %248 = vector.shape_cast %247 : vector<8x1x16xf32> to vector<8x16xf32>
    %249 = vector.shape_cast %246 : vector<4x16xf32> to vector<4x1x16xf32>
    %250 = vector.shape_cast %248 : vector<8x16xf32> to vector<1x8x16xf32>
    %251 = vector.broadcast %249 : vector<4x1x16xf32> to vector<4x8x16xf32>
    %252 = vector.broadcast %250 : vector<1x8x16xf32> to vector<4x8x16xf32>
    %253 = arith.mulf %251, %252 : vector<4x8x16xf32>
    %254 = arith.addf %244, %253 : vector<4x8x16xf32>
    %c0_213 = arith.constant 0 : index
    %c5_214 = arith.constant 5 : index
    %c0_215 = arith.constant 0 : index
    %255 = vector.load %arg13[%c0_213, %c5_214, %c0_215] : memref<4x32x16xf32, #tpu.memory_space<vmem>>, vector<4x1x16xf32>
    %256 = vector.shape_cast %255 : vector<4x1x16xf32> to vector<4x16xf32>
    %c0_216 = arith.constant 0 : index
    %c5_217 = arith.constant 5 : index
    %c0_218 = arith.constant 0 : index
    %257 = vector.load %arg14[%c0_216, %c5_217, %c0_218] : memref<8x32x16xf32, #tpu.memory_space<vmem>>, vector<8x1x16xf32>
    %258 = vector.shape_cast %257 : vector<8x1x16xf32> to vector<8x16xf32>
    %259 = vector.shape_cast %256 : vector<4x16xf32> to vector<4x1x16xf32>
    %260 = vector.shape_cast %258 : vector<8x16xf32> to vector<1x8x16xf32>
    %261 = vector.broadcast %259 : vector<4x1x16xf32> to vector<4x8x16xf32>
    %262 = vector.broadcast %260 : vector<1x8x16xf32> to vector<4x8x16xf32>
    %263 = arith.mulf %261, %262 : vector<4x8x16xf32>
    %264 = arith.addf %254, %263 : vector<4x8x16xf32>
    %c0_219 = arith.constant 0 : index
    %c6_220 = arith.constant 6 : index
    %c0_221 = arith.constant 0 : index
    %265 = vector.load %arg13[%c0_219, %c6_220, %c0_221] : memref<4x32x16xf32, #tpu.memory_space<vmem>>, vector<4x1x16xf32>
    %266 = vector.shape_cast %265 : vector<4x1x16xf32> to vector<4x16xf32>
    %c0_222 = arith.constant 0 : index
    %c6_223 = arith.constant 6 : index
    %c0_224 = arith.constant 0 : index
    %267 = vector.load %arg14[%c0_222, %c6_223, %c0_224] : memref<8x32x16xf32, #tpu.memory_space<vmem>>, vector<8x1x16xf32>
    %268 = vector.shape_cast %267 : vector<8x1x16xf32> to vector<8x16xf32>
    %269 = vector.shape_cast %266 : vector<4x16xf32> to vector<4x1x16xf32>
    %270 = vector.shape_cast %268 : vector<8x16xf32> to vector<1x8x16xf32>
    %271 = vector.broadcast %269 : vector<4x1x16xf32> to vector<4x8x16xf32>
    %272 = vector.broadcast %270 : vector<1x8x16xf32> to vector<4x8x16xf32>
    %273 = arith.mulf %271, %272 : vector<4x8x16xf32>
    %274 = arith.addf %264, %273 : vector<4x8x16xf32>
    %c0_225 = arith.constant 0 : index
    %c7_226 = arith.constant 7 : index
    %c0_227 = arith.constant 0 : index
    %275 = vector.load %arg13[%c0_225, %c7_226, %c0_227] : memref<4x32x16xf32, #tpu.memory_space<vmem>>, vector<4x1x16xf32>
    %276 = vector.shape_cast %275 : vector<4x1x16xf32> to vector<4x16xf32>
    %c0_228 = arith.constant 0 : index
    %c7_229 = arith.constant 7 : index
    %c0_230 = arith.constant 0 : index
    %277 = vector.load %arg14[%c0_228, %c7_229, %c0_230] : memref<8x32x16xf32, #tpu.memory_space<vmem>>, vector<8x1x16xf32>
    %278 = vector.shape_cast %277 : vector<8x1x16xf32> to vector<8x16xf32>
    %279 = vector.shape_cast %276 : vector<4x16xf32> to vector<4x1x16xf32>
    %280 = vector.shape_cast %278 : vector<8x16xf32> to vector<1x8x16xf32>
    %281 = vector.broadcast %279 : vector<4x1x16xf32> to vector<4x8x16xf32>
    %282 = vector.broadcast %280 : vector<1x8x16xf32> to vector<4x8x16xf32>
    %283 = arith.mulf %281, %282 : vector<4x8x16xf32>
    %284 = arith.addf %274, %283 : vector<4x8x16xf32>
    %cst_231 = arith.constant 5.000000e-01 : f32
    %285 = vector.broadcast %cst_231 : f32 to vector<4x8x16xf32>
    %286 = arith.mulf %284, %285 : vector<4x8x16xf32>
    %cst_232 = arith.constant dense<0xFF800000> : vector<4x16xf32>
    %287 = vector.multi_reduction <maximumf>, %286, %cst_232 [1] : vector<4x8x16xf32> to vector<4x16xf32>
    %288 = vector.shape_cast %287 : vector<4x16xf32> to vector<4x1x16xf32>
    %289 = vector.broadcast %288 : vector<4x1x16xf32> to vector<4x8x16xf32>
    %290 = arith.subf %286, %289 : vector<4x8x16xf32>
    %291 = math.exp %290 : vector<4x8x16xf32>
    %cst_233 = arith.constant dense<0.000000e+00> : vector<4x16xf32>
    %292 = vector.multi_reduction <add>, %291, %cst_233 [1] : vector<4x8x16xf32> to vector<4x16xf32>
    %293 = vector.shape_cast %292 : vector<4x16xf32> to vector<4x1x16xf32>
    %294 = tpu.reciprocal %293 {approx = true} : vector<4x1x16xf32> -> vector<4x1x16xf32>
    %295 = vector.broadcast %294 : vector<4x1x16xf32> to vector<4x8x16xf32>
    %296 = arith.mulf %291, %295 : vector<4x8x16xf32>
    %c0_234 = arith.constant 0 : index
    %c0_235 = arith.constant 0 : index
    %c0_236 = arith.constant 0 : index
    %297 = vector.load %arg15[%c0_234, %c0_235, %c0_236] : memref<8x32x16xf32, #tpu.memory_space<vmem>>, vector<8x1x16xf32>
    %298 = vector.shape_cast %297 : vector<8x1x16xf32> to vector<8x16xf32>
    %299 = vector.shape_cast %298 : vector<8x16xf32> to vector<1x8x16xf32>
    %300 = vector.broadcast %299 : vector<1x8x16xf32> to vector<4x8x16xf32>
    %301 = arith.mulf %296, %300 : vector<4x8x16xf32>
    %cst_237 = arith.constant dense<0.000000e+00> : vector<4x16xf32>
    %302 = vector.multi_reduction <add>, %301, %cst_237 [1] : vector<4x8x16xf32> to vector<4x16xf32>
    %c0_238 = arith.constant 0 : index
    %c0_239 = arith.constant 0 : index
    %c0_240 = arith.constant 0 : index
    %303 = vector.load %arg16[%c0_238, %c0_239, %c0_240] : memref<32x4x16xf32, #tpu.memory_space<vmem>>, vector<1x4x16xf32>
    %304 = vector.shape_cast %303 : vector<1x4x16xf32> to vector<4x16xf32>
    %305 = vector.shape_cast %302 : vector<4x16xf32> to vector<1x4x16xf32>
    tpu.vector_store %arg16[%c0_238, %c0_239, %c0_240], %305 {strides = array<i32>} : memref<32x4x16xf32, #tpu.memory_space<vmem>>, vector<1x4x16xf32>,
    %c0_241 = arith.constant 0 : index
    %c1_242 = arith.constant 1 : index
    %c0_243 = arith.constant 0 : index
    %306 = vector.load %arg15[%c0_241, %c1_242, %c0_243] : memref<8x32x16xf32, #tpu.memory_space<vmem>>, vector<8x1x16xf32>
    %307 = vector.shape_cast %306 : vector<8x1x16xf32> to vector<8x16xf32>
    %308 = vector.shape_cast %307 : vector<8x16xf32> to vector<1x8x16xf32>
    %309 = vector.broadcast %308 : vector<1x8x16xf32> to vector<4x8x16xf32>
    %310 = arith.mulf %296, %309 : vector<4x8x16xf32>
    %cst_244 = arith.constant dense<0.000000e+00> : vector<4x16xf32>
    %311 = vector.multi_reduction <add>, %310, %cst_244 [1] : vector<4x8x16xf32> to vector<4x16xf32>
    %c1_245 = arith.constant 1 : index
    %c0_246 = arith.constant 0 : index
    %c0_247 = arith.constant 0 : index
    %312 = vector.load %arg16[%c1_245, %c0_246, %c0_247] : memref<32x4x16xf32, #tpu.memory_space<vmem>>, vector<1x4x16xf32>
    %313 = vector.shape_cast %312 : vector<1x4x16xf32> to vector<4x16xf32>
    %314 = vector.shape_cast %311 : vector<4x16xf32> to vector<1x4x16xf32>
    tpu.vector_store %arg16[%c1_245, %c0_246, %c0_247], %314 {strides = array<i32>} : memref<32x4x16xf32, #tpu.memory_space<vmem>>, vector<1x4x16xf32>,
    %c0_248 = arith.constant 0 : index
    %c2_249 = arith.constant 2 : index
    %c0_250 = arith.constant 0 : index
    %315 = vector.load %arg15[%c0_248, %c2_249, %c0_250] : memref<8x32x16xf32, #tpu.memory_space<vmem>>, vector<8x1x16xf32>
    %316 = vector.shape_cast %315 : vector<8x1x16xf32> to vector<8x16xf32>
    %317 = vector.shape_cast %316 : vector<8x16xf32> to vector<1x8x16xf32>
    %318 = vector.broadcast %317 : vector<1x8x16xf32> to vector<4x8x16xf32>
    %319 = arith.mulf %296, %318 : vector<4x8x16xf32>
    %cst_251 = arith.constant dense<0.000000e+00> : vector<4x16xf32>
    %320 = vector.multi_reduction <add>, %319, %cst_251 [1] : vector<4x8x16xf32> to vector<4x16xf32>
    %c2_252 = arith.constant 2 : index
    %c0_253 = arith.constant 0 : index
    %c0_254 = arith.constant 0 : index
    %321 = vector.load %arg16[%c2_252, %c0_253, %c0_254] : memref<32x4x16xf32, #tpu.memory_space<vmem>>, vector<1x4x16xf32>
    %322 = vector.shape_cast %321 : vector<1x4x16xf32> to vector<4x16xf32>
    %323 = vector.shape_cast %320 : vector<4x16xf32> to vector<1x4x16xf32>
    tpu.vector_store %arg16[%c2_252, %c0_253, %c0_254], %323 {strides = array<i32>} : memref<32x4x16xf32, #tpu.memory_space<vmem>>, vector<1x4x16xf32>,
    %c0_255 = arith.constant 0 : index
    %c3_256 = arith.constant 3 : index
    %c0_257 = arith.constant 0 : index
    %324 = vector.load %arg15[%c0_255, %c3_256, %c0_257] : memref<8x32x16xf32, #tpu.memory_space<vmem>>, vector<8x1x16xf32>
    %325 = vector.shape_cast %324 : vector<8x1x16xf32> to vector<8x16xf32>
    %326 = vector.shape_cast %325 : vector<8x16xf32> to vector<1x8x16xf32>
    %327 = vector.broadcast %326 : vector<1x8x16xf32> to vector<4x8x16xf32>
    %328 = arith.mulf %296, %327 : vector<4x8x16xf32>
    %cst_258 = arith.constant dense<0.000000e+00> : vector<4x16xf32>
    %329 = vector.multi_reduction <add>, %328, %cst_258 [1] : vector<4x8x16xf32> to vector<4x16xf32>
    %c3_259 = arith.constant 3 : index
    %c0_260 = arith.constant 0 : index
    %c0_261 = arith.constant 0 : index
    %330 = vector.load %arg16[%c3_259, %c0_260, %c0_261] : memref<32x4x16xf32, #tpu.memory_space<vmem>>, vector<1x4x16xf32>
    %331 = vector.shape_cast %330 : vector<1x4x16xf32> to vector<4x16xf32>
    %332 = vector.shape_cast %329 : vector<4x16xf32> to vector<1x4x16xf32>
    tpu.vector_store %arg16[%c3_259, %c0_260, %c0_261], %332 {strides = array<i32>} : memref<32x4x16xf32, #tpu.memory_space<vmem>>, vector<1x4x16xf32>,
    %c0_262 = arith.constant 0 : index
    %c4_263 = arith.constant 4 : index
    %c0_264 = arith.constant 0 : index
    %333 = vector.load %arg15[%c0_262, %c4_263, %c0_264] : memref<8x32x16xf32, #tpu.memory_space<vmem>>, vector<8x1x16xf32>
    %334 = vector.shape_cast %333 : vector<8x1x16xf32> to vector<8x16xf32>
    %335 = vector.shape_cast %334 : vector<8x16xf32> to vector<1x8x16xf32>
    %336 = vector.broadcast %335 : vector<1x8x16xf32> to vector<4x8x16xf32>
    %337 = arith.mulf %296, %336 : vector<4x8x16xf32>
    %cst_265 = arith.constant dense<0.000000e+00> : vector<4x16xf32>
    %338 = vector.multi_reduction <add>, %337, %cst_265 [1] : vector<4x8x16xf32> to vector<4x16xf32>
    %c4_266 = arith.constant 4 : index
    %c0_267 = arith.constant 0 : index
    %c0_268 = arith.constant 0 : index
    %339 = vector.load %arg16[%c4_266, %c0_267, %c0_268] : memref<32x4x16xf32, #tpu.memory_space<vmem>>, vector<1x4x16xf32>
    %340 = vector.shape_cast %339 : vector<1x4x16xf32> to vector<4x16xf32>
    %341 = vector.shape_cast %338 : vector<4x16xf32> to vector<1x4x16xf32>
    tpu.vector_store %arg16[%c4_266, %c0_267, %c0_268], %341 {strides = array<i32>} : memref<32x4x16xf32, #tpu.memory_space<vmem>>, vector<1x4x16xf32>,
    %c0_269 = arith.constant 0 : index
    %c5_270 = arith.constant 5 : index
    %c0_271 = arith.constant 0 : index
    %342 = vector.load %arg15[%c0_269, %c5_270, %c0_271] : memref<8x32x16xf32, #tpu.memory_space<vmem>>, vector<8x1x16xf32>
    %343 = vector.shape_cast %342 : vector<8x1x16xf32> to vector<8x16xf32>
    %344 = vector.shape_cast %343 : vector<8x16xf32> to vector<1x8x16xf32>
    %345 = vector.broadcast %344 : vector<1x8x16xf32> to vector<4x8x16xf32>
    %346 = arith.mulf %296, %345 : vector<4x8x16xf32>
    %cst_272 = arith.constant dense<0.000000e+00> : vector<4x16xf32>
    %347 = vector.multi_reduction <add>, %346, %cst_272 [1] : vector<4x8x16xf32> to vector<4x16xf32>
    %c5_273 = arith.constant 5 : index
    %c0_274 = arith.constant 0 : index
    %c0_275 = arith.constant 0 : index
    %348 = vector.load %arg16[%c5_273, %c0_274, %c0_275] : memref<32x4x16xf32, #tpu.memory_space<vmem>>, vector<1x4x16xf32>
    %349 = vector.shape_cast %348 : vector<1x4x16xf32> to vector<4x16xf32>
    %350 = vector.shape_cast %347 : vector<4x16xf32> to vector<1x4x16xf32>
    tpu.vector_store %arg16[%c5_273, %c0_274, %c0_275], %350 {strides = array<i32>} : memref<32x4x16xf32, #tpu.memory_space<vmem>>, vector<1x4x16xf32>,
    %c0_276 = arith.constant 0 : index
    %c6_277 = arith.constant 6 : index
    %c0_278 = arith.constant 0 : index
    %351 = vector.load %arg15[%c0_276, %c6_277, %c0_278] : memref<8x32x16xf32, #tpu.memory_space<vmem>>, vector<8x1x16xf32>
    %352 = vector.shape_cast %351 : vector<8x1x16xf32> to vector<8x16xf32>
    %353 = vector.shape_cast %352 : vector<8x16xf32> to vector<1x8x16xf32>
    %354 = vector.broadcast %353 : vector<1x8x16xf32> to vector<4x8x16xf32>
    %355 = arith.mulf %296, %354 : vector<4x8x16xf32>
    %cst_279 = arith.constant dense<0.000000e+00> : vector<4x16xf32>
    %356 = vector.multi_reduction <add>, %355, %cst_279 [1] : vector<4x8x16xf32> to vector<4x16xf32>
    %c6_280 = arith.constant 6 : index
    %c0_281 = arith.constant 0 : index
    %c0_282 = arith.constant 0 : index
    %357 = vector.load %arg16[%c6_280, %c0_281, %c0_282] : memref<32x4x16xf32, #tpu.memory_space<vmem>>, vector<1x4x16xf32>
    %358 = vector.shape_cast %357 : vector<1x4x16xf32> to vector<4x16xf32>
    %359 = vector.shape_cast %356 : vector<4x16xf32> to vector<1x4x16xf32>
    tpu.vector_store %arg16[%c6_280, %c0_281, %c0_282], %359 {strides = array<i32>} : memref<32x4x16xf32, #tpu.memory_space<vmem>>, vector<1x4x16xf32>,
    %c0_283 = arith.constant 0 : index
    %c7_284 = arith.constant 7 : index
    %c0_285 = arith.constant 0 : index
    %360 = vector.load %arg15[%c0_283, %c7_284, %c0_285] : memref<8x32x16xf32, #tpu.memory_space<vmem>>, vector<8x1x16xf32>
    %361 = vector.shape_cast %360 : vector<8x1x16xf32> to vector<8x16xf32>
    %362 = vector.shape_cast %361 : vector<8x16xf32> to vector<1x8x16xf32>
    %363 = vector.broadcast %362 : vector<1x8x16xf32> to vector<4x8x16xf32>
    %364 = arith.mulf %296, %363 : vector<4x8x16xf32>
    %cst_286 = arith.constant dense<0.000000e+00> : vector<4x16xf32>
    %365 = vector.multi_reduction <add>, %364, %cst_286 [1] : vector<4x8x16xf32> to vector<4x16xf32>
    %c7_287 = arith.constant 7 : index
    %c0_288 = arith.constant 0 : index
    %c0_289 = arith.constant 0 : index
    %366 = vector.load %arg16[%c7_287, %c0_288, %c0_289] : memref<32x4x16xf32, #tpu.memory_space<vmem>>, vector<1x4x16xf32>
    %367 = vector.shape_cast %366 : vector<1x4x16xf32> to vector<4x16xf32>
    %368 = vector.shape_cast %365 : vector<4x16xf32> to vector<1x4x16xf32>
    tpu.vector_store %arg16[%c7_287, %c0_288, %c0_289], %368 {strides = array<i32>} : memref<32x4x16xf32, #tpu.memory_space<vmem>>, vector<1x4x16xf32>,
    %c0_290 = arith.constant 0 : index
    %c8 = arith.constant 8 : index
    %c0_291 = arith.constant 0 : index
    %369 = vector.load %arg13[%c0_290, %c8, %c0_291] : memref<4x32x16xf32, #tpu.memory_space<vmem>>, vector<4x1x16xf32>
    %370 = vector.shape_cast %369 : vector<4x1x16xf32> to vector<4x16xf32>
    %c0_292 = arith.constant 0 : index
    %c8_293 = arith.constant 8 : index
    %c0_294 = arith.constant 0 : index
    %371 = vector.load %arg14[%c0_292, %c8_293, %c0_294] : memref<8x32x16xf32, #tpu.memory_space<vmem>>, vector<8x1x16xf32>
    %372 = vector.shape_cast %371 : vector<8x1x16xf32> to vector<8x16xf32>
    %373 = vector.shape_cast %370 : vector<4x16xf32> to vector<4x1x16xf32>
    %374 = vector.shape_cast %372 : vector<8x16xf32> to vector<1x8x16xf32>
    %375 = vector.broadcast %373 : vector<4x1x16xf32> to vector<4x8x16xf32>
    %376 = vector.broadcast %374 : vector<1x8x16xf32> to vector<4x8x16xf32>
    %377 = arith.mulf %375, %376 : vector<4x8x16xf32>
    %c0_295 = arith.constant 0 : index
    %c9 = arith.constant 9 : index
    %c0_296 = arith.constant 0 : index
    %378 = vector.load %arg13[%c0_295, %c9, %c0_296] : memref<4x32x16xf32, #tpu.memory_space<vmem>>, vector<4x1x16xf32>
    %379 = vector.shape_cast %378 : vector<4x1x16xf32> to vector<4x16xf32>
    %c0_297 = arith.constant 0 : index
    %c9_298 = arith.constant 9 : index
    %c0_299 = arith.constant 0 : index
    %380 = vector.load %arg14[%c0_297, %c9_298, %c0_299] : memref<8x32x16xf32, #tpu.memory_space<vmem>>, vector<8x1x16xf32>
    %381 = vector.shape_cast %380 : vector<8x1x16xf32> to vector<8x16xf32>
    %382 = vector.shape_cast %379 : vector<4x16xf32> to vector<4x1x16xf32>
    %383 = vector.shape_cast %381 : vector<8x16xf32> to vector<1x8x16xf32>
    %384 = vector.broadcast %382 : vector<4x1x16xf32> to vector<4x8x16xf32>
    %385 = vector.broadcast %383 : vector<1x8x16xf32> to vector<4x8x16xf32>
    %386 = arith.mulf %384, %385 : vector<4x8x16xf32>
    %387 = arith.addf %377, %386 : vector<4x8x16xf32>
    %c0_300 = arith.constant 0 : index
    %c10 = arith.constant 10 : index
    %c0_301 = arith.constant 0 : index
    %388 = vector.load %arg13[%c0_300, %c10, %c0_301] : memref<4x32x16xf32, #tpu.memory_space<vmem>>, vector<4x1x16xf32>
    %389 = vector.shape_cast %388 : vector<4x1x16xf32> to vector<4x16xf32>
    %c0_302 = arith.constant 0 : index
    %c10_303 = arith.constant 10 : index
    %c0_304 = arith.constant 0 : index
    %390 = vector.load %arg14[%c0_302, %c10_303, %c0_304] : memref<8x32x16xf32, #tpu.memory_space<vmem>>, vector<8x1x16xf32>
    %391 = vector.shape_cast %390 : vector<8x1x16xf32> to vector<8x16xf32>
    %392 = vector.shape_cast %389 : vector<4x16xf32> to vector<4x1x16xf32>
    %393 = vector.shape_cast %391 : vector<8x16xf32> to vector<1x8x16xf32>
    %394 = vector.broadcast %392 : vector<4x1x16xf32> to vector<4x8x16xf32>
    %395 = vector.broadcast %393 : vector<1x8x16xf32> to vector<4x8x16xf32>
    %396 = arith.mulf %394, %395 : vector<4x8x16xf32>
    %397 = arith.addf %387, %396 : vector<4x8x16xf32>
    %c0_305 = arith.constant 0 : index
    %c11 = arith.constant 11 : index
    %c0_306 = arith.constant 0 : index
    %398 = vector.load %arg13[%c0_305, %c11, %c0_306] : memref<4x32x16xf32, #tpu.memory_space<vmem>>, vector<4x1x16xf32>
    %399 = vector.shape_cast %398 : vector<4x1x16xf32> to vector<4x16xf32>
    %c0_307 = arith.constant 0 : index
    %c11_308 = arith.constant 11 : index
    %c0_309 = arith.constant 0 : index
    %400 = vector.load %arg14[%c0_307, %c11_308, %c0_309] : memref<8x32x16xf32, #tpu.memory_space<vmem>>, vector<8x1x16xf32>
    %401 = vector.shape_cast %400 : vector<8x1x16xf32> to vector<8x16xf32>
    %402 = vector.shape_cast %399 : vector<4x16xf32> to vector<4x1x16xf32>
    %403 = vector.shape_cast %401 : vector<8x16xf32> to vector<1x8x16xf32>
    %404 = vector.broadcast %402 : vector<4x1x16xf32> to vector<4x8x16xf32>
    %405 = vector.broadcast %403 : vector<1x8x16xf32> to vector<4x8x16xf32>
    %406 = arith.mulf %404, %405 : vector<4x8x16xf32>
    %407 = arith.addf %397, %406 : vector<4x8x16xf32>
    %c0_310 = arith.constant 0 : index
    %c12 = arith.constant 12 : index
    %c0_311 = arith.constant 0 : index
    %408 = vector.load %arg13[%c0_310, %c12, %c0_311] : memref<4x32x16xf32, #tpu.memory_space<vmem>>, vector<4x1x16xf32>
    %409 = vector.shape_cast %408 : vector<4x1x16xf32> to vector<4x16xf32>
    %c0_312 = arith.constant 0 : index
    %c12_313 = arith.constant 12 : index
    %c0_314 = arith.constant 0 : index
    %410 = vector.load %arg14[%c0_312, %c12_313, %c0_314] : memref<8x32x16xf32, #tpu.memory_space<vmem>>, vector<8x1x16xf32>
    %411 = vector.shape_cast %410 : vector<8x1x16xf32> to vector<8x16xf32>
    %412 = vector.shape_cast %409 : vector<4x16xf32> to vector<4x1x16xf32>
    %413 = vector.shape_cast %411 : vector<8x16xf32> to vector<1x8x16xf32>
    %414 = vector.broadcast %412 : vector<4x1x16xf32> to vector<4x8x16xf32>
    %415 = vector.broadcast %413 : vector<1x8x16xf32> to vector<4x8x16xf32>
    %416 = arith.mulf %414, %415 : vector<4x8x16xf32>
    %417 = arith.addf %407, %416 : vector<4x8x16xf32>
    %c0_315 = arith.constant 0 : index
    %c13 = arith.constant 13 : index
    %c0_316 = arith.constant 0 : index
    %418 = vector.load %arg13[%c0_315, %c13, %c0_316] : memref<4x32x16xf32, #tpu.memory_space<vmem>>, vector<4x1x16xf32>
    %419 = vector.shape_cast %418 : vector<4x1x16xf32> to vector<4x16xf32>
    %c0_317 = arith.constant 0 : index
    %c13_318 = arith.constant 13 : index
    %c0_319 = arith.constant 0 : index
    %420 = vector.load %arg14[%c0_317, %c13_318, %c0_319] : memref<8x32x16xf32, #tpu.memory_space<vmem>>, vector<8x1x16xf32>
    %421 = vector.shape_cast %420 : vector<8x1x16xf32> to vector<8x16xf32>
    %422 = vector.shape_cast %419 : vector<4x16xf32> to vector<4x1x16xf32>
    %423 = vector.shape_cast %421 : vector<8x16xf32> to vector<1x8x16xf32>
    %424 = vector.broadcast %422 : vector<4x1x16xf32> to vector<4x8x16xf32>
    %425 = vector.broadcast %423 : vector<1x8x16xf32> to vector<4x8x16xf32>
    %426 = arith.mulf %424, %425 : vector<4x8x16xf32>
    %427 = arith.addf %417, %426 : vector<4x8x16xf32>
    %c0_320 = arith.constant 0 : index
    %c14 = arith.constant 14 : index
    %c0_321 = arith.constant 0 : index
    %428 = vector.load %arg13[%c0_320, %c14, %c0_321] : memref<4x32x16xf32, #tpu.memory_space<vmem>>, vector<4x1x16xf32>
    %429 = vector.shape_cast %428 : vector<4x1x16xf32> to vector<4x16xf32>
    %c0_322 = arith.constant 0 : index
    %c14_323 = arith.constant 14 : index
    %c0_324 = arith.constant 0 : index
    %430 = vector.load %arg14[%c0_322, %c14_323, %c0_324] : memref<8x32x16xf32, #tpu.memory_space<vmem>>, vector<8x1x16xf32>
    %431 = vector.shape_cast %430 : vector<8x1x16xf32> to vector<8x16xf32>
    %432 = vector.shape_cast %429 : vector<4x16xf32> to vector<4x1x16xf32>
    %433 = vector.shape_cast %431 : vector<8x16xf32> to vector<1x8x16xf32>
    %434 = vector.broadcast %432 : vector<4x1x16xf32> to vector<4x8x16xf32>
    %435 = vector.broadcast %433 : vector<1x8x16xf32> to vector<4x8x16xf32>
    %436 = arith.mulf %434, %435 : vector<4x8x16xf32>
    %437 = arith.addf %427, %436 : vector<4x8x16xf32>
    %c0_325 = arith.constant 0 : index
    %c15 = arith.constant 15 : index
    %c0_326 = arith.constant 0 : index
    %438 = vector.load %arg13[%c0_325, %c15, %c0_326] : memref<4x32x16xf32, #tpu.memory_space<vmem>>, vector<4x1x16xf32>
    %439 = vector.shape_cast %438 : vector<4x1x16xf32> to vector<4x16xf32>
    %c0_327 = arith.constant 0 : index
    %c15_328 = arith.constant 15 : index
    %c0_329 = arith.constant 0 : index
    %440 = vector.load %arg14[%c0_327, %c15_328, %c0_329] : memref<8x32x16xf32, #tpu.memory_space<vmem>>, vector<8x1x16xf32>
    %441 = vector.shape_cast %440 : vector<8x1x16xf32> to vector<8x16xf32>
    %442 = vector.shape_cast %439 : vector<4x16xf32> to vector<4x1x16xf32>
    %443 = vector.shape_cast %441 : vector<8x16xf32> to vector<1x8x16xf32>
    %444 = vector.broadcast %442 : vector<4x1x16xf32> to vector<4x8x16xf32>
    %445 = vector.broadcast %443 : vector<1x8x16xf32> to vector<4x8x16xf32>
    %446 = arith.mulf %444, %445 : vector<4x8x16xf32>
    %447 = arith.addf %437, %446 : vector<4x8x16xf32>
    %cst_330 = arith.constant 5.000000e-01 : f32
    %448 = vector.broadcast %cst_330 : f32 to vector<4x8x16xf32>
    %449 = arith.mulf %447, %448 : vector<4x8x16xf32>
    %cst_331 = arith.constant dense<0xFF800000> : vector<4x16xf32>
    %450 = vector.multi_reduction <maximumf>, %449, %cst_331 [1] : vector<4x8x16xf32> to vector<4x16xf32>
    %451 = vector.shape_cast %450 : vector<4x16xf32> to vector<4x1x16xf32>
    %452 = vector.broadcast %451 : vector<4x1x16xf32> to vector<4x8x16xf32>
    %453 = arith.subf %449, %452 : vector<4x8x16xf32>
    %454 = math.exp %453 : vector<4x8x16xf32>
    %cst_332 = arith.constant dense<0.000000e+00> : vector<4x16xf32>
    %455 = vector.multi_reduction <add>, %454, %cst_332 [1] : vector<4x8x16xf32> to vector<4x16xf32>
    %456 = vector.shape_cast %455 : vector<4x16xf32> to vector<4x1x16xf32>
    %457 = tpu.reciprocal %456 {approx = true} : vector<4x1x16xf32> -> vector<4x1x16xf32>
    %458 = vector.broadcast %457 : vector<4x1x16xf32> to vector<4x8x16xf32>
    %459 = arith.mulf %454, %458 : vector<4x8x16xf32>
    %c0_333 = arith.constant 0 : index
    %c8_334 = arith.constant 8 : index
    %c0_335 = arith.constant 0 : index
    %460 = vector.load %arg15[%c0_333, %c8_334, %c0_335] : memref<8x32x16xf32, #tpu.memory_space<vmem>>, vector<8x1x16xf32>
    %461 = vector.shape_cast %460 : vector<8x1x16xf32> to vector<8x16xf32>
    %462 = vector.shape_cast %461 : vector<8x16xf32> to vector<1x8x16xf32>
    %463 = vector.broadcast %462 : vector<1x8x16xf32> to vector<4x8x16xf32>
    %464 = arith.mulf %459, %463 : vector<4x8x16xf32>
    %cst_336 = arith.constant dense<0.000000e+00> : vector<4x16xf32>
    %465 = vector.multi_reduction <add>, %464, %cst_336 [1] : vector<4x8x16xf32> to vector<4x16xf32>
    %c8_337 = arith.constant 8 : index
    %c0_338 = arith.constant 0 : index
    %c0_339 = arith.constant 0 : index
    %466 = vector.load %arg16[%c8_337, %c0_338, %c0_339] : memref<32x4x16xf32, #tpu.memory_space<vmem>>, vector<1x4x16xf32>
    %467 = vector.shape_cast %466 : vector<1x4x16xf32> to vector<4x16xf32>
    %468 = vector.shape_cast %465 : vector<4x16xf32> to vector<1x4x16xf32>
    tpu.vector_store %arg16[%c8_337, %c0_338, %c0_339], %468 {strides = array<i32>} : memref<32x4x16xf32, #tpu.memory_space<vmem>>, vector<1x4x16xf32>,
    %c0_340 = arith.constant 0 : index
    %c9_341 = arith.constant 9 : index
    %c0_342 = arith.constant 0 : index
    %469 = vector.load %arg15[%c0_340, %c9_341, %c0_342] : memref<8x32x16xf32, #tpu.memory_space<vmem>>, vector<8x1x16xf32>
    %470 = vector.shape_cast %469 : vector<8x1x16xf32> to vector<8x16xf32>
    %471 = vector.shape_cast %470 : vector<8x16xf32> to vector<1x8x16xf32>
    %472 = vector.broadcast %471 : vector<1x8x16xf32> to vector<4x8x16xf32>
    %473 = arith.mulf %459, %472 : vector<4x8x16xf32>
    %cst_343 = arith.constant dense<0.000000e+00> : vector<4x16xf32>
    %474 = vector.multi_reduction <add>, %473, %cst_343 [1] : vector<4x8x16xf32> to vector<4x16xf32>
    %c9_344 = arith.constant 9 : index
    %c0_345 = arith.constant 0 : index
    %c0_346 = arith.constant 0 : index
    %475 = vector.load %arg16[%c9_344, %c0_345, %c0_346] : memref<32x4x16xf32, #tpu.memory_space<vmem>>, vector<1x4x16xf32>
    %476 = vector.shape_cast %475 : vector<1x4x16xf32> to vector<4x16xf32>
    %477 = vector.shape_cast %474 : vector<4x16xf32> to vector<1x4x16xf32>
    tpu.vector_store %arg16[%c9_344, %c0_345, %c0_346], %477 {strides = array<i32>} : memref<32x4x16xf32, #tpu.memory_space<vmem>>, vector<1x4x16xf32>,
    %c0_347 = arith.constant 0 : index
    %c10_348 = arith.constant 10 : index
    %c0_349 = arith.constant 0 : index
    %478 = vector.load %arg15[%c0_347, %c10_348, %c0_349] : memref<8x32x16xf32, #tpu.memory_space<vmem>>, vector<8x1x16xf32>
    %479 = vector.shape_cast %478 : vector<8x1x16xf32> to vector<8x16xf32>
    %480 = vector.shape_cast %479 : vector<8x16xf32> to vector<1x8x16xf32>
    %481 = vector.broadcast %480 : vector<1x8x16xf32> to vector<4x8x16xf32>
    %482 = arith.mulf %459, %481 : vector<4x8x16xf32>
    %cst_350 = arith.constant dense<0.000000e+00> : vector<4x16xf32>
    %483 = vector.multi_reduction <add>, %482, %cst_350 [1] : vector<4x8x16xf32> to vector<4x16xf32>
    %c10_351 = arith.constant 10 : index
    %c0_352 = arith.constant 0 : index
    %c0_353 = arith.constant 0 : index
    %484 = vector.load %arg16[%c10_351, %c0_352, %c0_353] : memref<32x4x16xf32, #tpu.memory_space<vmem>>, vector<1x4x16xf32>
    %485 = vector.shape_cast %484 : vector<1x4x16xf32> to vector<4x16xf32>
    %486 = vector.shape_cast %483 : vector<4x16xf32> to vector<1x4x16xf32>
    tpu.vector_store %arg16[%c10_351, %c0_352, %c0_353], %486 {strides = array<i32>} : memref<32x4x16xf32, #tpu.memory_space<vmem>>, vector<1x4x16xf32>,
    %c0_354 = arith.constant 0 : index
    %c11_355 = arith.constant 11 : index
    %c0_356 = arith.constant 0 : index
    %487 = vector.load %arg15[%c0_354, %c11_355, %c0_356] : memref<8x32x16xf32, #tpu.memory_space<vmem>>, vector<8x1x16xf32>
    %488 = vector.shape_cast %487 : vector<8x1x16xf32> to vector<8x16xf32>
    %489 = vector.shape_cast %488 : vector<8x16xf32> to vector<1x8x16xf32>
    %490 = vector.broadcast %489 : vector<1x8x16xf32> to vector<4x8x16xf32>
    %491 = arith.mulf %459, %490 : vector<4x8x16xf32>
    %cst_357 = arith.constant dense<0.000000e+00> : vector<4x16xf32>
    %492 = vector.multi_reduction <add>, %491, %cst_357 [1] : vector<4x8x16xf32> to vector<4x16xf32>
    %c11_358 = arith.constant 11 : index
    %c0_359 = arith.constant 0 : index
    %c0_360 = arith.constant 0 : index
    %493 = vector.load %arg16[%c11_358, %c0_359, %c0_360] : memref<32x4x16xf32, #tpu.memory_space<vmem>>, vector<1x4x16xf32>
    %494 = vector.shape_cast %493 : vector<1x4x16xf32> to vector<4x16xf32>
    %495 = vector.shape_cast %492 : vector<4x16xf32> to vector<1x4x16xf32>
    tpu.vector_store %arg16[%c11_358, %c0_359, %c0_360], %495 {strides = array<i32>} : memref<32x4x16xf32, #tpu.memory_space<vmem>>, vector<1x4x16xf32>,
    %c0_361 = arith.constant 0 : index
    %c12_362 = arith.constant 12 : index
    %c0_363 = arith.constant 0 : index
    %496 = vector.load %arg15[%c0_361, %c12_362, %c0_363] : memref<8x32x16xf32, #tpu.memory_space<vmem>>, vector<8x1x16xf32>
    %497 = vector.shape_cast %496 : vector<8x1x16xf32> to vector<8x16xf32>
    %498 = vector.shape_cast %497 : vector<8x16xf32> to vector<1x8x16xf32>
    %499 = vector.broadcast %498 : vector<1x8x16xf32> to vector<4x8x16xf32>
    %500 = arith.mulf %459, %499 : vector<4x8x16xf32>
    %cst_364 = arith.constant dense<0.000000e+00> : vector<4x16xf32>
    %501 = vector.multi_reduction <add>, %500, %cst_364 [1] : vector<4x8x16xf32> to vector<4x16xf32>
    %c12_365 = arith.constant 12 : index
    %c0_366 = arith.constant 0 : index
    %c0_367 = arith.constant 0 : index
    %502 = vector.load %arg16[%c12_365, %c0_366, %c0_367] : memref<32x4x16xf32, #tpu.memory_space<vmem>>, vector<1x4x16xf32>
    %503 = vector.shape_cast %502 : vector<1x4x16xf32> to vector<4x16xf32>
    %504 = vector.shape_cast %501 : vector<4x16xf32> to vector<1x4x16xf32>
    tpu.vector_store %arg16[%c12_365, %c0_366, %c0_367], %504 {strides = array<i32>} : memref<32x4x16xf32, #tpu.memory_space<vmem>>, vector<1x4x16xf32>,
    %c0_368 = arith.constant 0 : index
    %c13_369 = arith.constant 13 : index
    %c0_370 = arith.constant 0 : index
    %505 = vector.load %arg15[%c0_368, %c13_369, %c0_370] : memref<8x32x16xf32, #tpu.memory_space<vmem>>, vector<8x1x16xf32>
    %506 = vector.shape_cast %505 : vector<8x1x16xf32> to vector<8x16xf32>
    %507 = vector.shape_cast %506 : vector<8x16xf32> to vector<1x8x16xf32>
    %508 = vector.broadcast %507 : vector<1x8x16xf32> to vector<4x8x16xf32>
    %509 = arith.mulf %459, %508 : vector<4x8x16xf32>
    %cst_371 = arith.constant dense<0.000000e+00> : vector<4x16xf32>
    %510 = vector.multi_reduction <add>, %509, %cst_371 [1] : vector<4x8x16xf32> to vector<4x16xf32>
    %c13_372 = arith.constant 13 : index
    %c0_373 = arith.constant 0 : index
    %c0_374 = arith.constant 0 : index
    %511 = vector.load %arg16[%c13_372, %c0_373, %c0_374] : memref<32x4x16xf32, #tpu.memory_space<vmem>>, vector<1x4x16xf32>
    %512 = vector.shape_cast %511 : vector<1x4x16xf32> to vector<4x16xf32>
    %513 = vector.shape_cast %510 : vector<4x16xf32> to vector<1x4x16xf32>
    tpu.vector_store %arg16[%c13_372, %c0_373, %c0_374], %513 {strides = array<i32>} : memref<32x4x16xf32, #tpu.memory_space<vmem>>, vector<1x4x16xf32>,
    %c0_375 = arith.constant 0 : index
    %c14_376 = arith.constant 14 : index
    %c0_377 = arith.constant 0 : index
    %514 = vector.load %arg15[%c0_375, %c14_376, %c0_377] : memref<8x32x16xf32, #tpu.memory_space<vmem>>, vector<8x1x16xf32>
    %515 = vector.shape_cast %514 : vector<8x1x16xf32> to vector<8x16xf32>
    %516 = vector.shape_cast %515 : vector<8x16xf32> to vector<1x8x16xf32>
    %517 = vector.broadcast %516 : vector<1x8x16xf32> to vector<4x8x16xf32>
    %518 = arith.mulf %459, %517 : vector<4x8x16xf32>
    %cst_378 = arith.constant dense<0.000000e+00> : vector<4x16xf32>
    %519 = vector.multi_reduction <add>, %518, %cst_378 [1] : vector<4x8x16xf32> to vector<4x16xf32>
    %c14_379 = arith.constant 14 : index
    %c0_380 = arith.constant 0 : index
    %c0_381 = arith.constant 0 : index
    %520 = vector.load %arg16[%c14_379, %c0_380, %c0_381] : memref<32x4x16xf32, #tpu.memory_space<vmem>>, vector<1x4x16xf32>
    %521 = vector.shape_cast %520 : vector<1x4x16xf32> to vector<4x16xf32>
    %522 = vector.shape_cast %519 : vector<4x16xf32> to vector<1x4x16xf32>
    tpu.vector_store %arg16[%c14_379, %c0_380, %c0_381], %522 {strides = array<i32>} : memref<32x4x16xf32, #tpu.memory_space<vmem>>, vector<1x4x16xf32>,
    %c0_382 = arith.constant 0 : index
    %c15_383 = arith.constant 15 : index
    %c0_384 = arith.constant 0 : index
    %523 = vector.load %arg15[%c0_382, %c15_383, %c0_384] : memref<8x32x16xf32, #tpu.memory_space<vmem>>, vector<8x1x16xf32>
    %524 = vector.shape_cast %523 : vector<8x1x16xf32> to vector<8x16xf32>
    %525 = vector.shape_cast %524 : vector<8x16xf32> to vector<1x8x16xf32>
    %526 = vector.broadcast %525 : vector<1x8x16xf32> to vector<4x8x16xf32>
    %527 = arith.mulf %459, %526 : vector<4x8x16xf32>
    %cst_385 = arith.constant dense<0.000000e+00> : vector<4x16xf32>
    %528 = vector.multi_reduction <add>, %527, %cst_385 [1] : vector<4x8x16xf32> to vector<4x16xf32>
    %c15_386 = arith.constant 15 : index
    %c0_387 = arith.constant 0 : index
    %c0_388 = arith.constant 0 : index
    %529 = vector.load %arg16[%c15_386, %c0_387, %c0_388] : memref<32x4x16xf32, #tpu.memory_space<vmem>>, vector<1x4x16xf32>
    %530 = vector.shape_cast %529 : vector<1x4x16xf32> to vector<4x16xf32>
    %531 = vector.shape_cast %528 : vector<4x16xf32> to vector<1x4x16xf32>
    tpu.vector_store %arg16[%c15_386, %c0_387, %c0_388], %531 {strides = array<i32>} : memref<32x4x16xf32, #tpu.memory_space<vmem>>, vector<1x4x16xf32>,
    %c0_389 = arith.constant 0 : index
    %c16 = arith.constant 16 : index
    %c0_390 = arith.constant 0 : index
    %532 = vector.load %arg13[%c0_389, %c16, %c0_390] : memref<4x32x16xf32, #tpu.memory_space<vmem>>, vector<4x1x16xf32>
    %533 = vector.shape_cast %532 : vector<4x1x16xf32> to vector<4x16xf32>
    %c0_391 = arith.constant 0 : index
    %c16_392 = arith.constant 16 : index
    %c0_393 = arith.constant 0 : index
    %534 = vector.load %arg14[%c0_391, %c16_392, %c0_393] : memref<8x32x16xf32, #tpu.memory_space<vmem>>, vector<8x1x16xf32>
    %535 = vector.shape_cast %534 : vector<8x1x16xf32> to vector<8x16xf32>
    %536 = vector.shape_cast %533 : vector<4x16xf32> to vector<4x1x16xf32>
    %537 = vector.shape_cast %535 : vector<8x16xf32> to vector<1x8x16xf32>
    %538 = vector.broadcast %536 : vector<4x1x16xf32> to vector<4x8x16xf32>
    %539 = vector.broadcast %537 : vector<1x8x16xf32> to vector<4x8x16xf32>
    %540 = arith.mulf %538, %539 : vector<4x8x16xf32>
    %c0_394 = arith.constant 0 : index
    %c17 = arith.constant 17 : index
    %c0_395 = arith.constant 0 : index
    %541 = vector.load %arg13[%c0_394, %c17, %c0_395] : memref<4x32x16xf32, #tpu.memory_space<vmem>>, vector<4x1x16xf32>
    %542 = vector.shape_cast %541 : vector<4x1x16xf32> to vector<4x16xf32>
    %c0_396 = arith.constant 0 : index
    %c17_397 = arith.constant 17 : index
    %c0_398 = arith.constant 0 : index
    %543 = vector.load %arg14[%c0_396, %c17_397, %c0_398] : memref<8x32x16xf32, #tpu.memory_space<vmem>>, vector<8x1x16xf32>
    %544 = vector.shape_cast %543 : vector<8x1x16xf32> to vector<8x16xf32>
    %545 = vector.shape_cast %542 : vector<4x16xf32> to vector<4x1x16xf32>
    %546 = vector.shape_cast %544 : vector<8x16xf32> to vector<1x8x16xf32>
    %547 = vector.broadcast %545 : vector<4x1x16xf32> to vector<4x8x16xf32>
    %548 = vector.broadcast %546 : vector<1x8x16xf32> to vector<4x8x16xf32>
    %549 = arith.mulf %547, %548 : vector<4x8x16xf32>
    %550 = arith.addf %540, %549 : vector<4x8x16xf32>
    %c0_399 = arith.constant 0 : index
    %c18 = arith.constant 18 : index
    %c0_400 = arith.constant 0 : index
    %551 = vector.load %arg13[%c0_399, %c18, %c0_400] : memref<4x32x16xf32, #tpu.memory_space<vmem>>, vector<4x1x16xf32>
    %552 = vector.shape_cast %551 : vector<4x1x16xf32> to vector<4x16xf32>
    %c0_401 = arith.constant 0 : index
    %c18_402 = arith.constant 18 : index
    %c0_403 = arith.constant 0 : index
    %553 = vector.load %arg14[%c0_401, %c18_402, %c0_403] : memref<8x32x16xf32, #tpu.memory_space<vmem>>, vector<8x1x16xf32>
    %554 = vector.shape_cast %553 : vector<8x1x16xf32> to vector<8x16xf32>
    %555 = vector.shape_cast %552 : vector<4x16xf32> to vector<4x1x16xf32>
    %556 = vector.shape_cast %554 : vector<8x16xf32> to vector<1x8x16xf32>
    %557 = vector.broadcast %555 : vector<4x1x16xf32> to vector<4x8x16xf32>
    %558 = vector.broadcast %556 : vector<1x8x16xf32> to vector<4x8x16xf32>
    %559 = arith.mulf %557, %558 : vector<4x8x16xf32>
    %560 = arith.addf %550, %559 : vector<4x8x16xf32>
    %c0_404 = arith.constant 0 : index
    %c19 = arith.constant 19 : index
    %c0_405 = arith.constant 0 : index
    %561 = vector.load %arg13[%c0_404, %c19, %c0_405] : memref<4x32x16xf32, #tpu.memory_space<vmem>>, vector<4x1x16xf32>
    %562 = vector.shape_cast %561 : vector<4x1x16xf32> to vector<4x16xf32>
    %c0_406 = arith.constant 0 : index
    %c19_407 = arith.constant 19 : index
    %c0_408 = arith.constant 0 : index
    %563 = vector.load %arg14[%c0_406, %c19_407, %c0_408] : memref<8x32x16xf32, #tpu.memory_space<vmem>>, vector<8x1x16xf32>
    %564 = vector.shape_cast %563 : vector<8x1x16xf32> to vector<8x16xf32>
    %565 = vector.shape_cast %562 : vector<4x16xf32> to vector<4x1x16xf32>
    %566 = vector.shape_cast %564 : vector<8x16xf32> to vector<1x8x16xf32>
    %567 = vector.broadcast %565 : vector<4x1x16xf32> to vector<4x8x16xf32>
    %568 = vector.broadcast %566 : vector<1x8x16xf32> to vector<4x8x16xf32>
    %569 = arith.mulf %567, %568 : vector<4x8x16xf32>
    %570 = arith.addf %560, %569 : vector<4x8x16xf32>
    %c0_409 = arith.constant 0 : index
    %c20 = arith.constant 20 : index
    %c0_410 = arith.constant 0 : index
    %571 = vector.load %arg13[%c0_409, %c20, %c0_410] : memref<4x32x16xf32, #tpu.memory_space<vmem>>, vector<4x1x16xf32>
    %572 = vector.shape_cast %571 : vector<4x1x16xf32> to vector<4x16xf32>
    %c0_411 = arith.constant 0 : index
    %c20_412 = arith.constant 20 : index
    %c0_413 = arith.constant 0 : index
    %573 = vector.load %arg14[%c0_411, %c20_412, %c0_413] : memref<8x32x16xf32, #tpu.memory_space<vmem>>, vector<8x1x16xf32>
    %574 = vector.shape_cast %573 : vector<8x1x16xf32> to vector<8x16xf32>
    %575 = vector.shape_cast %572 : vector<4x16xf32> to vector<4x1x16xf32>
    %576 = vector.shape_cast %574 : vector<8x16xf32> to vector<1x8x16xf32>
    %577 = vector.broadcast %575 : vector<4x1x16xf32> to vector<4x8x16xf32>
    %578 = vector.broadcast %576 : vector<1x8x16xf32> to vector<4x8x16xf32>
    %579 = arith.mulf %577, %578 : vector<4x8x16xf32>
    %580 = arith.addf %570, %579 : vector<4x8x16xf32>
    %c0_414 = arith.constant 0 : index
    %c21 = arith.constant 21 : index
    %c0_415 = arith.constant 0 : index
    %581 = vector.load %arg13[%c0_414, %c21, %c0_415] : memref<4x32x16xf32, #tpu.memory_space<vmem>>, vector<4x1x16xf32>
    %582 = vector.shape_cast %581 : vector<4x1x16xf32> to vector<4x16xf32>
    %c0_416 = arith.constant 0 : index
    %c21_417 = arith.constant 21 : index
    %c0_418 = arith.constant 0 : index
    %583 = vector.load %arg14[%c0_416, %c21_417, %c0_418] : memref<8x32x16xf32, #tpu.memory_space<vmem>>, vector<8x1x16xf32>
    %584 = vector.shape_cast %583 : vector<8x1x16xf32> to vector<8x16xf32>
    %585 = vector.shape_cast %582 : vector<4x16xf32> to vector<4x1x16xf32>
    %586 = vector.shape_cast %584 : vector<8x16xf32> to vector<1x8x16xf32>
    %587 = vector.broadcast %585 : vector<4x1x16xf32> to vector<4x8x16xf32>
    %588 = vector.broadcast %586 : vector<1x8x16xf32> to vector<4x8x16xf32>
    %589 = arith.mulf %587, %588 : vector<4x8x16xf32>
    %590 = arith.addf %580, %589 : vector<4x8x16xf32>
    %c0_419 = arith.constant 0 : index
    %c22 = arith.constant 22 : index
    %c0_420 = arith.constant 0 : index
    %591 = vector.load %arg13[%c0_419, %c22, %c0_420] : memref<4x32x16xf32, #tpu.memory_space<vmem>>, vector<4x1x16xf32>
    %592 = vector.shape_cast %591 : vector<4x1x16xf32> to vector<4x16xf32>
    %c0_421 = arith.constant 0 : index
    %c22_422 = arith.constant 22 : index
    %c0_423 = arith.constant 0 : index
    %593 = vector.load %arg14[%c0_421, %c22_422, %c0_423] : memref<8x32x16xf32, #tpu.memory_space<vmem>>, vector<8x1x16xf32>
    %594 = vector.shape_cast %593 : vector<8x1x16xf32> to vector<8x16xf32>
    %595 = vector.shape_cast %592 : vector<4x16xf32> to vector<4x1x16xf32>
    %596 = vector.shape_cast %594 : vector<8x16xf32> to vector<1x8x16xf32>
    %597 = vector.broadcast %595 : vector<4x1x16xf32> to vector<4x8x16xf32>
    %598 = vector.broadcast %596 : vector<1x8x16xf32> to vector<4x8x16xf32>
    %599 = arith.mulf %597, %598 : vector<4x8x16xf32>
    %600 = arith.addf %590, %599 : vector<4x8x16xf32>
    %c0_424 = arith.constant 0 : index
    %c23 = arith.constant 23 : index
    %c0_425 = arith.constant 0 : index
    %601 = vector.load %arg13[%c0_424, %c23, %c0_425] : memref<4x32x16xf32, #tpu.memory_space<vmem>>, vector<4x1x16xf32>
    %602 = vector.shape_cast %601 : vector<4x1x16xf32> to vector<4x16xf32>
    %c0_426 = arith.constant 0 : index
    %c23_427 = arith.constant 23 : index
    %c0_428 = arith.constant 0 : index
    %603 = vector.load %arg14[%c0_426, %c23_427, %c0_428] : memref<8x32x16xf32, #tpu.memory_space<vmem>>, vector<8x1x16xf32>
    %604 = vector.shape_cast %603 : vector<8x1x16xf32> to vector<8x16xf32>
    %605 = vector.shape_cast %602 : vector<4x16xf32> to vector<4x1x16xf32>
    %606 = vector.shape_cast %604 : vector<8x16xf32> to vector<1x8x16xf32>
    %607 = vector.broadcast %605 : vector<4x1x16xf32> to vector<4x8x16xf32>
    %608 = vector.broadcast %606 : vector<1x8x16xf32> to vector<4x8x16xf32>
    %609 = arith.mulf %607, %608 : vector<4x8x16xf32>
    %610 = arith.addf %600, %609 : vector<4x8x16xf32>
    %cst_429 = arith.constant 5.000000e-01 : f32
    %611 = vector.broadcast %cst_429 : f32 to vector<4x8x16xf32>
    %612 = arith.mulf %610, %611 : vector<4x8x16xf32>
    %cst_430 = arith.constant dense<0xFF800000> : vector<4x16xf32>
    %613 = vector.multi_reduction <maximumf>, %612, %cst_430 [1] : vector<4x8x16xf32> to vector<4x16xf32>
    %614 = vector.shape_cast %613 : vector<4x16xf32> to vector<4x1x16xf32>
    %615 = vector.broadcast %614 : vector<4x1x16xf32> to vector<4x8x16xf32>
    %616 = arith.subf %612, %615 : vector<4x8x16xf32>
    %617 = math.exp %616 : vector<4x8x16xf32>
    %cst_431 = arith.constant dense<0.000000e+00> : vector<4x16xf32>
    %618 = vector.multi_reduction <add>, %617, %cst_431 [1] : vector<4x8x16xf32> to vector<4x16xf32>
    %619 = vector.shape_cast %618 : vector<4x16xf32> to vector<4x1x16xf32>
    %620 = tpu.reciprocal %619 {approx = true} : vector<4x1x16xf32> -> vector<4x1x16xf32>
    %621 = vector.broadcast %620 : vector<4x1x16xf32> to vector<4x8x16xf32>
    %622 = arith.mulf %617, %621 : vector<4x8x16xf32>
    %c0_432 = arith.constant 0 : index
    %c16_433 = arith.constant 16 : index
    %c0_434 = arith.constant 0 : index
    %623 = vector.load %arg15[%c0_432, %c16_433, %c0_434] : memref<8x32x16xf32, #tpu.memory_space<vmem>>, vector<8x1x16xf32>
    %624 = vector.shape_cast %623 : vector<8x1x16xf32> to vector<8x16xf32>
    %625 = vector.shape_cast %624 : vector<8x16xf32> to vector<1x8x16xf32>
    %626 = vector.broadcast %625 : vector<1x8x16xf32> to vector<4x8x16xf32>
    %627 = arith.mulf %622, %626 : vector<4x8x16xf32>
    %cst_435 = arith.constant dense<0.000000e+00> : vector<4x16xf32>
    %628 = vector.multi_reduction <add>, %627, %cst_435 [1] : vector<4x8x16xf32> to vector<4x16xf32>
    %c16_436 = arith.constant 16 : index
    %c0_437 = arith.constant 0 : index
    %c0_438 = arith.constant 0 : index
    %629 = vector.load %arg16[%c16_436, %c0_437, %c0_438] : memref<32x4x16xf32, #tpu.memory_space<vmem>>, vector<1x4x16xf32>
    %630 = vector.shape_cast %629 : vector<1x4x16xf32> to vector<4x16xf32>
    %631 = vector.shape_cast %628 : vector<4x16xf32> to vector<1x4x16xf32>
    tpu.vector_store %arg16[%c16_436, %c0_437, %c0_438], %631 {strides = array<i32>} : memref<32x4x16xf32, #tpu.memory_space<vmem>>, vector<1x4x16xf32>,
    %c0_439 = arith.constant 0 : index
    %c17_440 = arith.constant 17 : index
    %c0_441 = arith.constant 0 : index
    %632 = vector.load %arg15[%c0_439, %c17_440, %c0_441] : memref<8x32x16xf32, #tpu.memory_space<vmem>>, vector<8x1x16xf32>
    %633 = vector.shape_cast %632 : vector<8x1x16xf32> to vector<8x16xf32>
    %634 = vector.shape_cast %633 : vector<8x16xf32> to vector<1x8x16xf32>
    %635 = vector.broadcast %634 : vector<1x8x16xf32> to vector<4x8x16xf32>
    %636 = arith.mulf %622, %635 : vector<4x8x16xf32>
    %cst_442 = arith.constant dense<0.000000e+00> : vector<4x16xf32>
    %637 = vector.multi_reduction <add>, %636, %cst_442 [1] : vector<4x8x16xf32> to vector<4x16xf32>
    %c17_443 = arith.constant 17 : index
    %c0_444 = arith.constant 0 : index
    %c0_445 = arith.constant 0 : index
    %638 = vector.load %arg16[%c17_443, %c0_444, %c0_445] : memref<32x4x16xf32, #tpu.memory_space<vmem>>, vector<1x4x16xf32>
    %639 = vector.shape_cast %638 : vector<1x4x16xf32> to vector<4x16xf32>
    %640 = vector.shape_cast %637 : vector<4x16xf32> to vector<1x4x16xf32>
    tpu.vector_store %arg16[%c17_443, %c0_444, %c0_445], %640 {strides = array<i32>} : memref<32x4x16xf32, #tpu.memory_space<vmem>>, vector<1x4x16xf32>,
    %c0_446 = arith.constant 0 : index
    %c18_447 = arith.constant 18 : index
    %c0_448 = arith.constant 0 : index
    %641 = vector.load %arg15[%c0_446, %c18_447, %c0_448] : memref<8x32x16xf32, #tpu.memory_space<vmem>>, vector<8x1x16xf32>
    %642 = vector.shape_cast %641 : vector<8x1x16xf32> to vector<8x16xf32>
    %643 = vector.shape_cast %642 : vector<8x16xf32> to vector<1x8x16xf32>
    %644 = vector.broadcast %643 : vector<1x8x16xf32> to vector<4x8x16xf32>
    %645 = arith.mulf %622, %644 : vector<4x8x16xf32>
    %cst_449 = arith.constant dense<0.000000e+00> : vector<4x16xf32>
    %646 = vector.multi_reduction <add>, %645, %cst_449 [1] : vector<4x8x16xf32> to vector<4x16xf32>
    %c18_450 = arith.constant 18 : index
    %c0_451 = arith.constant 0 : index
    %c0_452 = arith.constant 0 : index
    %647 = vector.load %arg16[%c18_450, %c0_451, %c0_452] : memref<32x4x16xf32, #tpu.memory_space<vmem>>, vector<1x4x16xf32>
    %648 = vector.shape_cast %647 : vector<1x4x16xf32> to vector<4x16xf32>
    %649 = vector.shape_cast %646 : vector<4x16xf32> to vector<1x4x16xf32>
    tpu.vector_store %arg16[%c18_450, %c0_451, %c0_452], %649 {strides = array<i32>} : memref<32x4x16xf32, #tpu.memory_space<vmem>>, vector<1x4x16xf32>,
    %c0_453 = arith.constant 0 : index
    %c19_454 = arith.constant 19 : index
    %c0_455 = arith.constant 0 : index
    %650 = vector.load %arg15[%c0_453, %c19_454, %c0_455] : memref<8x32x16xf32, #tpu.memory_space<vmem>>, vector<8x1x16xf32>
    %651 = vector.shape_cast %650 : vector<8x1x16xf32> to vector<8x16xf32>
    %652 = vector.shape_cast %651 : vector<8x16xf32> to vector<1x8x16xf32>
    %653 = vector.broadcast %652 : vector<1x8x16xf32> to vector<4x8x16xf32>
    %654 = arith.mulf %622, %653 : vector<4x8x16xf32>
    %cst_456 = arith.constant dense<0.000000e+00> : vector<4x16xf32>
    %655 = vector.multi_reduction <add>, %654, %cst_456 [1] : vector<4x8x16xf32> to vector<4x16xf32>
    %c19_457 = arith.constant 19 : index
    %c0_458 = arith.constant 0 : index
    %c0_459 = arith.constant 0 : index
    %656 = vector.load %arg16[%c19_457, %c0_458, %c0_459] : memref<32x4x16xf32, #tpu.memory_space<vmem>>, vector<1x4x16xf32>
    %657 = vector.shape_cast %656 : vector<1x4x16xf32> to vector<4x16xf32>
    %658 = vector.shape_cast %655 : vector<4x16xf32> to vector<1x4x16xf32>
    tpu.vector_store %arg16[%c19_457, %c0_458, %c0_459], %658 {strides = array<i32>} : memref<32x4x16xf32, #tpu.memory_space<vmem>>, vector<1x4x16xf32>,
    %c0_460 = arith.constant 0 : index
    %c20_461 = arith.constant 20 : index
    %c0_462 = arith.constant 0 : index
    %659 = vector.load %arg15[%c0_460, %c20_461, %c0_462] : memref<8x32x16xf32, #tpu.memory_space<vmem>>, vector<8x1x16xf32>
    %660 = vector.shape_cast %659 : vector<8x1x16xf32> to vector<8x16xf32>
    %661 = vector.shape_cast %660 : vector<8x16xf32> to vector<1x8x16xf32>
    %662 = vector.broadcast %661 : vector<1x8x16xf32> to vector<4x8x16xf32>
    %663 = arith.mulf %622, %662 : vector<4x8x16xf32>
    %cst_463 = arith.constant dense<0.000000e+00> : vector<4x16xf32>
    %664 = vector.multi_reduction <add>, %663, %cst_463 [1] : vector<4x8x16xf32> to vector<4x16xf32>
    %c20_464 = arith.constant 20 : index
    %c0_465 = arith.constant 0 : index
    %c0_466 = arith.constant 0 : index
    %665 = vector.load %arg16[%c20_464, %c0_465, %c0_466] : memref<32x4x16xf32, #tpu.memory_space<vmem>>, vector<1x4x16xf32>
    %666 = vector.shape_cast %665 : vector<1x4x16xf32> to vector<4x16xf32>
    %667 = vector.shape_cast %664 : vector<4x16xf32> to vector<1x4x16xf32>
    tpu.vector_store %arg16[%c20_464, %c0_465, %c0_466], %667 {strides = array<i32>} : memref<32x4x16xf32, #tpu.memory_space<vmem>>, vector<1x4x16xf32>,
    %c0_467 = arith.constant 0 : index
    %c21_468 = arith.constant 21 : index
    %c0_469 = arith.constant 0 : index
    %668 = vector.load %arg15[%c0_467, %c21_468, %c0_469] : memref<8x32x16xf32, #tpu.memory_space<vmem>>, vector<8x1x16xf32>
    %669 = vector.shape_cast %668 : vector<8x1x16xf32> to vector<8x16xf32>
    %670 = vector.shape_cast %669 : vector<8x16xf32> to vector<1x8x16xf32>
    %671 = vector.broadcast %670 : vector<1x8x16xf32> to vector<4x8x16xf32>
    %672 = arith.mulf %622, %671 : vector<4x8x16xf32>
    %cst_470 = arith.constant dense<0.000000e+00> : vector<4x16xf32>
    %673 = vector.multi_reduction <add>, %672, %cst_470 [1] : vector<4x8x16xf32> to vector<4x16xf32>
    %c21_471 = arith.constant 21 : index
    %c0_472 = arith.constant 0 : index
    %c0_473 = arith.constant 0 : index
    %674 = vector.load %arg16[%c21_471, %c0_472, %c0_473] : memref<32x4x16xf32, #tpu.memory_space<vmem>>, vector<1x4x16xf32>
    %675 = vector.shape_cast %674 : vector<1x4x16xf32> to vector<4x16xf32>
    %676 = vector.shape_cast %673 : vector<4x16xf32> to vector<1x4x16xf32>
    tpu.vector_store %arg16[%c21_471, %c0_472, %c0_473], %676 {strides = array<i32>} : memref<32x4x16xf32, #tpu.memory_space<vmem>>, vector<1x4x16xf32>,
    %c0_474 = arith.constant 0 : index
    %c22_475 = arith.constant 22 : index
    %c0_476 = arith.constant 0 : index
    %677 = vector.load %arg15[%c0_474, %c22_475, %c0_476] : memref<8x32x16xf32, #tpu.memory_space<vmem>>, vector<8x1x16xf32>
    %678 = vector.shape_cast %677 : vector<8x1x16xf32> to vector<8x16xf32>
    %679 = vector.shape_cast %678 : vector<8x16xf32> to vector<1x8x16xf32>
    %680 = vector.broadcast %679 : vector<1x8x16xf32> to vector<4x8x16xf32>
    %681 = arith.mulf %622, %680 : vector<4x8x16xf32>
    %cst_477 = arith.constant dense<0.000000e+00> : vector<4x16xf32>
    %682 = vector.multi_reduction <add>, %681, %cst_477 [1] : vector<4x8x16xf32> to vector<4x16xf32>
    %c22_478 = arith.constant 22 : index
    %c0_479 = arith.constant 0 : index
    %c0_480 = arith.constant 0 : index
    %683 = vector.load %arg16[%c22_478, %c0_479, %c0_480] : memref<32x4x16xf32, #tpu.memory_space<vmem>>, vector<1x4x16xf32>
    %684 = vector.shape_cast %683 : vector<1x4x16xf32> to vector<4x16xf32>
    %685 = vector.shape_cast %682 : vector<4x16xf32> to vector<1x4x16xf32>
    tpu.vector_store %arg16[%c22_478, %c0_479, %c0_480], %685 {strides = array<i32>} : memref<32x4x16xf32, #tpu.memory_space<vmem>>, vector<1x4x16xf32>,
    %c0_481 = arith.constant 0 : index
    %c23_482 = arith.constant 23 : index
    %c0_483 = arith.constant 0 : index
    %686 = vector.load %arg15[%c0_481, %c23_482, %c0_483] : memref<8x32x16xf32, #tpu.memory_space<vmem>>, vector<8x1x16xf32>
    %687 = vector.shape_cast %686 : vector<8x1x16xf32> to vector<8x16xf32>
    %688 = vector.shape_cast %687 : vector<8x16xf32> to vector<1x8x16xf32>
    %689 = vector.broadcast %688 : vector<1x8x16xf32> to vector<4x8x16xf32>
    %690 = arith.mulf %622, %689 : vector<4x8x16xf32>
    %cst_484 = arith.constant dense<0.000000e+00> : vector<4x16xf32>
    %691 = vector.multi_reduction <add>, %690, %cst_484 [1] : vector<4x8x16xf32> to vector<4x16xf32>
    %c23_485 = arith.constant 23 : index
    %c0_486 = arith.constant 0 : index
    %c0_487 = arith.constant 0 : index
    %692 = vector.load %arg16[%c23_485, %c0_486, %c0_487] : memref<32x4x16xf32, #tpu.memory_space<vmem>>, vector<1x4x16xf32>
    %693 = vector.shape_cast %692 : vector<1x4x16xf32> to vector<4x16xf32>
    %694 = vector.shape_cast %691 : vector<4x16xf32> to vector<1x4x16xf32>
    tpu.vector_store %arg16[%c23_485, %c0_486, %c0_487], %694 {strides = array<i32>} : memref<32x4x16xf32, #tpu.memory_space<vmem>>, vector<1x4x16xf32>,
    %c0_488 = arith.constant 0 : index
    %c24 = arith.constant 24 : index
    %c0_489 = arith.constant 0 : index
    %695 = vector.load %arg13[%c0_488, %c24, %c0_489] : memref<4x32x16xf32, #tpu.memory_space<vmem>>, vector<4x1x16xf32>
    %696 = vector.shape_cast %695 : vector<4x1x16xf32> to vector<4x16xf32>
    %c0_490 = arith.constant 0 : index
    %c24_491 = arith.constant 24 : index
    %c0_492 = arith.constant 0 : index
    %697 = vector.load %arg14[%c0_490, %c24_491, %c0_492] : memref<8x32x16xf32, #tpu.memory_space<vmem>>, vector<8x1x16xf32>
    %698 = vector.shape_cast %697 : vector<8x1x16xf32> to vector<8x16xf32>
    %699 = vector.shape_cast %696 : vector<4x16xf32> to vector<4x1x16xf32>
    %700 = vector.shape_cast %698 : vector<8x16xf32> to vector<1x8x16xf32>
    %701 = vector.broadcast %699 : vector<4x1x16xf32> to vector<4x8x16xf32>
    %702 = vector.broadcast %700 : vector<1x8x16xf32> to vector<4x8x16xf32>
    %703 = arith.mulf %701, %702 : vector<4x8x16xf32>
    %c0_493 = arith.constant 0 : index
    %c25 = arith.constant 25 : index
    %c0_494 = arith.constant 0 : index
    %704 = vector.load %arg13[%c0_493, %c25, %c0_494] : memref<4x32x16xf32, #tpu.memory_space<vmem>>, vector<4x1x16xf32>
    %705 = vector.shape_cast %704 : vector<4x1x16xf32> to vector<4x16xf32>
    %c0_495 = arith.constant 0 : index
    %c25_496 = arith.constant 25 : index
    %c0_497 = arith.constant 0 : index
    %706 = vector.load %arg14[%c0_495, %c25_496, %c0_497] : memref<8x32x16xf32, #tpu.memory_space<vmem>>, vector<8x1x16xf32>
    %707 = vector.shape_cast %706 : vector<8x1x16xf32> to vector<8x16xf32>
    %708 = vector.shape_cast %705 : vector<4x16xf32> to vector<4x1x16xf32>
    %709 = vector.shape_cast %707 : vector<8x16xf32> to vector<1x8x16xf32>
    %710 = vector.broadcast %708 : vector<4x1x16xf32> to vector<4x8x16xf32>
    %711 = vector.broadcast %709 : vector<1x8x16xf32> to vector<4x8x16xf32>
    %712 = arith.mulf %710, %711 : vector<4x8x16xf32>
    %713 = arith.addf %703, %712 : vector<4x8x16xf32>
    %c0_498 = arith.constant 0 : index
    %c26 = arith.constant 26 : index
    %c0_499 = arith.constant 0 : index
    %714 = vector.load %arg13[%c0_498, %c26, %c0_499] : memref<4x32x16xf32, #tpu.memory_space<vmem>>, vector<4x1x16xf32>
    %715 = vector.shape_cast %714 : vector<4x1x16xf32> to vector<4x16xf32>
    %c0_500 = arith.constant 0 : index
    %c26_501 = arith.constant 26 : index
    %c0_502 = arith.constant 0 : index
    %716 = vector.load %arg14[%c0_500, %c26_501, %c0_502] : memref<8x32x16xf32, #tpu.memory_space<vmem>>, vector<8x1x16xf32>
    %717 = vector.shape_cast %716 : vector<8x1x16xf32> to vector<8x16xf32>
    %718 = vector.shape_cast %715 : vector<4x16xf32> to vector<4x1x16xf32>
    %719 = vector.shape_cast %717 : vector<8x16xf32> to vector<1x8x16xf32>
    %720 = vector.broadcast %718 : vector<4x1x16xf32> to vector<4x8x16xf32>
    %721 = vector.broadcast %719 : vector<1x8x16xf32> to vector<4x8x16xf32>
    %722 = arith.mulf %720, %721 : vector<4x8x16xf32>
    %723 = arith.addf %713, %722 : vector<4x8x16xf32>
    %c0_503 = arith.constant 0 : index
    %c27 = arith.constant 27 : index
    %c0_504 = arith.constant 0 : index
    %724 = vector.load %arg13[%c0_503, %c27, %c0_504] : memref<4x32x16xf32, #tpu.memory_space<vmem>>, vector<4x1x16xf32>
    %725 = vector.shape_cast %724 : vector<4x1x16xf32> to vector<4x16xf32>
    %c0_505 = arith.constant 0 : index
    %c27_506 = arith.constant 27 : index
    %c0_507 = arith.constant 0 : index
    %726 = vector.load %arg14[%c0_505, %c27_506, %c0_507] : memref<8x32x16xf32, #tpu.memory_space<vmem>>, vector<8x1x16xf32>
    %727 = vector.shape_cast %726 : vector<8x1x16xf32> to vector<8x16xf32>
    %728 = vector.shape_cast %725 : vector<4x16xf32> to vector<4x1x16xf32>
    %729 = vector.shape_cast %727 : vector<8x16xf32> to vector<1x8x16xf32>
    %730 = vector.broadcast %728 : vector<4x1x16xf32> to vector<4x8x16xf32>
    %731 = vector.broadcast %729 : vector<1x8x16xf32> to vector<4x8x16xf32>
    %732 = arith.mulf %730, %731 : vector<4x8x16xf32>
    %733 = arith.addf %723, %732 : vector<4x8x16xf32>
    %c0_508 = arith.constant 0 : index
    %c28 = arith.constant 28 : index
    %c0_509 = arith.constant 0 : index
    %734 = vector.load %arg13[%c0_508, %c28, %c0_509] : memref<4x32x16xf32, #tpu.memory_space<vmem>>, vector<4x1x16xf32>
    %735 = vector.shape_cast %734 : vector<4x1x16xf32> to vector<4x16xf32>
    %c0_510 = arith.constant 0 : index
    %c28_511 = arith.constant 28 : index
    %c0_512 = arith.constant 0 : index
    %736 = vector.load %arg14[%c0_510, %c28_511, %c0_512] : memref<8x32x16xf32, #tpu.memory_space<vmem>>, vector<8x1x16xf32>
    %737 = vector.shape_cast %736 : vector<8x1x16xf32> to vector<8x16xf32>
    %738 = vector.shape_cast %735 : vector<4x16xf32> to vector<4x1x16xf32>
    %739 = vector.shape_cast %737 : vector<8x16xf32> to vector<1x8x16xf32>
    %740 = vector.broadcast %738 : vector<4x1x16xf32> to vector<4x8x16xf32>
    %741 = vector.broadcast %739 : vector<1x8x16xf32> to vector<4x8x16xf32>
    %742 = arith.mulf %740, %741 : vector<4x8x16xf32>
    %743 = arith.addf %733, %742 : vector<4x8x16xf32>
    %c0_513 = arith.constant 0 : index
    %c29 = arith.constant 29 : index
    %c0_514 = arith.constant 0 : index
    %744 = vector.load %arg13[%c0_513, %c29, %c0_514] : memref<4x32x16xf32, #tpu.memory_space<vmem>>, vector<4x1x16xf32>
    %745 = vector.shape_cast %744 : vector<4x1x16xf32> to vector<4x16xf32>
    %c0_515 = arith.constant 0 : index
    %c29_516 = arith.constant 29 : index
    %c0_517 = arith.constant 0 : index
    %746 = vector.load %arg14[%c0_515, %c29_516, %c0_517] : memref<8x32x16xf32, #tpu.memory_space<vmem>>, vector<8x1x16xf32>
    %747 = vector.shape_cast %746 : vector<8x1x16xf32> to vector<8x16xf32>
    %748 = vector.shape_cast %745 : vector<4x16xf32> to vector<4x1x16xf32>
    %749 = vector.shape_cast %747 : vector<8x16xf32> to vector<1x8x16xf32>
    %750 = vector.broadcast %748 : vector<4x1x16xf32> to vector<4x8x16xf32>
    %751 = vector.broadcast %749 : vector<1x8x16xf32> to vector<4x8x16xf32>
    %752 = arith.mulf %750, %751 : vector<4x8x16xf32>
    %753 = arith.addf %743, %752 : vector<4x8x16xf32>
    %c0_518 = arith.constant 0 : index
    %c30 = arith.constant 30 : index
    %c0_519 = arith.constant 0 : index
    %754 = vector.load %arg13[%c0_518, %c30, %c0_519] : memref<4x32x16xf32, #tpu.memory_space<vmem>>, vector<4x1x16xf32>
    %755 = vector.shape_cast %754 : vector<4x1x16xf32> to vector<4x16xf32>
    %c0_520 = arith.constant 0 : index
    %c30_521 = arith.constant 30 : index
    %c0_522 = arith.constant 0 : index
    %756 = vector.load %arg14[%c0_520, %c30_521, %c0_522] : memref<8x32x16xf32, #tpu.memory_space<vmem>>, vector<8x1x16xf32>
    %757 = vector.shape_cast %756 : vector<8x1x16xf32> to vector<8x16xf32>
    %758 = vector.shape_cast %755 : vector<4x16xf32> to vector<4x1x16xf32>
    %759 = vector.shape_cast %757 : vector<8x16xf32> to vector<1x8x16xf32>
    %760 = vector.broadcast %758 : vector<4x1x16xf32> to vector<4x8x16xf32>
    %761 = vector.broadcast %759 : vector<1x8x16xf32> to vector<4x8x16xf32>
    %762 = arith.mulf %760, %761 : vector<4x8x16xf32>
    %763 = arith.addf %753, %762 : vector<4x8x16xf32>
    %c0_523 = arith.constant 0 : index
    %c31 = arith.constant 31 : index
    %c0_524 = arith.constant 0 : index
    %764 = vector.load %arg13[%c0_523, %c31, %c0_524] : memref<4x32x16xf32, #tpu.memory_space<vmem>>, vector<4x1x16xf32>
    %765 = vector.shape_cast %764 : vector<4x1x16xf32> to vector<4x16xf32>
    %c0_525 = arith.constant 0 : index
    %c31_526 = arith.constant 31 : index
    %c0_527 = arith.constant 0 : index
    %766 = vector.load %arg14[%c0_525, %c31_526, %c0_527] : memref<8x32x16xf32, #tpu.memory_space<vmem>>, vector<8x1x16xf32>
    %767 = vector.shape_cast %766 : vector<8x1x16xf32> to vector<8x16xf32>
    %768 = vector.shape_cast %765 : vector<4x16xf32> to vector<4x1x16xf32>
    %769 = vector.shape_cast %767 : vector<8x16xf32> to vector<1x8x16xf32>
    %770 = vector.broadcast %768 : vector<4x1x16xf32> to vector<4x8x16xf32>
    %771 = vector.broadcast %769 : vector<1x8x16xf32> to vector<4x8x16xf32>
    %772 = arith.mulf %770, %771 : vector<4x8x16xf32>
    %773 = arith.addf %763, %772 : vector<4x8x16xf32>
    %cst_528 = arith.constant 5.000000e-01 : f32
    %774 = vector.broadcast %cst_528 : f32 to vector<4x8x16xf32>
    %775 = arith.mulf %773, %774 : vector<4x8x16xf32>
    %cst_529 = arith.constant dense<0xFF800000> : vector<4x16xf32>
    %776 = vector.multi_reduction <maximumf>, %775, %cst_529 [1] : vector<4x8x16xf32> to vector<4x16xf32>
    %777 = vector.shape_cast %776 : vector<4x16xf32> to vector<4x1x16xf32>
    %778 = vector.broadcast %777 : vector<4x1x16xf32> to vector<4x8x16xf32>
    %779 = arith.subf %775, %778 : vector<4x8x16xf32>
    %780 = math.exp %779 : vector<4x8x16xf32>
    %cst_530 = arith.constant dense<0.000000e+00> : vector<4x16xf32>
    %781 = vector.multi_reduction <add>, %780, %cst_530 [1] : vector<4x8x16xf32> to vector<4x16xf32>
    %782 = vector.shape_cast %781 : vector<4x16xf32> to vector<4x1x16xf32>
    %783 = tpu.reciprocal %782 {approx = true} : vector<4x1x16xf32> -> vector<4x1x16xf32>
    %784 = vector.broadcast %783 : vector<4x1x16xf32> to vector<4x8x16xf32>
    %785 = arith.mulf %780, %784 : vector<4x8x16xf32>
    %c0_531 = arith.constant 0 : index
    %c24_532 = arith.constant 24 : index
    %c0_533 = arith.constant 0 : index
    %786 = vector.load %arg15[%c0_531, %c24_532, %c0_533] : memref<8x32x16xf32, #tpu.memory_space<vmem>>, vector<8x1x16xf32>
    %787 = vector.shape_cast %786 : vector<8x1x16xf32> to vector<8x16xf32>
    %788 = vector.shape_cast %787 : vector<8x16xf32> to vector<1x8x16xf32>
    %789 = vector.broadcast %788 : vector<1x8x16xf32> to vector<4x8x16xf32>
    %790 = arith.mulf %785, %789 : vector<4x8x16xf32>
    %cst_534 = arith.constant dense<0.000000e+00> : vector<4x16xf32>
    %791 = vector.multi_reduction <add>, %790, %cst_534 [1] : vector<4x8x16xf32> to vector<4x16xf32>
    %c24_535 = arith.constant 24 : index
    %c0_536 = arith.constant 0 : index
    %c0_537 = arith.constant 0 : index
    %792 = vector.load %arg16[%c24_535, %c0_536, %c0_537] : memref<32x4x16xf32, #tpu.memory_space<vmem>>, vector<1x4x16xf32>
    %793 = vector.shape_cast %792 : vector<1x4x16xf32> to vector<4x16xf32>
    %794 = vector.shape_cast %791 : vector<4x16xf32> to vector<1x4x16xf32>
    tpu.vector_store %arg16[%c24_535, %c0_536, %c0_537], %794 {strides = array<i32>} : memref<32x4x16xf32, #tpu.memory_space<vmem>>, vector<1x4x16xf32>,
    %c0_538 = arith.constant 0 : index
    %c25_539 = arith.constant 25 : index
    %c0_540 = arith.constant 0 : index
    %795 = vector.load %arg15[%c0_538, %c25_539, %c0_540] : memref<8x32x16xf32, #tpu.memory_space<vmem>>, vector<8x1x16xf32>
    %796 = vector.shape_cast %795 : vector<8x1x16xf32> to vector<8x16xf32>
    %797 = vector.shape_cast %796 : vector<8x16xf32> to vector<1x8x16xf32>
    %798 = vector.broadcast %797 : vector<1x8x16xf32> to vector<4x8x16xf32>
    %799 = arith.mulf %785, %798 : vector<4x8x16xf32>
    %cst_541 = arith.constant dense<0.000000e+00> : vector<4x16xf32>
    %800 = vector.multi_reduction <add>, %799, %cst_541 [1] : vector<4x8x16xf32> to vector<4x16xf32>
    %c25_542 = arith.constant 25 : index
    %c0_543 = arith.constant 0 : index
    %c0_544 = arith.constant 0 : index
    %801 = vector.load %arg16[%c25_542, %c0_543, %c0_544] : memref<32x4x16xf32, #tpu.memory_space<vmem>>, vector<1x4x16xf32>
    %802 = vector.shape_cast %801 : vector<1x4x16xf32> to vector<4x16xf32>
    %803 = vector.shape_cast %800 : vector<4x16xf32> to vector<1x4x16xf32>
    tpu.vector_store %arg16[%c25_542, %c0_543, %c0_544], %803 {strides = array<i32>} : memref<32x4x16xf32, #tpu.memory_space<vmem>>, vector<1x4x16xf32>,
    %c0_545 = arith.constant 0 : index
    %c26_546 = arith.constant 26 : index
    %c0_547 = arith.constant 0 : index
    %804 = vector.load %arg15[%c0_545, %c26_546, %c0_547] : memref<8x32x16xf32, #tpu.memory_space<vmem>>, vector<8x1x16xf32>
    %805 = vector.shape_cast %804 : vector<8x1x16xf32> to vector<8x16xf32>
    %806 = vector.shape_cast %805 : vector<8x16xf32> to vector<1x8x16xf32>
    %807 = vector.broadcast %806 : vector<1x8x16xf32> to vector<4x8x16xf32>
    %808 = arith.mulf %785, %807 : vector<4x8x16xf32>
    %cst_548 = arith.constant dense<0.000000e+00> : vector<4x16xf32>
    %809 = vector.multi_reduction <add>, %808, %cst_548 [1] : vector<4x8x16xf32> to vector<4x16xf32>
    %c26_549 = arith.constant 26 : index
    %c0_550 = arith.constant 0 : index
    %c0_551 = arith.constant 0 : index
    %810 = vector.load %arg16[%c26_549, %c0_550, %c0_551] : memref<32x4x16xf32, #tpu.memory_space<vmem>>, vector<1x4x16xf32>
    %811 = vector.shape_cast %810 : vector<1x4x16xf32> to vector<4x16xf32>
    %812 = vector.shape_cast %809 : vector<4x16xf32> to vector<1x4x16xf32>
    tpu.vector_store %arg16[%c26_549, %c0_550, %c0_551], %812 {strides = array<i32>} : memref<32x4x16xf32, #tpu.memory_space<vmem>>, vector<1x4x16xf32>,
    %c0_552 = arith.constant 0 : index
    %c27_553 = arith.constant 27 : index
    %c0_554 = arith.constant 0 : index
    %813 = vector.load %arg15[%c0_552, %c27_553, %c0_554] : memref<8x32x16xf32, #tpu.memory_space<vmem>>, vector<8x1x16xf32>
    %814 = vector.shape_cast %813 : vector<8x1x16xf32> to vector<8x16xf32>
    %815 = vector.shape_cast %814 : vector<8x16xf32> to vector<1x8x16xf32>
    %816 = vector.broadcast %815 : vector<1x8x16xf32> to vector<4x8x16xf32>
    %817 = arith.mulf %785, %816 : vector<4x8x16xf32>
    %cst_555 = arith.constant dense<0.000000e+00> : vector<4x16xf32>
    %818 = vector.multi_reduction <add>, %817, %cst_555 [1] : vector<4x8x16xf32> to vector<4x16xf32>
    %c27_556 = arith.constant 27 : index
    %c0_557 = arith.constant 0 : index
    %c0_558 = arith.constant 0 : index
    %819 = vector.load %arg16[%c27_556, %c0_557, %c0_558] : memref<32x4x16xf32, #tpu.memory_space<vmem>>, vector<1x4x16xf32>
    %820 = vector.shape_cast %819 : vector<1x4x16xf32> to vector<4x16xf32>
    %821 = vector.shape_cast %818 : vector<4x16xf32> to vector<1x4x16xf32>
    tpu.vector_store %arg16[%c27_556, %c0_557, %c0_558], %821 {strides = array<i32>} : memref<32x4x16xf32, #tpu.memory_space<vmem>>, vector<1x4x16xf32>,
    %c0_559 = arith.constant 0 : index
    %c28_560 = arith.constant 28 : index
    %c0_561 = arith.constant 0 : index
    %822 = vector.load %arg15[%c0_559, %c28_560, %c0_561] : memref<8x32x16xf32, #tpu.memory_space<vmem>>, vector<8x1x16xf32>
    %823 = vector.shape_cast %822 : vector<8x1x16xf32> to vector<8x16xf32>
    %824 = vector.shape_cast %823 : vector<8x16xf32> to vector<1x8x16xf32>
    %825 = vector.broadcast %824 : vector<1x8x16xf32> to vector<4x8x16xf32>
    %826 = arith.mulf %785, %825 : vector<4x8x16xf32>
    %cst_562 = arith.constant dense<0.000000e+00> : vector<4x16xf32>
    %827 = vector.multi_reduction <add>, %826, %cst_562 [1] : vector<4x8x16xf32> to vector<4x16xf32>
    %c28_563 = arith.constant 28 : index
    %c0_564 = arith.constant 0 : index
    %c0_565 = arith.constant 0 : index
    %828 = vector.load %arg16[%c28_563, %c0_564, %c0_565] : memref<32x4x16xf32, #tpu.memory_space<vmem>>, vector<1x4x16xf32>
    %829 = vector.shape_cast %828 : vector<1x4x16xf32> to vector<4x16xf32>
    %830 = vector.shape_cast %827 : vector<4x16xf32> to vector<1x4x16xf32>
    tpu.vector_store %arg16[%c28_563, %c0_564, %c0_565], %830 {strides = array<i32>} : memref<32x4x16xf32, #tpu.memory_space<vmem>>, vector<1x4x16xf32>,
    %c0_566 = arith.constant 0 : index
    %c29_567 = arith.constant 29 : index
    %c0_568 = arith.constant 0 : index
    %831 = vector.load %arg15[%c0_566, %c29_567, %c0_568] : memref<8x32x16xf32, #tpu.memory_space<vmem>>, vector<8x1x16xf32>
    %832 = vector.shape_cast %831 : vector<8x1x16xf32> to vector<8x16xf32>
    %833 = vector.shape_cast %832 : vector<8x16xf32> to vector<1x8x16xf32>
    %834 = vector.broadcast %833 : vector<1x8x16xf32> to vector<4x8x16xf32>
    %835 = arith.mulf %785, %834 : vector<4x8x16xf32>
    %cst_569 = arith.constant dense<0.000000e+00> : vector<4x16xf32>
    %836 = vector.multi_reduction <add>, %835, %cst_569 [1] : vector<4x8x16xf32> to vector<4x16xf32>
    %c29_570 = arith.constant 29 : index
    %c0_571 = arith.constant 0 : index
    %c0_572 = arith.constant 0 : index
    %837 = vector.load %arg16[%c29_570, %c0_571, %c0_572] : memref<32x4x16xf32, #tpu.memory_space<vmem>>, vector<1x4x16xf32>
    %838 = vector.shape_cast %837 : vector<1x4x16xf32> to vector<4x16xf32>
    %839 = vector.shape_cast %836 : vector<4x16xf32> to vector<1x4x16xf32>
    tpu.vector_store %arg16[%c29_570, %c0_571, %c0_572], %839 {strides = array<i32>} : memref<32x4x16xf32, #tpu.memory_space<vmem>>, vector<1x4x16xf32>,
    %c0_573 = arith.constant 0 : index
    %c30_574 = arith.constant 30 : index
    %c0_575 = arith.constant 0 : index
    %840 = vector.load %arg15[%c0_573, %c30_574, %c0_575] : memref<8x32x16xf32, #tpu.memory_space<vmem>>, vector<8x1x16xf32>
    %841 = vector.shape_cast %840 : vector<8x1x16xf32> to vector<8x16xf32>
    %842 = vector.shape_cast %841 : vector<8x16xf32> to vector<1x8x16xf32>
    %843 = vector.broadcast %842 : vector<1x8x16xf32> to vector<4x8x16xf32>
    %844 = arith.mulf %785, %843 : vector<4x8x16xf32>
    %cst_576 = arith.constant dense<0.000000e+00> : vector<4x16xf32>
    %845 = vector.multi_reduction <add>, %844, %cst_576 [1] : vector<4x8x16xf32> to vector<4x16xf32>
    %c30_577 = arith.constant 30 : index
    %c0_578 = arith.constant 0 : index
    %c0_579 = arith.constant 0 : index
    %846 = vector.load %arg16[%c30_577, %c0_578, %c0_579] : memref<32x4x16xf32, #tpu.memory_space<vmem>>, vector<1x4x16xf32>
    %847 = vector.shape_cast %846 : vector<1x4x16xf32> to vector<4x16xf32>
    %848 = vector.shape_cast %845 : vector<4x16xf32> to vector<1x4x16xf32>
    tpu.vector_store %arg16[%c30_577, %c0_578, %c0_579], %848 {strides = array<i32>} : memref<32x4x16xf32, #tpu.memory_space<vmem>>, vector<1x4x16xf32>,
    %c0_580 = arith.constant 0 : index
    %c31_581 = arith.constant 31 : index
    %c0_582 = arith.constant 0 : index
    %849 = vector.load %arg15[%c0_580, %c31_581, %c0_582] : memref<8x32x16xf32, #tpu.memory_space<vmem>>, vector<8x1x16xf32>
    %850 = vector.shape_cast %849 : vector<8x1x16xf32> to vector<8x16xf32>
    %851 = vector.shape_cast %850 : vector<8x16xf32> to vector<1x8x16xf32>
    %852 = vector.broadcast %851 : vector<1x8x16xf32> to vector<4x8x16xf32>
    %853 = arith.mulf %785, %852 : vector<4x8x16xf32>
    %cst_583 = arith.constant dense<0.000000e+00> : vector<4x16xf32>
    %854 = vector.multi_reduction <add>, %853, %cst_583 [1] : vector<4x8x16xf32> to vector<4x16xf32>
    %c31_584 = arith.constant 31 : index
    %c0_585 = arith.constant 0 : index
    %c0_586 = arith.constant 0 : index
    %855 = vector.load %arg16[%c31_584, %c0_585, %c0_586] : memref<32x4x16xf32, #tpu.memory_space<vmem>>, vector<1x4x16xf32>
    %856 = vector.shape_cast %855 : vector<1x4x16xf32> to vector<4x16xf32>
    %857 = vector.shape_cast %854 : vector<4x16xf32> to vector<1x4x16xf32>
    tpu.vector_store %arg16[%c31_584, %c0_585, %c0_586], %857 {strides = array<i32>} : memref<32x4x16xf32, #tpu.memory_space<vmem>>, vector<1x4x16xf32>,
    %c0_587 = arith.constant 0 : index
    %c0_588 = arith.constant 0 : index
    %858 = vector.load %arg10[%c0_587, %c0_588] : memref<32x32xf32, #tpu.memory_space<vmem>>, vector<32x32xf32>
    %c0_589 = arith.constant 0 : index
    %c0_590 = arith.constant 0 : index
    %859 = vector.load %arg11[%c0_589, %c0_590] : memref<1x32xf32, #tpu.memory_space<vmem>>, vector<1x32xf32>
    %c0_591 = arith.constant 0 : index
    %c0_592 = arith.constant 0 : index
    %c0_593 = arith.constant 0 : index
    %860 = vector.load %arg16[%c0_591, %c0_592, %c0_593] : memref<32x4x16xf32, #tpu.memory_space<vmem>>, vector<32x1x16xf32>
    %861 = vector.shape_cast %860 : vector<32x1x16xf32> to vector<32x16xf32>
    %cst_594 = arith.constant dense<0.000000e+00> : vector<16x32xf32>
    %862 = tpu.matmul %861, %858, %cst_594 {dimension_numbers = #tpu.dot_dimension_numbers<[0], [0], [1], [1], [0, 1, 1, 1], [], []>} : vector<32x16xf32>, vector<32x32xf32>, vector<16x32xf32> -> vector<16x32xf32>
    %863 = vector.broadcast %859 : vector<1x32xf32> to vector<16x32xf32>
    %864 = arith.addf %862, %863 : vector<16x32xf32>
    %cst_595 = arith.constant 0.000000e+00 : f32
    %865 = vector.broadcast %cst_595 : f32 to vector<16x32xf32>
    %866 = arith.maximumf %864, %865 : vector<16x32xf32>
    %c0_596 = arith.constant 0 : index
    %c0_597 = arith.constant 0 : index
    %c0_598 = arith.constant 0 : index
    %c0_599 = arith.constant 0 : index
    %867 = vector.load %arg12[%c0_596, %c0_597, %c0_598, %c0_599] : memref<1x4x16x32xf32, #tpu.memory_space<vmem>>, vector<1x1x16x32xf32>
    %868 = vector.shape_cast %867 : vector<1x1x16x32xf32> to vector<16x32xf32>
    %869 = vector.shape_cast %866 : vector<16x32xf32> to vector<1x1x16x32xf32>
    tpu.vector_store %arg12[%c0_596, %c0_597, %c0_598, %c0_599], %869 {strides = array<i32>} : memref<1x4x16x32xf32, #tpu.memory_space<vmem>>, vector<1x1x16x32xf32>,
    %c0_600 = arith.constant 0 : index
    %c1_601 = arith.constant 1 : index
    %c0_602 = arith.constant 0 : index
    %870 = vector.load %arg16[%c0_600, %c1_601, %c0_602] : memref<32x4x16xf32, #tpu.memory_space<vmem>>, vector<32x1x16xf32>
    %871 = vector.shape_cast %870 : vector<32x1x16xf32> to vector<32x16xf32>
    %cst_603 = arith.constant dense<0.000000e+00> : vector<16x32xf32>
    %872 = tpu.matmul %871, %858, %cst_603 {dimension_numbers = #tpu.dot_dimension_numbers<[0], [0], [1], [1], [0, 1, 1, 1], [], []>} : vector<32x16xf32>, vector<32x32xf32>, vector<16x32xf32> -> vector<16x32xf32>
    %873 = vector.broadcast %859 : vector<1x32xf32> to vector<16x32xf32>
    %874 = arith.addf %872, %873 : vector<16x32xf32>
    %cst_604 = arith.constant 0.000000e+00 : f32
    %875 = vector.broadcast %cst_604 : f32 to vector<16x32xf32>
    %876 = arith.maximumf %874, %875 : vector<16x32xf32>
    %c0_605 = arith.constant 0 : index
    %c1_606 = arith.constant 1 : index
    %c0_607 = arith.constant 0 : index
    %c0_608 = arith.constant 0 : index
    %877 = vector.load %arg12[%c0_605, %c1_606, %c0_607, %c0_608] : memref<1x4x16x32xf32, #tpu.memory_space<vmem>>, vector<1x1x16x32xf32>
    %878 = vector.shape_cast %877 : vector<1x1x16x32xf32> to vector<16x32xf32>
    %879 = vector.shape_cast %876 : vector<16x32xf32> to vector<1x1x16x32xf32>
    tpu.vector_store %arg12[%c0_605, %c1_606, %c0_607, %c0_608], %879 {strides = array<i32>} : memref<1x4x16x32xf32, #tpu.memory_space<vmem>>, vector<1x1x16x32xf32>,
    %c0_609 = arith.constant 0 : index
    %c2_610 = arith.constant 2 : index
    %c0_611 = arith.constant 0 : index
    %880 = vector.load %arg16[%c0_609, %c2_610, %c0_611] : memref<32x4x16xf32, #tpu.memory_space<vmem>>, vector<32x1x16xf32>
    %881 = vector.shape_cast %880 : vector<32x1x16xf32> to vector<32x16xf32>
    %cst_612 = arith.constant dense<0.000000e+00> : vector<16x32xf32>
    %882 = tpu.matmul %881, %858, %cst_612 {dimension_numbers = #tpu.dot_dimension_numbers<[0], [0], [1], [1], [0, 1, 1, 1], [], []>} : vector<32x16xf32>, vector<32x32xf32>, vector<16x32xf32> -> vector<16x32xf32>
    %883 = vector.broadcast %859 : vector<1x32xf32> to vector<16x32xf32>
    %884 = arith.addf %882, %883 : vector<16x32xf32>
    %cst_613 = arith.constant 0.000000e+00 : f32
    %885 = vector.broadcast %cst_613 : f32 to vector<16x32xf32>
    %886 = arith.maximumf %884, %885 : vector<16x32xf32>
    %c0_614 = arith.constant 0 : index
    %c2_615 = arith.constant 2 : index
    %c0_616 = arith.constant 0 : index
    %c0_617 = arith.constant 0 : index
    %887 = vector.load %arg12[%c0_614, %c2_615, %c0_616, %c0_617] : memref<1x4x16x32xf32, #tpu.memory_space<vmem>>, vector<1x1x16x32xf32>
    %888 = vector.shape_cast %887 : vector<1x1x16x32xf32> to vector<16x32xf32>
    %889 = vector.shape_cast %886 : vector<16x32xf32> to vector<1x1x16x32xf32>
    tpu.vector_store %arg12[%c0_614, %c2_615, %c0_616, %c0_617], %889 {strides = array<i32>} : memref<1x4x16x32xf32, #tpu.memory_space<vmem>>, vector<1x1x16x32xf32>,
    %c0_618 = arith.constant 0 : index
    %c3_619 = arith.constant 3 : index
    %c0_620 = arith.constant 0 : index
    %890 = vector.load %arg16[%c0_618, %c3_619, %c0_620] : memref<32x4x16xf32, #tpu.memory_space<vmem>>, vector<32x1x16xf32>
    %891 = vector.shape_cast %890 : vector<32x1x16xf32> to vector<32x16xf32>
    %cst_621 = arith.constant dense<0.000000e+00> : vector<16x32xf32>
    %892 = tpu.matmul %891, %858, %cst_621 {dimension_numbers = #tpu.dot_dimension_numbers<[0], [0], [1], [1], [0, 1, 1, 1], [], []>} : vector<32x16xf32>, vector<32x32xf32>, vector<16x32xf32> -> vector<16x32xf32>
    %893 = vector.broadcast %859 : vector<1x32xf32> to vector<16x32xf32>
    %894 = arith.addf %892, %893 : vector<16x32xf32>
    %cst_622 = arith.constant 0.000000e+00 : f32
    %895 = vector.broadcast %cst_622 : f32 to vector<16x32xf32>
    %896 = arith.maximumf %894, %895 : vector<16x32xf32>
    %c0_623 = arith.constant 0 : index
    %c3_624 = arith.constant 3 : index
    %c0_625 = arith.constant 0 : index
    %c0_626 = arith.constant 0 : index
    %897 = vector.load %arg12[%c0_623, %c3_624, %c0_625, %c0_626] : memref<1x4x16x32xf32, #tpu.memory_space<vmem>>, vector<1x1x16x32xf32>
    %898 = vector.shape_cast %897 : vector<1x1x16x32xf32> to vector<16x32xf32>
    %899 = vector.shape_cast %896 : vector<16x32xf32> to vector<1x1x16x32xf32>
    tpu.vector_store %arg12[%c0_623, %c3_624, %c0_625, %c0_626], %899 {strides = array<i32>} : memref<1x4x16x32xf32, #tpu.memory_space<vmem>>, vector<1x1x16x32xf32>,
    return
  }
  func.func @transform_0(%arg0: i32) -> (i32, i32, i32, i32) {
    %c0_i32 = arith.constant 0 : i32
    %c0_i32_0 = arith.constant 0 : i32
    %c0_i32_1 = arith.constant 0 : i32
    %c0_i32_2 = arith.constant 0 : i32
    return %arg0, %c0_i32, %c0_i32_0, %c0_i32_1 : i32, i32, i32, i32
  }
  func.func @transform_1(%arg0: i32) -> (i32, i32, i32, i32) {
    %c0_i32 = arith.constant 0 : i32
    %c0_i32_0 = arith.constant 0 : i32
    %c0_i32_1 = arith.constant 0 : i32
    %c0_i32_2 = arith.constant 0 : i32
    return %arg0, %c0_i32, %c0_i32_0, %c0_i32_1 : i32, i32, i32, i32
  }
  func.func @transform_2(%arg0: i32) -> (i32, i32, i32, i32) {
    %c0_i32 = arith.constant 0 : i32
    %c0_i32_0 = arith.constant 0 : i32
    %c0_i32_1 = arith.constant 0 : i32
    %c0_i32_2 = arith.constant 0 : i32
    return %arg0, %c0_i32, %c0_i32_0, %c0_i32_1 : i32, i32, i32, i32
  }
  func.func @transform_3(%arg0: i32) -> (i32, i32) {
    %c0_i32 = arith.constant 0 : i32
    %c0_i32_0 = arith.constant 0 : i32
    %c0_i32_1 = arith.constant 0 : i32
    return %c0_i32, %c0_i32_0 : i32, i32
  }
  func.func @transform_4(%arg0: i32) -> (i32, i32) {
    %c0_i32 = arith.constant 0 : i32
    %c0_i32_0 = arith.constant 0 : i32
    %c0_i32_1 = arith.constant 0 : i32
    return %c0_i32, %c0_i32_0 : i32, i32
  }
  func.func @transform_5(%arg0: i32) -> (i32, i32) {
    %c0_i32 = arith.constant 0 : i32
    %c0_i32_0 = arith.constant 0 : i32
    %c0_i32_1 = arith.constant 0 : i32
    return %c0_i32, %c0_i32_0 : i32, i32
  }
  func.func @transform_6(%arg0: i32) -> (i32, i32) {
    %c0_i32 = arith.constant 0 : i32
    %c0_i32_0 = arith.constant 0 : i32
    %c0_i32_1 = arith.constant 0 : i32
    return %c0_i32, %c0_i32_0 : i32, i32
  }
  func.func @transform_7(%arg0: i32) -> (i32, i32) {
    %c0_i32 = arith.constant 0 : i32
    %c0_i32_0 = arith.constant 0 : i32
    %c0_i32_1 = arith.constant 0 : i32
    return %c0_i32, %c0_i32_0 : i32, i32
  }
  func.func @transform_8(%arg0: i32) -> (i32, i32) {
    %c0_i32 = arith.constant 0 : i32
    %c0_i32_0 = arith.constant 0 : i32
    %c0_i32_1 = arith.constant 0 : i32
    return %c0_i32, %c0_i32_0 : i32, i32
  }
  func.func @transform_9(%arg0: i32) -> (i32, i32) {
    %c0_i32 = arith.constant 0 : i32
    %c0_i32_0 = arith.constant 0 : i32
    %c0_i32_1 = arith.constant 0 : i32
    return %c0_i32, %c0_i32_0 : i32, i32
  }
  func.func @transform_10(%arg0: i32) -> (i32, i32) {
    %c0_i32 = arith.constant 0 : i32
    %c0_i32_0 = arith.constant 0 : i32
    %c0_i32_1 = arith.constant 0 : i32
    return %c0_i32, %c0_i32_0 : i32, i32
  }
  func.func @transform_11(%arg0: i32) -> (i32, i32, i32, i32) {
    %c0_i32 = arith.constant 0 : i32
    %c0_i32_0 = arith.constant 0 : i32
    %c0_i32_1 = arith.constant 0 : i32
    %c0_i32_2 = arith.constant 0 : i32
    return %arg0, %c0_i32, %c0_i32_0, %c0_i32_1 : i32, i32, i32, i32
  }
}

</mosaic_0001>

<bundles_post_ra>
// kernel: tpu_custom_call.1
= control target key start
LH: loop header
LB: loop body
LE: loop exit
PB: predicated region body
PF: predicated region fallthrough
CT: control target
= control target key end

     0   :  { %s10451_s0 = inlined_call_operand.hbm [shape: f32[2,4,16,32], index: 0, kind: input, shape index: {}]   ;;  %s10452_s1 = inlined_call_operand.hbm [shape: f32[2,8,16,32], index: 1, kind: input, shape index: {}]   ;;  %s10453_s2 = inlined_call_operand.hbm [shape: f32[2,8,16,32], index: 2, kind: input, shape index: {}]   ;;  %s10454_s3 = inlined_call_operand.vmem [shape: f32[32,32], index: 3, kind: input, shape index: {}]   ;;  %s10455_s4 = inlined_call_operand.vmem [shape: f32[32,1], index: 4, kind: input, shape index: {}]   ;;  %s10456_s5 = inlined_call_operand.vmem [shape: f32[32,32], index: 5, kind: input, shape index: {}]   ;;  %s10457_s6 = inlined_call_operand.vmem [shape: f32[32,1], index: 6, kind: input, shape index: {}]   ;;  %s10458_s7 = inlined_call_operand.vmem [shape: f32[32,32], index: 7, kind: input, shape index: {}]   ;;  %s10459_s8 = inlined_call_operand.vmem [shape: f32[32,1], index: 8, kind: input, shape index: {}]   ;;  %s10460_s9 = inlined_call_operand.hbm [shape: f32[32,32], index: 9, kind: input, shape index: {}]   ;;  %s10461_s10 = inlined_call_operand.vmem [shape: f32[1,32], index: 10, kind: input, shape index: {}]   ;;  %s10462_s11 = inlined_call_operand.hbm [shape: f32[2,4,16,32], index: 11, kind: output, shape index: {}]  }
   0x1   :  { %10544 = sst [smem:[#allocation106_spill]] %s10452_s1 }
   0x2   :  { %10545 = sst [smem:[#allocation107_spill]] %s10458_s7 }
   0x3   :  { %10546 = sst [smem:[#allocation108_spill]] %s10459_s8 }
   0x4   :  { %10547 = sst [smem:[#allocation109_spill]] %s10460_s9 }
   0x5   :  { %10548 = sst [smem:[#allocation110_spill]] %s10461_s10 }
   0x6   :  { %10549 = sst [smem:[#allocation111_spill]] %s10462_s11 }
   0x7   :  { %16 = vsyncpa [#allocation7], 0 }
   0x8   :  { %18 = vsyncpa [#allocation7 + $0x1], 0 }
   0x9   :  { %19 = vsyncpa [#allocation10], 0 }
   0xa   :  { %21 = vsyncpa [#allocation10 + $0x1], 0 }
   0xb   :  { %22 = vsyncpa [#allocation13], 0 }
   0xc   :  { %23 = vsyncpa [#allocation8], 0 }
   0xd   :  { %25 = vsyncpa [#allocation8 + $0x1], 0  ;;  %s7348_s17 = smov 0   ;;  %s7350_s18 = smov 0  }
   0xe   :  { %s7352_s19 = smov 0   ;;  %s7354_s20 = smov 0  }
   0xf LB: > { %10550 = sst [smem:[#allocation19_spill]] %s7268_s17  ;;  %s7369_s21 = sadd.s32 1, %s7280_s20   ;;  %s7280_s20 = sphi %s7354_s20, %s10840_s20   ;;  %s7276_s19 = sphi %s7352_s19, %s10842_s19   ;;  %s7272_s18 = sphi %s7350_s18, %s10844_s18   ;;  %s7268_s17 = sphi %s7348_s17, %s10843_s17  }
  0x10   : > { %10551 = sst [smem:[#allocation20_spill]] %s7276_s19  ;;  %s38_s22 = sadd.s32 1, %s7276_s19 }
  0x11   : > { %10552 = sst [smem:[#allocation21_spill]] %s7369_s21  ;;  %s35_s23 = ssub.s32 %s7280_s20, %s7369_s21 }
  0x12   : > { %p45_p0 = scmp.ne.s32.totalorder %s7276_s19, %s7272_s18  ;;  %p36_p1 = scmp.eq.s32.totalorder %s35_s23, 0 }
  0x13   : > { %p46_p2 = scmp.eq.s32.totalorder %s7280_s20, 0  ;;  %p6848_p5 = scmp.lt.s32.totalorder %s7280_s20, 2 }
  0x14   : > { %s7378_s24 = scalar_select %p36_p1, %s7276_s19, %s38_s22  }
  0x15   : > { %p47_p3 = por %p46_p2, %p45_p0  ;;  %s7386_s25 = sand.u32 1, %s7276_s19  }
  0x16   : > { %10553 = sst [smem:[#allocation22_spill]] %s7378_s24  ;;  %s378_s26 = sand.u32 1, %s7280_s20  }
  0x17   : > { %s10463_s27 = sshll.u32 %s7386_s25, 7  ;;  %p7390_p6 = pnand %p6848_p5, %p47_p3 }
  0x18   : > { %s6814_s29 = sshll.u32 %s7280_s20, 7  ;;  %s10555_s1 = sld [smem:[#allocation106_spill]] }
  0x19   : > { %s382_s15 = scalar_lea.vmem [#allocation9], %s10463_s27  ;;  %s7400_s22 = scalar_lea.sflag [#allocation10], %s378_s26 }
  0x1a   : > { %s390_s16 = sshll.u32 %s382_s15, 4  ;;  %p7090_p8 = pneg %p7390_p6  ;;  %s391_s16 = int_to_ptr.vmem [resolvable:$true] %s390_s16 }
  0x1e   : > { %s387_s13 = scalar_lea.hbm %s10555_s1, %s6814_s29 }
  0x1f   : > { %s388_s14 = sshll.u32 %s387_s13, 4  ;;  %s7093_s13 = scalar_lea.hbm %s10555_s1, 256  ;;  %s389_s14 = int_to_ptr.hbm [resolvable:$true] %s388_s14 }
  0x20   : > { %s7086_s23 = sshra.s32 %s389_s14, 4  ;;  %s7087_s23 = int_to_ptr.hbm [resolvable:$true] %s7086_s23 }
  0x21   : > { %s7088_s24 = scalar_lea.hbm %s7087_s23, 128  ;;  %p7094_p11 = scmp.lt.s32.totalorder %s7087_s23, %s10555_s1 }
  0x22   : > { %p7089_p7 = scmp.ne.s32.totalorder %s7087_s23, %s7088_s24  ;;  %p7095_p12 = scmp.lt.s32.totalorder %s7093_s13, %s7088_s24 }
  0x24   : > { %p7091_p9 = pnand %p7090_p8, %p7089_p7  ;;  %p7096_p13 = por %p7095_p12, %p7094_p11 }
  0x26   : > { %p7092_p10 = pneg %p7091_p9 }
  0x28   : > { %p7097_p1 = pnand %p7096_p13, %p7092_p10 }
  0x2a   : > { %7100 = shalt.err (!%p7097_p1)
}
  0x2b   : > { %s10467_s26 = smov 128   ;;  %s10469_s21 = smov 8  }
  0x2c   : > { %6839 = dma.hbm_to_vmem [thread:$0]  (!%p7390_p6), %s389_s14, 2048, %s391_s16, %s7400_s22, %s10467_s26, %s10467_s26, %s10469_s21  }
  0x2d   : > { %s409_s23 = scalar_lea.hbm %s10453_s2, %s6814_s29  ;;  %s10556_s12 = sshll.u32 %s7386_s25, 7 }
  0x2e   : > { %s410_s30 = sshll.u32 %s409_s23, 4  ;;  %s404_s13 = scalar_lea.vmem [#allocation11], %s10556_s12  ;;  %s7424_s30 = int_to_ptr.hbm [resolvable:$true] %s410_s30 }
  0x2f   : > { %s412_s15 = sshll.u32 %s404_s13, 4  ;;  %s7429_s1 = sadd.s32 4294967295, %s7280_s20   ;;  %s7426_s15 = int_to_ptr.vmem [resolvable:$true] %s412_s15 }
  0x30   : > { %s6621_s11 = sadd.s32 4294967294, %s7280_s20   ;;  %p51_p2 = scmp.ne.s32.totalorder %s7272_s18, %s7268_s17 }
  0x31   : > { %p10478_p3 = scmp.eq.s32.totalorder %s7429_s1, 0  ;;  %p295_p5 = scmp.eq.s32.totalorder %s7429_s1, 1 }
  0x32   : > { %p301_p7 = scmp.eq.s32.totalorder %s6621_s11, 1  ;;  %p6622_p10 = scmp.ge.s32.totalorder %s7280_s20, 1 }
  0x33   : > { %p7438_p9 = por %p10478_p3, %p51_p2  ;;  %p7446_p11 = por %p295_p5, %p45_p0 }
  0x34   : > { %p7450_p12 = por %p301_p7, %p51_p2  ;;  %p308_p13 = scmp.lt.s32.totalorder %s7280_s20, 3 }
  0x35   : > { %s10558_s14 = scalar_select %p7446_p11, 1, 0 }
  0x36   : > { %s10560_s16 = scalar_select %p7450_p12, 1, 0 }
  0x37   : > { %10559 = sst [smem:[#allocation23_spill]] %s10558_s14  ;;  %p7458_p1 = pnand %p6622_p10, %p308_p13 }
  0x38   : > { %10561 = sst [smem:[#allocation24_spill]] %s10560_s16  ;;  %s7284_s12 = smov [#allocation12]  }
  0x39   : > { %s10562_s9 = sld [smem:[#allocation109_spill]]  ;;  %s339_s13 = sshll.u32 %s7284_s12, 4  ;;  %s340_s13 = int_to_ptr.vmem [resolvable:$true] %s339_s13 }
  0x3a   : > { %p6829_p0 = pneg %p7458_p1  ;;  %s6625_s26 = sshll.u32 %s7386_s25, 6 }
  0x3b   : > { %s6813_s21 = sshll.u32 %s7280_s20, 6  ;;  %s10564_s14 = smov 8  }
  0x3c   : > { %p6830_p2 = pnand %p6829_p0, %p10478_p3  ;;  %s365_s27 = scalar_lea.hbm %s10451_s0, %s6813_s21 }
  0x3d   : > { %s366_s17 = sshll.u32 %s365_s27, 4  ;;  %s10565_s10 = smov 128   ;;  %s367_s17 = int_to_ptr.hbm [resolvable:$true] %s366_s17 }
  0x3e   : > { %s357_s12 = scalar_lea.sflag [#allocation7], %s7386_s25  ;;  %s7146_s7 = sshra.s32 %s367_s17, 4  ;;  %s7147_s7 = int_to_ptr.hbm [resolvable:$true] %s7146_s7 }
  0x3f   : > { %s337_s11 = sshll.u32 %s10562_s9, 4  ;;  %s360_s9 = scalar_lea.vmem [#allocation6], %s6625_s26  ;;  %s338_s11 = int_to_ptr.hbm [resolvable:$true] %s337_s11 }
  0x40   : > { %s368_s16 = sshll.u32 %s360_s9, 4  ;;  %s7148_s8 = scalar_lea.hbm %s7147_s7, 64  ;;  %s369_s16 = int_to_ptr.vmem [resolvable:$true] %s368_s16 }
  0x41   : > { %6832 = dma.hbm_to_vmem [thread:$0]  (!%p6830_p2), %s338_s11, 512, %s340_s13, [#allocation13], %s10565_s10, %s10565_s10, %s10564_s14  }
  0x42   : > { %p7149_p5 = scmp.ne.s32.totalorder %s7147_s7, %s7148_s8  ;;  %s7153_s9 = scalar_lea.hbm %s10451_s0, 128 }
  0x43   : > { %p7154_p13 = scmp.lt.s32.totalorder %s7147_s7, %s10451_s0  ;;  %p7155_p0 = scmp.lt.s32.totalorder %s7153_s9, %s7148_s8 }
  0x44   : > { %p7151_p7 = pnand %p7149_p5, %p7090_p8 }
  0x45   : > { %p7156_p2 = por %p7155_p0, %p7154_p13 }
  0x46   : > { %p7152_p10 = pneg %p7151_p7 }
  0x48   : > { %p7157_p4 = pnand %p7156_p2, %p7152_p10 }
  0x4a   : > { %7160 = shalt.err (!%p7157_p4)
}
  0x4b   : > { %6836 = dma.hbm_to_vmem [thread:$0]  (!%p7390_p6), %s367_s17, 1024, %s369_s16, %s357_s12, %s10565_s10, %s10565_s10, %s10564_s14  }
  0x4c   : > { %s7176_s25 = sshra.s32 %s7424_s30, 4  ;;  %s7183_s13 = scalar_lea.hbm %s10453_s2, 256  ;;  %s7177_s25 = int_to_ptr.hbm [resolvable:$true] %s7176_s25 }
  0x4d   : > { %s7178_s11 = scalar_lea.hbm %s7177_s25, 128  ;;  %p7184_p4 = scmp.lt.s32.totalorder %s7177_s25, %s10453_s2 }
  0x4e   : > { %p7179_p5 = scmp.ne.s32.totalorder %s7177_s25, %s7178_s11  ;;  %p7185_p10 = scmp.lt.s32.totalorder %s7183_s13, %s7178_s11 }
  0x50   : > { %p7181_p7 = pnand %p7179_p5, %p7090_p8  ;;  %p7186_p13 = por %p7185_p10, %p7184_p4 }
  0x52   : > { %p7182_p3 = pneg %p7181_p7 }
  0x54   : > { %p7187_p0 = pnand %p7186_p13, %p7182_p3 }
  0x56   : > { %7190 = shalt.err (!%p7187_p0)
}
  0x57   : > { %6842 = dma.hbm_to_vmem [thread:$0]  (!%p7390_p6), %s7424_s30, 2048, %s7426_s15, %s7400_s22, %s10565_s10, %s10565_s10, %s10564_s14  }
  0x58   : > { %424 = sbr.rel (%p7458_p1) target bundleno = 1346 (0x542), region = 64 }
  0x5d   : > { %s7510_s17 = sand.u32 1, %s7272_s18  }
  0x5e   : > { %s6635_s16 = sshll.u32 %s7510_s17, 6  ;;  %s427_s12 = scalar_lea.sflag [#allocation7], %s7510_s17 }
  0x5f   : > { %s430_s28 = scalar_lea.vmem [#allocation6], %s6635_s16 }
  0x60   : > { %7251 = dma.done.wait (%p7438_p9), %s427_s12, 1024  }
  0x61   : > { %7253 = vsyncadd (%p7438_p9), %s427_s12, 4294966272  ;;  %s436_s10 = sand.u32 1, %s7429_s1   ;;  %s6636_s22 = sshll.u32 %s7510_s17, 7 }
  0x62   : > { %s437_s30 = scalar_lea.sflag [#allocation10], %s436_s10  ;;  %s7522_s15 = scalar_lea.vmem [#allocation9], %s6636_s22 }
  0x63   : > { %7255 = dma.done.wait (%p7438_p9), %s437_s30, 4096  }
  0x64   : > { %7257 = vsyncadd (%p7438_p9), %s437_s30, 4294963200  ;;  %s7528_s14 = scalar_lea.vmem [#allocation11], %s6636_s22  ;;  %p10566_p6 = scmp.eq.s32.totalorder %s7429_s1, 0 }
  0x66   : > { %7259 = dma.done.wait (%p10566_p6), [#allocation13], 512   ;;  %p10567_p8 = pmov %p10566_p6 }
  0x67   : > { %v7285_v0 = vmov 0   ;;  %vm535_vm0 = vcmask 261120   ;;  %v514_v1 = vld [vmem:[%s430_s28 + $0x8] sm:$0xff]  ;;  %v6647_v2 = vld [vmem:[%s430_s28 + $0x18] sm:$0xff]  ;;  %v513_v5 = vld [vmem:[%s430_s28] sm:$0xff]  ;;  %s10568_s27 = sld [smem:[#allocation108_spill]] }
  0x68   : > { %7261 = vsyncadd (%p10567_p8), [#allocation13], 4294966784  ;;  %6891 = vset.pattern.permute.xlu1 %v7285_v0  ;;  %6890 = vset.pattern.permute.xlu0 %v7285_v0  ;;  %v6655_v3 = vld [vmem:[%s430_s28 + $0x28] sm:$0xff]  ;;  %v6663_v4 = vld [vmem:[%s430_s28 + $0x38] sm:$0xff]  ;;  %vm587_vm1 = vcmask 130048   ;;  %vm1586_vm2 = vcmask 1041409  }
  0x69   : > { %6892 = vset.pattern.permute.xlu2 %v7285_v0  ;;  %6640 = vmatpush.xpose.msk.msra.mxu0 %vm535_vm0, %v514_v1  ;;  %v6646_v6 = vld [vmem:[%s430_s28 + $0x10] sm:$0xff]  ;;  %v6654_v7 = vld [vmem:[%s430_s28 + $0x20] sm:$0xff]  ;;  %v6685_v9 = vld [vmem:[%s7522_s15 + $0x28] sm:$0xff]  ;;  %vm1589_vm3 = vcmask 1042434   ;;  %vm1592_vm4 = vcmask 1043459   ;;  %vm1595_vm5 = vcmask 1044484  }
  0x6a   : > { %6648 = vmatpush.xpose.msk.msra.mxu1 %vm535_vm0, %v6647_v2  ;;  %6656 = vmatpush.xpose.msk.msra.mxu2 %vm535_vm0, %v6655_v3  ;;  %v6662_v8 = vld [vmem:[%s430_s28 + $0x30] sm:$0xff]  ;;  %v6693_v10 = vld [vmem:[%s7522_s15 + $0x38] sm:$0xff]  ;;  %v505_v11 = vld [vmem:[%s10454_s3] sm:$0xff]  ;;  %vm1598_vm6 = vcmask 1045509   ;;  %vm1601_vm7 = vcmask 1046534   ;;  %vm1604_vm8 = vcmask 1047559  }
  0x6b   : > { %6664 = vmatpush.xpose.msk.msra.mxu3 %vm535_vm0, %v6663_v4  ;;  %v742_v12 = vld [vmem:[%s7522_s15 + $0x8] sm:$0xff]  ;;  %v6677_v13 = vld [vmem:[%s7522_s15 + $0x18] sm:$0xff]  ;;  %v739_v14 = vld [vmem:[%s10457_s6 + $0x10] sm:$0xff]  ;;  %vm2091_vm9 = vcmask 125952   ;;  %s10834_s28 = sld [smem:[#allocation110_spill]]  ;;  %s10399_s10 = scalar_lea.vmem [#allocation14], %s6635_s16 }
  0x6c   : > { %v737_v15 = vld [vmem:[%s10457_s6] sm:$0xff]  ;;  %v6692_v17 = vld [vmem:[%s7522_s15 + $0x30] sm:$0xff]  ;;  %v6717_v18 = vld [vmem:[%s7522_s15 + $0x68] sm:$0xff]  ;;  %755 = vperm.xlu1 %6891, %v739_v14   ;;  %s6816_s16 = sshll.u32 %s7429_s1, 6  ;;  %s10835_s29 = sld [smem:[#allocation111_spill]] }
  0x6d   : > { %6641 = vmatpush.xpose.msk.msra.mxu0 %vm535_vm0, %v513_v5  ;;  %v6684_v16 = vld [vmem:[%s7522_s15 + $0x20] sm:$0xff]  ;;  %v6725_v19 = vld [vmem:[%s7522_s15 + $0x78] sm:$0xff]  ;;  %745 = vperm.xlu0 %6890, %v737_v15   ;;  %v6676_v21 = vld [vmem:[%s7522_s15 + $0x10] sm:$0xff]  ;;  %s6492_s9 = sshll.u32 %s10399_s10, 4  ;;  %s6480_s24 = scalar_lea.sflag [#allocation8], %s7510_s17  ;;  %s6493_s9 = int_to_ptr.vmem [resolvable:$true] %s6492_s9 }
  0x6e   : > { %6649 = vmatpush.xpose.msk.msra.mxu1 %vm535_vm0, %v6646_v6  ;;  %6657 = vmatpush.xpose.msk.msra.mxu2 %vm535_vm0, %v6654_v7  ;;  %v741_v20 = vld [vmem:[%s7522_s15] sm:$0xff]  ;;  %v6701_v22 = vld [vmem:[%s7522_s15 + $0x48] sm:$0xff]  ;;  %v6709_v23 = vld [vmem:[%s7522_s15 + $0x58] sm:$0xff] }
  0x6f   : > { %6665 = vmatpush.xpose.msk.msra.mxu3 %vm535_vm0, %v6662_v8  ;;  %v506_v24 = vld [vmem:[%s10454_s3 + $0x8] sm:$0xff]  ;;  %v740_v25 = vld [vmem:[%s10457_s6 + $0x18] sm:$0xff]  ;;  %v509_v26 = vld [vmem:[%s10455_s4] sm:$0xff] }
  0x70   : > { %6642 = vmatmul.msk.f32.vlgmr.msra.gmra.mxu0 %vm535_vm0, %v505_v11  ;;  %v738_v27 = vld [vmem:[%s10457_s6 + $0x8] sm:$0xff]  ;;  %760 = vperm.xlu2 %6892, %v740_v25   ;;  %v507_v28 = vld [vmem:[%s10454_s3 + $0x10] sm:$0xff]  ;;  %v512_v31 = vld [vmem:[%s10455_s4 + $0x18] sm:$0xff] }
  0x71   : > { %6650 = vmatmul.msk.f32.vlgmr.msra.gmra.mxu1 %vm535_vm0, %v505_v11  ;;  %6658 = vmatmul.msk.f32.vlgmr.msra.gmra.mxu2 %vm535_vm0, %v505_v11  ;;  %v510_v29 = vld [vmem:[%s10455_s4 + $0x8] sm:$0xff]  ;;  %v511_v30 = vld [vmem:[%s10455_s4 + $0x10] sm:$0xff]  ;;  %v6716_v32 = vld [vmem:[%s7522_s15 + $0x60] sm:$0xff] }
  0x72   : > { %6686 = vmatpush.xpose.msk.msrb.mxu2 %vm535_vm0, %v6685_v9  ;;  %6666 = vmatmul.msk.f32.vlgmr.msra.gmra.mxu3 %vm535_vm0, %v505_v11  ;;  %v6724_v33 = vld [vmem:[%s7522_s15 + $0x70] sm:$0xff]  ;;  %v6700_v34 = vld [vmem:[%s7522_s15 + $0x40] sm:$0xff]  ;;  %v508_v36 = vld [vmem:[%s10454_s3 + $0x18] sm:$0xff]  ;;  %s6491_s21 = scalar_lea.hbm %s10835_s29, %s6816_s16  ;;  %s7226_s7 = scalar_lea.hbm %s10835_s29, 128 }
  0x73   : > { %6694 = vmatpush.xpose.msk.msrb.mxu3 %vm535_vm0, %v6693_v10  ;;  %6670 = vmatpush.xpose.msk.msrb.mxu0 %vm535_vm0, %v742_v12  ;;  %v6708_v35 = vld [vmem:[%s7522_s15 + $0x50] sm:$0xff]  ;;  %v733_v37 = vld [vmem:[%s10456_s5] sm:$0xff]  ;;  %v6747_v38 = vld [vmem:[%s7528_s14 + $0x28] sm:$0xff]  ;;  %s10569_s15 = sld [smem:[#allocation107_spill]]  ;;  %s6494_s26 = sshll.u32 %s6491_s21, 4  ;;  %s6495_s26 = int_to_ptr.hbm [resolvable:$true] %s6494_s26 }
  0x74   : > { %6678 = vmatpush.xpose.msk.msrb.mxu1 %vm535_vm0, %v6677_v13  ;;  %517 = vperm.xlu1 %6891, %v509_v26   ;;  %v6755_v39 = vld [vmem:[%s7528_s14 + $0x38] sm:$0xff]  ;;  %v1156_v40 = vld [vmem:[%s7528_s14 + $0x8] sm:$0xff]  ;;  %v1153_v43 = vld [vmem:[%s10568_s27 + $0x10] sm:$0xff] }
  0x75   : > { %750 = vperm.xlu0 %6890, %v738_v27   ;;  %v6739_v41 = vld [vmem:[%s7528_s14 + $0x18] sm:$0xff]  ;;  %v734_v42 = vld [vmem:[%s10456_s5 + $0x8] sm:$0xff]  ;;  %v735_v45 = vld [vmem:[%s10456_s5 + $0x10] sm:$0xff] }
  0x76   : > { %6687 = vmatpush.xpose.msk.msrb.mxu2 %vm535_vm0, %v6684_v16  ;;  %v1152_v44 = vld [vmem:[%s10568_s27 + $0x8] sm:$0xff]  ;;  %v6746_v46 = vld [vmem:[%s7528_s14 + $0x20] sm:$0xff]  ;;  %v6754_v47 = vld [vmem:[%s7528_s14 + $0x30] sm:$0xff] }
  0x77   : > { %6695 = vmatpush.xpose.msk.msrb.mxu3 %vm535_vm0, %v6692_v17  ;;  %6671 = vmatpush.xpose.msk.msrb.mxu0 %vm535_vm0, %v741_v20  ;;  %v1155_v48 = vld [vmem:[%s7528_s14] sm:$0xff]  ;;  %v6738_v49 = vld [vmem:[%s7528_s14 + $0x10] sm:$0xff]  ;;  %v736_v50 = vld [vmem:[%s10456_s5 + $0x18] sm:$0xff] }
  0x78   : > { %6679 = vmatpush.xpose.msk.msrb.mxu1 %vm535_vm0, %v6676_v21  ;;  %6643 = vmatmul.msk.f32.gmra.mxu0 %vm535_vm0, %v506_v24  ;;  %v6779_v51 = vld [vmem:[%s7528_s14 + $0x68] sm:$0xff]  ;;  %v6787_v52 = vld [vmem:[%s7528_s14 + $0x78] sm:$0xff]  ;;  %v1151_v53 = vld [vmem:[%s10568_s27] sm:$0xff] }
  0x79   : > { %6651 = vmatmul.msk.f32.gmra.mxu1 %vm535_vm0, %v506_v24  ;;  %6659 = vmatmul.msk.f32.gmra.mxu2 %vm535_vm0, %v506_v24  ;;  %v6763_v54 = vld [vmem:[%s7528_s14 + $0x48] sm:$0xff]  ;;  %v6771_v55 = vld [vmem:[%s7528_s14 + $0x58] sm:$0xff]  ;;  %v6778_v57 = vld [vmem:[%s7528_s14 + $0x60] sm:$0xff] }
  0x7a   : > { %6718 = vmatpush.xpose.msk.msra.mxu2 %vm535_vm0, %v6717_v18  ;;  %6667 = vmatmul.msk.f32.gmra.mxu3 %vm535_vm0, %v506_v24  ;;  %v1154_v56 = vld [vmem:[%s10568_s27 + $0x18] sm:$0xff]  ;;  %v6786_v58 = vld [vmem:[%s7528_s14 + $0x70] sm:$0xff]  ;;  %v6762_v59 = vld [vmem:[%s7528_s14 + $0x40] sm:$0xff] }
  0x7b   : > { %6726 = vmatpush.xpose.msk.msra.mxu3 %vm535_vm0, %v6725_v19  ;;  %6702 = vmatpush.xpose.msk.msra.mxu0 %vm535_vm0, %v6701_v22  ;;  %v6770_v60 = vld [vmem:[%s7528_s14 + $0x50] sm:$0xff]  ;;  %v1147_v61 = vld [vmem:[%s10569_s15] sm:$0xff]  ;;  %v1148_v62 = vld [vmem:[%s10569_s15 + $0x8] sm:$0xff]  ;;  %s7220_s14 = sshra.s32 %s6495_s26, 4  ;;  %s7221_s14 = int_to_ptr.hbm [resolvable:$true] %s7220_s14 }
  0x7c   : > { %6710 = vmatpush.xpose.msk.msra.mxu1 %vm535_vm0, %v6709_v23  ;;  %522 = vperm.xlu2 %6892, %v510_v29   ;;  %v1149_v63 = vld [vmem:[%s10569_s15 + $0x10] sm:$0xff]  ;;  %v1150_v0 = vld [vmem:[%s10569_s15 + $0x18] sm:$0xff]  ;;  %s7222_s1 = scalar_lea.hbm %s7221_s14, 64  ;;  %p7227_p2 = scmp.lt.s32.totalorder %s7221_s14, %s10835_s29 }
  0x7d   : > { %527 = vperm.xlu0 %6890, %v511_v30   ;;  %532 = vperm.xlu1 %6891, %v512_v31   ;;  %p7223_p3 = scmp.ne.s32.totalorder %s7221_s14, %s7222_s1  ;;  %p7228_p5 = scmp.lt.s32.totalorder %s7226_s7, %s7222_s1 }
  0x7e   : > { %6719 = vmatpush.xpose.msk.msra.mxu2 %vm535_vm0, %v6716_v32 }
  0x7f   : > { %6727 = vmatpush.xpose.msk.msra.mxu3 %vm535_vm0, %v6724_v33  ;;  %6703 = vmatpush.xpose.msk.msra.mxu0 %vm535_vm0, %v6700_v34  ;;  %p7224_p9 = pnand %p7223_p3, %p7446_p11  ;;  %p7229_p7 = por %p7228_p5, %p7227_p2 }
  0x80   : > { %6644 = vmatmul.msk.f32.gmra.mxu0 %vm535_vm0, %v507_v28  ;;  %6711 = vmatpush.xpose.msk.msra.mxu1 %vm535_vm0, %v6708_v35 }
  0x81   : > { %6652 = vmatmul.msk.f32.gmra.mxu1 %vm535_vm0, %v507_v28  ;;  %6660 = vmatmul.msk.f32.gmra.mxu2 %vm535_vm0, %v507_v28  ;;  %p7225_p1 = pneg %p7224_p9 }
  0x82   : > { %6668 = vmatmul.msk.f32.gmra.mxu3 %vm535_vm0, %v507_v28 }
  0x83   : > { %p7230_p4 = pnand %p7229_p7, %p7225_p1 }
  0x84   : > { %1159 = vperm.xlu2 %6892, %v1151_v53  }
  0x85   : > { %1169 = vperm.xlu1 %6891, %v1153_v43   ;;  %1164 = vperm.xlu0 %6890, %v1152_v44  }
  0x88   : > { %6645 = vmatmul.msk.f32.gmra.mxu0 %vm535_vm0, %v508_v36 }
  0x89   : > { %6653 = vmatmul.msk.f32.gmra.mxu1 %vm535_vm0, %v508_v36  ;;  %6661 = vmatmul.msk.f32.gmra.mxu2 %vm535_vm0, %v508_v36 }
  0x8a   : > { %6669 = vmatmul.msk.f32.gmra.mxu3 %vm535_vm0, %v508_v36 }
  0x8c   : > { %1174 = vperm.xlu2 %6892, %v1154_v56  }
  0x90   : > { %6672 = vmatmul.msk.f32.vlgmr.msrb.gmra.mxu0 %vm535_vm0, %v733_v37 }
  0x91   : > { %6680 = vmatmul.msk.f32.vlgmr.msrb.gmra.mxu1 %vm535_vm0, %v733_v37  ;;  %6688 = vmatmul.msk.f32.vlgmr.msrb.gmra.mxu2 %vm535_vm0, %v733_v37 }
  0x92   : > { %6696 = vmatmul.msk.f32.vlgmr.msrb.gmra.mxu3 %vm535_vm0, %v733_v37  ;;  %6748 = vmatpush.xpose.msk.msrb.mxu2 %vm535_vm0, %v6747_v38 }
  0x93   : > { %6756 = vmatpush.xpose.msk.msrb.mxu3 %vm535_vm0, %v6755_v39  ;;  %6732 = vmatpush.xpose.msk.msrb.mxu0 %vm535_vm0, %v1156_v40 }
  0x94   : > { %6740 = vmatpush.xpose.msk.msrb.mxu1 %vm535_vm0, %v6739_v41 }
  0x96   : > { %6749 = vmatpush.xpose.msk.msrb.mxu2 %vm535_vm0, %v6746_v46 }
  0x97   : > { %6757 = vmatpush.xpose.msk.msrb.mxu3 %vm535_vm0, %v6754_v47  ;;  %6733 = vmatpush.xpose.msk.msrb.mxu0 %vm535_vm0, %v1155_v48 }
  0x98   : > { %6673 = vmatmul.msk.f32.gmra.mxu0 %vm535_vm0, %v734_v42  ;;  %6741 = vmatpush.xpose.msk.msrb.mxu1 %vm535_vm0, %v6738_v49 }
  0x99   : > { %6681 = vmatmul.msk.f32.gmra.mxu1 %vm535_vm0, %v734_v42  ;;  %6689 = vmatmul.msk.f32.gmra.mxu2 %vm535_vm0, %v734_v42 }
  0x9a   : > { %6697 = vmatmul.msk.f32.gmra.mxu3 %vm535_vm0, %v734_v42 }
  0xa0   : > { %6674 = vmatmul.msk.f32.gmra.mxu0 %vm535_vm0, %v735_v45 }
  0xa1   : > { %6682 = vmatmul.msk.f32.gmra.mxu1 %vm535_vm0, %v735_v45  ;;  %6690 = vmatmul.msk.f32.gmra.mxu2 %vm535_vm0, %v735_v45 }
  0xa2   : > { %6698 = vmatmul.msk.f32.gmra.mxu3 %vm535_vm0, %v735_v45 }
  0xa8   : > { %6675 = vmatmul.msk.f32.gmra.mxu0 %vm535_vm0, %v736_v50 }
  0xa9   : > { %6683 = vmatmul.msk.f32.gmra.mxu1 %vm535_vm0, %v736_v50  ;;  %6691 = vmatmul.msk.f32.gmra.mxu2 %vm535_vm0, %v736_v50 }
  0xaa   : > { %6699 = vmatmul.msk.f32.gmra.mxu3 %vm535_vm0, %v736_v50 }
  0xb0   : > { %6704 = vmatmul.msk.f32.vlgmr.msra.gmra.mxu0 %vm535_vm0, %v733_v37 }
  0xb1   : > { %6712 = vmatmul.msk.f32.vlgmr.msra.gmra.mxu1 %vm535_vm0, %v733_v37  ;;  %6720 = vmatmul.msk.f32.vlgmr.msra.gmra.mxu2 %vm535_vm0, %v733_v37 }
  0xb2   : > { %6728 = vmatmul.msk.f32.vlgmr.msra.gmra.mxu3 %vm535_vm0, %v733_v37  ;;  %6780 = vmatpush.xpose.msk.msra.mxu2 %vm535_vm0, %v6779_v51 }
  0xb3   : > { %6788 = vmatpush.xpose.msk.msra.mxu3 %vm535_vm0, %v6787_v52  ;;  %6764 = vmatpush.xpose.msk.msra.mxu0 %vm535_vm0, %v6763_v54 }
  0xb4   : > { %6772 = vmatpush.xpose.msk.msra.mxu1 %vm535_vm0, %v6771_v55 }
  0xb6   : > { %6781 = vmatpush.xpose.msk.msra.mxu2 %vm535_vm0, %v6778_v57 }
  0xb7   : > { %6789 = vmatpush.xpose.msk.msra.mxu3 %vm535_vm0, %v6786_v58  ;;  %6765 = vmatpush.xpose.msk.msra.mxu0 %vm535_vm0, %v6762_v59 }
  0xb8   : > { %6705 = vmatmul.msk.f32.gmra.mxu0 %vm535_vm0, %v734_v42  ;;  %6773 = vmatpush.xpose.msk.msra.mxu1 %vm535_vm0, %v6770_v60 }
  0xb9   : > { %6713 = vmatmul.msk.f32.gmra.mxu1 %vm535_vm0, %v734_v42  ;;  %6721 = vmatmul.msk.f32.gmra.mxu2 %vm535_vm0, %v734_v42 }
  0xba   : > { %6729 = vmatmul.msk.f32.gmra.mxu3 %vm535_vm0, %v734_v42 }
  0xc0   : > { %6706 = vmatmul.msk.f32.gmra.mxu0 %vm535_vm0, %v735_v45 }
  0xc1   : > { %6714 = vmatmul.msk.f32.gmra.mxu1 %vm535_vm0, %v735_v45  ;;  %6722 = vmatmul.msk.f32.gmra.mxu2 %vm535_vm0, %v735_v45 }
  0xc2   : > { %6730 = vmatmul.msk.f32.gmra.mxu3 %vm535_vm0, %v735_v45 }
  0xc8   : > { %6707 = vmatmul.msk.f32.gmra.mxu0 %vm535_vm0, %v736_v50 }
  0xc9   : > { %6715 = vmatmul.msk.f32.gmra.mxu1 %vm535_vm0, %v736_v50  ;;  %6723 = vmatmul.msk.f32.gmra.mxu2 %vm535_vm0, %v736_v50 }
  0xca   : > { %6731 = vmatmul.msk.f32.gmra.mxu3 %vm535_vm0, %v736_v50  ;;  %v7752_v12 = vpop.permute.xlu2 %760 }
  0xcb   : > { %10570 = vst [vmem:[#allocation25_spill] sm:$0xff] %v7752_v12 }
  0xd0   : > { %6734 = vmatmul.msk.f32.vlgmr.msrb.gmra.mxu0 %vm535_vm0, %v1147_v61 }
  0xd1   : > { %6742 = vmatmul.msk.f32.vlgmr.msrb.gmra.mxu1 %vm535_vm0, %v1147_v61  ;;  %6750 = vmatmul.msk.f32.vlgmr.msrb.gmra.mxu2 %vm535_vm0, %v1147_v61 }
  0xd2   : > { %6758 = vmatmul.msk.f32.vlgmr.msrb.gmra.mxu3 %vm535_vm0, %v1147_v61 }
  0xd6   : > { %v523_v18 = vpop.permute.xlu2 %522 }
  0xd8   : > { %6735 = vmatmul.msk.f32.gmra.mxu0 %vm535_vm0, %v1148_v62 }
  0xd9   : > { %6743 = vmatmul.msk.f32.gmra.mxu1 %vm535_vm0, %v1148_v62  ;;  %6751 = vmatmul.msk.f32.gmra.mxu2 %vm535_vm0, %v1148_v62 }
  0xda   : > { %6759 = vmatmul.msk.f32.gmra.mxu3 %vm535_vm0, %v1148_v62 }
  0xde   : > { %v7738_v1 = vpop.permute.xlu1 %755 }
  0xdf   : > { %v7746_v7 = vpop.permute.xlu0 %745 }
  0xe0   : > { %6736 = vmatmul.msk.f32.gmra.mxu0 %vm535_vm0, %v1149_v63 }
  0xe1   : > { %6744 = vmatmul.msk.f32.gmra.mxu1 %vm535_vm0, %v1149_v63  ;;  %6752 = vmatmul.msk.f32.gmra.mxu2 %vm535_vm0, %v1149_v63 }
  0xe2   : > { %6760 = vmatmul.msk.f32.gmra.mxu3 %vm535_vm0, %v1149_v63 }
  0xe6   : > { %v518_v4 = vpop.permute.xlu1 %517 }
  0xe7   : > { %v7759_v15 = vpop.permute.xlu0 %750 }
  0xe8   : > { %6737 = vmatmul.msk.f32.gmra.mxu0 %vm535_vm0, %v1150_v0 }
  0xe9   : > { %6745 = vmatmul.msk.f32.gmra.mxu1 %vm535_vm0, %v1150_v0  ;;  %6753 = vmatmul.msk.f32.gmra.mxu2 %vm535_vm0, %v1150_v0 }
  0xea   : > { %6761 = vmatmul.msk.f32.gmra.mxu3 %vm535_vm0, %v1150_v0 }
  0xed   : > { %v571_v2 = vpop.f32.mrf.mxu0 }
  0xee   : > { %v618_v3 = vpop.f32.mrf.mxu1  ;;  %v572_v5 = vadd.f32 %v571_v2, %v518_v4 }
  0xef   : > { %v619_v6 = vadd.f32 %v618_v3, %v518_v4  ;;  %v528_v24 = vpop.permute.xlu0 %527  ;;  %v533_v41 = vpop.permute.xlu1 %532 }
  0xf0   : > { %6766 = vmatmul.msk.f32.vlgmr.msra.gmra.mxu0 %vm535_vm0, %v1147_v61  ;;  %v583_v8 = vmax.f32 %v572_v5, 0.0 }
  0xf1   : > { %6774 = vmatmul.msk.f32.vlgmr.msra.gmra.mxu1 %vm535_vm0, %v1147_v61  ;;  %6782 = vmatmul.msk.f32.vlgmr.msra.gmra.mxu2 %vm535_vm0, %v1147_v61  ;;  %v630_v9 = vmax.f32 %v619_v6, 0.0 }
  0xf2   : > { %6790 = vmatmul.msk.f32.vlgmr.msra.gmra.mxu3 %vm535_vm0, %v1147_v61  ;;  %588 = vst.msk [vmem:[#allocation2] sm:$0xff] %vm587_vm1, %v583_v8 }
  0xf3   : > { %635 = vst.msk [vmem:[#allocation2 + $0x20] sm:$0xff] %vm587_vm1, %v630_v9 }
  0xf4   : > { %v665_v10 = vpop.f32.mrf.mxu2 }
  0xf5   : > { %v666_v11 = vadd.f32 %v665_v10, %v518_v4  ;;  %v712_v14 = vpop.f32.mrf.mxu3  ;;  %v574_v16 = vpop.f32.mrf.mxu0 }
  0xf6   : > { %v621_v17 = vpop.f32.mrf.mxu1  ;;  %v713_v19 = vadd.f32 %v712_v14, %v518_v4  ;;  %v575_v20 = vadd.f32 %v574_v16, %v523_v18 }
  0xf7   : > { %v677_v13 = vmax.f32 %v666_v11, 0.0  ;;  %v622_v23 = vadd.f32 %v621_v17, %v523_v18 }
  0xf8   : > { %6767 = vmatmul.msk.f32.gmra.mxu0 %vm535_vm0, %v1148_v62  ;;  %v724_v25 = vmax.f32 %v713_v19, 0.0  ;;  %v584_v29 = vmax.f32 %v575_v20, 0.0 }
  0xf9   : > { %6775 = vmatmul.msk.f32.gmra.mxu1 %vm535_vm0, %v1148_v62  ;;  %682 = vst.msk [vmem:[#allocation2 + $0x40] sm:$0xff] %vm587_vm1, %v677_v13  ;;  %6783 = vmatmul.msk.f32.gmra.mxu2 %vm535_vm0, %v1148_v62  ;;  %v631_v32 = vmax.f32 %v622_v23, 0.0 }
  0xfa   : > { %6791 = vmatmul.msk.f32.gmra.mxu3 %vm535_vm0, %v1148_v62  ;;  %729 = vst.msk [vmem:[#allocation2 + $0x60] sm:$0xff] %vm587_vm1, %v724_v25 }
  0xfb   : > { %589 = vst.msk [vmem:[#allocation2 + $0x8] sm:$0xff] %vm587_vm1, %v584_v29 }
  0xfc   : > { %v668_v21 = vpop.f32.mrf.mxu2  ;;  %636 = vst.msk [vmem:[#allocation2 + $0x28] sm:$0xff] %vm587_vm1, %v631_v32 }
  0xfd   : > { %v715_v22 = vpop.f32.mrf.mxu3  ;;  %v669_v26 = vadd.f32 %v668_v21, %v523_v18  ;;  %v577_v28 = vpop.f32.mrf.mxu0 }
  0xfe   : > { %v716_v27 = vadd.f32 %v715_v22, %v523_v18  ;;  %v624_v30 = vpop.f32.mrf.mxu1  ;;  %v578_v31 = vadd.f32 %v577_v28, %v528_v24 }
  0xff   : > { %v625_v33 = vadd.f32 %v624_v30, %v528_v24  ;;  %v678_v34 = vmax.f32 %v669_v26, 0.0 }
 0x100   : > { %6768 = vmatmul.msk.f32.gmra.mxu0 %vm535_vm0, %v1149_v63  ;;  %v725_v35 = vmax.f32 %v716_v27, 0.0  ;;  %v585_v36 = vmax.f32 %v578_v31, 0.0 }
 0x101   : > { %6776 = vmatmul.msk.f32.gmra.mxu1 %vm535_vm0, %v1149_v63  ;;  %6784 = vmatmul.msk.f32.gmra.mxu2 %vm535_vm0, %v1149_v63  ;;  %v632_v37 = vmax.f32 %v625_v33, 0.0  ;;  %683 = vst.msk [vmem:[#allocation2 + $0x48] sm:$0xff] %vm587_vm1, %v678_v34 }
 0x102   : > { %6792 = vmatmul.msk.f32.gmra.mxu3 %vm535_vm0, %v1149_v63  ;;  %730 = vst.msk [vmem:[#allocation2 + $0x68] sm:$0xff] %vm587_vm1, %v725_v35 }
 0x103   : > { %590 = vst.msk [vmem:[#allocation2 + $0x10] sm:$0xff] %vm587_vm1, %v585_v36 }
 0x104   : > { %637 = vst.msk [vmem:[#allocation2 + $0x30] sm:$0xff] %vm587_vm1, %v632_v37  ;;  %v671_v38 = vpop.f32.mrf.mxu2 }
 0x105   : > { %v718_v39 = vpop.f32.mrf.mxu3  ;;  %v672_v40 = vadd.f32 %v671_v38, %v528_v24  ;;  %v580_v42 = vpop.f32.mrf.mxu0 }
 0x106   : > { %v627_v44 = vpop.f32.mrf.mxu1  ;;  %v719_v47 = vadd.f32 %v718_v39, %v528_v24  ;;  %v581_v48 = vadd.f32 %v580_v42, %v533_v41 }
 0x107   : > { %v679_v46 = vmax.f32 %v672_v40, 0.0  ;;  %v628_v49 = vadd.f32 %v627_v44, %v533_v41 }
 0x108   : > { %6769 = vmatmul.msk.f32.gmra.mxu0 %vm535_vm0, %v1150_v0  ;;  %v726_v52 = vmax.f32 %v719_v47, 0.0  ;;  %v586_v53 = vmax.f32 %v581_v48, 0.0 }
 0x109   : > { %6777 = vmatmul.msk.f32.gmra.mxu1 %vm535_vm0, %v1150_v0  ;;  %6785 = vmatmul.msk.f32.gmra.mxu2 %vm535_vm0, %v1150_v0  ;;  %684 = vst.msk [vmem:[#allocation2 + $0x50] sm:$0xff] %vm587_vm1, %v679_v46  ;;  %v633_v54 = vmax.f32 %v628_v49, 0.0 }
 0x10a   : > { %6793 = vmatmul.msk.f32.gmra.mxu3 %vm535_vm0, %v1150_v0  ;;  %731 = vst.msk [vmem:[#allocation2 + $0x70] sm:$0xff] %vm587_vm1, %v726_v52 }
 0x10b   : > { %591 = vst.msk [vmem:[#allocation2 + $0x18] sm:$0xff] %vm587_vm1, %v586_v53 }
 0x10c   : > { %v674_v43 = vpop.f32.mrf.mxu2  ;;  %638 = vst.msk [vmem:[#allocation2 + $0x38] sm:$0xff] %vm587_vm1, %v633_v54 }
 0x10d   : > { %v721_v45 = vpop.f32.mrf.mxu3  ;;  %v675_v50 = vadd.f32 %v674_v43, %v533_v41  ;;  %v798_v58 = vpop.f32.mrf.mxu0 }
 0x10e   : > { %v722_v51 = vadd.f32 %v721_v45, %v533_v41  ;;  %v844_v59 = vpop.f32.mrf.mxu1  ;;  %v799_v61 = vadd.f32 %v798_v58, %v7746_v7 }
 0x10f   : > { %v680_v55 = vmax.f32 %v675_v50, 0.0  ;;  %v845_v62 = vadd.f32 %v844_v59, %v7746_v7 }
 0x110   : > { %v727_v56 = vmax.f32 %v722_v51, 0.0  ;;  %v810_v0 = vmax.f32 %v799_v61, 0.0 }
 0x111   : > { %685 = vst.msk [vmem:[#allocation2 + $0x58] sm:$0xff] %vm587_vm1, %v680_v55  ;;  %v856_v6 = vmax.f32 %v845_v62, 0.0 }
 0x112   : > { %732 = vst.msk [vmem:[#allocation2 + $0x78] sm:$0xff] %vm587_vm1, %v727_v56 }
 0x113   : > { %814 = vst.msk [vmem:[#allocation3] sm:$0xff] %vm587_vm1, %v810_v0 }
 0x114   : > { %v891_v57 = vpop.f32.mrf.mxu2  ;;  %861 = vst.msk [vmem:[#allocation3 + $0x20] sm:$0xff] %vm587_vm1, %v856_v6 }
 0x115   : > { %v938_v60 = vpop.f32.mrf.mxu3  ;;  %v892_v2 = vadd.f32 %v891_v57, %v7746_v7  ;;  %v801_v4 = vpop.f32.mrf.mxu0 }
 0x116   : > { %v939_v3 = vadd.f32 %v938_v60, %v7746_v7  ;;  %v847_v5 = vpop.f32.mrf.mxu1  ;;  %v802_v8 = vadd.f32 %v801_v4, %v7759_v15 }
 0x117   : > { %v848_v9 = vadd.f32 %v847_v5, %v7759_v15  ;;  %v903_v13 = vmax.f32 %v892_v2, 0.0 }
 0x118   : > { %v950_v14 = vmax.f32 %v939_v3, 0.0  ;;  %v811_v16 = vmax.f32 %v802_v8, 0.0 }
 0x119   : > { %v857_v17 = vmax.f32 %v848_v9, 0.0  ;;  %908 = vst.msk [vmem:[#allocation3 + $0x40] sm:$0xff] %vm587_vm1, %v903_v13 }
 0x11a   : > { %955 = vst.msk [vmem:[#allocation3 + $0x60] sm:$0xff] %vm587_vm1, %v950_v14  ;;  %v1565_v14 = vld [vmem:[#allocation3] sm:$0x1] }
 0x11b   : > { %815 = vst.msk [vmem:[#allocation3 + $0x8] sm:$0xff] %vm587_vm1, %v811_v16  ;;  %v1566_v48 = vld [vmem:[#allocation3 + $0x20] sm:$0x1]  ;;  %v1616_v49 = vld [vmem:[#allocation3 + $0x21] sm:$0x1] }
 0x11c   : > { %v894_v63 = vpop.f32.mrf.mxu2  ;;  %862 = vst.msk [vmem:[#allocation3 + $0x28] sm:$0xff] %vm587_vm1, %v857_v17  ;;  %v7814_v50 = vld [vmem:[#allocation3 + $0x22] sm:$0x1]  ;;  %v7816_v51 = vld [vmem:[#allocation3 + $0x23] sm:$0x1]  ;;  %v1585_v55 = vrot.slane %v1566_v48, 7 }
 0x11d   : > { %v895_v10 = vadd.f32 %v894_v63, %v7759_v15  ;;  %v941_v11 = vpop.f32.mrf.mxu3  ;;  %v804_v21 = vpop.f32.mrf.mxu0  ;;  %v7819_v53 = vld [vmem:[#allocation3 + $0x24] sm:$0x1]  ;;  %v7821_v54 = vld [vmem:[#allocation3 + $0x25] sm:$0x1]  ;;  %v1635_v56 = vrot.slane %v1616_v49, 7  ;;  %v1682_v57 = vrot.slane %v7814_v50, 7 }
 0x11e   : > { %v942_v19 = vadd.f32 %v941_v11, %v7759_v15  ;;  %v805_v22 = vadd.f32 %v804_v21, %v7738_v1  ;;  %v850_v23 = vpop.f32.mrf.mxu1  ;;  %v1729_v58 = vrot.slane %v7816_v51, 7  ;;  %v1776_v60 = vrot.slane %v7819_v53, 7  ;;  %v7829_v62 = vld [vmem:[#allocation3 + $0x26] sm:$0x1]  ;;  %v7831_v63 = vld [vmem:[#allocation3 + $0x27] sm:$0x1] }
 0x11f   : > { %v904_v18 = vmax.f32 %v895_v10, 0.0  ;;  %v851_v24 = vadd.f32 %v850_v23, %v7738_v1  ;;  %v1823_v61 = vrot.slane %v7821_v54, 7  ;;  %v1870_v9 = vrot.slane %v7829_v62, 7 }
 0x120   : > { %v951_v20 = vmax.f32 %v942_v19, 0.0  ;;  %v812_v25 = vmax.f32 %v805_v22, 0.0  ;;  %v7833_v0 = vld [vmem:[#allocation3 + $0x40] sm:$0x1]  ;;  %v7835_v2 = vld [vmem:[#allocation3 + $0x41] sm:$0x1] }
 0x121   : > { %909 = vst.msk [vmem:[#allocation3 + $0x48] sm:$0xff] %vm587_vm1, %v904_v18  ;;  %v858_v26 = vmax.f32 %v851_v24, 0.0  ;;  %v7837_v3 = vld [vmem:[#allocation3 + $0x42] sm:$0x1]  ;;  %v7839_v4 = vld [vmem:[#allocation3 + $0x43] sm:$0x1] }
 0x122   : > { %956 = vst.msk [vmem:[#allocation3 + $0x68] sm:$0xff] %vm587_vm1, %v951_v20  ;;  %v7841_v5 = vld [vmem:[#allocation3 + $0x44] sm:$0x1]  ;;  %v7843_v6 = vld [vmem:[#allocation3 + $0x45] sm:$0x1]  ;;  %v1917_v16 = vrot.slane %v7831_v63, 7 }
 0x123   : > { %816 = vst.msk [vmem:[#allocation3 + $0x10] sm:$0xff] %vm587_vm1, %v812_v25  ;;  %v7846_v10 = vld [vmem:[#allocation3 + $0x46] sm:$0x1]  ;;  %v7848_v11 = vld [vmem:[#allocation3 + $0x47] sm:$0x1]  ;;  %v1588_v17 = vrot.slane %v7833_v0, 6 }
 0x124   : > { %863 = vst.msk [vmem:[#allocation3 + $0x30] sm:$0xff] %vm587_vm1, %v858_v26  ;;  %v897_v27 = vpop.f32.mrf.mxu2  ;;  %v1637_v18 = vrot.slane %v7835_v2, 6  ;;  %v1684_v19 = vrot.slane %v7837_v3, 6  ;;  %v1615_v20 = vld [vmem:[#allocation3 + $0x1] sm:$0x1]  ;;  %v1731_v21 = vrot.slane %v7839_v4, 6 }
 0x125   : > { %v898_v28 = vadd.f32 %v897_v27, %v7738_v1  ;;  %v944_v30 = vpop.f32.mrf.mxu3  ;;  %v807_v32 = vpop.f32.mrf.mxu0  ;;  %v1778_v22 = vrot.slane %v7841_v5, 6  ;;  %v1825_v23 = vrot.slane %v7843_v6, 6  ;;  %v1872_v25 = vrot.slane %v7846_v10, 6  ;;  %v7861_v27 = vld [vmem:[#allocation3 + $0x60] sm:$0x1] }
 0x126   : > { %v945_v31 = vadd.f32 %v944_v30, %v7738_v1  ;;  %v808_v34 = vadd.f32 %v807_v32, %v7752_v12  ;;  %v853_v37 = vpop.f32.mrf.mxu1  ;;  %v1919_v26 = vrot.slane %v7848_v11, 6  ;;  %v1709_v30 = vld [vmem:[#allocation3 + $0x3] sm:$0x1]  ;;  %v7901_v5 = vld [vmem:[#allocation3 + $0x2a] sm:$0x1] }
 0x127   : > { %v905_v29 = vmax.f32 %v898_v28, 0.0  ;;  %v854_v38 = vadd.f32 %v853_v37, %v7752_v12  ;;  %v7863_v28 = vld [vmem:[#allocation3 + $0x61] sm:$0x1]  ;;  %v7867_v32 = vld [vmem:[#allocation3 + $0x63] sm:$0x1]  ;;  %v1730_v2 = vsel %vm1586_vm2, %v1729_v58, %v1709_v30 }
 0x128   : > { %v952_v33 = vmax.f32 %v945_v31, 0.0  ;;  %v813_v36 = vmax.f32 %v808_v34, 0.0  ;;  %v7865_v31 = vld [vmem:[#allocation3 + $0x62] sm:$0x1]  ;;  %v1756_v34 = vld [vmem:[#allocation3 + $0x4] sm:$0x1] }
 0x129   : > { %910 = vst.msk [vmem:[#allocation3 + $0x50] sm:$0xff] %vm587_vm1, %v905_v29  ;;  %v859_v40 = vmax.f32 %v854_v38, 0.0  ;;  %v1662_v29 = vld [vmem:[#allocation3 + $0x2] sm:$0x1]  ;;  %v7873_v37 = vld [vmem:[#allocation3 + $0x66] sm:$0x1] }
 0x12a   : > { %957 = vst.msk [vmem:[#allocation3 + $0x70] sm:$0xff] %vm587_vm1, %v952_v33  ;;  %v7869_v33 = vld [vmem:[#allocation3 + $0x64] sm:$0x1]  ;;  %v7875_v38 = vld [vmem:[#allocation3 + $0x67] sm:$0x1]  ;;  %v1686_v48 = vrot.slane %v7865_v31, 5  ;;  %v1683_v0 = vsel %vm1586_vm2, %v1682_v57, %v1662_v29 }
 0x12b   : > { %817 = vst.msk [vmem:[#allocation3 + $0x18] sm:$0xff] %vm587_vm1, %v813_v36  ;;  %v7871_v36 = vld [vmem:[#allocation3 + $0x65] sm:$0x1]  ;;  %v1733_v49 = vrot.slane %v7867_v32, 5  ;;  %v7903_v6 = vld [vmem:[#allocation3 + $0x2b] sm:$0x1]  ;;  %v1685_v53 = vsel %vm1589_vm3, %v1684_v19, %v1683_v0 }
 0x12c   : > { %v900_v35 = vpop.f32.mrf.mxu2  ;;  %864 = vst.msk [vmem:[#allocation3 + $0x38] sm:$0xff] %vm587_vm1, %v859_v40  ;;  %v1587_v40 = vsel %vm1586_vm2, %v1585_v55, %v1565_v14  ;;  %v1827_v55 = vrot.slane %v7871_v36, 5  ;;  %v7913_v58 = vld [vmem:[#allocation3 + $0x2c] sm:$0x1]  ;;  %v7915_v10 = vld [vmem:[#allocation3 + $0x2d] sm:$0x1]  ;;  %v7962_v63 = vsel %vm1592_vm4, %v1686_v48, %v1685_v53 }
 0x12d   : > { %v901_v39 = vadd.f32 %v900_v35, %v7752_v12  ;;  %v947_v42 = vpop.f32.mrf.mxu3  ;;  %v985_v43 = vpop.f32.mrf.mxu0  ;;  %v1803_v35 = vld [vmem:[#allocation3 + $0x5] sm:$0x1]  ;;  %v1590_v57 = vsel %vm1589_vm3, %v1588_v17, %v1587_v40  ;;  %v7934_v19 = vld [vmem:[#allocation3 + $0x4b] sm:$0x1]  ;;  %v2608_v29 = vld [vmem:[#allocation3 + $0x8] sm:$0x1] }
 0x12e   : > { %v948_v44 = vadd.f32 %v947_v42, %v7752_v12  ;;  %v986_v45 = vadd.f32 %v985_v43, %v7746_v7  ;;  %v1032_v52 = vpop.f32.mrf.mxu1  ;;  %v1591_v42 = vrot.slane %v7861_v27, 5  ;;  %v7880_v43 = vld [vmem:[#allocation3 + $0x28] sm:$0x1]  ;;  %v1824_v50 = vsel %vm1586_vm2, %v1823_v61, %v1803_v35  ;;  %v2794_v40 = vld [vmem:[#allocation3 + $0x4c] sm:$0x1] }
 0x12f   : > { %v906_v41 = vmax.f32 %v901_v39, 0.0  ;;  %v1033_v59 = vadd.f32 %v1032_v52, %v7746_v7  ;;  %v1780_v52 = vrot.slane %v7869_v33, 5  ;;  %v2628_v3 = vrot.slane %v7880_v43, 7  ;;  %v7925_v61 = vld [vmem:[#allocation3 + $0x48] sm:$0x1] }
 0x130   : > { %v953_v46 = vmax.f32 %v948_v44, 0.0  ;;  %v997_v47 = vmax.f32 %v986_v45, 0.0  ;;  %v7882_v44 = vld [vmem:[#allocation3 + $0x29] sm:$0x1]  ;;  %v2812_v30 = vrot.slane %v7913_v58, 7  ;;  %v2859_v31 = vrot.slane %v7915_v10, 7 }
 0x131   : > { %911 = vst.msk [vmem:[#allocation3 + $0x58] sm:$0xff] %vm587_vm1, %v906_v41  ;;  %v1044_v13 = vmax.f32 %v1033_v59, 0.0  ;;  %v1636_v41 = vsel %vm1586_vm2, %v1635_v56, %v1615_v20  ;;  %v1874_v56 = vrot.slane %v7873_v37, 5  ;;  %v1921_v59 = vrot.slane %v7875_v38, 5  ;;  %v7923_v20 = vld [vmem:[#allocation3 + $0x2f] sm:$0x1] }
 0x132   : > { %958 = vst.msk [vmem:[#allocation3 + $0x78] sm:$0xff] %vm587_vm1, %v953_v46  ;;  %v1850_v46 = vld [vmem:[#allocation3 + $0x6] sm:$0x1]  ;;  %v2671_v4 = vrot.slane %v7882_v44, 7  ;;  %v1638_v14 = vsel %vm1589_vm3, %v1637_v18, %v1636_v41  ;;  %v7932_v18 = vld [vmem:[#allocation3 + $0x4a] sm:$0x1] }
 0x133   : > { %1002 = vst.msk [vmem:[#allocation3 + $0x80] sm:$0xff] %vm587_vm1, %v997_v47  ;;  %v1639_v47 = vrot.slane %v7863_v28, 5  ;;  %v1871_v51 = vsel %vm1586_vm2, %v1870_v9, %v1850_v46  ;;  %v7927_v9 = vld [vmem:[#allocation3 + $0x49] sm:$0x1]  ;;  %v2718_v28 = vrot.slane %v7901_v5, 7  ;;  %v2720_v37 = vrot.slane %v7932_v18, 6 }
 0x134   : > { %v1079_v8 = vpop.f32.mrf.mxu2  ;;  %1049 = vst.msk [vmem:[#allocation3 + $0xa0] sm:$0xff] %vm587_vm1, %v1044_v13  ;;  %v7917_v13 = vld [vmem:[#allocation3 + $0x2e] sm:$0x1]  ;;  %v1873_v27 = vsel %vm1589_vm3, %v1872_v25, %v1871_v51  ;;  %v2651_v33 = vld [vmem:[#allocation3 + $0x9] sm:$0x1]  ;;  %v2630_v25 = vrot.slane %v7925_v61, 6  ;;  %v7956_v46 = vsel %vm1592_vm4, %v1591_v42, %v1590_v57 }
 0x135   : > { %v1080_v24 = vadd.f32 %v1079_v8, %v7746_v7  ;;  %v1126_v39 = vpop.f32.mrf.mxu3  ;;  %v1897_v8 = vld [vmem:[#allocation3 + $0x7] sm:$0x1]  ;;  %v988_v17 = vpop.f32.mrf.mxu0  ;;  %v2906_v32 = vrot.slane %v7917_v13, 7  ;;  %v2841_v41 = vld [vmem:[#allocation3 + $0x4d] sm:$0x1] }
 0x136   : > { %v1127_v62 = vadd.f32 %v1126_v39, %v7746_v7  ;;  %v1777_v7 = vsel %vm1586_vm2, %v1776_v60, %v1756_v34  ;;  %v1732_v60 = vsel %vm1589_vm3, %v1731_v21, %v1730_v2  ;;  %v2673_v34 = vrot.slane %v7927_v9, 6  ;;  %v2745_v0 = vld [vmem:[#allocation3 + $0xb] sm:$0x1]  ;;  %v2888_v2 = vld [vmem:[#allocation3 + $0x4e] sm:$0x1] }
 0x137   : > { %v1091_v45 = vmax.f32 %v1080_v24, 0.0  ;;  %v1779_v54 = vsel %vm1589_vm3, %v1778_v22, %v1777_v7  ;;  %v1826_v24 = vsel %vm1589_vm3, %v1825_v23, %v1824_v50  ;;  %v2765_v22 = vrot.slane %v7903_v6, 7  ;;  %v2935_v5 = vld [vmem:[#allocation3 + $0x4f] sm:$0x1]  ;;  %v7964_v6 = vld [vmem:[#allocation3 + $0x68] sm:$0x1] }
 0x138   : > { %v1138_v21 = vmax.f32 %v1127_v62, 0.0  ;;  %v2953_v23 = vrot.slane %v7923_v20, 7  ;;  %v989_v35 = vadd.f32 %v988_v17, %v7759_v15  ;;  %v1918_v36 = vsel %vm1586_vm2, %v1917_v16, %v1897_v8  ;;  %v2698_v16 = vld [vmem:[#allocation3 + $0xa] sm:$0x1]  ;;  %v2792_v48 = vld [vmem:[#allocation3 + $0xc] sm:$0x1] }
 0x139   : > { %1096 = vst.msk [vmem:[#allocation3 + $0xc0] sm:$0xff] %vm587_vm1, %v1091_v45  ;;  %v2767_v39 = vrot.slane %v7934_v19, 6  ;;  %v7953_v45 = vsel %vm1589_vm3, %v1919_v26, %v1918_v36  ;;  %v7959_v62 = vsel %vm1592_vm4, %v1639_v47, %v1638_v14  ;;  %v7967_v11 = vsel %vm1592_vm4, %v1733_v49, %v1732_v60  ;;  %v2839_v8 = vld [vmem:[#allocation3 + $0xd] sm:$0x1]  ;;  %v2886_v7 = vld [vmem:[#allocation3 + $0xe] sm:$0x1]  ;;  %v1035_v49 = vpop.f32.mrf.mxu1 }
 0x13a   : > { %1143 = vst.msk [vmem:[#allocation3 + $0xe0] sm:$0xff] %vm587_vm1, %v1138_v21  ;;  %v7970_v26 = vsel %vm1592_vm4, %v1780_v52, %v1779_v54  ;;  %v7973_v42 = vsel %vm1592_vm4, %v1827_v55, %v1826_v24  ;;  %v7976_v47 = vsel %vm1592_vm4, %v1874_v56, %v1873_v27  ;;  %v7978_v50 = vld [vmem:[#allocation3 + $0x69] sm:$0x1]  ;;  %v7980_v51 = vld [vmem:[#allocation3 + $0x6a] sm:$0x1]  ;;  %v2629_v52 = vsel %vm1586_vm2, %v2628_v3, %v2608_v29 }
 0x13b   : > { %v7982_v57 = vld [vmem:[#allocation3 + $0x6b] sm:$0x1]  ;;  %v2672_v55 = vsel %vm1586_vm2, %v2671_v4, %v2651_v33  ;;  %v2814_v56 = vrot.slane %v2794_v40, 6  ;;  %v7990_v58 = vld [vmem:[#allocation3 + $0x6c] sm:$0x1]  ;;  %v998_v13 = vmax.f32 %v989_v35, 0.0  ;;  %v1036_v4 = vadd.f32 %v1035_v49, %v7759_v15 }
 0x13c   : > { %v7992_v10 = vld [vmem:[#allocation3 + $0x6d] sm:$0x1]  ;;  %v2933_v14 = vld [vmem:[#allocation3 + $0xf] sm:$0x1]  ;;  %v2861_v53 = vrot.slane %v2841_v41, 6  ;;  %v2908_v60 = vrot.slane %v2888_v2, 6  ;;  %v2719_v9 = vsel %vm1586_vm2, %v2718_v28, %v2698_v16  ;;  %v2766_v17 = vsel %vm1586_vm2, %v2765_v22, %v2745_v0 }
 0x13d   : > { %v2955_v54 = vrot.slane %v2935_v5, 6  ;;  %v2632_v20 = vrot.slane %v7964_v6, 5  ;;  %v2675_v43 = vrot.slane %v7978_v50, 5  ;;  %v2722_v3 = vrot.slane %v7980_v51, 5  ;;  %v2889_v61 = vld [vmem:[#allocation3 + $0x6e] sm:$0x1] }
 0x13e   : > { %v2769_v44 = vrot.slane %v7982_v57, 5  ;;  %1003 = vst.msk [vmem:[#allocation3 + $0x88] sm:$0xff] %vm587_vm1, %v998_v13  ;;  %v2816_v24 = vrot.slane %v7990_v58, 5  ;;  %v2863_v27 = vrot.slane %v7992_v10, 5  ;;  %v2936_v18 = vld [vmem:[#allocation3 + $0x6f] sm:$0x1]  ;;  %v2813_v21 = vsel %vm1586_vm2, %v2812_v30, %v2792_v48 }
 0x13f   : > { %v3645_v19 = vld [vmem:[#allocation3 + $0x30] sm:$0x1]  ;;  %v2860_v29 = vsel %vm1586_vm2, %v2859_v31, %v2839_v8  ;;  %v2907_v33 = vsel %vm1586_vm2, %v2906_v32, %v2886_v7  ;;  %v2954_v35 = vsel %vm1586_vm2, %v2953_v23, %v2933_v14  ;;  %v3688_v36 = vld [vmem:[#allocation3 + $0x31] sm:$0x1]  ;;  %v3735_v40 = vld [vmem:[#allocation3 + $0x32] sm:$0x1]  ;;  %v2631_v28 = vsel %vm1589_vm3, %v2630_v25, %v2629_v52 }
 0x140   : > { %v3782_v41 = vld [vmem:[#allocation3 + $0x33] sm:$0x1]  ;;  %v2674_v22 = vsel %vm1589_vm3, %v2673_v34, %v2672_v55  ;;  %v2721_v16 = vsel %vm1589_vm3, %v2720_v37, %v2719_v9  ;;  %v2768_v0 = vsel %vm1589_vm3, %v2767_v39, %v2766_v17  ;;  %v3829_v2 = vld [vmem:[#allocation3 + $0x34] sm:$0x1]  ;;  %v8012_v5 = vld [vmem:[#allocation3 + $0x35] sm:$0x1]  ;;  %v2815_v31 = vsel %vm1589_vm3, %v2814_v56, %v2813_v21 }
 0x141   : > { %v8014_v30 = vld [vmem:[#allocation3 + $0x36] sm:$0x1]  ;;  %v2862_v32 = vsel %vm1589_vm3, %v2861_v53, %v2860_v29  ;;  %v2910_v23 = vrot.slane %v2889_v61, 5  ;;  %v8018_v6 = vld [vmem:[#allocation3 + $0x37] sm:$0x1]  ;;  %v1045_v25 = vmax.f32 %v1036_v4, 0.0  ;;  %v2909_v34 = vsel %vm1589_vm3, %v2908_v60, %v2907_v33 }
 0x142   : > { %v8020_v48 = vld [vmem:[#allocation3 + $0x50] sm:$0x1]  ;;  %v2956_v37 = vsel %vm1589_vm3, %v2955_v54, %v2954_v35  ;;  %v2957_v39 = vrot.slane %v2936_v18, 5  ;;  %v3687_v7 = vld [vmem:[#allocation3 + $0x11] sm:$0x1]  ;;  %v3664_v51 = vrot.slane %v3645_v19, 7  ;;  %v8033_v54 = vsel %vm1592_vm4, %v1921_v59, %v7953_v45 }
 0x143   : > { %v3644_v8 = vld [vmem:[#allocation3 + $0x10] sm:$0x1]  ;;  %v3734_v50 = vld [vmem:[#allocation3 + $0x12] sm:$0x1]  ;;  %v3781_v57 = vld [vmem:[#allocation3 + $0x13] sm:$0x1]  ;;  %v8036_v61 = vsel %vm1592_vm4, %v2632_v20, %v2631_v28  ;;  %v8039_v4 = vsel %vm1592_vm4, %v2675_v43, %v2674_v22  ;;  %v8042_v9 = vsel %vm1592_vm4, %v2722_v3, %v2721_v16  ;;  %v8045_v21 = vsel %vm1592_vm4, %v2769_v44, %v2768_v0 }
 0x144   : > { %v3828_v49 = vld [vmem:[#allocation3 + $0x14] sm:$0x1]  ;;  %v3707_v52 = vrot.slane %v3688_v36, 7  ;;  %v3754_v55 = vrot.slane %v3735_v40, 7  ;;  %v3801_v56 = vrot.slane %v3782_v41, 7  ;;  %v3848_v58 = vrot.slane %v3829_v2, 7 }
 0x145   : > { %1050 = vst.msk [vmem:[#allocation3 + $0xa8] sm:$0xff] %vm587_vm1, %v1045_v25  ;;  %v3895_v10 = vrot.slane %v8012_v5, 7  ;;  %v3942_v13 = vrot.slane %v8014_v30, 7  ;;  %v3989_v14 = vrot.slane %v8018_v6, 7  ;;  %v3666_v53 = vrot.slane %v8020_v48, 6 }
 0x146   : > { %v3689_v60 = vld [vmem:[#allocation3 + $0x51] sm:$0x1]  ;;  %v3736_v17 = vld [vmem:[#allocation3 + $0x52] sm:$0x1]  ;;  %v3783_v18 = vld [vmem:[#allocation3 + $0x53] sm:$0x1]  ;;  %v8048_v38 = vsel %vm1592_vm4, %v2816_v24, %v2815_v31  ;;  %v8051_v59 = vsel %vm1592_vm4, %v2863_v27, %v2862_v32  ;;  %v8054_v45 = vsel %vm1592_vm4, %v2910_v23, %v2909_v34  ;;  %v8059_v35 = vsel %vm1592_vm4, %v2957_v39, %v2956_v37 }
 0x147   : > { %v3830_v19 = vld [vmem:[#allocation3 + $0x54] sm:$0x1]  ;;  %v3875_v20 = vld [vmem:[#allocation3 + $0x15] sm:$0x1]  ;;  %v3922_v43 = vld [vmem:[#allocation3 + $0x16] sm:$0x1]  ;;  %v3665_v36 = vsel %vm1586_vm2, %v3664_v51, %v3644_v8  ;;  %v3708_v24 = vsel %vm1586_vm2, %v3707_v52, %v3687_v7  ;;  %v3755_v27 = vsel %vm1586_vm2, %v3754_v55, %v3734_v50  ;;  %v3802_v22 = vsel %vm1586_vm2, %v3801_v56, %v3781_v57 }
 0x148   : > { %v3877_v29 = vld [vmem:[#allocation3 + $0x55] sm:$0x1]  ;;  %v3924_v3 = vld [vmem:[#allocation3 + $0x56] sm:$0x1]  ;;  %v8056_v33 = vld [vmem:[#allocation3 + $0x57] sm:$0x1]  ;;  %v3849_v16 = vsel %vm1586_vm2, %v3848_v58, %v3828_v49  ;;  %v3896_v7 = vsel %vm1586_vm2, %v3895_v10, %v3875_v20  ;;  %v3943_v50 = vsel %vm1586_vm2, %v3942_v13, %v3922_v43  ;;  %v3667_v56 = vsel %vm1589_vm3, %v3666_v53, %v3665_v36 }
 0x149   : > { %v3969_v44 = vld [vmem:[#allocation3 + $0x17] sm:$0x1]  ;;  %v8064_v40 = vld [vmem:[#allocation3 + $0x70] sm:$0x1]  ;;  %v8066_v41 = vld [vmem:[#allocation3 + $0x71] sm:$0x1] }
 0x14a   : > { %v8068_v28 = vld [vmem:[#allocation3 + $0x72] sm:$0x1]  ;;  %v3709_v0 = vrot.slane %v3689_v60, 6  ;;  %v3756_v2 = vrot.slane %v3736_v17, 6  ;;  %v1569_v5 = vld [vmem:[#allocation3 + $0x80] sm:$0x1]  ;;  %v3990_v55 = vsel %vm1586_vm2, %v3989_v14, %v3969_v44 }
 0x14b   : > { %v1619_v30 = vld [vmem:[#allocation3 + $0x81] sm:$0x1]  ;;  %v3803_v31 = vrot.slane %v3783_v18, 6  ;;  %v3850_v32 = vrot.slane %v3830_v19, 6  ;;  %v3897_v23 = vrot.slane %v3877_v29, 6  ;;  %v3944_v6 = vrot.slane %v3924_v3, 6 }
 0x14c   : > { %v8072_v48 = vld [vmem:[#allocation3 + $0x73] sm:$0x1]  ;;  %v3991_v25 = vrot.slane %v8056_v33, 6  ;;  %v3668_v34 = vrot.slane %v8064_v40, 5  ;;  %v3711_v37 = vrot.slane %v8066_v41, 5  ;;  %v3758_v39 = vrot.slane %v8068_v28, 5 }
 0x14d   : > { %v8078_v8 = vld [vmem:[#allocation3 + $0x74] sm:$0x1]  ;;  %v1594_v51 = vrot.slane %v1569_v5, 4  ;;  %v1641_v57 = vrot.slane %v1619_v30, 4  ;;  %v1570_v49 = vld [vmem:[#allocation3 + $0xa0] sm:$0x1]  ;;  %v3710_v19 = vsel %vm1589_vm3, %v3709_v0, %v3708_v24  ;;  %v3757_v10 = vsel %vm1589_vm3, %v3756_v2, %v3755_v27 }
 0x14e   : > { %v1620_v52 = vld [vmem:[#allocation3 + $0xa1] sm:$0x1]  ;;  %v3805_v58 = vrot.slane %v8072_v48, 5  ;;  %v8085_v60 = vld [vmem:[#allocation3 + $0x75] sm:$0x1]  ;;  %v3852_v13 = vrot.slane %v8078_v8, 5  ;;  %v3804_v14 = vsel %vm1589_vm3, %v3803_v31, %v3802_v22  ;;  %v8092_v53 = vsel %vm1589_vm3, %v3850_v32, %v3849_v16 }
 0x14f   : > { %v1571_v17 = vld [vmem:[#allocation3 + $0xc0] sm:$0x1]  ;;  %v1621_v18 = vld [vmem:[#allocation3 + $0xc1] sm:$0x1]  ;;  %v1666_v20 = vld [vmem:[#allocation3 + $0x82] sm:$0x1]  ;;  %v1596_v36 = vsel %vm1595_vm5, %v1594_v51, %v7956_v46  ;;  %v1642_v24 = vsel %vm1595_vm5, %v1641_v57, %v7959_v62  ;;  %v8099_v30 = vsel %vm1589_vm3, %v3897_v23, %v3896_v7  ;;  %v8102_v22 = vsel %vm1589_vm3, %v3944_v6, %v3943_v50 }
 0x150   : > { %v1713_v43 = vld [vmem:[#allocation3 + $0x83] sm:$0x1]  ;;  %v1760_v29 = vld [vmem:[#allocation3 + $0x84] sm:$0x1]  ;;  %v1807_v3 = vld [vmem:[#allocation3 + $0x85] sm:$0x1] }
 0x151   : > { %v1597_v33 = vrot.slane %v1570_v49, 3  ;;  %v1643_v44 = vrot.slane %v1620_v52, 3  ;;  %v1600_v27 = vrot.slane %v1571_v17, 2  ;;  %v1645_v0 = vrot.slane %v1621_v18, 2  ;;  %v1572_v2 = vld [vmem:[#allocation3 + $0xe0] sm:$0x1] }
 0x152   : > { %v1622_v5 = vld [vmem:[#allocation3 + $0xe1] sm:$0x1]  ;;  %v8104_v16 = vld [vmem:[#allocation3 + $0x76] sm:$0x1]  ;;  %v1688_v31 = vrot.slane %v1666_v20, 4  ;;  %v3899_v46 = vrot.slane %v8085_v60, 5  ;;  %v8112_v18 = vsel %vm1589_vm3, %v3991_v25, %v3990_v55  ;;  %v8125_v25 = vsel %vm1592_vm4, %v3711_v37, %v3710_v19 }
 0x153   : > { %v1667_v32 = vld [vmem:[#allocation3 + $0xa2] sm:$0x1]  ;;  %v1735_v48 = vrot.slane %v1713_v43, 4  ;;  %v1782_v51 = vrot.slane %v1760_v29, 4  ;;  %v1829_v62 = vrot.slane %v1807_v3, 4  ;;  %v1599_v49 = vsel %vm1598_vm6, %v1597_v33, %v1596_v36 }
 0x154   : > { %v1668_v57 = vld [vmem:[#allocation3 + $0xc2] sm:$0x1]  ;;  %v1644_v52 = vsel %vm1598_vm6, %v1643_v44, %v1642_v24  ;;  %v1603_v23 = vrot.slane %v1572_v2, 1  ;;  %v1647_v7 = vrot.slane %v1622_v5, 1  ;;  %v1690_v17 = vrot.slane %v1667_v32, 3 }
 0x155   : > { %v1602_v6 = vsel %vm1601_vm7, %v1600_v27, %v1599_v49  ;;  %v1646_v50 = vsel %vm1601_vm7, %v1645_v0, %v1644_v52  ;;  %v1689_v43 = vsel %vm1595_vm5, %v1688_v31, %v7962_v63  ;;  %v1854_v29 = vld [vmem:[#allocation3 + $0x86] sm:$0x1]  ;;  %v1901_v3 = vld [vmem:[#allocation3 + $0x87] sm:$0x1]  ;;  %v1692_v33 = vrot.slane %v1668_v57, 2 }
 0x156   : > { %v6893_v44 = vld [vmem:[#allocation2] ss:$0 sm:$0xff]  ;;  %v8120_v24 = vsel %vm1592_vm4, %v3668_v34, %v3667_v56  ;;  %v8130_v55 = vsel %vm1592_vm4, %v3758_v39, %v3757_v10  ;;  %v8133_v63 = vsel %vm1592_vm4, %v3805_v58, %v3804_v14  ;;  %v1714_v27 = vld [vmem:[#allocation3 + $0xa3] sm:$0x1]  ;;  %v1669_v2 = vld [vmem:[#allocation3 + $0xe2] sm:$0x1]  ;;  %v1736_v41 = vsel %vm1595_vm5, %v1735_v48, %v7967_v11 }
 0x157   : > { %v6894_v36 = vld [vmem:[#allocation2 + $0x20] ss:$0 sm:$0xff]  ;;  %v1715_v0 = vld [vmem:[#allocation3 + $0xc3] sm:$0x1]  ;;  %v6895_v40 = vld [vmem:[#allocation2 + $0x1] ss:$0 sm:$0xff]  ;;  %v1783_v37 = vsel %vm1595_vm5, %v1782_v51, %v7970_v26  ;;  %v1605_v28 = vsel %vm1604_vm8, %v1603_v23, %v1602_v6  ;;  %v1648_v39 = vsel %vm1604_vm8, %v1647_v7, %v1646_v50  ;;  %v1830_v56 = vsel %vm1595_vm5, %v1829_v62, %v7973_v42  ;;  %v1082_v42 = vpop.f32.mrf.mxu2 }
 0x158   : > { %v6896_v5 = vld [vmem:[#allocation2 + $0x21] ss:$0 sm:$0xff]  ;;  %v6909_v34 = vld [vmem:[#allocation2 + $0x40] ss:$0 sm:$0xff]  ;;  %v1876_v58 = vrot.slane %v1854_v29, 4  ;;  %v1923_v19 = vrot.slane %v1901_v3, 4  ;;  %v1691_v10 = vsel %vm1598_vm6, %v1690_v17, %v1689_v43  ;;  %v1607_v52 = vmul.f32 %v6893_v44, %v1605_v28 }
 0x159   : > { %v1761_v14 = vld [vmem:[#allocation3 + $0xa4] sm:$0x1]  ;;  %v1808_v31 = vld [vmem:[#allocation3 + $0xa5] sm:$0x1]  ;;  %v6910_v32 = vld [vmem:[#allocation2 + $0x41] ss:$0 sm:$0xff]  ;;  %v1693_v11 = vsel %vm1601_vm7, %v1692_v33, %v1691_v10  ;;  %v1608_v23 = vmul.f32 %v6894_v36, %v1605_v28  ;;  %v1650_v7 = vmul.f32 %v6895_v40, %v1648_v39  ;;  %v1651_v6 = vmul.f32 %v6896_v5, %v1648_v39 }
 0x15a   : > { %v1737_v57 = vrot.slane %v1714_v27, 3  ;;  %v1739_v48 = vrot.slane %v1715_v0, 2  ;;  %v1694_v49 = vrot.slane %v1669_v2, 1  ;;  %v6917_v26 = vld [vmem:[#allocation2 + $0x60] ss:$0 sm:$0xff]  ;;  %v1784_v62 = vrot.slane %v1761_v14, 3 }
 0x15b   : > { %v6918_v51 = vld [vmem:[#allocation2 + $0x61] ss:$0 sm:$0xff]  ;;  %v1716_v50 = vld [vmem:[#allocation3 + $0xe3] sm:$0x1]  ;;  %v1831_v29 = vrot.slane %v1808_v31, 3  ;;  %v1609_v17 = vmul.f32 %v6909_v34, %v1605_v28  ;;  %v1652_v43 = vmul.f32 %v6910_v32, %v1648_v39  ;;  %v8147_v27 = vsel %vm1595_vm5, %v1876_v58, %v7976_v47 }
 0x15c   : > { %v1762_v3 = vld [vmem:[#allocation3 + $0xc4] sm:$0x1]  ;;  %v8151_v33 = vsel %vm1595_vm5, %v1923_v19, %v8033_v54  ;;  %v8153_v0 = vld [vmem:[#allocation3 + $0xa6] sm:$0x1]  ;;  %v1610_v44 = vmul.f32 %v6917_v26, %v1605_v28  ;;  %v1653_v36 = vmul.f32 %v6918_v51, %v1648_v39  ;;  %v6897_v2 = vld [vmem:[#allocation2 + $0x2] ss:$0 sm:$0xff]  ;;  %v1738_v40 = vsel %vm1598_vm6, %v1737_v57, %v1736_v41 }
 0x15d   : > { %v1809_v5 = vld [vmem:[#allocation3 + $0xc5] sm:$0x1]  ;;  %v1695_v10 = vsel %vm1604_vm8, %v1694_v49, %v1693_v11  ;;  %v1741_v34 = vrot.slane %v1716_v50, 1  ;;  %v1083_v14 = vadd.f32 %v1082_v42, %v7759_v15  ;;  %v6898_v31 = vld [vmem:[#allocation2 + $0x22] ss:$0 sm:$0xff]  ;;  %v1740_v47 = vsel %vm1601_vm7, %v1739_v48, %v1738_v40  ;;  %v1129_v48 = vpop.f32.mrf.mxu3 }
 0x15e   : > { %v1786_v58 = vrot.slane %v1762_v3, 2  ;;  %v1654_v32 = vadd.f32 %v1650_v7, %v1607_v52  ;;  %v1655_v54 = vadd.f32 %v1651_v6, %v1608_v23  ;;  %v1763_v19 = vld [vmem:[#allocation3 + $0xe4] sm:$0x1]  ;;  %v6911_v20 = vld [vmem:[#allocation2 + $0x42] ss:$0 sm:$0xff]  ;;  %v1785_v28 = vsel %vm1598_vm6, %v1784_v62, %v1783_v37  ;;  %v991_v3 = vpop.f32.mrf.mxu0 }
 0x15f   : > { %v1832_v39 = vsel %vm1598_vm6, %v1831_v29, %v1830_v56  ;;  %v1878_v41 = vrot.slane %v8153_v0, 3  ;;  %v1656_v57 = vadd.f32 %v1652_v43, %v1609_v17  ;;  %v6919_v26 = vld [vmem:[#allocation2 + $0x62] ss:$0 sm:$0xff]  ;;  %v1833_v11 = vrot.slane %v1809_v5, 2  ;;  %v8162_v49 = vld [vmem:[#allocation3 + $0xc6] sm:$0x1] }
 0x160   : > { %v1657_v51 = vadd.f32 %v1653_v36, %v1610_v44  ;;  %v1697_v50 = vmul.f32 %v6897_v2, %v1695_v10  ;;  %v1698_v42 = vmul.f32 %v6898_v31, %v1695_v10  ;;  %v1699_v52 = vmul.f32 %v6911_v20, %v1695_v10  ;;  %v1810_v6 = vld [vmem:[#allocation3 + $0xe5] sm:$0x1]  ;;  %v6899_v62 = vld [vmem:[#allocation2 + $0x3] ss:$0 sm:$0xff]  ;;  %v4681_v8 = vld [vmem:[#allocation3 + $0x38] sm:$0x1] }
 0x161   : > { %v1742_v23 = vsel %vm1604_vm8, %v1741_v34, %v1740_v47  ;;  %v1788_v7 = vrot.slane %v1763_v19, 1  ;;  %v1092_v37 = vmax.f32 %v1083_v14, 0.0  ;;  %v6900_v56 = vld [vmem:[#allocation2 + $0x23] ss:$0 sm:$0xff]  ;;  %v1787_v29 = vsel %vm1601_vm7, %v1786_v58, %v1785_v28  ;;  %v1902_v34 = vld [vmem:[#allocation3 + $0xa7] sm:$0x1] }
 0x162   : > { %v1700_v17 = vmul.f32 %v6919_v26, %v1695_v10  ;;  %v1701_v43 = vadd.f32 %v1697_v50, %v1654_v32  ;;  %v1702_v0 = vadd.f32 %v1698_v42, %v1655_v54  ;;  %v6912_v40 = vld [vmem:[#allocation2 + $0x43] ss:$0 sm:$0xff]  ;;  %v1880_v44 = vrot.slane %v8162_v49, 2  ;;  %v1903_v58 = vld [vmem:[#allocation3 + $0xc7] sm:$0x1] }
 0x163   : > { %v1703_v36 = vadd.f32 %v1699_v52, %v1656_v57  ;;  %1097 = vst.msk [vmem:[#allocation3 + $0xc8] sm:$0xff] %vm587_vm1, %v1092_v37  ;;  %v1130_v20 = vadd.f32 %v1129_v48, %v7759_v15  ;;  %v992_v2 = vadd.f32 %v991_v3, %v7738_v1  ;;  %v6920_v5 = vld [vmem:[#allocation2 + $0x63] ss:$0 sm:$0xff]  ;;  %v1744_v31 = vmul.f32 %v6899_v62, %v1742_v23  ;;  %v6901_v26 = vld [vmem:[#allocation2 + $0x4] ss:$0 sm:$0xff]  ;;  %v1038_v3 = vpop.f32.mrf.mxu1 }
 0x164   : > { %v1704_v14 = vadd.f32 %v1700_v17, %v1657_v51  ;;  %v1745_v47 = vmul.f32 %v6900_v56, %v1742_v23  ;;  %v1835_v19 = vrot.slane %v1810_v6, 1  ;;  %v1746_v10 = vmul.f32 %v6912_v40, %v1742_v23  ;;  %v6902_v57 = vld [vmem:[#allocation2 + $0x24] ss:$0 sm:$0xff]  ;;  %v1857_v48 = vld [vmem:[#allocation3 + $0xe6] sm:$0x1] }
 0x165   : > { %v1789_v32 = vsel %vm1604_vm8, %v1788_v7, %v1787_v29  ;;  %v1139_v54 = vmax.f32 %v1130_v20, 0.0  ;;  %v999_v28 = vmax.f32 %v992_v2, 0.0  ;;  %v1834_v49 = vsel %vm1601_vm7, %v1833_v11, %v1832_v39  ;;  %v6913_v52 = vld [vmem:[#allocation2 + $0x44] ss:$0 sm:$0xff]  ;;  %v3972_v56 = vld [vmem:[#allocation3 + $0x77] sm:$0x1] }
 0x166   : > { %v1747_v50 = vmul.f32 %v6920_v5, %v1742_v23  ;;  %v1748_v15 = vadd.f32 %v1744_v31, %v1701_v43  ;;  %v1749_v42 = vadd.f32 %v1745_v47, %v1702_v0  ;;  %v1879_v51 = vsel %vm1598_vm6, %v1878_v41, %v8147_v27  ;;  %v6921_v62 = vld [vmem:[#allocation2 + $0x64] ss:$0 sm:$0xff]  ;;  %v6903_v27 = vld [vmem:[#allocation2 + $0x5] ss:$0 sm:$0xff]  ;;  %v6905_v60 = vld [vmem:[#allocation2 + $0x6] ss:$0 sm:$0xff] }
 0x167   : > { %v1925_v6 = vrot.slane %v1902_v34, 3  ;;  %v1750_v37 = vadd.f32 %v1746_v10, %v1703_v36  ;;  %1144 = vst.msk [vmem:[#allocation3 + $0xe8] sm:$0xff] %vm587_vm1, %v1139_v54  ;;  %v1039_v7 = vadd.f32 %v1038_v3, %v7738_v1  ;;  %v1927_v29 = vrot.slane %v1903_v58, 2  ;;  %v6904_v41 = vld [vmem:[#allocation2 + $0x25] ss:$0 sm:$0xff] }
 0x168   : > { %v1751_v17 = vadd.f32 %v1747_v50, %v1704_v14  ;;  %v1791_v39 = vmul.f32 %v6901_v26, %v1789_v32  ;;  %v1792_v11 = vmul.f32 %v6902_v57, %v1789_v32  ;;  %v1793_v23 = vmul.f32 %v6913_v52, %v1789_v32  ;;  %1004 = vst.msk [vmem:[#allocation3 + $0x90] sm:$0xff] %vm587_vm1, %v999_v28  ;;  %v1904_v34 = vld [vmem:[#allocation3 + $0xe7] sm:$0x1]  ;;  %v6914_v31 = vld [vmem:[#allocation2 + $0x45] ss:$0 sm:$0xff] }
 0x169   : > { %v1836_v43 = vsel %vm1604_vm8, %v1835_v19, %v1834_v49  ;;  %v1882_v0 = vrot.slane %v1857_v48, 1  ;;  %v1046_v40 = vmax.f32 %v1039_v7, 0.0  ;;  %v1881_v36 = vsel %vm1601_vm7, %v1880_v44, %v1879_v51  ;;  %v6922_v47 = vld [vmem:[#allocation2 + $0x65] ss:$0 sm:$0xff]  ;;  %v4724_v54 = vld [vmem:[#allocation3 + $0x39] sm:$0x1] }
 0x16a   : > { %v1794_v20 = vmul.f32 %v6921_v62, %v1789_v32  ;;  %v1795_v2 = vadd.f32 %v1791_v39, %v1748_v15  ;;  %v1796_v5 = vadd.f32 %v1792_v11, %v1749_v42  ;;  %v8183_v14 = vsel %vm1592_vm4, %v3852_v13, %v8092_v53  ;;  %v2612_v26 = vld [vmem:[#allocation3 + $0x88] sm:$0x1]  ;;  %v6906_v57 = vld [vmem:[#allocation2 + $0x26] ss:$0 sm:$0xff]  ;;  %v2655_v52 = vld [vmem:[#allocation3 + $0x89] sm:$0x1] }
 0x16b   : > { %v8189_v19 = vsel %vm1592_vm4, %v3899_v46, %v8099_v30  ;;  %v3993_v58 = vrot.slane %v3972_v56, 5  ;;  %v1797_v44 = vadd.f32 %v1793_v23, %v1750_v37  ;;  %1051 = vst.msk [vmem:[#allocation3 + $0xb0] sm:$0xff] %vm587_vm1, %v1046_v40  ;;  %v10571_v10 = vrot.slane %v8104_v16, 5  ;;  %v6915_v15 = vld [vmem:[#allocation2 + $0x46] ss:$0 sm:$0xff] }
 0x16c   : > { %v1798_v13 = vadd.f32 %v1794_v20, %v1751_v17  ;;  %v1838_v53 = vmul.f32 %v6903_v27, %v1836_v43  ;;  %v1839_v28 = vmul.f32 %v6904_v41, %v1836_v43  ;;  %v1926_v30 = vsel %vm1598_vm6, %v1925_v6, %v8151_v33  ;;  %v8201_v16 = vld [vmem:[#allocation3 + $0x3a] sm:$0x1]  ;;  %v8204_v7 = vld [vmem:[#allocation3 + $0x3b] sm:$0x1]  ;;  %v6907_v33 = vld [vmem:[#allocation2 + $0x7] ss:$0 sm:$0xff] }
 0x16d   : > { %v8196_v32 = vsel %vm1592_vm4, %v10571_v10, %v8102_v22  ;;  %v1840_v46 = vmul.f32 %v6914_v31, %v1836_v43  ;;  %v1883_v49 = vsel %vm1604_vm8, %v1882_v0, %v1881_v36  ;;  %v1929_v50 = vrot.slane %v1904_v34, 1  ;;  %v6908_v6 = vld [vmem:[#allocation2 + $0x27] ss:$0 sm:$0xff]  ;;  %v6923_v17 = vld [vmem:[#allocation2 + $0x66] ss:$0 sm:$0xff] }
 0x16e   : > { %10572 = vst [vmem:[#allocation26_spill] sm:$0xff] %v8196_v32  ;;  %v1928_v22 = vsel %vm1601_vm7, %v1927_v29, %v1926_v30  ;;  %v1841_v42 = vmul.f32 %v6922_v47, %v1836_v43  ;;  %v1842_v48 = vadd.f32 %v1838_v53, %v1795_v2  ;;  %v1843_v3 = vadd.f32 %v1839_v28, %v1796_v5  ;;  %v4680_v11 = vld [vmem:[#allocation3 + $0x18] sm:$0x1]  ;;  %v4723_v23 = vld [vmem:[#allocation3 + $0x19] sm:$0x1] }
 0x16f   : > { %v4700_v51 = vrot.slane %v4681_v8, 7  ;;  %v4743_v37 = vrot.slane %v4724_v54, 7  ;;  %v1844_v62 = vadd.f32 %v1840_v46, %v1797_v44  ;;  %v2634_v56 = vrot.slane %v2612_v26, 4  ;;  %v6916_v40 = vld [vmem:[#allocation2 + $0x47] ss:$0 sm:$0xff] }
 0x170   : > { %v8208_v39 = vsel %vm1592_vm4, %v3993_v58, %v8112_v18  ;;  %v1845_v29 = vadd.f32 %v1841_v42, %v1798_v13  ;;  %v1885_v43 = vmul.f32 %v6905_v60, %v1883_v49  ;;  %v1886_v0 = vmul.f32 %v6906_v57, %v1883_v49  ;;  %v6924_v27 = vld [vmem:[#allocation2 + $0x67] ss:$0 sm:$0xff]  ;;  %v2613_v18 = vld [vmem:[#allocation3 + $0xa8] sm:$0x1]  ;;  %v2656_v58 = vld [vmem:[#allocation3 + $0xa9] sm:$0x1] }
 0x171   : > { %10573 = vst [vmem:[#allocation27_spill] sm:$0xff] %v8208_v39  ;;  %v4790_v41 = vrot.slane %v8201_v16, 7  ;;  %v1887_v36 = vmul.f32 %v6915_v15, %v1883_v49  ;;  %v1930_v20 = vsel %vm1604_vm8, %v1929_v50, %v1928_v22  ;;  %v2677_v2 = vrot.slane %v2655_v52, 4  ;;  %v8219_v8 = vld [vmem:[#allocation3 + $0x3c] sm:$0x1] }
 0x172   : > { %v4837_v5 = vrot.slane %v8204_v7, 7  ;;  %v1888_v34 = vmul.f32 %v6923_v17, %v1883_v49  ;;  %v1889_v31 = vadd.f32 %v1885_v43, %v1842_v48  ;;  %v1890_v47 = vadd.f32 %v1886_v0, %v1843_v3  ;;  %v2614_v53 = vld [vmem:[#allocation3 + $0xc8] sm:$0x1]  ;;  %v2657_v28 = vld [vmem:[#allocation3 + $0xc9] sm:$0x1] }
 0x173   : > { %v8214_v44 = vsel %vm1586_vm2, %v4700_v51, %v4680_v11  ;;  %v8217_v10 = vsel %vm1586_vm2, %v4743_v37, %v4723_v23  ;;  %v1891_v54 = vadd.f32 %v1887_v36, %v1844_v62  ;;  %v2635_v13 = vsel %vm1595_vm5, %v2634_v56, %v8036_v61  ;;  %v8223_v26 = vld [vmem:[#allocation3 + $0x3d] sm:$0x1]  ;;  %v2702_v49 = vld [vmem:[#allocation3 + $0x8a] sm:$0x1]  ;;  %v2749_v50 = vld [vmem:[#allocation3 + $0x8b] sm:$0x1] }
 0x174   : > { %v1892_v60 = vadd.f32 %v1888_v34, %v1845_v29  ;;  %v1932_v57 = vmul.f32 %v6907_v33, %v1930_v20  ;;  %v1933_v30 = vmul.f32 %v6908_v6, %v1930_v20  ;;  %v1934_v46 = vmul.f32 %v6916_v40, %v1930_v20  ;;  %v2796_v22 = vld [vmem:[#allocation3 + $0x8c] sm:$0x1]  ;;  %v2843_v42 = vld [vmem:[#allocation3 + $0x8d] sm:$0x1]  ;;  %v4770_v52 = vld [vmem:[#allocation3 + $0x1a] sm:$0x1] }
 0x175   : > { %v1935_v15 = vmul.f32 %v6924_v27, %v1930_v20  ;;  %v2678_v16 = vsel %vm1595_vm5, %v2677_v2, %v8039_v4  ;;  %v2636_v48 = vrot.slane %v2613_v18, 3  ;;  %v2679_v3 = vrot.slane %v2656_v58, 3  ;;  %v2615_v62 = vld [vmem:[#allocation3 + $0xe8] sm:$0x1]  ;;  %v2658_v56 = vld [vmem:[#allocation3 + $0xe9] sm:$0x1] }
 0x176   : > { %v1936_v61 = vadd.f32 %v1932_v57, %v1889_v31  ;;  %v1937_v51 = vadd.f32 %v1933_v30, %v1890_v47  ;;  %v2638_v37 = vrot.slane %v2614_v53, 2  ;;  %v2681_v7 = vrot.slane %v2657_v28, 2  ;;  %v4817_v33 = vld [vmem:[#allocation3 + $0x1b] sm:$0x1]  ;;  %v2703_v40 = vld [vmem:[#allocation3 + $0xaa] sm:$0x1] }
 0x177   : > { %v1938_v11 = vadd.f32 %v1934_v46, %v1891_v54  ;;  %v2724_v23 = vrot.slane %v2702_v49, 4  ;;  %v1939_v29 = vadd.f32 %v1935_v15, %v1892_v60  ;;  %v2771_v4 = vrot.slane %v2749_v50, 4  ;;  %v2704_v20 = vld [vmem:[#allocation3 + $0xca] sm:$0x1]  ;;  %v8245_v28 = vld [vmem:[#allocation3 + $0x8e] sm:$0x1] }
 0x178   : > { %v2818_v43 = vrot.slane %v2796_v22, 4  ;;  %v2865_v0 = vrot.slane %v2843_v42, 4  ;;  %v2637_v27 = vsel %vm1598_vm6, %v2636_v48, %v2635_v13  ;;  %v2680_v36 = vsel %vm1598_vm6, %v2679_v3, %v2678_v16  ;;  %v8247_v60 = vld [vmem:[#allocation3 + $0x8f] sm:$0x1]  ;;  %v6925_v30 = vld [vmem:[#allocation2 + $0x8] ss:$0 sm:$0xff] }
 0x179   : > { %v2640_v2 = vrot.slane %v2615_v62, 1  ;;  %v2683_v34 = vrot.slane %v2658_v56, 1  ;;  %v8231_v31 = vmul.f32 0.5, %v1936_v61  ;;  %v8233_v47 = vmul.f32 0.5, %v1937_v51  ;;  %v6927_v46 = vld [vmem:[#allocation2 + $0x9] ss:$0 sm:$0xff] }
 0x17a   : > { %v2639_v18 = vsel %vm1601_vm7, %v2638_v37, %v2637_v27  ;;  %v2682_v58 = vsel %vm1601_vm7, %v2681_v7, %v2680_v36  ;;  %v8238_v54 = vsel %vm1586_vm2, %v4790_v41, %v4770_v52  ;;  %v8241_v53 = vsel %vm1586_vm2, %v4837_v5, %v4817_v33  ;;  %v2750_v5 = vld [vmem:[#allocation3 + $0xab] sm:$0x1]  ;;  %v2705_v16 = vld [vmem:[#allocation3 + $0xea] sm:$0x1]  ;;  %v6926_v22 = vld [vmem:[#allocation2 + $0x28] ss:$0 sm:$0xff] }
 0x17b   : > { %v8243_v13 = vmul.f32 0.5, %v1938_v11  ;;  %v2726_v57 = vrot.slane %v2703_v40, 3  ;;  %v2725_v49 = vsel %vm1595_vm5, %v2724_v23, %v8042_v9  ;;  %v2772_v50 = vsel %vm1595_vm5, %v2771_v4, %v8045_v21  ;;  %v6928_v42 = vld [vmem:[#allocation2 + $0x29] ss:$0 sm:$0xff]  ;;  %v6941_v48 = vld [vmem:[#allocation2 + $0x48] ss:$0 sm:$0xff] }
 0x17c   : > { %v2819_v41 = vsel %vm1595_vm5, %v2818_v43, %v8048_v38  ;;  %v2728_v15 = vrot.slane %v2704_v20, 2  ;;  %v6942_v3 = vld [vmem:[#allocation2 + $0x49] ss:$0 sm:$0xff]  ;;  %v8255_v52 = vmul.f32 0.5, %v1939_v29  ;;  %v8259_v61 = vsel %vm1595_vm5, %v2865_v0, %v8051_v59  ;;  %v2751_v9 = vld [vmem:[#allocation3 + $0xcb] sm:$0x1] }
 0x17d   : > { %v2641_v51 = vsel %vm1604_vm8, %v2640_v2, %v2639_v18  ;;  %v2684_v21 = vsel %vm1604_vm8, %v2683_v34, %v2682_v58  ;;  %v6949_v37 = vld [vmem:[#allocation2 + $0x68] ss:$0 sm:$0xff]  ;;  %v1944_v38 = vsel %vm587_vm1, %v8231_v31, -inf  ;;  %v8267_v7 = vsel %vm587_vm1, %v8233_v47, -inf  ;;  %v2797_v23 = vld [vmem:[#allocation3 + $0xac] sm:$0x1] }
 0x17e   : > { %v2912_v62 = vrot.slane %v8245_v28, 4  ;;  %v8273_v59 = vsel %vm587_vm1, %v8243_v13, -inf  ;;  %v2727_v33 = vsel %vm1598_vm6, %v2726_v57, %v2725_v49  ;;  %v2773_v11 = vrot.slane %v2750_v5, 3  ;;  %v6950_v4 = vld [vmem:[#allocation2 + $0x69] ss:$0 sm:$0xff] }
 0x17f   : > { %v2730_v29 = vrot.slane %v2705_v16, 1  ;;  %v2729_v43 = vsel %vm1601_vm7, %v2728_v15, %v2727_v33  ;;  %v2775_v0 = vrot.slane %v2751_v9, 2  ;;  %v2643_v40 = vmul.f32 %v6925_v30, %v2641_v51  ;;  %v2752_v36 = vld [vmem:[#allocation3 + $0xeb] sm:$0x1]  ;;  %v2798_v20 = vld [vmem:[#allocation3 + $0xcc] sm:$0x1] }
 0x180   : > { %v2686_v27 = vmul.f32 %v6927_v46, %v2684_v21  ;;  %v2644_v2 = vmul.f32 %v6926_v22, %v2641_v51  ;;  %v2645_v34 = vmul.f32 %v6941_v48, %v2641_v51  ;;  %v2687_v18 = vmul.f32 %v6928_v42, %v2684_v21  ;;  %v6929_v16 = vld [vmem:[#allocation2 + $0xa] ss:$0 sm:$0xff]  ;;  %v2844_v9 = vld [vmem:[#allocation3 + $0xad] sm:$0x1]  ;;  %v2799_v6 = vld [vmem:[#allocation3 + $0xec] sm:$0x1] }
 0x181   : > { %v2688_v58 = vmul.f32 %v6942_v3, %v2684_v21  ;;  %v8279_v28 = vsel %vm587_vm1, %v8255_v52, -inf  ;;  %v2820_v57 = vrot.slane %v2797_v23, 3  ;;  %v2646_v49 = vmul.f32 %v6949_v37, %v2641_v51  ;;  %v6930_v33 = vld [vmem:[#allocation2 + $0x2a] ss:$0 sm:$0xff]  ;;  %v2845_v37 = vld [vmem:[#allocation3 + $0xcd] sm:$0x1] }
 0x182   : > { %v2689_v5 = vmul.f32 %v6950_v4, %v2684_v21  ;;  %v1945_v17 = vrot.slane %v1944_v38, 4  ;;  %v2774_v15 = vsel %vm1598_vm6, %v2773_v11, %v2772_v50  ;;  %v2731_v30 = vsel %vm1604_vm8, %v2730_v29, %v2729_v43  ;;  %v6943_v56 = vld [vmem:[#allocation2 + $0x4a] ss:$0 sm:$0xff]  ;;  %v2891_v22 = vld [vmem:[#allocation3 + $0xae] sm:$0x1] }
 0x183   : > { %v2777_v46 = vrot.slane %v2752_v36, 1  ;;  %v2776_v42 = vsel %vm1601_vm7, %v2775_v0, %v2774_v15  ;;  %v2822_v48 = vrot.slane %v2798_v20, 2  ;;  %v2690_v3 = vadd.f32 %v2686_v27, %v2643_v40  ;;  %v6951_v11 = vld [vmem:[#allocation2 + $0x6a] ss:$0 sm:$0xff]  ;;  %v6931_v20 = vld [vmem:[#allocation2 + $0xb] ss:$0 sm:$0xff] }
 0x184   : > { %v2691_v23 = vadd.f32 %v2687_v18, %v2644_v2  ;;  %v2692_v50 = vadd.f32 %v2688_v58, %v2645_v34  ;;  %v2821_v29 = vsel %vm1598_vm6, %v2820_v57, %v2819_v41  ;;  %v2867_v4 = vrot.slane %v2844_v9, 3  ;;  %v2846_v2 = vld [vmem:[#allocation3 + $0xed] sm:$0x1]  ;;  %v6932_v34 = vld [vmem:[#allocation2 + $0x2b] ss:$0 sm:$0xff] }
 0x185   : > { %v2693_v43 = vadd.f32 %v2689_v5, %v2646_v49  ;;  %v2733_v36 = vmul.f32 %v6929_v16, %v2731_v30  ;;  %v2734_v39 = vmul.f32 %v6930_v33, %v2731_v30  ;;  %v2735_v0 = vmul.f32 %v6943_v56, %v2731_v30  ;;  %v6944_v18 = vld [vmem:[#allocation2 + $0x4b] ss:$0 sm:$0xff]  ;;  %v2892_v57 = vld [vmem:[#allocation3 + $0xce] sm:$0x1]  ;;  %v2938_v33 = vld [vmem:[#allocation3 + $0xaf] sm:$0x1] }
 0x186   : > { %v2778_v40 = vsel %vm1604_vm8, %v2777_v46, %v2776_v42  ;;  %v2824_v27 = vrot.slane %v2799_v6, 1  ;;  %v2823_v15 = vsel %vm1601_vm7, %v2822_v48, %v2821_v29  ;;  %v2869_v51 = vrot.slane %v2845_v37, 2  ;;  %v6952_v5 = vld [vmem:[#allocation2 + $0x6b] ss:$0 sm:$0xff] }
 0x187   : > { %v2736_v21 = vmul.f32 %v6951_v11, %v2731_v30  ;;  %v2737_v32 = vadd.f32 %v2733_v36, %v2690_v3  ;;  %v8290_v58 = vmax.f32 %v1944_v38, %v1945_v17  ;;  %v2913_v41 = vsel %vm1595_vm5, %v2912_v62, %v8054_v45  ;;  %v6933_v30 = vld [vmem:[#allocation2 + $0xc] ss:$0 sm:$0xff]  ;;  %v2939_v11 = vld [vmem:[#allocation3 + $0xcf] sm:$0x1] }
 0x188   : > { %v2738_v49 = vadd.f32 %v2734_v39, %v2691_v23  ;;  %v2739_v56 = vadd.f32 %v2735_v0, %v2692_v50  ;;  %v2868_v6 = vsel %vm1598_vm6, %v2867_v4, %v8259_v61  ;;  %v2914_v16 = vrot.slane %v2891_v22, 3  ;;  %v6934_v3 = vld [vmem:[#allocation2 + $0x2c] ss:$0 sm:$0xff]  ;;  %v2893_v23 = vld [vmem:[#allocation3 + $0xee] sm:$0x1] }
 0x189   : > { %v2740_v9 = vadd.f32 %v2736_v21, %v2693_v43  ;;  %v2780_v46 = vmul.f32 %v6931_v20, %v2778_v40  ;;  %v2781_v42 = vmul.f32 %v6932_v34, %v2778_v40  ;;  %v2782_v48 = vmul.f32 %v6944_v18, %v2778_v40  ;;  %v6945_v50 = vld [vmem:[#allocation2 + $0x4c] ss:$0 sm:$0xff] }
 0x18a   : > { %v2825_v17 = vsel %vm1604_vm8, %v2824_v27, %v2823_v15  ;;  %v2871_v38 = vrot.slane %v2846_v2, 1  ;;  %v2870_v45 = vsel %vm1601_vm7, %v2869_v51, %v2868_v6  ;;  %v2916_v62 = vrot.slane %v2892_v57, 2  ;;  %v6953_v43 = vld [vmem:[#allocation2 + $0x6c] ss:$0 sm:$0xff]  ;;  %v6935_v2 = vld [vmem:[#allocation2 + $0xd] ss:$0 sm:$0xff] }
 0x18b   : > { %v2783_v39 = vmul.f32 %v6952_v5, %v2778_v40  ;;  %v2784_v37 = vadd.f32 %v2780_v46, %v2737_v32  ;;  %v1947_v61 = vrot.slane %v8290_v58, 2  ;;  %v10574_v22 = vrot.slane %v8247_v60, 4  ;;  %v2940_v57 = vld [vmem:[#allocation3 + $0xef] sm:$0x1] }
 0x18c   : > { %v2785_v29 = vadd.f32 %v2781_v42, %v2738_v49  ;;  %v2786_v4 = vadd.f32 %v2782_v48, %v2739_v56  ;;  %v2915_v36 = vsel %vm1598_vm6, %v2914_v16, %v2913_v41  ;;  %v2961_v0 = vrot.slane %v2938_v33, 3  ;;  %v6936_v49 = vld [vmem:[#allocation2 + $0x2d] ss:$0 sm:$0xff]  ;;  %v8312_v33 = vld [vmem:[#allocation3 + $0x3e] sm:$0x1] }
 0x18d   : > { %v2960_v21 = vsel %vm1595_vm5, %v10574_v22, %v8059_v35  ;;  %v2787_v51 = vadd.f32 %v2783_v39, %v2740_v9  ;;  %v2827_v27 = vmul.f32 %v6933_v30, %v2825_v17  ;;  %v2828_v40 = vmul.f32 %v6934_v3, %v2825_v17  ;;  %v6946_v56 = vld [vmem:[#allocation2 + $0x4d] ss:$0 sm:$0xff]  ;;  %v8314_v42 = vld [vmem:[#allocation3 + $0x3f] sm:$0x1] }
 0x18e   : > { %v2829_v32 = vmul.f32 %v6945_v50, %v2825_v17  ;;  %v2872_v20 = vsel %vm1604_vm8, %v2871_v38, %v2870_v45  ;;  %v2918_v15 = vrot.slane %v2893_v23, 1  ;;  %v2917_v34 = vsel %vm1601_vm7, %v2916_v62, %v2915_v36  ;;  %v6954_v30 = vld [vmem:[#allocation2 + $0x6d] ss:$0 sm:$0xff]  ;;  %v6938_v23 = vld [vmem:[#allocation2 + $0x2e] ss:$0 sm:$0xff] }
 0x18f   : > { %v2963_v60 = vrot.slane %v2939_v11, 2  ;;  %v2830_v18 = vmul.f32 %v6953_v43, %v2825_v17  ;;  %v2831_v35 = vadd.f32 %v2827_v27, %v2784_v37  ;;  %v10575_v5 = vrot.slane %v8267_v7, 4  ;;  %v6937_v37 = vld [vmem:[#allocation2 + $0xe] ss:$0 sm:$0xff]  ;;  %v4911_v27 = vld [vmem:[#allocation3 + $0x1d] sm:$0x1] }
 0x190   : > { %v10576_v6 = vrot.slane %v8273_v59, 4  ;;  %v2832_v9 = vadd.f32 %v2828_v40, %v2785_v29  ;;  %v2833_v46 = vadd.f32 %v2829_v32, %v2786_v4  ;;  %v10577_v48 = vrot.slane %v8279_v28, 4  ;;  %v6947_v50 = vld [vmem:[#allocation2 + $0x4e] ss:$0 sm:$0xff]  ;;  %v8325_v40 = vld [vmem:[#allocation3 + $0x58] sm:$0x1] }
 0x191   : > { %v1953_v41 = vmax.f32 %v8267_v7, %v10575_v5  ;;  %v2962_v38 = vsel %vm1598_vm6, %v2961_v0, %v2960_v21  ;;  %v2834_v3 = vadd.f32 %v2830_v18, %v2787_v51  ;;  %v2874_v45 = vmul.f32 %v6935_v2, %v2872_v20  ;;  %v6955_v43 = vld [vmem:[#allocation2 + $0x6e] ss:$0 sm:$0xff]  ;;  %v6939_v18 = vld [vmem:[#allocation2 + $0xf] ss:$0 sm:$0xff] }
 0x192   : > { %v1960_v16 = vmax.f32 %v8273_v59, %v10576_v6  ;;  %v1967_v17 = vmax.f32 %v8279_v28, %v10577_v48  ;;  %v2875_v7 = vmul.f32 %v6936_v49, %v2872_v20  ;;  %v2876_v62 = vmul.f32 %v6946_v56, %v2872_v20  ;;  %v4864_v28 = vld [vmem:[#allocation3 + $0x1c] sm:$0x1]  ;;  %v1085_v6 = vpop.f32.mrf.mxu2 }
 0x193   : > { %v2919_v39 = vsel %vm1604_vm8, %v2918_v15, %v2917_v34  ;;  %v2965_v59 = vrot.slane %v2940_v57, 1  ;;  %v1948_v22 = vmax.f32 %v8290_v58, %v1947_v61  ;;  %v2964_v11 = vsel %vm1601_vm7, %v2963_v60, %v2962_v38 }
 0x194   : > { %v2877_v29 = vmul.f32 %v6954_v30, %v2872_v20  ;;  %v2878_v4 = vadd.f32 %v2874_v45, %v2831_v35  ;;  %v4978_v21 = vrot.slane %v8312_v33, 7  ;;  %v5025_v36 = vrot.slane %v8314_v42, 7  ;;  %v1132_v45 = vpop.f32.mrf.mxu3 }
 0x195   : > { %v2879_v0 = vadd.f32 %v2875_v7, %v2832_v9  ;;  %v2880_v51 = vadd.f32 %v2876_v62, %v2833_v46  ;;  %v1954_v32 = vrot.slane %v1953_v41, 2  ;;  %v1961_v15 = vrot.slane %v1960_v16, 2  ;;  %v6940_v9 = vld [vmem:[#allocation2 + $0x2f] ss:$0 sm:$0xff]  ;;  %v4958_v7 = vld [vmem:[#allocation3 + $0x1e] sm:$0x1] }
 0x196   : > { %v2881_v2 = vadd.f32 %v2877_v29, %v2834_v3  ;;  %v2921_v34 = vmul.f32 %v6937_v37, %v2919_v39  ;;  %v1968_v58 = vrot.slane %v1967_v17, 2  ;;  %v2922_v61 = vmul.f32 %v6938_v23, %v2919_v39  ;;  %v6948_v46 = vld [vmem:[#allocation2 + $0x4f] ss:$0 sm:$0xff]  ;;  %v4725_v23 = vld [vmem:[#allocation3 + $0x59] sm:$0x1] }
 0x197   : > { %v2923_v60 = vmul.f32 %v6947_v50, %v2919_v39  ;;  %v2966_v20 = vsel %vm1604_vm8, %v2965_v59, %v2964_v11  ;;  %v10578_v35 = vrot.slane %v8219_v8, 7  ;;  %v1949_v49 = vrot.slane %v1948_v22, 1  ;;  %v6956_v8 = vld [vmem:[#allocation2 + $0x6f] ss:$0 sm:$0xff] }
 0x198   : > { %v2924_v56 = vmul.f32 %v6955_v43, %v2919_v39  ;;  %v2925_v5 = vadd.f32 %v2921_v34, %v2878_v4  ;;  %v10579_v30 = vrot.slane %v8223_v26, 7  ;;  %v4702_v48 = vrot.slane %v8325_v40, 6  ;;  %v994_v4 = vpop.f32.mrf.mxu0  ;;  %v4772_v43 = vld [vmem:[#allocation3 + $0x5a] sm:$0x1]  ;;  %v5005_v34 = vld [vmem:[#allocation3 + $0x1f] sm:$0x1] }
 0x199   : > { %v8331_v57 = vsel %vm1586_vm2, %v10578_v35, %v4864_v28  ;;  %v2926_v38 = vadd.f32 %v2922_v61, %v2879_v0  ;;  %v2927_v3 = vadd.f32 %v2923_v60, %v2880_v51  ;;  %v1955_v62 = vmax.f32 %v1953_v41, %v1954_v32  ;;  %v4819_v28 = vld [vmem:[#allocation3 + $0x5b] sm:$0x1] }
 0x19a   : > { %v8336_v33 = vsel %vm1586_vm2, %v10579_v30, %v4911_v27  ;;  %v1962_v59 = vmax.f32 %v1960_v16, %v1961_v15  ;;  %v2928_v37 = vadd.f32 %v2924_v56, %v2881_v2  ;;  %v2968_v39 = vmul.f32 %v6939_v18, %v2966_v20  ;;  %v8344_v2 = vld [vmem:[#allocation3 + $0x5c] sm:$0x1] }
 0x19b   : > { %v1969_v50 = vmax.f32 %v1967_v17, %v1968_v58  ;;  %v2969_v11 = vmul.f32 %v6940_v9, %v2966_v20  ;;  %v2970_v29 = vmul.f32 %v6948_v46, %v2966_v20  ;;  %v1086_v26 = vadd.f32 %v1085_v6, %v7738_v1  ;;  %v8346_v58 = vld [vmem:[#allocation3 + $0x5d] sm:$0x1] }
 0x19c   : > { %v1950_v27 = vmax.f32 %v1948_v22, %v1949_v49  ;;  %v2971_v40 = vmul.f32 %v6956_v8, %v2966_v20  ;;  %v2972_v0 = vadd.f32 %v2968_v39, %v2925_v5  ;;  %v1133_v51 = vadd.f32 %v1132_v45, %v7738_v1  ;;  %v3648_v8 = vld [vmem:[#allocation3 + $0x90] sm:$0x1] }
 0x19d   : > { %v8342_v41 = vsel %vm1586_vm2, %v4978_v21, %v4958_v7  ;;  %v2973_v16 = vadd.f32 %v2969_v11, %v2926_v38  ;;  %v2974_v32 = vadd.f32 %v2970_v29, %v2927_v3  ;;  %v1093_v15 = vmax.f32 %v1086_v26, 0.0  ;;  %v1041_v38 = vpop.f32.mrf.mxu1  ;;  %v3691_v7 = vld [vmem:[#allocation3 + $0x91] sm:$0x1]  ;;  %v3832_v11 = vld [vmem:[#allocation3 + $0x94] sm:$0x1] }
 0x19e   : > { %v4745_v17 = vrot.slane %v4725_v23, 6  ;;  %v2975_v61 = vadd.f32 %v2971_v40, %v2928_v37  ;;  %v1140_v60 = vmax.f32 %v1133_v51, 0.0  ;;  %v995_v22 = vadd.f32 %v994_v4, %v7752_v12  ;;  %v3785_v23 = vld [vmem:[#allocation3 + $0x93] sm:$0x1]  ;;  %v3926_v51 = vld [vmem:[#allocation3 + $0x96] sm:$0x1] }
 0x19f   : > { %v4792_v20 = vrot.slane %v4772_v43, 6  ;;  %v4839_v18 = vrot.slane %v4819_v28, 6  ;;  %v1956_v35 = vrot.slane %v1955_v62, 1  ;;  %v1963_v1 = vrot.slane %v1962_v59, 1  ;;  %1098 = vst.msk [vmem:[#allocation3 + $0xd0] sm:$0xff] %vm587_vm1, %v1093_v15 }
 0x1a0   : > { %v1970_v21 = vrot.slane %v1969_v50, 1  ;;  %v1972_v49 = vsub.f32 %v8231_v31, %v1950_v27  ;;  %v8351_v56 = vmul.f32 0.5, %v2972_v0  ;;  %1145 = vst.msk [vmem:[#allocation3 + $0xf0] sm:$0xff] %vm587_vm1, %v1140_v60  ;;  %v1000_v5 = vmax.f32 %v995_v22, 0.0  ;;  %v6960_v22 = vld [vmem:[#allocation2 + $0x31] ss:$0 sm:$0xff] }
 0x1a1   : > { %v8356_v46 = vmul.f32 0.5, %v2973_v16  ;;  %v8358_v30 = vmul.f32 0.5, %v2974_v32  ;;  %v8363_v3 = vsel %vm1586_vm2, %v5025_v36, %v5005_v34  ;;  %v8367_v31 = vsel %vm1589_vm3, %v4702_v48, %v8214_v44  ;;  %v3738_v48 = vld [vmem:[#allocation3 + $0x92] sm:$0x1]  ;;  %v3649_v34 = vld [vmem:[#allocation3 + $0xb0] sm:$0x1] }
 0x1a2   : > { %10580 = vst [vmem:[#allocation28_spill] sm:$0xff] %v8351_v56  ;;  %v8369_v45 = vmul.f32 0.5, %v2975_v61  ;;  %v1042_v37 = vadd.f32 %v1041_v38, %v7752_v12  ;;  %v8375_v39 = vsel %vm1589_vm3, %v4745_v17, %v8217_v10  ;;  %v8379_v42 = vsel %vm1589_vm3, %v4792_v20, %v8238_v54  ;;  %v3879_v10 = vld [vmem:[#allocation3 + $0x95] sm:$0x1]  ;;  %v3739_v38 = vld [vmem:[#allocation3 + $0xb2] sm:$0x1] }
 0x1a3   : > { %10581 = vst [vmem:[#allocation29_spill] sm:$0xff] %v8356_v46  ;;  %v8381_v36 = vmax.f32 %v1955_v62, %v1956_v35  ;;  %v8383_v44 = vmax.f32 %v1962_v59, %v1963_v1  ;;  %v8385_v29 = vmax.f32 %v1969_v50, %v1970_v21  ;;  %v8387_v26 = vmul.f32 1.442695, %v1972_v49  ;;  %v3973_v1 = vld [vmem:[#allocation3 + $0x97] sm:$0x1] }
 0x1a4   : > { %10582 = vst [vmem:[#allocation30_spill] sm:$0xff] %v8358_v30  ;;  %v2980_v4 = vsel %vm587_vm1, %v8351_v56, -inf  ;;  %v1047_v43 = vmax.f32 %v1042_v37, 0.0  ;;  %v2987_v54 = vsel %vm587_vm1, %v8356_v46, -inf  ;;  %v2994_v62 = vsel %vm587_vm1, %v8358_v30, -inf }
 0x1a5   : > { %10583 = vst [vmem:[#allocation31_spill] sm:$0xff] %v8369_v45  ;;  %v3670_v59 = vrot.slane %v3648_v8, 4  ;;  %v3713_v28 = vrot.slane %v3691_v7, 4  ;;  %v3001_v27 = vsel %vm587_vm1, %v8369_v45, -inf  ;;  %v3760_v50 = vrot.slane %v3738_v48, 4 }
 0x1a6   : > { %1005 = vst.msk [vmem:[#allocation3 + $0x98] sm:$0xff] %vm587_vm1, %v1000_v5  ;;  %v3807_v40 = vrot.slane %v3785_v23, 4  ;;  %v3854_v0 = vrot.slane %v3832_v11, 4  ;;  %v8399_v16 = vsel %vm1589_vm3, %v4839_v18, %v8241_v53  ;;  %v2981_v15 = vrot.slane %v2980_v4, 4  ;;  %v3650_v61 = vld [vmem:[#allocation3 + $0xd0] sm:$0x1] }
 0x1a7   : > { %10584 = vst [vmem:[#allocation32_spill] sm:$0xff] %v8379_v42  ;;  %v3901_v17 = vrot.slane %v3879_v10, 4  ;;  %v2988_v20 = vrot.slane %v2987_v54, 4  ;;  %v2995_v35 = vrot.slane %v2994_v62, 4  ;;  %v3692_v21 = vld [vmem:[#allocation3 + $0xb1] sm:$0x1]  ;;  %v3671_v18 = vsel %vm1595_vm5, %v3670_v59, %v8120_v24 }
 0x1a8   : > { %10585 = vst [vmem:[#allocation33_spill] sm:$0xff] %v8399_v16  ;;  %v3002_v53 = vrot.slane %v3001_v27, 4  ;;  %v3714_v49 = vsel %vm1595_vm5, %v3713_v28, %v8125_v25  ;;  %v3672_v5 = vrot.slane %v3649_v34, 3  ;;  %v3786_v8 = vld [vmem:[#allocation3 + $0xb3] sm:$0x1]  ;;  %v3761_v7 = vsel %vm1595_vm5, %v3760_v50, %v8130_v55 }
 0x1a9   : > { %1052 = vst.msk [vmem:[#allocation3 + $0xb8] sm:$0xff] %vm587_vm1, %v1047_v43  ;;  %v3808_v37 = vsel %vm1595_vm5, %v3807_v40, %v8133_v63  ;;  %v3855_v48 = vsel %vm1595_vm5, %v3854_v0, %v8183_v14  ;;  %v3674_v23 = vrot.slane %v3650_v61, 2  ;;  %v3693_v11 = vld [vmem:[#allocation3 + $0xd1] sm:$0x1]  ;;  %v3740_v10 = vld [vmem:[#allocation3 + $0xd2] sm:$0x1]  ;;  %v8418_v43 = vmax.f32 %v2980_v4, %v2981_v15 }
 0x1aa   : > { %v3902_v24 = vsel %vm1595_vm5, %v3901_v17, %v8189_v19  ;;  %v3948_v25 = vrot.slane %v3926_v51, 4  ;;  %v3995_v59 = vrot.slane %v3973_v1, 4  ;;  %v3833_v28 = vld [vmem:[#allocation3 + $0xb4] sm:$0x1]  ;;  %v3880_v34 = vld [vmem:[#allocation3 + $0xb5] sm:$0x1]  ;;  %v8422_v9 = vmax.f32 %v2987_v54, %v2988_v20 }
 0x1ab   : > { %v8424_v55 = vmax.f32 %v2994_v62, %v2995_v35  ;;  %v3715_v63 = vrot.slane %v3692_v21, 3  ;;  %v3762_v50 = vrot.slane %v3739_v38, 3  ;;  %v3927_v40 = vld [vmem:[#allocation3 + $0xb6] sm:$0x1]  ;;  %v3651_v14 = vld [vmem:[#allocation3 + $0xf0] sm:$0x1]  ;;  %v8426_v0 = vmax.f32 %v3001_v27, %v3002_v53 }
 0x1ac   : > { %v3673_v4 = vsel %vm1598_vm6, %v3672_v5, %v3671_v18  ;;  %v3717_v15 = vrot.slane %v3693_v11, 2  ;;  %v3764_v61 = vrot.slane %v3740_v10, 2  ;;  %v3694_v6 = vld [vmem:[#allocation3 + $0xf1] sm:$0x1]  ;;  %v3741_v19 = vld [vmem:[#allocation3 + $0xf2] sm:$0x1]  ;;  %7022 = vpow2.f32 %v8387_v26 }
 0x1ad   : > { %v3809_v51 = vrot.slane %v3786_v8, 3  ;;  %v3856_v17 = vrot.slane %v3833_v28, 3  ;;  %v3903_v1 = vrot.slane %v3880_v34, 3  ;;  %v3675_v54 = vsel %vm1601_vm7, %v3674_v23, %v3673_v4  ;;  %v3787_v20 = vld [vmem:[#allocation3 + $0xd3] sm:$0x1]  ;;  %v10586_v35 = vld [vmem:[#allocation26_spill] sm:$0xff] }
 0x1ae   : > { %v6957_v62 = vld [vmem:[#allocation2 + $0x10] ss:$0 sm:$0xff]  ;;  %v3949_v21 = vsel %vm1595_vm5, %v3948_v25, %v10586_v35  ;;  %v3950_v53 = vrot.slane %v3927_v40, 3  ;;  %v8436_v18 = vld [vmem:[#allocation3 + $0xb7] sm:$0x1]  ;;  %v3676_v5 = vrot.slane %v3651_v14, 1  ;;  %v3716_v8 = vsel %vm1598_vm6, %v3715_v63, %v3714_v49 }
 0x1af   : > { %v10587_v38 = vld [vmem:[#allocation27_spill] sm:$0xff]  ;;  %v3763_v10 = vsel %vm1598_vm6, %v3762_v50, %v3761_v7  ;;  %v3719_v23 = vrot.slane %v3694_v6, 1  ;;  %v3766_v34 = vrot.slane %v3741_v19, 1  ;;  %v3718_v25 = vsel %vm1601_vm7, %v3717_v15, %v3716_v8 }
 0x1b0   : > { %v8434_v27 = vsel %vm1595_vm5, %v3995_v59, %v10587_v38  ;;  %v6958_v11 = vld [vmem:[#allocation2 + $0x30] ss:$0 sm:$0xff]  ;;  %v3834_v28 = vld [vmem:[#allocation3 + $0xd4] sm:$0x1]  ;;  %v6959_v4 = vld [vmem:[#allocation2 + $0x11] ss:$0 sm:$0xff]  ;;  %v3765_v59 = vsel %vm1601_vm7, %v3764_v61, %v3763_v10  ;;  %v3677_v40 = vsel %vm1604_vm8, %v3676_v5, %v3675_v54  ;;  %v3810_v14 = vsel %vm1598_vm6, %v3809_v51, %v3808_v37 }
 0x1b1   : > { %v6973_v60 = vld [vmem:[#allocation2 + $0x50] ss:$0 sm:$0xff]  ;;  %v3811_v35 = vrot.slane %v3787_v20, 2  ;;  %v3857_v49 = vsel %vm1598_vm6, %v3856_v17, %v3855_v48  ;;  %v3904_v7 = vsel %vm1598_vm6, %v3903_v1, %v3902_v24  ;;  %v3788_v63 = vld [vmem:[#allocation3 + $0xf3] sm:$0x1]  ;;  %v8448_v50 = vsel %vm1598_vm6, %v3950_v53, %v3949_v21 }
 0x1b2   : > { %v6981_v38 = vld [vmem:[#allocation2 + $0x70] ss:$0 sm:$0xff]  ;;  %v3858_v19 = vrot.slane %v3834_v28, 2  ;;  %v3881_v15 = vld [vmem:[#allocation3 + $0xd5] sm:$0x1]  ;;  %v3679_v61 = vmul.f32 %v6957_v62, %v3677_v40  ;;  %v3680_v20 = vmul.f32 %v6958_v11, %v3677_v40  ;;  %v3681_v10 = vmul.f32 %v6973_v60, %v3677_v40 }
 0x1b3   : > { %v8450_v8 = vld [vmem:[#allocation3 + $0xd6] sm:$0x1]  ;;  %v6974_v54 = vld [vmem:[#allocation2 + $0x51] ss:$0 sm:$0xff]  ;;  %v3682_v37 = vmul.f32 %v6981_v38, %v3677_v40  ;;  %v3720_v48 = vsel %vm1604_vm8, %v3719_v23, %v3718_v25  ;;  %v3767_v24 = vsel %vm1604_vm8, %v3766_v34, %v3765_v59  ;;  %v6961_v51 = vld [vmem:[#allocation2 + $0x12] ss:$0 sm:$0xff]  ;;  %v3812_v17 = vsel %vm1601_vm7, %v3811_v35, %v3810_v14 }
 0x1b4   : > { %v6982_v5 = vld [vmem:[#allocation2 + $0x71] ss:$0 sm:$0xff]  ;;  %v3975_v1 = vld [vmem:[#allocation3 + $0xd7] sm:$0x1]  ;;  %v3722_v21 = vmul.f32 %v6959_v4, %v3720_v48  ;;  %v3723_v53 = vmul.f32 %v6960_v22, %v3720_v48  ;;  %v3813_v28 = vrot.slane %v3788_v63, 1  ;;  %v3905_v16 = vrot.slane %v3881_v15, 2 }
 0x1b5   : > { %v6962_v32 = vld [vmem:[#allocation2 + $0x32] ss:$0 sm:$0xff]  ;;  %v6963_v6 = vld [vmem:[#allocation2 + $0x13] ss:$0 sm:$0xff]  ;;  %v3952_v62 = vrot.slane %v8450_v8, 2  ;;  %v3724_v11 = vmul.f32 %v6974_v54, %v3720_v48  ;;  %v3725_v42 = vmul.f32 %v6982_v5, %v3720_v48  ;;  %v3859_v23 = vsel %vm1601_vm7, %v3858_v19, %v3857_v49 }
 0x1b6   : > { %v6964_v60 = vld [vmem:[#allocation2 + $0x33] ss:$0 sm:$0xff]  ;;  %v6975_v40 = vld [vmem:[#allocation2 + $0x52] ss:$0 sm:$0xff]  ;;  %v3726_v34 = vadd.f32 %v3722_v21, %v3679_v61  ;;  %v3727_v25 = vadd.f32 %v3723_v53, %v3680_v20  ;;  %v3769_v59 = vmul.f32 %v6961_v51, %v3767_v24  ;;  %v3999_v14 = vrot.slane %v3975_v1, 2 }
 0x1b7   : > { %v6983_v38 = vld [vmem:[#allocation2 + $0x72] ss:$0 sm:$0xff]  ;;  %v6976_v35 = vld [vmem:[#allocation2 + $0x53] ss:$0 sm:$0xff]  ;;  %v3728_v4 = vadd.f32 %v3724_v11, %v3681_v10  ;;  %v3729_v22 = vadd.f32 %v3725_v42, %v3682_v37  ;;  %v3770_v63 = vmul.f32 %v6962_v32, %v3767_v24  ;;  %v3835_v12 = vld [vmem:[#allocation3 + $0xf4] sm:$0x1]  ;;  %v3771_v15 = vmul.f32 %v6975_v40, %v3767_v24 }
 0x1b8   : > { %v6984_v45 = vld [vmem:[#allocation2 + $0x73] ss:$0 sm:$0xff]  ;;  %v3772_v30 = vmul.f32 %v6983_v38, %v3767_v24  ;;  %v3773_v8 = vadd.f32 %v3769_v59, %v3726_v34  ;;  %v3814_v54 = vsel %vm1604_vm8, %v3813_v28, %v3812_v17  ;;  %v3882_v5 = vld [vmem:[#allocation3 + $0xf5] sm:$0x1]  ;;  %v6965_v19 = vld [vmem:[#allocation2 + $0x14] ss:$0 sm:$0xff]  ;;  %v3906_v32 = vsel %vm1601_vm7, %v3905_v16, %v3904_v7 }
 0x1b9   : > { %v3774_v48 = vadd.f32 %v3770_v63, %v3727_v25  ;;  %v3816_v46 = vmul.f32 %v6963_v6, %v3814_v54  ;;  %v3817_v56 = vmul.f32 %v6964_v60, %v3814_v54  ;;  %v3818_v49 = vmul.f32 %v6976_v35, %v3814_v54  ;;  %v6966_v61 = vld [vmem:[#allocation2 + $0x34] ss:$0 sm:$0xff]  ;;  %v3929_v53 = vld [vmem:[#allocation3 + $0xf6] sm:$0x1]  ;;  %v6986_v38 = vld [vmem:[#allocation2 + $0x75] ss:$0 sm:$0xff] }
 0x1ba   : > { %v3775_v20 = vadd.f32 %v3771_v15, %v3728_v4  ;;  %v3776_v51 = vadd.f32 %v3772_v30, %v3729_v22  ;;  %v3819_v1 = vmul.f32 %v6984_v45, %v3814_v54  ;;  %v3860_v10 = vrot.slane %v3835_v12, 1  ;;  %v6977_v42 = vld [vmem:[#allocation2 + $0x54] ss:$0 sm:$0xff]  ;;  %v6967_v30 = vld [vmem:[#allocation2 + $0x15] ss:$0 sm:$0xff] }
 0x1bb   : > { %v3820_v37 = vadd.f32 %v3816_v46, %v3773_v8  ;;  %v3821_v21 = vadd.f32 %v3817_v56, %v3774_v48  ;;  %v3907_v24 = vrot.slane %v3882_v5, 1  ;;  %v6985_v11 = vld [vmem:[#allocation2 + $0x74] ss:$0 sm:$0xff]  ;;  %v10588_v17 = vrot.slane %v8436_v18, 3  ;;  %v6968_v45 = vld [vmem:[#allocation2 + $0x35] ss:$0 sm:$0xff] }
 0x1bc   : > { %v3822_v28 = vadd.f32 %v3818_v49, %v3775_v20  ;;  %v3823_v60 = vadd.f32 %v3819_v1, %v3776_v51  ;;  %v3861_v40 = vsel %vm1604_vm8, %v3860_v10, %v3859_v23  ;;  %v6978_v12 = vld [vmem:[#allocation2 + $0x55] ss:$0 sm:$0xff]  ;;  %v3953_v16 = vsel %vm1601_vm7, %v3952_v62, %v8448_v50  ;;  %v3976_v59 = vld [vmem:[#allocation3 + $0xf7] sm:$0x1]  ;;  %v6969_v63 = vld [vmem:[#allocation2 + $0x16] ss:$0 sm:$0xff] }
 0x1bd   : > { %v3998_v6 = vsel %vm1598_vm6, %v10588_v17, %v8434_v27  ;;  %v3863_v46 = vmul.f32 %v6965_v19, %v3861_v40  ;;  %v3864_v56 = vmul.f32 %v6966_v61, %v3861_v40  ;;  %v3865_v7 = vmul.f32 %v6977_v42, %v3861_v40  ;;  %v6970_v62 = vld [vmem:[#allocation2 + $0x36] ss:$0 sm:$0xff]  ;;  %v6971_v42 = vld [vmem:[#allocation2 + $0x17] ss:$0 sm:$0xff] }
 0x1be   : > { %v4000_v34 = vsel %vm1601_vm7, %v3999_v14, %v3998_v6  ;;  %v3866_v25 = vmul.f32 %v6985_v11, %v3861_v40  ;;  %v3908_v18 = vsel %vm1604_vm8, %v3907_v24, %v3906_v32  ;;  %v3954_v27 = vrot.slane %v3929_v53, 1  ;;  %v6979_v5 = vld [vmem:[#allocation2 + $0x56] ss:$0 sm:$0xff]  ;;  %v6972_v32 = vld [vmem:[#allocation2 + $0x37] ss:$0 sm:$0xff] }
 0x1bf   : > { %v3867_v35 = vadd.f32 %v3863_v46, %v3820_v37  ;;  %v3868_v4 = vadd.f32 %v3864_v56, %v3821_v21  ;;  %v3869_v23 = vadd.f32 %v3865_v7, %v3822_v28  ;;  %v3910_v22 = vmul.f32 %v6967_v30, %v3908_v18  ;;  %v6987_v61 = vld [vmem:[#allocation2 + $0x76] ss:$0 sm:$0xff]  ;;  %v4960_v11 = vld [vmem:[#allocation3 + $0x5e] sm:$0x1]  ;;  %v6980_v30 = vld [vmem:[#allocation2 + $0x57] ss:$0 sm:$0xff] }
 0x1c0   : > { %v3870_v15 = vadd.f32 %v3866_v25, %v3823_v60  ;;  %v3911_v8 = vmul.f32 %v6968_v45, %v3908_v18  ;;  %v3912_v54 = vmul.f32 %v6978_v12, %v3908_v18  ;;  %v3913_v50 = vmul.f32 %v6986_v38, %v3908_v18  ;;  %v6988_v7 = vld [vmem:[#allocation2 + $0x77] ss:$0 sm:$0xff]  ;;  %v5007_v18 = vld [vmem:[#allocation3 + $0x5f] sm:$0x1] }
 0x1c1   : > { %v2983_v48 = vrot.slane %v8418_v43, 2  ;;  %v3914_v49 = vadd.f32 %v3910_v22, %v3867_v35  ;;  %v3955_v14 = vsel %vm1604_vm8, %v3954_v27, %v3953_v16  ;;  %v4001_v19 = vrot.slane %v3976_v59, 1  ;;  %v4683_v35 = vld [vmem:[#allocation3 + $0x78] sm:$0x1] }
 0x1c2   : > { %v3915_v20 = vadd.f32 %v3911_v8, %v3868_v4  ;;  %v3916_v51 = vadd.f32 %v3912_v54, %v3869_v23  ;;  %v3917_v1 = vadd.f32 %v3913_v50, %v3870_v15  ;;  %v3957_v10 = vmul.f32 %v6969_v63, %v3955_v14 }
 0x1c3   : > { %v2990_v37 = vrot.slane %v8422_v9, 2  ;;  %v3958_v21 = vmul.f32 %v6970_v62, %v3955_v14  ;;  %v3959_v24 = vmul.f32 %v6979_v5, %v3955_v14  ;;  %v4002_v53 = vsel %vm1604_vm8, %v4001_v19, %v4000_v34 }
 0x1c4   : > { %v10589_v17 = vsub.f32 %v8233_v47, %v8381_v36  ;;  %v2997_v28 = vrot.slane %v8424_v55, 2  ;;  %v3960_v60 = vmul.f32 %v6987_v61, %v3955_v14  ;;  %v3961_v40 = vadd.f32 %v3957_v10, %v3914_v49  ;;  %v8504_v49 = vld [vmem:[#allocation3 + $0x7c] sm:$0x1]  ;;  %v8510_v61 = vpop.eup %7022  ;;  %v8523_v10 = vld [vmem:[#allocation3 + $0x7d] sm:$0x1] }
 0x1c5   : > { %v10590_v45 = vsub.f32 %v8243_v13, %v8383_v44  ;;  %v3004_v16 = vrot.slane %v8426_v0, 2  ;;  %v3962_v46 = vadd.f32 %v3958_v21, %v3915_v20  ;;  %v3963_v56 = vadd.f32 %v3959_v24, %v3916_v51  ;;  %v4726_v13 = vld [vmem:[#allocation3 + $0x79] sm:$0x1] }
 0x1c6   : > { %v1978_v6 = vmul.f32 1.442695, %v10589_v17  ;;  %v2984_v38 = vmax.f32 %v8418_v43, %v2983_v48  ;;  %v3964_v34 = vadd.f32 %v3960_v60, %v3917_v1  ;;  %v4004_v25 = vmul.f32 %v6971_v42, %v4002_v53  ;;  %v8502_v48 = vld [vmem:[#allocation3 + $0x7b] sm:$0x1]  ;;  %v8541_v17 = vld [vmem:[#allocation3 + $0x7f] sm:$0x1] }
 0x1c7   : > { %v1980_v12 = vmul.f32 1.442695, %v10590_v45  ;;  %v4005_v47 = vmul.f32 %v6972_v32, %v4002_v53  ;;  %v4980_v36 = vrot.slane %v4960_v11, 6  ;;  %v2991_v27 = vmax.f32 %v8422_v9, %v2990_v37 }
 0x1c8   : > { %v4006_v59 = vmul.f32 %v6980_v30, %v4002_v53  ;;  %v2998_v44 = vmax.f32 %v8424_v55, %v2997_v28  ;;  %v4007_v4 = vmul.f32 %v6988_v7, %v4002_v53  ;;  %v4008_v23 = vadd.f32 %v4004_v25, %v3961_v40  ;;  %v4961_v53 = vld [vmem:[#allocation3 + $0x7e] sm:$0x1] }
 0x1c9   : > { %v4009_v22 = vadd.f32 %v4005_v47, %v3962_v46  ;;  %7024 = vpow2.f32 %v1978_v6  ;;  %v10591_v43 = vsub.f32 %v8255_v52, %v8385_v29  ;;  %v3005_v15 = vmax.f32 %v8426_v0, %v3004_v16  ;;  %v8500_v0 = vld [vmem:[#allocation3 + $0x7a] sm:$0x1] }
 0x1ca   : > { %v4010_v8 = vadd.f32 %v4006_v59, %v3963_v56  ;;  %v5027_v54 = vrot.slane %v5007_v18, 6  ;;  %7026 = vpow2.f32 %v1980_v12  ;;  %v2985_v26 = vrot.slane %v2984_v38, 1  ;;  %v10594_v46 = vld [vmem:[#allocation28_spill] sm:$0xff] }
 0x1cb   : > { %v1982_v63 = vmul.f32 1.442695, %v10591_v43  ;;  %v4011_v9 = vadd.f32 %v4007_v4, %v3964_v34  ;;  %v10592_v50 = vrot.slane %v8344_v2, 6  ;;  %v10593_v62 = vrot.slane %v8346_v58, 6 }
 0x1cc   : > { %v4704_v52 = vrot.slane %v4683_v35, 5  ;;  %v4747_v29 = vrot.slane %v4726_v13, 5  ;;  %v2992_v14 = vrot.slane %v2991_v27, 1  ;;  %v2999_v19 = vrot.slane %v2998_v44, 1  ;;  %v10596_v35 = vld [vmem:[#allocation29_spill] sm:$0xff] }
 0x1cd   : > { %v8492_v55 = vsel %vm1589_vm3, %v10592_v50, %v8331_v57  ;;  %v8498_v5 = vsel %vm1589_vm3, %v10593_v62, %v8336_v33  ;;  %v8506_v2 = vmul.f32 0.5, %v4008_v23  ;;  %v8508_v57 = vmul.f32 0.5, %v4009_v22  ;;  %v1212_v22 = vpop.f32.mrf.mxu0 }
 0x1ce   : > { %v8514_v33 = vsel %vm1589_vm3, %v4980_v36, %v8342_v41  ;;  %7028 = vpow2.f32 %v1982_v63  ;;  %v3006_v58 = vrot.slane %v3005_v15, 1  ;;  %v8516_v20 = vmul.f32 0.5, %v4010_v8  ;;  %v10598_v63 = vld [vmem:[#allocation31_spill] sm:$0xff] }
 0x1cf   : > { %v8520_v51 = vsel %vm1589_vm3, %v5027_v54, %v8363_v3  ;;  %v4794_v1 = vrot.slane %v8500_v0, 5  ;;  %v2986_v42 = vmax.f32 %v2984_v38, %v2985_v26  ;;  %v8525_v32 = vmul.f32 0.5, %v4011_v9  ;;  %v8527_v37 = vpop.eup %7024  ;;  %v1088_v38 = vpop.f32.mrf.mxu2  ;;  %v10599_v54 = vld [vmem:[#allocation25_spill] sm:$0xff] }
 0x1d0   : > { %v8531_v41 = vsel %vm1592_vm4, %v4704_v52, %v8367_v31  ;;  %v8535_v21 = vsel %vm1592_vm4, %v4747_v29, %v8375_v39  ;;  %v4841_v3 = vrot.slane %v8502_v48, 5  ;;  %v4888_v24 = vrot.slane %v8504_v49, 5  ;;  %v8539_v11 = vpop.eup %7026  ;;  %v8568_v9 = vpop.permute.xlu2 %1159 }
 0x1d1   : > { %v2993_v6 = vmax.f32 %v2991_v27, %v2992_v14  ;;  %v3000_v28 = vmax.f32 %v2998_v44, %v2999_v19  ;;  %v4016_v60 = vsel %vm587_vm1, %v8506_v2, -inf  ;;  %v4023_v31 = vsel %vm587_vm1, %v8508_v57, -inf  ;;  %v1135_v27 = vpop.f32.mrf.mxu3  ;;  %v10597_v44 = vld [vmem:[#allocation30_spill] sm:$0xff]  ;;  %v1258_v0 = vpop.f32.mrf.mxu1 }
 0x1d2   : > { %v4935_v39 = vrot.slane %v8523_v10, 5  ;;  %v1984_v40 = vsel %vm587_vm1, %v8510_v61, 0.0  ;;  %v3007_v30 = vmax.f32 %v3005_v15, %v3006_v58  ;;  %v4030_v45 = vsel %vm587_vm1, %v8516_v20, -inf }
 0x1d3   : > { %v4982_v12 = vrot.slane %v4961_v53, 5  ;;  %v1991_v16 = vsel %vm587_vm1, %v8527_v37, 0.0  ;;  %v3008_v56 = vsub.f32 %v10594_v46, %v2986_v42  ;;  %v4037_v7 = vsel %vm587_vm1, %v8525_v32, -inf  ;;  %v10600_v46 = vld [vmem:[#allocation32_spill] sm:$0xff] }
 0x1d4   : > { %v8557_v34 = vpop.eup %7028  ;;  %v5029_v25 = vrot.slane %v8541_v17, 5  ;;  %v8562_v47 = vsel %vm587_vm1, %v8539_v11, 0.0  ;;  %v4017_v36 = vrot.slane %v4016_v60, 4  ;;  %v4024_v18 = vrot.slane %v4023_v31, 4 }
 0x1d5   : > { %10595 = vst [vmem:[#allocation26_spill] sm:$0xff] %v8557_v34  ;;  %v1985_v59 = vrot.slane %v1984_v40, 4  ;;  %v3009_v13 = vsub.f32 %v10596_v35, %v2993_v6  ;;  %v3010_v4 = vsub.f32 %v10597_v44, %v3000_v28  ;;  %v4031_v23 = vrot.slane %v4030_v45, 4  ;;  %v4821_v44 = vld [vmem:[#allocation3 + $0x9b] sm:$0x1] }
 0x1d6   : > { %v1992_v43 = vrot.slane %v1991_v16, 4  ;;  %v3011_v15 = vsub.f32 %v10598_v63, %v3007_v30  ;;  %v4038_v8 = vrot.slane %v4037_v7, 4  ;;  %v1089_v26 = vadd.f32 %v1088_v38, %v10599_v54  ;;  %v10601_v38 = vld [vmem:[#allocation33_spill] sm:$0xff] }
 0x1d7   : > { %v8573_v62 = vsel %vm587_vm1, %v8557_v34, 0.0  ;;  %v3012_v52 = vmul.f32 1.442695, %v3008_v56  ;;  %v1136_v29 = vadd.f32 %v1135_v27, %v10599_v54  ;;  %v4018_v48 = vmax.f32 %v4016_v60, %v4017_v36  ;;  %v4684_v36 = vld [vmem:[#allocation3 + $0x98] sm:$0x1] }
 0x1d8   : > { %v4025_v49 = vmax.f32 %v4023_v31, %v4024_v18  ;;  %v1094_v14 = vmax.f32 %v1089_v26, 0.0  ;;  %v1213_v19 = vadd.f32 %v1212_v22, %v8568_v9  ;;  %v3014_v58 = vmul.f32 1.442695, %v3009_v13  ;;  %v4727_v18 = vld [vmem:[#allocation3 + $0x99] sm:$0x1] }
 0x1d9   : > { %v3016_v10 = vmul.f32 1.442695, %v3010_v4  ;;  %v4032_v42 = vmax.f32 %v4030_v45, %v4031_v23  ;;  %v1141_v53 = vmax.f32 %v1136_v29, 0.0  ;;  %v3018_v17 = vmul.f32 1.442695, %v3011_v15 }
 0x1da   : > { %v4039_v6 = vmax.f32 %v4037_v7, %v4038_v8  ;;  %1099 = vst.msk [vmem:[#allocation3 + $0xd8] sm:$0xff] %vm587_vm1, %v1094_v14  ;;  %v1224_v28 = vmax.f32 %v1213_v19, 0.0  ;;  %v1259_v30 = vadd.f32 %v1258_v0, %v8568_v9  ;;  %v4795_v56 = vsel %vm1592_vm4, %v4794_v1, %v10600_v46  ;;  %v4774_v7 = vld [vmem:[#allocation3 + $0x9a] sm:$0x1]  ;;  %v4962_v22 = vld [vmem:[#allocation3 + $0x9e] sm:$0x1] }
 0x1db   : > { %v4842_v60 = vsel %vm1592_vm4, %v4841_v3, %v10601_v38  ;;  %v4889_v31 = vsel %vm1592_vm4, %v4888_v24, %v8492_v55  ;;  %v4936_v45 = vsel %vm1592_vm4, %v4935_v39, %v8498_v5  ;;  %v4983_v27 = vsel %vm1592_vm4, %v4982_v12, %v8514_v33  ;;  %1146 = vst.msk [vmem:[#allocation3 + $0xf8] sm:$0xff] %vm587_vm1, %v1141_v53  ;;  %v4868_v24 = vld [vmem:[#allocation3 + $0x9c] sm:$0x1]  ;;  %v4915_v39 = vld [vmem:[#allocation3 + $0x9d] sm:$0x1] }
 0x1dc   : > { %v4019_v35 = vrot.slane %v4018_v48, 2  ;;  %v4026_v13 = vrot.slane %v4025_v49, 2  ;;  %v1270_v1 = vmax.f32 %v1259_v30, 0.0  ;;  %v5030_v3 = vsel %vm1592_vm4, %v5029_v25, %v8520_v51  ;;  %1228 = vst.msk [vmem:[#allocation4] sm:$0xff] %vm587_vm1, %v1224_v28  ;;  %v5009_v25 = vld [vmem:[#allocation3 + $0x9f] sm:$0x1] }
 0x1dd   : > { %v8592_v4 = vadd.f32 %v1985_v59, %v1984_v40  ;;  %v8594_v55 = vadd.f32 %v1992_v43, %v1991_v16  ;;  %v4033_v5 = vrot.slane %v4032_v42, 2  ;;  %7030 = vpow2.f32 %v3012_v52  ;;  %v4685_v15 = vld [vmem:[#allocation3 + $0xb8] sm:$0x1]  ;;  %v4728_v8 = vld [vmem:[#allocation3 + $0xb9] sm:$0x1] }
 0x1de   : > { %v4040_v33 = vrot.slane %v4039_v6, 2  ;;  %v4706_v12 = vrot.slane %v4684_v36, 4  ;;  %v4749_v23 = vrot.slane %v4727_v18, 4  ;;  %1275 = vst.msk [vmem:[#allocation4 + $0x20] sm:$0xff] %vm587_vm1, %v1270_v1  ;;  %7032 = vpow2.f32 %v3014_v58  ;;  %v4775_v29 = vld [vmem:[#allocation3 + $0xba] sm:$0x1] }
 0x1df   : > { %v4796_v51 = vrot.slane %v4774_v7, 4  ;;  %v4843_v40 = vrot.slane %v4821_v44, 4  ;;  %7034 = vpow2.f32 %v3016_v10  ;;  %v4020_v16 = vmax.f32 %v4018_v48, %v4019_v35  ;;  %v4822_v53 = vld [vmem:[#allocation3 + $0xbb] sm:$0x1]  ;;  %v4916_v30 = vld [vmem:[#allocation3 + $0xbd] sm:$0x1] }
 0x1e0   : > { %v4027_v59 = vmax.f32 %v4025_v49, %v4026_v13  ;;  %v4890_v43 = vrot.slane %v4868_v24, 4  ;;  %7036 = vpow2.f32 %v3018_v17  ;;  %v4034_v54 = vmax.f32 %v4032_v42, %v4033_v5  ;;  %v4869_v42 = vld [vmem:[#allocation3 + $0xbc] sm:$0x1]  ;;  %v4963_v18 = vld [vmem:[#allocation3 + $0xbe] sm:$0x1] }
 0x1e1   : > { %v4937_v26 = vrot.slane %v4915_v39, 4  ;;  %v4984_v52 = vrot.slane %v4962_v22, 4  ;;  %v4041_v0 = vmax.f32 %v4039_v6, %v4040_v33  ;;  %v4707_v14 = vsel %vm1595_vm5, %v4706_v12, %v8531_v41  ;;  %v4686_v10 = vld [vmem:[#allocation3 + $0xd8] sm:$0x1]  ;;  %v4729_v13 = vld [vmem:[#allocation3 + $0xd9] sm:$0x1] }
 0x1e2   : > { %v4750_v19 = vsel %vm1595_vm5, %v4749_v23, %v8535_v21  ;;  %v5031_v58 = vrot.slane %v5009_v25, 4  ;;  %v4797_v48 = vsel %vm1595_vm5, %v4796_v51, %v4795_v56  ;;  %v4844_v49 = vsel %vm1595_vm5, %v4843_v40, %v4842_v60  ;;  %v4776_v44 = vld [vmem:[#allocation3 + $0xda] sm:$0x1]  ;;  %v4871_v50 = vld [vmem:[#allocation3 + $0xfc] sm:$0x1] }
 0x1e3   : > { %v4708_v28 = vrot.slane %v4685_v15, 3  ;;  %v4751_v17 = vrot.slane %v4728_v8, 3  ;;  %v8605_v46 = vpop.eup %7030  ;;  %v4021_v6 = vrot.slane %v4020_v16, 1  ;;  %v4028_v38 = vrot.slane %v4027_v59, 1  ;;  %v4730_v8 = vld [vmem:[#allocation3 + $0xf9] sm:$0x1] }
 0x1e4   : > { %v4891_v41 = vsel %vm1595_vm5, %v4890_v43, %v4889_v31  ;;  %v4798_v36 = vrot.slane %v4775_v29, 3  ;;  %v8608_v21 = vpop.eup %7032  ;;  %v4035_v7 = vrot.slane %v4034_v54, 1  ;;  %v4938_v35 = vsel %vm1595_vm5, %v4937_v26, %v4936_v45  ;;  %v5010_v31 = vld [vmem:[#allocation3 + $0xbf] sm:$0x1] }
 0x1e5   : > { %v4985_v56 = vsel %vm1595_vm5, %v4984_v52, %v4983_v27  ;;  %v4710_v60 = vrot.slane %v4686_v10, 2  ;;  %v8612_v1 = vpop.eup %7034  ;;  %v4042_v5 = vrot.slane %v4041_v0, 1  ;;  %v5032_v24 = vsel %vm1595_vm5, %v5031_v58, %v5030_v3  ;;  %v4687_v27 = vld [vmem:[#allocation3 + $0xf8] sm:$0x1]  ;;  %v4777_v3 = vld [vmem:[#allocation3 + $0xfa] sm:$0x1] }
 0x1e6   : > { %v4845_v39 = vrot.slane %v4822_v53, 3  ;;  %v4892_v33 = vrot.slane %v4869_v42, 3  ;;  %v8615_v12 = vpop.eup %7036  ;;  %v4709_v23 = vsel %vm1598_vm6, %v4708_v28, %v4707_v14  ;;  %v4752_v22 = vsel %vm1598_vm6, %v4751_v17, %v4750_v19  ;;  %v4823_v58 = vld [vmem:[#allocation3 + $0xdb] sm:$0x1]  ;;  %v6989_v19 = vld [vmem:[#allocation2 + $0x18] ss:$0 sm:$0xff] }
 0x1e7   : > { %v4939_v45 = vrot.slane %v4916_v30, 3  ;;  %v4986_v51 = vrot.slane %v4963_v18, 3  ;;  %v8619_v40 = vmax.f32 %v4020_v16, %v4021_v6  ;;  %v4799_v25 = vsel %vm1598_vm6, %v4798_v36, %v4797_v48  ;;  %v6990_v28 = vld [vmem:[#allocation2 + $0x38] ss:$0 sm:$0xff]  ;;  %v6991_v6 = vld [vmem:[#allocation2 + $0x19] ss:$0 sm:$0xff] }
 0x1e8   : > { %v4753_v43 = vrot.slane %v4729_v13, 2  ;;  %v4800_v15 = vrot.slane %v4776_v44, 2  ;;  %v8622_v26 = vmax.f32 %v4027_v59, %v4028_v38  ;;  %v8624_v52 = vmax.f32 %v4034_v54, %v4035_v7  ;;  %v4870_v54 = vld [vmem:[#allocation3 + $0xdc] sm:$0x1]  ;;  %v6992_v38 = vld [vmem:[#allocation2 + $0x39] ss:$0 sm:$0xff] }
 0x1e9   : > { %v5033_v29 = vrot.slane %v5010_v31, 3  ;;  %v4711_v14 = vsel %vm1601_vm7, %v4710_v60, %v4709_v23  ;;  %v8627_v53 = vmax.f32 %v4041_v0, %v4042_v5  ;;  %v4846_v16 = vsel %vm1598_vm6, %v4845_v39, %v4844_v49  ;;  %v7005_v18 = vld [vmem:[#allocation2 + $0x58] ss:$0 sm:$0xff]  ;;  %v4824_v44 = vld [vmem:[#allocation3 + $0xfb] sm:$0x1] }
 0x1ea   : > { %v4893_v10 = vsel %vm1598_vm6, %v4892_v33, %v4891_v41  ;;  %v4712_v48 = vrot.slane %v4687_v27, 1  ;;  %v8632_v17 = vsel %vm1598_vm6, %v4939_v45, %v4938_v35  ;;  %v8635_v59 = vsel %vm1598_vm6, %v4986_v51, %v4985_v56  ;;  %v7013_v7 = vld [vmem:[#allocation2 + $0x78] ss:$0 sm:$0xff]  ;;  %v4917_v33 = vld [vmem:[#allocation3 + $0xdd] sm:$0x1] }
 0x1eb   : > { %v4755_v42 = vrot.slane %v4730_v8, 1  ;;  %v4802_v30 = vrot.slane %v4777_v3, 1  ;;  %v4754_v0 = vsel %vm1601_vm7, %v4753_v43, %v4752_v22  ;;  %v4801_v36 = vsel %vm1601_vm7, %v4800_v15, %v4799_v25  ;;  %v8651_v31 = vld [vmem:[#allocation3 + $0xde] sm:$0x1]  ;;  %v7006_v45 = vld [vmem:[#allocation2 + $0x59] ss:$0 sm:$0xff] }
 0x1ec   : > { %v4847_v49 = vrot.slane %v4823_v58, 2  ;;  %v4713_v41 = vsel %vm1604_vm8, %v4712_v48, %v4711_v14  ;;  %v8647_v13 = vsel %vm1598_vm6, %v5033_v29, %v5032_v24  ;;  %v4894_v39 = vrot.slane %v4870_v54, 2  ;;  %v7014_v51 = vld [vmem:[#allocation2 + $0x79] ss:$0 sm:$0xff]  ;;  %v6993_v24 = vld [vmem:[#allocation2 + $0x1a] ss:$0 sm:$0xff] }
 0x1ed   : > { %v4715_v23 = vmul.f32 %v6989_v19, %v4713_v41  ;;  %v4716_v22 = vmul.f32 %v6990_v28, %v4713_v41  ;;  %v4717_v27 = vmul.f32 %v7005_v18, %v4713_v41  ;;  %v4718_v25 = vmul.f32 %v7013_v7, %v4713_v41  ;;  %v5011_v3 = vld [vmem:[#allocation3 + $0xdf] sm:$0x1]  ;;  %v6994_v48 = vld [vmem:[#allocation2 + $0x3a] ss:$0 sm:$0xff]  ;;  %v6995_v54 = vld [vmem:[#allocation2 + $0x1b] ss:$0 sm:$0xff] }
 0x1ee   : > { %v4756_v43 = vsel %vm1604_vm8, %v4755_v42, %v4754_v0  ;;  %v4803_v15 = vsel %vm1604_vm8, %v4802_v30, %v4801_v36  ;;  %v4848_v8 = vsel %vm1601_vm7, %v4847_v49, %v4846_v16  ;;  %v4849_v58 = vrot.slane %v4824_v44, 1  ;;  %v6996_v18 = vld [vmem:[#allocation2 + $0x3b] ss:$0 sm:$0xff]  ;;  %v7007_v41 = vld [vmem:[#allocation2 + $0x5a] ss:$0 sm:$0xff] }
 0x1ef   : > { %v4758_v29 = vmul.f32 %v6991_v6, %v4756_v43  ;;  %v4759_v14 = vmul.f32 %v6992_v38, %v4756_v43  ;;  %v4941_v63 = vrot.slane %v4917_v33, 2  ;;  %v4988_v19 = vrot.slane %v8651_v31, 2  ;;  %v7015_v7 = vld [vmem:[#allocation2 + $0x7a] ss:$0 sm:$0xff]  ;;  %v7008_v16 = vld [vmem:[#allocation2 + $0x5b] ss:$0 sm:$0xff] }
 0x1f0   : > { %v4760_v28 = vmul.f32 %v7006_v45, %v4756_v43  ;;  %v4761_v5 = vmul.f32 %v7014_v51, %v4756_v43  ;;  %v4895_v42 = vsel %vm1601_vm7, %v4894_v39, %v4893_v10  ;;  %v4805_v36 = vmul.f32 %v6993_v24, %v4803_v15  ;;  %v7016_v60 = vld [vmem:[#allocation2 + $0x7b] ss:$0 sm:$0xff]  ;;  %v4918_v51 = vld [vmem:[#allocation3 + $0xfd] sm:$0x1]  ;;  %v6997_v39 = vld [vmem:[#allocation2 + $0x1c] ss:$0 sm:$0xff] }
 0x1f1   : > { %v4762_v30 = vadd.f32 %v4758_v29, %v4715_v23  ;;  %v4763_v0 = vadd.f32 %v4759_v14, %v4716_v22  ;;  %v5035_v49 = vrot.slane %v5011_v3, 2  ;;  %v4806_v44 = vmul.f32 %v6994_v48, %v4803_v15  ;;  %v6998_v23 = vld [vmem:[#allocation2 + $0x3c] ss:$0 sm:$0xff]  ;;  %v4965_v48 = vld [vmem:[#allocation3 + $0xfe] sm:$0x1] }
 0x1f2   : > { %v4764_v6 = vadd.f32 %v4760_v28, %v4717_v27  ;;  %v4765_v38 = vadd.f32 %v4761_v5, %v4718_v25  ;;  %v4807_v33 = vmul.f32 %v7007_v41, %v4803_v15  ;;  %v4808_v56 = vmul.f32 %v7015_v7, %v4803_v15  ;;  %v7009_v5 = vld [vmem:[#allocation2 + $0x5c] ss:$0 sm:$0xff] }
 0x1f3   : > { %v4809_v31 = vadd.f32 %v4805_v36, %v4762_v30  ;;  %v4850_v45 = vsel %vm1604_vm8, %v4849_v58, %v4848_v8  ;;  %v4810_v43 = vadd.f32 %v4806_v44, %v4763_v0  ;;  %v4896_v27 = vrot.slane %v4871_v50, 1  ;;  %v7017_v8 = vld [vmem:[#allocation2 + $0x7c] ss:$0 sm:$0xff]  ;;  %v7010_v50 = vld [vmem:[#allocation2 + $0x5d] ss:$0 sm:$0xff] }
 0x1f4   : > { %v4852_v35 = vmul.f32 %v6995_v54, %v4850_v45  ;;  %v4853_v34 = vmul.f32 %v6996_v18, %v4850_v45  ;;  %v4854_v10 = vmul.f32 %v7008_v16, %v4850_v45  ;;  %v4811_v22 = vadd.f32 %v4807_v33, %v4764_v6  ;;  %v5012_v36 = vld [vmem:[#allocation3 + $0xff] sm:$0x1]  ;;  %v7001_v44 = vld [vmem:[#allocation2 + $0x1e] ss:$0 sm:$0xff] }
 0x1f5   : > { %v4812_v24 = vadd.f32 %v4808_v56, %v4765_v38  ;;  %v4855_v3 = vmul.f32 %v7016_v60, %v4850_v45  ;;  %v4942_v25 = vsel %vm1601_vm7, %v4941_v63, %v8632_v17  ;;  %v4943_v14 = vrot.slane %v4918_v51, 1  ;;  %v6999_v56 = vld [vmem:[#allocation2 + $0x1d] ss:$0 sm:$0xff]  ;;  %v7002_v33 = vld [vmem:[#allocation2 + $0x3e] ss:$0 sm:$0xff] }
 0x1f6   : > { %v4856_v29 = vadd.f32 %v4852_v35, %v4809_v31  ;;  %v4857_v15 = vadd.f32 %v4853_v34, %v4810_v43  ;;  %v10602_v58 = vsub.f32 %v8506_v2, %v8619_v40  ;;  %v4858_v28 = vadd.f32 %v4854_v10, %v4811_v22  ;;  %v7000_v60 = vld [vmem:[#allocation2 + $0x3d] ss:$0 sm:$0xff]  ;;  %v7011_v31 = vld [vmem:[#allocation2 + $0x5e] ss:$0 sm:$0xff]  ;;  %v7003_v22 = vld [vmem:[#allocation2 + $0x1f] ss:$0 sm:$0xff] }
 0x1f7   : > { %v4859_v18 = vadd.f32 %v4855_v3, %v4812_v24  ;;  %v4897_v41 = vsel %vm1604_vm8, %v4896_v27, %v4895_v42  ;;  %v4989_v7 = vsel %vm1601_vm7, %v4988_v19, %v8635_v59  ;;  %v7018_v35 = vld [vmem:[#allocation2 + $0x7d] ss:$0 sm:$0xff]  ;;  %v5036_v30 = vsel %vm1601_vm7, %v5035_v49, %v8647_v13  ;;  %v7019_v43 = vld [vmem:[#allocation2 + $0x7e] ss:$0 sm:$0xff]  ;;  %v7004_v24 = vld [vmem:[#allocation2 + $0x3f] ss:$0 sm:$0xff] }
 0x1f8   : > { %v4048_v54 = vmul.f32 1.442695, %v10602_v58  ;;  %v4899_v63 = vmul.f32 %v6997_v39, %v4897_v41  ;;  %v4900_v17 = vmul.f32 %v6998_v23, %v4897_v41  ;;  %v4901_v34 = vmul.f32 %v7009_v5, %v4897_v41  ;;  %v7020_v58 = vld [vmem:[#allocation2 + $0x7f] ss:$0 sm:$0xff] }
 0x1f9   : > { %v4902_v0 = vmul.f32 %v7017_v8, %v4897_v41  ;;  %v4944_v2 = vsel %vm1604_vm8, %v4943_v14, %v4942_v25  ;;  %v4990_v40 = vrot.slane %v4965_v48, 1  ;;  %v10603_v13 = vsub.f32 %v8508_v57, %v8622_v26 }
 0x1fa   : > { %v4903_v16 = vadd.f32 %v4899_v63, %v4856_v29  ;;  %v4904_v42 = vadd.f32 %v4900_v17, %v4857_v15  ;;  %v4905_v6 = vadd.f32 %v4901_v34, %v4858_v28  ;;  %v4946_v38 = vmul.f32 %v6999_v56, %v4944_v2  ;;  %v7012_v29 = vld [vmem:[#allocation2 + $0x5f] ss:$0 sm:$0xff]  ;;  %v1305_v56 = vpop.f32.mrf.mxu2  ;;  %v1352_v17 = vpop.f32.mrf.mxu3 }
 0x1fb   : > { %v4906_v59 = vadd.f32 %v4902_v0, %v4859_v18  ;;  %v4947_v19 = vmul.f32 %v7000_v60, %v4944_v2  ;;  %v4948_v45 = vmul.f32 %v7010_v50, %v4944_v2  ;;  %v4949_v51 = vmul.f32 %v7018_v35, %v4944_v2 }
 0x1fc   : > { %v4050_v49 = vmul.f32 1.442695, %v10603_v13  ;;  %v4950_v10 = vadd.f32 %v4946_v38, %v4903_v16  ;;  %v4991_v39 = vsel %vm1604_vm8, %v4990_v40, %v4989_v7  ;;  %v5037_v23 = vrot.slane %v5012_v36, 1 }
 0x1fd   : > { %v4951_v3 = vadd.f32 %v4947_v19, %v4904_v42  ;;  %v4952_v27 = vadd.f32 %v4948_v45, %v4905_v6  ;;  %v4953_v5 = vadd.f32 %v4949_v51, %v4906_v59  ;;  %v4993_v25 = vmul.f32 %v7001_v44, %v4991_v39 }
 0x1fe   : > { %v4994_v15 = vmul.f32 %v7002_v33, %v4991_v39  ;;  %v4995_v14 = vmul.f32 %v7011_v31, %v4991_v39  ;;  %v4996_v48 = vmul.f32 %v7019_v43, %v4991_v39  ;;  %v5038_v8 = vsel %vm1604_vm8, %v5037_v23, %v5036_v30 }
 0x1ff   : > { %v10604_v57 = vsub.f32 %v8516_v20, %v8624_v52  ;;  %v4997_v28 = vadd.f32 %v4993_v25, %v4950_v10  ;;  %v5040_v18 = vmul.f32 %v7003_v22, %v5038_v8  ;;  %v5041_v41 = vmul.f32 %v7004_v24, %v5038_v8  ;;  %v1215_v20 = vpop.f32.mrf.mxu0  ;;  %v1261_v52 = vpop.f32.mrf.mxu1 }
 0x200   : > { %v4998_v60 = vadd.f32 %v4994_v15, %v4951_v3  ;;  %v4999_v50 = vadd.f32 %v4995_v14, %v4952_v27  ;;  %v5000_v7 = vadd.f32 %v4996_v48, %v4953_v5  ;;  %v5042_v63 = vmul.f32 %v7012_v29, %v5038_v8  ;;  %v8723_v24 = vpop.permute.xlu0 %1164 }
 0x201   : > { %v4052_v26 = vmul.f32 1.442695, %v10604_v57  ;;  %v1987_v34 = vrot.slane %v8592_v4, 2  ;;  %v10605_v35 = vrot.slane %v8562_v47, 4  ;;  %v5043_v0 = vmul.f32 %v7020_v58, %v5038_v8 }
 0x202   : > { %v5044_v2 = vadd.f32 %v5040_v18, %v4997_v28  ;;  %v3020_v40 = vsel %vm587_vm1, %v8605_v46, 0.0  ;;  %7038 = vpow2.f32 %v4048_v54  ;;  %v5045_v36 = vadd.f32 %v5041_v41, %v4998_v60  ;;  %v1308_v29 = vpop.f32.mrf.mxu2  ;;  %v1355_v58 = vpop.f32.mrf.mxu3 }
 0x203   : > { %v8682_v30 = vadd.f32 %v10605_v35, %v8562_v47  ;;  %v5046_v16 = vadd.f32 %v5042_v63, %v4999_v50  ;;  %7040 = vpow2.f32 %v4050_v49  ;;  %v10606_v42 = vsub.f32 %v8525_v32, %v8627_v53 }
 0x204   : > { %v5047_v38 = vadd.f32 %v5043_v0, %v5000_v7  ;;  %v8689_v44 = vmul.f32 0.5, %v5044_v2  ;;  %v1994_v47 = vrot.slane %v8594_v55, 2  ;;  %7042 = vpow2.f32 %v4052_v26 }
 0x205   : > { %v4054_v6 = vmul.f32 1.442695, %v10606_v42  ;;  %v1306_v33 = vadd.f32 %v1305_v56, %v8568_v9  ;;  %v3021_v31 = vrot.slane %v3020_v40, 4  ;;  %v3027_v59 = vsel %vm587_vm1, %v8608_v21, 0.0 }
 0x206   : > { %v8695_v54 = vmul.f32 0.5, %v5045_v36  ;;  %v8698_v19 = vadd.f32 %v1987_v34, %v8592_v4  ;;  %v10607_v32 = vrot.slane %v8573_v62, 4  ;;  %v3034_v45 = vsel %vm587_vm1, %v8612_v1, 0.0  ;;  %v8744_v34 = vpop.permute.xlu1 %1169 }
 0x207   : > { %v8707_v51 = vmul.f32 0.5, %v5046_v16  ;;  %v2001_v43 = vrot.slane %v8682_v30, 2  ;;  %7044 = vpow2.f32 %v4054_v6  ;;  %v8710_v13 = vmul.f32 0.5, %v5047_v38  ;;  %v1218_v41 = vpop.f32.mrf.mxu0  ;;  %v1264_v56 = vpop.f32.mrf.mxu1  ;;  %10608 = vst [vmem:[#allocation27_spill] sm:$0xff] %v8744_v34 }
 0x208   : > { %v8703_v53 = vadd.f32 %v10607_v32, %v8573_v62  ;;  %v5052_v49 = vsel %vm587_vm1, %v8689_v44, -inf  ;;  %v8714_v4 = vpop.eup %7038  ;;  %v8717_v10 = vadd.f32 %v1994_v47, %v8594_v55  ;;  %v3028_v62 = vrot.slane %v3027_v59, 4 }
 0x209   : > { %v3041_v39 = vsel %vm587_vm1, %v8615_v12, 0.0  ;;  %v1317_v23 = vmax.f32 %v1306_v33, 0.0  ;;  %v8721_v22 = vpop.eup %7040  ;;  %v8725_v3 = vadd.f32 %v3021_v31, %v3020_v40  ;;  %v3035_v27 = vrot.slane %v3034_v45, 4 }
 0x20a   : > { %v5059_v5 = vsel %vm587_vm1, %v8695_v54, -inf  ;;  %v1353_v25 = vadd.f32 %v1352_v17, %v8568_v9  ;;  %v8730_v55 = vpop.eup %7042  ;;  %v5053_v15 = vrot.slane %v5052_v49, 4  ;;  %v5066_v14 = vsel %vm587_vm1, %v8707_v51, -inf }
 0x20b   : > { %1322 = vst.msk [vmem:[#allocation4 + $0x40] sm:$0xff] %vm587_vm1, %v1317_v23  ;;  %v1216_v48 = vadd.f32 %v1215_v20, %v8723_v24  ;;  %v1262_v8 = vadd.f32 %v1261_v52, %v8723_v24  ;;  %v3042_v57 = vrot.slane %v3041_v39, 4  ;;  %v4056_v26 = vsel %vm587_vm1, %v8714_v4, 0.0 }
 0x20c   : > { %v5073_v28 = vsel %vm587_vm1, %v8710_v13, -inf  ;;  %v1364_v18 = vmax.f32 %v1353_v25, 0.0  ;;  %v5060_v60 = vrot.slane %v5059_v5, 4  ;;  %v1309_v63 = vadd.f32 %v1308_v29, %v8723_v24 }
 0x20d   : > { %v1225_v50 = vmax.f32 %v1216_v48, 0.0  ;;  %v1271_v7 = vmax.f32 %v1262_v8, 0.0  ;;  %v8742_v17 = vpop.eup %7044  ;;  %v4063_v35 = vsel %vm587_vm1, %v8721_v22, 0.0  ;;  %v4070_v0 = vsel %vm587_vm1, %v8730_v55, 0.0 }
 0x20e   : > { %v5067_v2 = vrot.slane %v5066_v14, 4  ;;  %1369 = vst.msk [vmem:[#allocation4 + $0x60] sm:$0xff] %vm587_vm1, %v1364_v18  ;;  %v1356_v20 = vadd.f32 %v1355_v58, %v8723_v24  ;;  %v5054_v52 = vmax.f32 %v5052_v49, %v5053_v15  ;;  %v1318_v40 = vmax.f32 %v1309_v63, 0.0 }
 0x20f   : > { %1229 = vst.msk [vmem:[#allocation4 + $0x8] sm:$0xff] %vm587_vm1, %v1225_v50  ;;  %v1219_v36 = vadd.f32 %v1218_v41, %v8744_v34  ;;  %v1265_v16 = vadd.f32 %v1264_v56, %v8744_v34  ;;  %v3029_v42 = vadd.f32 %v3028_v62, %v3027_v59  ;;  %v4057_v6 = vrot.slane %v4056_v26, 4 }
 0x210   : > { %v5074_v38 = vrot.slane %v5073_v28, 4  ;;  %1276 = vst.msk [vmem:[#allocation4 + $0x28] sm:$0xff] %vm587_vm1, %v1271_v7  ;;  %v1365_v47 = vmax.f32 %v1356_v20, 0.0  ;;  %v4064_v33 = vrot.slane %v4063_v35, 4  ;;  %v4077_v31 = vsel %vm587_vm1, %v8742_v17, 0.0 }
 0x211   : > { %v5061_v32 = vmax.f32 %v5059_v5, %v5060_v60  ;;  %1323 = vst.msk [vmem:[#allocation4 + $0x48] sm:$0xff] %vm587_vm1, %v1318_v40  ;;  %v1226_v49 = vmax.f32 %v1219_v36, 0.0  ;;  %v2008_v23 = vrot.slane %v8703_v53, 2  ;;  %v3036_v25 = vadd.f32 %v3035_v27, %v3034_v45 }
 0x212   : > { %v4071_v29 = vrot.slane %v4070_v0, 4  ;;  %v5068_v15 = vmax.f32 %v5066_v14, %v5067_v2  ;;  %v1989_v59 = vrot.slane %v8698_v19, 1  ;;  %v3043_v62 = vadd.f32 %v3042_v57, %v3041_v39  ;;  %1370 = vst.msk [vmem:[#allocation4 + $0x68] sm:$0xff] %vm587_vm1, %v1365_v47  ;;  %v1311_v2 = vpop.f32.mrf.mxu2 }
 0x213   : > { %v5055_v48 = vrot.slane %v5054_v52, 2  ;;  %v1272_v8 = vmax.f32 %v1265_v16, 0.0  ;;  %v3023_v58 = vrot.slane %v8725_v3, 2  ;;  %v4058_v18 = vadd.f32 %v4057_v6, %v4056_v26  ;;  %1230 = vst.msk [vmem:[#allocation4 + $0x10] sm:$0xff] %vm587_vm1, %v1226_v49 }
 0x214   : > { %v4078_v41 = vrot.slane %v4077_v31, 4  ;;  %v5075_v5 = vmax.f32 %v5073_v28, %v5074_v38  ;;  %v2002_v45 = vadd.f32 %v2001_v43, %v8682_v30  ;;  %v3030_v27 = vrot.slane %v3029_v42, 2 }
 0x215   : > { %v4065_v14 = vadd.f32 %v4064_v33, %v4063_v35  ;;  %v5062_v56 = vrot.slane %v5061_v32, 2  ;;  %v1996_v39 = vrot.slane %v8717_v10, 1  ;;  %v3037_v57 = vrot.slane %v3036_v25, 2  ;;  %1277 = vst.msk [vmem:[#allocation4 + $0x30] sm:$0xff] %vm587_vm1, %v1272_v8 }
 0x216   : > { %v4072_v60 = vadd.f32 %v4071_v29, %v4070_v0  ;;  %v5069_v50 = vrot.slane %v5068_v15, 2  ;;  %v1990_v7 = vadd.f32 %v1989_v59, %v8698_v19  ;;  %v2009_v26 = vadd.f32 %v2008_v23, %v8703_v53 }
 0x217   : > { %v3044_v63 = vrot.slane %v3043_v62, 2  ;;  %v5056_v28 = vmax.f32 %v5054_v52, %v5055_v48  ;;  %v3024_v20 = vadd.f32 %v3023_v58, %v8725_v3  ;;  %v4059_v30 = vrot.slane %v4058_v18, 2 }
 0x218   : > { %v4079_v43 = vadd.f32 %v4078_v41, %v4077_v31  ;;  %v5076_v35 = vrot.slane %v5075_v5, 2  ;;  %v2003_v40 = vrot.slane %v2002_v45, 1  ;;  %v3031_v36 = vadd.f32 %v3030_v27, %v3029_v42 }
 0x219   : > { %v4066_v16 = vrot.slane %v4065_v14, 2  ;;  %v5063_v6 = vmax.f32 %v5061_v32, %v5062_v56  ;;  %v3038_v0 = vadd.f32 %v3037_v57, %v3036_v25  ;;  %v4073_v38 = vrot.slane %v4072_v60, 2 }
 0x21a   : > { %v5070_v47 = vmax.f32 %v5068_v15, %v5069_v50  ;;  %v1312_v19 = vadd.f32 %v1311_v2, %v8744_v34  ;;  %v1997_v53 = vadd.f32 %v1996_v39, %v8717_v10  ;;  %v2010_v52 = vrot.slane %v2009_v26, 1 }
 0x21b   : > { %v3045_v33 = vadd.f32 %v3044_v63, %v3043_v62  ;;  %v5057_v49 = vrot.slane %v5056_v28, 1  ;;  %v3025_v23 = vrot.slane %v3024_v20, 1  ;;  %v4060_v29 = vadd.f32 %v4059_v30, %v4058_v18 }
 0x21c   : > { %v4080_v3 = vrot.slane %v4079_v43, 2  ;;  %v5077_v59 = vmax.f32 %v5075_v5, %v5076_v35  ;;  %v2004_v31 = vadd.f32 %v2003_v40, %v2002_v45  ;;  %v3032_v48 = vrot.slane %v3031_v36, 1 }
 0x21d   : > { %v4067_v8 = vadd.f32 %v4066_v16, %v4065_v14  ;;  %v5064_v42 = vrot.slane %v5063_v6, 1  ;;  %v3039_v58 = vrot.slane %v3038_v0, 1  ;;  %v4074_v32 = vadd.f32 %v4073_v38, %v4072_v60  ;;  %v8779_v38 = vpop.f32.mrf.mxu3 }
 0x21e   : > { %v5071_v25 = vrot.slane %v5070_v47, 1  ;;  %v1319_v41 = vmax.f32 %v1312_v19, 0.0  ;;  %v2011_v15 = vadd.f32 %v2010_v52, %v2009_v26  ;;  %7046 = vrcp.f32 %v1990_v7 }
 0x21f   : > { %v3046_v27 = vrot.slane %v3045_v33, 1  ;;  %v5058_v56 = vmax.f32 %v5056_v28, %v5057_v49  ;;  %v3026_v10 = vadd.f32 %v3025_v23, %v3024_v20  ;;  %v4061_v39 = vrot.slane %v4060_v29, 1 }
 0x220   : > { %v4081_v62 = vadd.f32 %v4080_v3, %v4079_v43  ;;  %v5078_v57 = vrot.slane %v5077_v59, 1  ;;  %7048 = vrcp.f32 %v1997_v53  ;;  %v3033_v18 = vadd.f32 %v3032_v48, %v3031_v36  ;;  %1324 = vst.msk [vmem:[#allocation4 + $0x50] sm:$0xff] %vm587_vm1, %v1319_v41  ;;  %v2021_v3 = vld [vmem:[#allocation4 + $0x20] sm:$0x1]  ;;  %v8781_v48 = vpop.f32.mrf.mxu1  ;;  %v8788_v41 = vpop.f32.mrf.mxu2 }
 0x221   : > { %v4068_v50 = vrot.slane %v4067_v8, 1  ;;  %v5065_v5 = vmax.f32 %v5063_v6, %v5064_v42  ;;  %7050 = vrcp.f32 %v2004_v31  ;;  %v3040_v45 = vadd.f32 %v3039_v58, %v3038_v0  ;;  %v1221_v31 = vpop.f32.mrf.mxu0  ;;  %v2167_v58 = vld [vmem:[#allocation4 + $0x22] sm:$0x1] }
 0x222   : > { %v4075_v14 = vrot.slane %v4074_v32, 1  ;;  %v5072_v60 = vmax.f32 %v5070_v47, %v5071_v25  ;;  %7052 = vrcp.f32 %v2011_v15  ;;  %v3047_v63 = vadd.f32 %v3046_v27, %v3045_v33  ;;  %v2313_v25 = vld [vmem:[#allocation4 + $0x24] sm:$0x1] }
 0x223   : > { %v5080_v7 = vsub.f32 %v8689_v44, %v5058_v56  ;;  %7054 = vrcp.f32 %v3026_v10  ;;  %v4062_v26 = vadd.f32 %v4061_v39, %v4060_v29  ;;  %v4082_v28 = vrot.slane %v4081_v62, 1  ;;  %v10609_v10 = vld [vmem:[#allocation26_spill] sm:$0xff] }
 0x224   : > { %v5079_v2 = vmax.f32 %v5077_v59, %v5078_v57  ;;  %v7047_v20 = vpop.eup %7046  ;;  %7056 = vrcp.f32 %v3033_v18  ;;  %v4069_v30 = vadd.f32 %v4068_v50, %v4067_v8  ;;  %v5081_v43 = vsub.f32 %v8695_v54, %v5065_v5  ;;  %v2094_v59 = vld [vmem:[#allocation4 + $0x21] sm:$0x1]  ;;  %v2386_v57 = vld [vmem:[#allocation4 + $0x25] sm:$0x1] }
 0x225   : > { %7058 = vrcp.f32 %v3040_v45  ;;  %v4076_v35 = vadd.f32 %v4075_v14, %v4074_v32  ;;  %v5082_v40 = vsub.f32 %v8707_v51, %v5072_v60  ;;  %v5084_v16 = vmul.f32 1.442695, %v5080_v7  ;;  %v2240_v32 = vld [vmem:[#allocation4 + $0x23] sm:$0x1]  ;;  %v8799_v18 = vpop.f32.mrf.mxu3 }
 0x226   : > { %v7049_v36 = vpop.eup %7048  ;;  %7060 = vrcp.f32 %v3047_v63  ;;  %v4083_v0 = vadd.f32 %v4082_v28, %v4081_v62  ;;  %v5083_v44 = vsub.f32 %v8710_v13, %v5079_v2  ;;  %v5086_v19 = vmul.f32 1.442695, %v5081_v43  ;;  %v2093_v63 = vld [vmem:[#allocation4 + $0x1] sm:$0x1]  ;;  %v2166_v2 = vld [vmem:[#allocation4 + $0x2] sm:$0x1] }
 0x227   : > { %v7051_v6 = vpop.eup %7050  ;;  %7062 = vrcp.f32 %v4062_v26  ;;  %v5088_v54 = vmul.f32 1.442695, %v5082_v40  ;;  %v8786_v42 = vmul.f32 %v7047_v20, %v8510_v61  ;;  %v8791_v27 = vmul.f32 %v7049_v36, %v8527_v37  ;;  %v2239_v20 = vld [vmem:[#allocation4 + $0x3] sm:$0x1] }
 0x228   : > { %v7053_v47 = vpop.eup %7052  ;;  %7064 = vrcp.f32 %v4069_v30  ;;  %v5090_v51 = vmul.f32 1.442695, %v5083_v44  ;;  %v8794_v56 = vmul.f32 %v7051_v6, %v8539_v11  ;;  %v2036_v62 = vrot.slane %v2021_v3, 7  ;;  %v2020_v11 = vld [vmem:[#allocation4] sm:$0x1]  ;;  %v8838_v6 = vpop.permute.xlu2 %1174 }
 0x229   : > { %v7055_v53 = vpop.eup %7054  ;;  %7066 = vrcp.f32 %v4076_v35  ;;  %v8797_v39 = vmul.f32 %v7053_v47, %v10609_v10  ;;  %v2109_v45 = vrot.slane %v2094_v59, 7  ;;  %v2182_v7 = vrot.slane %v2167_v58, 7  ;;  %v2312_v30 = vld [vmem:[#allocation4 + $0x4] sm:$0x1]  ;;  %10616 = vst [vmem:[#allocation33_spill] sm:$0xff] %v8838_v6  ;;  %v1446_v10 = vpop.f32.mrf.mxu1 }
 0x22a   : > { %v7057_v52 = vpop.eup %7056  ;;  %7068 = vpow2.f32 %v5084_v16  ;;  %v8804_v50 = vmul.f32 %v7055_v53, %v8605_v46  ;;  %v2255_v26 = vrot.slane %v2240_v32, 7  ;;  %v2328_v28 = vrot.slane %v2313_v25, 7  ;;  %v2532_v16 = vld [vmem:[#allocation4 + $0x27] sm:$0x1]  ;;  %v2022_v47 = vld [vmem:[#allocation4 + $0x40] sm:$0x1] }
 0x22b   : > { %v7059_v33 = vpop.eup %7058  ;;  %7070 = vrcp.f32 %v4083_v0  ;;  %v8807_v5 = vmul.f32 %v7057_v52, %v8608_v21  ;;  %v2401_v43 = vrot.slane %v2386_v57, 7  ;;  %v2385_v53 = vld [vmem:[#allocation4 + $0x5] sm:$0x1]  ;;  %v2547_v58 = vrot.slane %v2532_v16, 7  ;;  %v2460_v16 = vld [vmem:[#allocation4 + $0x46] sm:$0x1] }
 0x22c   : > { %v7061_v49 = vpop.eup %7060  ;;  %7072 = vpow2.f32 %v5086_v19  ;;  %v8810_v37 = vmul.f32 %v7059_v33, %v8612_v1  ;;  %v1359_v19 = vadd.f32 %v8779_v38, %v8744_v34  ;;  %v8853_v52 = vsel %vm1586_vm2, %v2255_v26, %v2239_v20  ;;  %v4311_v34 = vld [vmem:[#allocation4 + $0x13] sm:$0x1] }
 0x22d   : > { %v7063_v23 = vpop.eup %7062  ;;  %7074 = vpow2.f32 %v5088_v54  ;;  %v8817_v46 = vmul.f32 %v7061_v49, %v8615_v12  ;;  %v8850_v54 = vsel %vm1586_vm2, %v2182_v7, %v2166_v2  ;;  %v8856_v33 = vsel %vm1586_vm2, %v2328_v28, %v2312_v30  ;;  %v8860_v49 = vld [vmem:[#allocation4 + $0x43] sm:$0x1]  ;;  %v8871_v7 = vld [vmem:[#allocation4 + $0x44] sm:$0x1]  ;;  %v1540_v20 = vpop.f32.mrf.mxu3 }
 0x22e   : > { %v7065_v29 = vpop.eup %7064  ;;  %7076 = vpow2.f32 %v5090_v51  ;;  %10610 = vst [vmem:[#allocation28_spill] sm:$0xff] %v8810_v37  ;;  %v8820_v21 = vmul.f32 %v7063_v23, %v8714_v4  ;;  %v8836_v4 = vsel %vm1586_vm2, %v2036_v62, %v2020_v11  ;;  %v8858_v51 = vld [vmem:[#allocation4 + $0x42] sm:$0x1]  ;;  %v1222_v23 = vadd.f32 %v1221_v31, %v8838_v6 }
 0x22f   : > { %v7067_v13 = vpop.eup %7066  ;;  %10611 = vst [vmem:[#allocation29_spill] sm:$0xff] %v8817_v46  ;;  %v8823_v1 = vmul.f32 %v7065_v29, %v8721_v22  ;;  %v2459_v22 = vld [vmem:[#allocation4 + $0x26] sm:$0x1]  ;;  %v8866_v3 = vsel %vm1586_vm2, %v2401_v43, %v2385_v53  ;;  %v2038_v32 = vrot.slane %v2022_v47, 6  ;;  %v2184_v57 = vrot.slane %v8858_v51, 6 }
 0x230   : > { %v8783_v8 = vpop.eup %7068  ;;  %10612 = vst [vmem:[#allocation30_spill] sm:$0xff] %v8820_v21  ;;  %v8828_v40 = vmul.f32 %v7067_v13, %v8730_v55  ;;  %v8843_v55 = vsel %vm1586_vm2, %v2109_v45, %v2093_v63  ;;  %v2474_v13 = vrot.slane %v2459_v22, 7  ;;  %v2257_v31 = vrot.slane %v8860_v49, 6  ;;  %v1493_v45 = vpop.f32.mrf.mxu2  ;;  %v2458_v43 = vld [vmem:[#allocation4 + $0x6] sm:$0x1] }
 0x231   : > { %v7071_v15 = vpop.eup %7070  ;;  %v5092_v60 = vsel %vm587_vm1, %v8783_v8, 0.0  ;;  %10613 = vst [vmem:[#allocation31_spill] sm:$0xff] %v8823_v1  ;;  %v1366_v11 = vmax.f32 %v1359_v19, 0.0  ;;  %v1227_v26 = vmax.f32 %v1222_v23, 0.0  ;;  %v1268_v28 = vadd.f32 %v8781_v48, %v8838_v6  ;;  %v2387_v22 = vld [vmem:[#allocation4 + $0x45] sm:$0x1] }
 0x232   : > { %v8801_v61 = vpop.eup %7072  ;;  %10614 = vst [vmem:[#allocation25_spill] sm:$0xff] %v8828_v40  ;;  %v8831_v36 = vmul.f32 %v7071_v15, %v8742_v17  ;;  %v5093_v0 = vrot.slane %v5092_v60, 4  ;;  %v8845_v17 = vld [vmem:[#allocation4 + $0x41] sm:$0x1]  ;;  %v1399_v15 = vpop.f32.mrf.mxu0  ;;  %v1315_v2 = vadd.f32 %v8788_v41, %v8838_v6  ;;  %v2533_v48 = vld [vmem:[#allocation4 + $0x47] sm:$0x1] }
 0x233   : > { %v8812_v14 = vpop.eup %7074  ;;  %v5099_v12 = vsel %vm587_vm1, %v8801_v61, 0.0  ;;  %v2111_v25 = vrot.slane %v8845_v17, 6  ;;  %1371 = vst.msk [vmem:[#allocation4 + $0x70] sm:$0xff] %vm587_vm1, %v1366_v11  ;;  %v1400_v47 = vadd.f32 %v1399_v15, %v8568_v9  ;;  %v1447_v17 = vadd.f32 %v1446_v10, %v8568_v9  ;;  %v2023_v49 = vld [vmem:[#allocation4 + $0x60] sm:$0x1] }
 0x234   : > { %v8825_v35 = vpop.eup %7076  ;;  %10615 = vst [vmem:[#allocation32_spill] sm:$0xff] %v8831_v36  ;;  %v5106_v44 = vsel %vm587_vm1, %v8812_v14, 0.0  ;;  %v5100_v29 = vrot.slane %v5099_v12, 4  ;;  %v5094_v62 = vadd.f32 %v5093_v0, %v5092_v60  ;;  %v2531_v60 = vld [vmem:[#allocation4 + $0x7] sm:$0x1]  ;;  %v1362_v0 = vadd.f32 %v8799_v18, %v8838_v6 }
 0x235   : > { %v5113_v38 = vsel %vm587_vm1, %v8825_v35, 0.0  ;;  %v5107_v59 = vrot.slane %v5106_v44, 4  ;;  %1231 = vst.msk [vmem:[#allocation4 + $0x18] sm:$0xff] %vm587_vm1, %v1227_v26  ;;  %v1273_v41 = vmax.f32 %v1268_v28, 0.0  ;;  %v1320_v53 = vmax.f32 %v1315_v2, 0.0 }
 0x236   : > { %v5114_v63 = vrot.slane %v5113_v38, 4  ;;  %v5101_v30 = vadd.f32 %v5100_v29, %v5099_v12  ;;  %v1494_v12 = vadd.f32 %v1493_v45, %v8568_v9  ;;  %v2330_v51 = vrot.slane %v8871_v7, 6  ;;  %v2169_v10 = vld [vmem:[#allocation4 + $0x62] sm:$0x1]  ;;  %v2242_v28 = vld [vmem:[#allocation4 + $0x63] sm:$0x1] }
 0x237   : > { %v5108_v19 = vadd.f32 %v5107_v59, %v5106_v44  ;;  %v1367_v23 = vmax.f32 %v1362_v0, 0.0  ;;  %v1411_v29 = vmax.f32 %v1400_v47, 0.0  ;;  %v1541_v11 = vadd.f32 %v1540_v20, %v8568_v9  ;;  %v2096_v59 = vld [vmem:[#allocation4 + $0x61] sm:$0x1]  ;;  %1278 = vst.msk [vmem:[#allocation4 + $0x38] sm:$0xff] %vm587_vm1, %v1273_v41 }
 0x238   : > { %v5095_v18 = vrot.slane %v5094_v62, 2  ;;  %v5115_v6 = vadd.f32 %v5114_v63, %v5113_v38  ;;  %v2475_v15 = vsel %vm1586_vm2, %v2474_v13, %v2458_v43  ;;  %v2548_v44 = vsel %vm1586_vm2, %v2547_v58, %v2531_v60  ;;  %1325 = vst.msk [vmem:[#allocation4 + $0x58] sm:$0xff] %vm587_vm1, %v1320_v53  ;;  %v2315_v63 = vld [vmem:[#allocation4 + $0x64] sm:$0x1]  ;;  %v4532_v46 = vld [vmem:[#allocation4 + $0x56] sm:$0x1] }
 0x239   : > { %v5102_v26 = vrot.slane %v5101_v30, 2  ;;  %v2039_v45 = vsel %vm1589_vm3, %v2038_v32, %v8836_v4  ;;  %v2403_v7 = vrot.slane %v2387_v22, 6  ;;  %v1458_v2 = vmax.f32 %v1447_v17, 0.0  ;;  %1372 = vst.msk [vmem:[#allocation4 + $0x78] sm:$0xff] %vm587_vm1, %v1367_v23  ;;  %v2388_v4 = vld [vmem:[#allocation4 + $0x65] sm:$0x1] }
 0x23a   : > { %v5109_v9 = vrot.slane %v5108_v19, 2  ;;  %v2112_v38 = vsel %vm1589_vm3, %v2111_v25, %v8843_v55  ;;  %v2476_v13 = vrot.slane %v2460_v16, 6  ;;  %v1505_v58 = vmax.f32 %v1494_v12, 0.0  ;;  %1416 = vst.msk [vmem:[#allocation4 + $0x80] sm:$0xff] %vm587_vm1, %v1411_v29  ;;  %v2461_v25 = vld [vmem:[#allocation4 + $0x66] sm:$0x1] }
 0x23b   : > { %v2185_v20 = vsel %vm1589_vm3, %v2184_v57, %v8850_v54  ;;  %v2549_v43 = vrot.slane %v2533_v48, 6  ;;  %v2040_v60 = vrot.slane %v2023_v49, 5  ;;  %v1552_v32 = vmax.f32 %v1541_v11, 0.0  ;;  %v2534_v16 = vld [vmem:[#allocation4 + $0x67] sm:$0x1]  ;;  %1463 = vst.msk [vmem:[#allocation4 + $0xa0] sm:$0xff] %vm587_vm1, %v1458_v2 }
 0x23c   : > { %v5096_v22 = vadd.f32 %v5095_v18, %v5094_v62  ;;  %v5116_v0 = vrot.slane %v5115_v6, 2  ;;  %v2258_v47 = vsel %vm1589_vm3, %v2257_v31, %v8853_v52  ;;  %v2113_v55 = vrot.slane %v2096_v59, 5  ;;  %v3057_v23 = vld [vmem:[#allocation4 + $0x28] sm:$0x1]  ;;  %v3130_v49 = vld [vmem:[#allocation4 + $0x29] sm:$0x1] }
 0x23d   : > { %v5103_v17 = vadd.f32 %v5102_v26, %v5101_v30  ;;  %v2186_v41 = vrot.slane %v2169_v10, 5  ;;  %v2259_v53 = vrot.slane %v2242_v28, 5  ;;  %v2332_v12 = vrot.slane %v2315_v63, 5  ;;  %v3203_v52 = vld [vmem:[#allocation4 + $0x2a] sm:$0x1]  ;;  %1510 = vst.msk [vmem:[#allocation4 + $0xc0] sm:$0xff] %vm587_vm1, %v1505_v58 }
 0x23e   : > { %v5110_v54 = vadd.f32 %v5109_v9, %v5108_v19  ;;  %v2331_v57 = vsel %vm1589_vm3, %v2330_v51, %v8856_v33  ;;  %v2404_v62 = vsel %vm1589_vm3, %v2403_v7, %v8866_v3  ;;  %v2405_v48 = vrot.slane %v2388_v4, 5  ;;  %v3276_v19 = vld [vmem:[#allocation4 + $0x2b] sm:$0x1]  ;;  %v8911_v18 = vld [vmem:[#allocation4 + $0x2c] sm:$0x1]  ;;  %1557 = vst.msk [vmem:[#allocation4 + $0xe0] sm:$0xff] %vm587_vm1, %v1552_v32 }
 0x23f   : > { %v2477_v31 = vsel %vm1589_vm3, %v2476_v13, %v2475_v15  ;;  %v2550_v30 = vsel %vm1589_vm3, %v2549_v43, %v2548_v44  ;;  %v8909_v29 = vsel %vm1592_vm4, %v2040_v60, %v2039_v45  ;;  %v2478_v11 = vrot.slane %v2461_v25, 5  ;;  %v8917_v10 = vld [vmem:[#allocation4 + $0x2d] sm:$0x1]  ;;  %v8919_v15 = vld [vmem:[#allocation4 + $0x2e] sm:$0x1] }
 0x240   : > { %v5097_v33 = vrot.slane %v5096_v22, 1  ;;  %v5117_v3 = vadd.f32 %v5116_v0, %v5115_v6  ;;  %v8915_v51 = vsel %vm1592_vm4, %v2113_v55, %v2112_v38  ;;  %v2551_v59 = vrot.slane %v2534_v16, 5  ;;  %v8924_v28 = vld [vmem:[#allocation4 + $0x2f] sm:$0x1]  ;;  %v8932_v13 = vld [vmem:[#allocation4 + $0x48] sm:$0x1] }
 0x241   : > { %v5104_v44 = vrot.slane %v5103_v17, 1  ;;  %v8922_v26 = vsel %vm1592_vm4, %v2186_v41, %v2185_v20  ;;  %v3072_v45 = vrot.slane %v3057_v23, 7  ;;  %v3145_v7 = vrot.slane %v3130_v49, 7  ;;  %v8934_v63 = vld [vmem:[#allocation4 + $0x49] sm:$0x1] }
 0x242   : > { %v5111_v2 = vrot.slane %v5110_v54, 1  ;;  %v8927_v9 = vsel %vm1592_vm4, %v2259_v53, %v2258_v47  ;;  %v8930_v6 = vsel %vm1592_vm4, %v2332_v12, %v2331_v57  ;;  %v3218_v38 = vrot.slane %v3203_v52, 7  ;;  %v3056_v58 = vld [vmem:[#allocation4 + $0x8] sm:$0x1]  ;;  %v3129_v43 = vld [vmem:[#allocation4 + $0x9] sm:$0x1] }
 0x243   : > { %v3291_v20 = vrot.slane %v3276_v19, 7  ;;  %v3364_v60 = vrot.slane %v8911_v18, 7  ;;  %v3437_v4 = vrot.slane %v8917_v10, 7  ;;  %v8939_v0 = vld [vmem:[#allocation4 + $0x4a] sm:$0x1]  ;;  %v5098_v47 = vadd.f32 %v5097_v33, %v5096_v22 }
 0x244   : > { %v5118_v55 = vrot.slane %v5117_v3, 1  ;;  %v8942_v25 = vsel %vm1592_vm4, %v2405_v48, %v2404_v62  ;;  %v3202_v16 = vld [vmem:[#allocation4 + $0xa] sm:$0x1]  ;;  %v3275_v41 = vld [vmem:[#allocation4 + $0xb] sm:$0x1]  ;;  %v5105_v57 = vadd.f32 %v5104_v44, %v5103_v17  ;;  %v8950_v49 = vsel %vm1592_vm4, %v2478_v11, %v2477_v31 }
 0x245   : > { %v8945_v12 = vld [vmem:[#allocation4 + $0x4b] sm:$0x1]  ;;  %v8947_v23 = vld [vmem:[#allocation4 + $0x4c] sm:$0x1]  ;;  %v3074_v52 = vrot.slane %v8932_v13, 6  ;;  %v3147_v22 = vrot.slane %v8934_v63, 6  ;;  %v5112_v48 = vadd.f32 %v5111_v2, %v5110_v54  ;;  %v8959_v18 = vsel %vm1592_vm4, %v2551_v59, %v2550_v30 }
 0x246   : > { %v8954_v19 = vld [vmem:[#allocation4 + $0x4d] sm:$0x1]  ;;  %v8956_v62 = vld [vmem:[#allocation4 + $0x4e] sm:$0x1]  ;;  %v3348_v33 = vld [vmem:[#allocation4 + $0xc] sm:$0x1]  ;;  %v3073_v10 = vsel %vm1586_vm2, %v3072_v45, %v3056_v58  ;;  %v3146_v17 = vsel %vm1586_vm2, %v3145_v7, %v3129_v43  ;;  %v3219_v63 = vsel %vm1586_vm2, %v3218_v38, %v3202_v16  ;;  %v3292_v53 = vsel %vm1586_vm2, %v3291_v20, %v3275_v41 }
 0x247   : > { %v3569_v44 = vld [vmem:[#allocation4 + $0x4f] sm:$0x1]  ;;  %v3059_v31 = vld [vmem:[#allocation4 + $0x68] sm:$0x1]  ;;  %v8963_v11 = vld [vmem:[#allocation4 + $0x69] sm:$0x1]  ;;  %v5119_v2 = vadd.f32 %v5118_v55, %v5117_v3  ;;  %7078 = vrcp.f32 %v5098_v47  ;;  %v3365_v38 = vsel %vm1586_vm2, %v3364_v60, %v3348_v33  ;;  %v3148_v36 = vsel %vm1589_vm3, %v3147_v22, %v3146_v17 }
 0x248   : > { %v3421_v13 = vld [vmem:[#allocation4 + $0xd] sm:$0x1]  ;;  %v3220_v32 = vrot.slane %v8939_v0, 6  ;;  %v3293_v54 = vrot.slane %v8945_v12, 6  ;;  %v3205_v30 = vld [vmem:[#allocation4 + $0x6a] sm:$0x1]  ;;  %7080 = vrcp.f32 %v5105_v57 }
 0x249   : > { %v8969_v59 = vld [vmem:[#allocation4 + $0x6b] sm:$0x1]  ;;  %v3366_v45 = vrot.slane %v8947_v23, 6  ;;  %v3439_v7 = vrot.slane %v8954_v19, 6  ;;  %v8973_v58 = vld [vmem:[#allocation4 + $0x6c] sm:$0x1]  ;;  %7082 = vrcp.f32 %v5112_v48  ;;  %v3438_v3 = vsel %vm1586_vm2, %v3437_v4, %v3421_v13 }
 0x24a   : > { %v8975_v43 = vld [vmem:[#allocation4 + $0x6d] sm:$0x1]  ;;  %v3512_v20 = vrot.slane %v8956_v62, 6  ;;  %v3585_v0 = vrot.slane %v3569_v44, 6  ;;  %v8979_v16 = vld [vmem:[#allocation4 + $0x6e] sm:$0x1]  ;;  %7084 = vrcp.f32 %v5119_v2  ;;  %v3075_v48 = vsel %vm1589_vm3, %v3074_v52, %v3073_v10 }
 0x24b   : > { %v8981_v41 = vld [vmem:[#allocation4 + $0x6f] sm:$0x1]  ;;  %v3076_v47 = vrot.slane %v3059_v31, 5  ;;  %v3149_v55 = vrot.slane %v8963_v11, 5  ;;  %v8985_v12 = vld [vmem:[#allocation4 + $0x30] sm:$0x1]  ;;  %v3294_v22 = vsel %vm1589_vm3, %v3293_v54, %v3292_v53  ;;  %v3440_v1 = vsel %vm1589_vm3, %v3439_v7, %v3438_v3 }
 0x24c   : > { %v8987_v23 = vld [vmem:[#allocation4 + $0x31] sm:$0x1]  ;;  %v3494_v57 = vld [vmem:[#allocation4 + $0xe] sm:$0x1]  ;;  %v3567_v19 = vld [vmem:[#allocation4 + $0xf] sm:$0x1] }
 0x24d   : > { %v3222_v60 = vrot.slane %v3205_v30, 5  ;;  %v3295_v62 = vrot.slane %v8969_v59, 5  ;;  %v3368_v33 = vrot.slane %v8973_v58, 5  ;;  %v3441_v44 = vrot.slane %v8975_v43, 5  ;;  %v8995_v11 = vld [vmem:[#allocation4 + $0x32] sm:$0x1]  ;;  %v7079_v52 = vpop.eup %7078 }
 0x24e   : > { %v3514_v4 = vrot.slane %v8979_v16, 5  ;;  %v3587_v31 = vrot.slane %v8981_v41, 5  ;;  %v8997_v13 = vld [vmem:[#allocation4 + $0x33] sm:$0x1]  ;;  %v3221_v30 = vsel %vm1589_vm3, %v3220_v32, %v3219_v63  ;;  %v4108_v59 = vrot.slane %v8985_v12, 7 }
 0x24f   : > { %v4181_v58 = vrot.slane %v8987_v23, 7  ;;  %v9003_v43 = vld [vmem:[#allocation4 + $0x34] sm:$0x1]  ;;  %v9005_v2 = vld [vmem:[#allocation4 + $0x35] sm:$0x1]  ;;  %v10617_v10 = vrot.slane %v8919_v15, 7  ;;  %v3367_v32 = vsel %vm1589_vm3, %v3366_v45, %v3365_v38  ;;  %v7081_v23 = vpop.eup %7080  ;;  %v9030_v45 = vsel %vm1592_vm4, %v3149_v55, %v3148_v36 }
 0x250   : > { %v10618_v41 = vrot.slane %v8924_v28, 7  ;;  %v9015_v17 = vld [vmem:[#allocation4 + $0x36] sm:$0x1]  ;;  %v9017_v63 = vld [vmem:[#allocation4 + $0x37] sm:$0x1]  ;;  %v9023_v28 = vsel %vm1592_vm4, %v3076_v47, %v3075_v48  ;;  %v7083_v54 = vpop.eup %7082  ;;  %v9033_v38 = vsel %vm1592_vm4, %v3222_v60, %v3221_v30  ;;  %v4254_v7 = vrot.slane %v8995_v11, 7 }
 0x251   : > { %v3511_v16 = vsel %vm1586_vm2, %v10617_v10, %v3494_v57  ;;  %v4094_v12 = vld [vmem:[#allocation4 + $0x50] sm:$0x1]  ;;  %v9025_v10 = vld [vmem:[#allocation4 + $0x52] sm:$0x1]  ;;  %v9027_v53 = vld [vmem:[#allocation4 + $0x53] sm:$0x1]  ;;  %v7085_v55 = vpop.eup %7084  ;;  %v9051_v21 = vsel %vm1592_vm4, %v3295_v62, %v3294_v22 }
 0x252   : > { %v3584_v40 = vsel %vm1586_vm2, %v10618_v41, %v3567_v19  ;;  %v3513_v15 = vsel %vm1589_vm3, %v3512_v20, %v3511_v16  ;;  %v4167_v19 = vld [vmem:[#allocation4 + $0x51] sm:$0x1]  ;;  %v4327_v20 = vrot.slane %v8997_v13, 7  ;;  %v4400_v3 = vrot.slane %v9003_v43, 7  ;;  %v4092_v16 = vld [vmem:[#allocation4 + $0x10] sm:$0x1] }
 0x253   : > { %v3586_v57 = vsel %vm1589_vm3, %v3585_v0, %v3584_v40  ;;  %v9037_v40 = vld [vmem:[#allocation4 + $0x54] sm:$0x1]  ;;  %v9039_v0 = vld [vmem:[#allocation4 + $0x55] sm:$0x1]  ;;  %v4473_v47 = vrot.slane %v9005_v2, 7  ;;  %v4546_v48 = vrot.slane %v9015_v17, 7  ;;  %v9048_v41 = vmul.f32 %v7079_v52, %v8783_v8 }
 0x254   : > { %v4619_v36 = vrot.slane %v9017_v63, 7  ;;  %v4110_v60 = vrot.slane %v4094_v12, 6  ;;  %v4183_v30 = vrot.slane %v4167_v19, 6  ;;  %v4256_v11 = vrot.slane %v9025_v10, 6  ;;  %v4165_v43 = vld [vmem:[#allocation4 + $0x11] sm:$0x1] }
 0x255   : > { %v4329_v13 = vrot.slane %v9027_v53, 6  ;;  %10619 = vst [vmem:[#allocation26_spill] sm:$0xff] %v9048_v41  ;;  %v4238_v2 = vld [vmem:[#allocation4 + $0x12] sm:$0x1]  ;;  %v4402_v17 = vrot.slane %v9037_v40, 6  ;;  %v4475_v63 = vrot.slane %v9039_v0, 6  ;;  %v9056_v19 = vmul.f32 %v7081_v23, %v8801_v61 }
 0x256   : > { %v4605_v12 = vld [vmem:[#allocation4 + $0x57] sm:$0x1]  ;;  %v9059_v10 = vsel %vm1592_vm4, %v3368_v33, %v3367_v32  ;;  %v9062_v8 = vsel %vm1592_vm4, %v3441_v44, %v3440_v1  ;;  %v9065_v62 = vsel %vm1592_vm4, %v3514_v4, %v3513_v15  ;;  %v4095_v52 = vld [vmem:[#allocation4 + $0x70] sm:$0x1]  ;;  %v4168_v22 = vld [vmem:[#allocation4 + $0x71] sm:$0x1]  ;;  %v9068_v40 = vmul.f32 %v7083_v54, %v8812_v14 }
 0x257   : > { %10620 = vst [vmem:[#allocation34_spill] sm:$0xff] %v9056_v19  ;;  %v4241_v53 = vld [vmem:[#allocation4 + $0x72] sm:$0x1]  ;;  %v9071_v0 = vmul.f32 %v7085_v55, %v8825_v35  ;;  %v9074_v61 = vsel %vm1592_vm4, %v3587_v31, %v3586_v57  ;;  %v4109_v33 = vsel %vm1586_vm2, %v4108_v59, %v4092_v16  ;;  %v4314_v32 = vld [vmem:[#allocation4 + $0x73] sm:$0x1]  ;;  %v4182_v4 = vsel %vm1586_vm2, %v4181_v58, %v4165_v43 }
 0x258   : > { %10621 = vst [vmem:[#allocation35_spill] sm:$0xff] %v9068_v40  ;;  %v9077_v1 = vld [vmem:[#allocation4 + $0x74] sm:$0x1]  ;;  %v9079_v44 = vld [vmem:[#allocation4 + $0x75] sm:$0x1]  ;;  %v4255_v23 = vsel %vm1586_vm2, %v4254_v7, %v4238_v2  ;;  %v4328_v14 = vsel %vm1586_vm2, %v4327_v20, %v4311_v34  ;;  %v4111_v15 = vsel %vm1589_vm3, %v4110_v60, %v4109_v33  ;;  %v4184_v16 = vsel %vm1589_vm3, %v4183_v30, %v4182_v4 }
 0x259   : > { %10622 = vst [vmem:[#allocation36_spill] sm:$0xff] %v9071_v0  ;;  %v9085_v35 = vld [vmem:[#allocation4 + $0x76] sm:$0x1]  ;;  %v9087_v54 = vld [vmem:[#allocation4 + $0x77] sm:$0x1]  ;;  %v4548_v0 = vrot.slane %v4532_v46, 6 }
 0x25a   : > { %v9089_v31 = vld [vmem:[#allocation4 + $0x38] sm:$0x1]  ;;  %v4384_v59 = vld [vmem:[#allocation4 + $0x14] sm:$0x1]  ;;  %v4457_v57 = vld [vmem:[#allocation4 + $0x15] sm:$0x1] }
 0x25b   : > { %v4530_v55 = vld [vmem:[#allocation4 + $0x16] sm:$0x1]  ;;  %v4621_v40 = vrot.slane %v4605_v12, 6  ;;  %v4112_v58 = vrot.slane %v4095_v52, 5  ;;  %v4603_v43 = vld [vmem:[#allocation4 + $0x17] sm:$0x1]  ;;  %v4401_v30 = vsel %vm1586_vm2, %v4400_v3, %v4384_v59  ;;  %v4474_v46 = vsel %vm1586_vm2, %v4473_v47, %v4457_v57 }
 0x25c   : > { %v4185_v7 = vrot.slane %v4168_v22, 5  ;;  %v4258_v2 = vrot.slane %v4241_v53, 5  ;;  %v4331_v34 = vrot.slane %v4314_v32, 5  ;;  %v4404_v20 = vrot.slane %v9077_v1, 5  ;;  %v5202_v37 = vld [vmem:[#allocation4 + $0x39] sm:$0x1] }
 0x25d   : > { %v4477_v60 = vrot.slane %v9079_v44, 5  ;;  %v4550_v33 = vrot.slane %v9085_v35, 5  ;;  %v4623_v19 = vrot.slane %v9087_v54, 5  ;;  %v5144_v41 = vrot.slane %v9089_v31, 7  ;;  %v5275_v22 = vld [vmem:[#allocation4 + $0x3a] sm:$0x1] }
 0x25e   : > { %v4547_v12 = vsel %vm1586_vm2, %v4546_v48, %v4530_v55  ;;  %v4620_v52 = vsel %vm1586_vm2, %v4619_v36, %v4603_v43  ;;  %v5348_v53 = vld [vmem:[#allocation4 + $0x3b] sm:$0x1]  ;;  %v5421_v32 = vld [vmem:[#allocation4 + $0x3c] sm:$0x1]  ;;  %v4257_v1 = vsel %vm1589_vm3, %v4256_v11, %v4255_v23  ;;  %v4330_v44 = vsel %vm1589_vm3, %v4329_v13, %v4328_v14  ;;  %v5494_v54 = vld [vmem:[#allocation4 + $0x3d] sm:$0x1] }
 0x25f   : > { %v4403_v4 = vsel %vm1589_vm3, %v4402_v17, %v4401_v30  ;;  %v4476_v35 = vsel %vm1589_vm3, %v4475_v63, %v4474_v46  ;;  %v5567_v31 = vld [vmem:[#allocation4 + $0x3e] sm:$0x1]  ;;  %v5640_v3 = vld [vmem:[#allocation4 + $0x3f] sm:$0x1]  ;;  %v4549_v47 = vsel %vm1589_vm3, %v4548_v0, %v4547_v12  ;;  %v4622_v48 = vsel %vm1589_vm3, %v4621_v40, %v4620_v52  ;;  %v9113_v11 = vld [vmem:[#allocation4 + $0x58] sm:$0x1] }
 0x260   : > { %v9108_v36 = vsel %vm1592_vm4, %v4112_v58, %v4111_v15  ;;  %v9111_v59 = vsel %vm1592_vm4, %v4185_v7, %v4184_v16  ;;  %v9115_v13 = vld [vmem:[#allocation4 + $0x59] sm:$0x1]  ;;  %v9117_v17 = vld [vmem:[#allocation4 + $0x5a] sm:$0x1]  ;;  %v5217_v63 = vrot.slane %v5202_v37, 7  ;;  %v5290_v23 = vrot.slane %v5275_v22, 7 }
 0x261   : > { %10623 = vst [vmem:[#allocation37_spill] sm:$0xff] %v9111_v59  ;;  %v5363_v14 = vrot.slane %v5348_v53, 7  ;;  %v5436_v57 = vrot.slane %v5421_v32, 7  ;;  %v9120_v0 = vsel %vm1592_vm4, %v4258_v2, %v4257_v1  ;;  %v9123_v40 = vsel %vm1592_vm4, %v4331_v34, %v4330_v44  ;;  %v5128_v15 = vld [vmem:[#allocation4 + $0x18] sm:$0x1] }
 0x262   : > { %10624 = vst [vmem:[#allocation38_spill] sm:$0xff] %v9120_v0  ;;  %v5201_v55 = vld [vmem:[#allocation4 + $0x19] sm:$0x1]  ;;  %v5509_v16 = vrot.slane %v5494_v54, 7  ;;  %v5582_v58 = vrot.slane %v5567_v31, 7  ;;  %v5655_v37 = vrot.slane %v5640_v3, 7  ;;  %v9129_v34 = vsel %vm1592_vm4, %v4404_v20, %v4403_v4 }
 0x263   : > { %10625 = vst [vmem:[#allocation39_spill] sm:$0xff] %v9123_v40  ;;  %v5349_v43 = vld [vmem:[#allocation4 + $0x5b] sm:$0x1]  ;;  %v2024_v7 = vld [vmem:[#allocation4 + $0x80] sm:$0x1]  ;;  %v5146_v22 = vrot.slane %v9113_v11, 6  ;;  %v9132_v1 = vsel %vm1592_vm4, %v4477_v60, %v4476_v35  ;;  %v9135_v44 = vsel %vm1592_vm4, %v4550_v33, %v4549_v47  ;;  %v9138_v54 = vsel %vm1592_vm4, %v4623_v19, %v4622_v48 }
 0x264   : > { %v5274_v30 = vld [vmem:[#allocation4 + $0x1a] sm:$0x1]  ;;  %v5347_v46 = vld [vmem:[#allocation4 + $0x1b] sm:$0x1]  ;;  %v5420_v12 = vld [vmem:[#allocation4 + $0x1c] sm:$0x1]  ;;  %v5218_v0 = vsel %vm1586_vm2, %v5217_v63, %v5201_v55 }
 0x265   : > { %v5493_v52 = vld [vmem:[#allocation4 + $0x1d] sm:$0x1]  ;;  %v5219_v53 = vrot.slane %v9115_v13, 6  ;;  %v5292_v2 = vrot.slane %v9117_v17, 6  ;;  %v5422_v32 = vld [vmem:[#allocation4 + $0x5c] sm:$0x1]  ;;  %v5145_v17 = vsel %vm1586_vm2, %v5144_v41, %v5128_v15  ;;  %v5291_v35 = vsel %vm1586_vm2, %v5290_v23, %v5274_v30 }
 0x266   : > { %10626 = vst [vmem:[#allocation40_spill] sm:$0xff] %v9129_v34  ;;  %v5566_v31 = vld [vmem:[#allocation4 + $0x1e] sm:$0x1]  ;;  %v5639_v3 = vld [vmem:[#allocation4 + $0x1f] sm:$0x1]  ;;  %v5365_v20 = vrot.slane %v5349_v43, 6  ;;  %v5364_v33 = vsel %vm1586_vm2, %v5363_v14, %v5347_v46  ;;  %v5437_v19 = vsel %vm1586_vm2, %v5436_v57, %v5420_v12  ;;  %v5510_v47 = vsel %vm1586_vm2, %v5509_v16, %v5493_v52 }
 0x267   : > { %10627 = vst [vmem:[#allocation41_spill] sm:$0xff] %v9132_v1  ;;  %v5495_v11 = vld [vmem:[#allocation4 + $0x5d] sm:$0x1]  ;;  %v5568_v40 = vld [vmem:[#allocation4 + $0x5e] sm:$0x1]  ;;  %v2042_v34 = vrot.slane %v2024_v7, 4  ;;  %v5583_v1 = vsel %vm1586_vm2, %v5582_v58, %v5566_v31  ;;  %v5656_v41 = vsel %vm1586_vm2, %v5655_v37, %v5639_v3  ;;  %v5147_v52 = vsel %vm1589_vm3, %v5146_v22, %v5145_v17 }
 0x268   : > { %10628 = vst [vmem:[#allocation42_spill] sm:$0xff] %v9135_v44  ;;  %v5641_v13 = vld [vmem:[#allocation4 + $0x5f] sm:$0x1]  ;;  %v5131_v4 = vld [vmem:[#allocation4 + $0x78] sm:$0x1]  ;;  %v5438_v63 = vrot.slane %v5422_v32, 6  ;;  %v5220_v58 = vsel %vm1589_vm3, %v5219_v53, %v5218_v0 }
 0x269   : > { %10629 = vst [vmem:[#allocation43_spill] sm:$0xff] %v9138_v54  ;;  %v2025_v60 = vld [vmem:[#allocation4 + $0xa0] sm:$0x1]  ;;  %v5204_v48 = vld [vmem:[#allocation4 + $0x79] sm:$0x1]  ;;  %v5511_v15 = vrot.slane %v5495_v11, 6  ;;  %v2043_v57 = vsel %vm1595_vm5, %v2042_v34, %v8909_v29  ;;  %v5366_v11 = vsel %vm1589_vm3, %v5365_v20, %v5364_v33 }
 0x26a   : > { %v5277_v54 = vld [vmem:[#allocation4 + $0x7a] sm:$0x1]  ;;  %v2026_v44 = vld [vmem:[#allocation4 + $0xc0] sm:$0x1]  ;;  %v5350_v55 = vld [vmem:[#allocation4 + $0x7b] sm:$0x1] }
 0x26b   : > { %v2097_v43 = vld [vmem:[#allocation4 + $0x81] sm:$0x1]  ;;  %v5584_v7 = vrot.slane %v5568_v40, 6  ;;  %v5657_v59 = vrot.slane %v5641_v13, 6  ;;  %v5148_v23 = vrot.slane %v5131_v4, 5  ;;  %v2044_v30 = vrot.slane %v2025_v60, 3 }
 0x26c   : > { %v5221_v14 = vrot.slane %v5204_v48, 5  ;;  %v5294_v46 = vrot.slane %v5277_v54, 5  ;;  %v2046_v16 = vrot.slane %v2026_v44, 2  ;;  %v2027_v12 = vld [vmem:[#allocation4 + $0xe0] sm:$0x1]  ;;  %v5367_v37 = vrot.slane %v5350_v55, 5 }
 0x26d   : > { %v5423_v32 = vld [vmem:[#allocation4 + $0x7c] sm:$0x1]  ;;  %v2115_v31 = vrot.slane %v2097_v43, 4  ;;  %v2098_v3 = vld [vmem:[#allocation4 + $0xa1] sm:$0x1]  ;;  %v5293_v40 = vsel %vm1589_vm3, %v5292_v2, %v5291_v35  ;;  %v5439_v13 = vsel %vm1589_vm3, %v5438_v63, %v5437_v19  ;;  %v5512_v54 = vsel %vm1589_vm3, %v5511_v15, %v5510_v47 }
 0x26e   : > { %v5496_v4 = vld [vmem:[#allocation4 + $0x7d] sm:$0x1]  ;;  %v5569_v29 = vld [vmem:[#allocation4 + $0x7e] sm:$0x1]  ;;  %v2099_v34 = vld [vmem:[#allocation4 + $0xc1] sm:$0x1]  ;;  %v5585_v44 = vsel %vm1589_vm3, %v5584_v7, %v5583_v1  ;;  %v5658_v22 = vsel %vm1589_vm3, %v5657_v59, %v5656_v41  ;;  %v2045_v17 = vsel %vm1598_vm6, %v2044_v30, %v2043_v57  ;;  %v9160_v2 = vsel %vm1592_vm4, %v5148_v23, %v5147_v52 }
 0x26f   : > { %v5642_v0 = vld [vmem:[#allocation4 + $0x7f] sm:$0x1]  ;;  %v2170_v53 = vld [vmem:[#allocation4 + $0x82] sm:$0x1]  ;;  %v2048_v60 = vrot.slane %v2027_v12, 1  ;;  %10630 = vst [vmem:[#allocation44_spill] sm:$0xff] %v9160_v2  ;;  %v2047_v47 = vsel %vm1601_vm7, %v2046_v16, %v2045_v17  ;;  %v9164_v48 = vsel %vm1592_vm4, %v5221_v14, %v5220_v58  ;;  %v2116_v59 = vsel %vm1595_vm5, %v2115_v31, %v8915_v51 }
 0x270   : > { %v5440_v20 = vrot.slane %v5423_v32, 5  ;;  %v2243_v35 = vld [vmem:[#allocation4 + $0x83] sm:$0x1]  ;;  %v2316_v33 = vld [vmem:[#allocation4 + $0x84] sm:$0x1]  ;;  %v2117_v19 = vrot.slane %v2098_v3, 3  ;;  %v9169_v55 = vsel %vm1592_vm4, %v5294_v46, %v5293_v40  ;;  %v9172_v43 = vsel %vm1592_vm4, %v5367_v37, %v5366_v11 }
 0x271   : > { %10631 = vst [vmem:[#allocation45_spill] sm:$0xff] %v9164_v48  ;;  %v5513_v1 = vrot.slane %v5496_v4, 5  ;;  %v2389_v41 = vld [vmem:[#allocation4 + $0x85] sm:$0x1]  ;;  %v2119_v63 = vrot.slane %v2099_v34, 2  ;;  %v5586_v7 = vrot.slane %v5569_v29, 5  ;;  %v2049_v52 = vsel %vm1604_vm8, %v2048_v60, %v2047_v47 }
 0x272   : > { %v2100_v15 = vld [vmem:[#allocation4 + $0xe1] sm:$0x1]  ;;  %10632 = vst [vmem:[#allocation46_spill] sm:$0xff] %v9169_v55  ;;  %v5659_v23 = vrot.slane %v5642_v0, 5  ;;  %v2462_v30 = vld [vmem:[#allocation4 + $0x86] sm:$0x1]  ;;  %v9176_v51 = vsel %vm1592_vm4, %v5440_v20, %v5439_v13  ;;  %v2118_v32 = vsel %vm1598_vm6, %v2117_v19, %v2116_v59  ;;  %v2051_v0 = vmul.f32 %v2049_v52, %v8786_v42 }
 0x273   : > { %10633 = vst [vmem:[#allocation47_spill] sm:$0xff] %v9172_v43  ;;  %v2535_v57 = vld [vmem:[#allocation4 + $0x87] sm:$0x1]  ;;  %v2188_v16 = vrot.slane %v2170_v53, 4  ;;  %v2261_v14 = vrot.slane %v2243_v35, 4  ;;  %v2334_v12 = vrot.slane %v2316_v33, 4  ;;  %v9180_v31 = vsel %vm1592_vm4, %v5513_v1, %v5512_v54 }
 0x274   : > { %10634 = vst [vmem:[#allocation48_spill] sm:$0xff] %v9176_v51  ;;  %v2407_v58 = vrot.slane %v2389_v41, 4  ;;  %v2121_v46 = vrot.slane %v2100_v15, 1  ;;  %v2480_v37 = vrot.slane %v2462_v30, 4  ;;  %v2553_v3 = vrot.slane %v2535_v57, 4 }
 0x275   : > { %10635 = vst [vmem:[#allocation49_spill] sm:$0xff] %v9180_v31  ;;  %v2171_v40 = vld [vmem:[#allocation4 + $0xa2] sm:$0x1]  ;;  %v2244_v11 = vld [vmem:[#allocation4 + $0xa3] sm:$0x1]  ;;  %v2120_v4 = vsel %vm1601_vm7, %v2119_v63, %v2118_v32  ;;  %v9184_v29 = vsel %vm1592_vm4, %v5586_v7, %v5585_v44  ;;  %v9187_v34 = vsel %vm1592_vm4, %v5659_v23, %v5658_v22  ;;  %v2052_v53 = vmul.f32 %v2049_v52, %v8791_v27 }
 0x276   : > { %10636 = vst [vmem:[#allocation50_spill] sm:$0xff] %v9184_v29  ;;  %v2317_v13 = vld [vmem:[#allocation4 + $0xa4] sm:$0x1]  ;;  %v2189_v54 = vsel %vm1595_vm5, %v2188_v16, %v8922_v26  ;;  %v2262_v17 = vsel %vm1595_vm5, %v2261_v14, %v8927_v9  ;;  %v2335_v60 = vsel %vm1595_vm5, %v2334_v12, %v8930_v6  ;;  %v2390_v20 = vld [vmem:[#allocation4 + $0xa5] sm:$0x1]  ;;  %v2053_v35 = vmul.f32 %v2049_v52, %v8794_v56 }
 0x277   : > { %10637 = vst [vmem:[#allocation51_spill] sm:$0xff] %v9187_v34  ;;  %v2463_v44 = vld [vmem:[#allocation4 + $0xa6] sm:$0x1]  ;;  %v2408_v22 = vsel %vm1595_vm5, %v2407_v58, %v8942_v25  ;;  %v2190_v33 = vrot.slane %v2171_v40, 3  ;;  %v2263_v19 = vrot.slane %v2244_v11, 3  ;;  %v2122_v59 = vsel %vm1604_vm8, %v2121_v46, %v2120_v4 }
 0x278   : > { %v2536_v47 = vld [vmem:[#allocation4 + $0xa7] sm:$0x1]  ;;  %v2172_v1 = vld [vmem:[#allocation4 + $0xc2] sm:$0x1]  ;;  %v2481_v26 = vsel %vm1595_vm5, %v2480_v37, %v8950_v49  ;;  %v2554_v9 = vsel %vm1595_vm5, %v2553_v3, %v8959_v18  ;;  %v2336_v6 = vrot.slane %v2317_v13, 3  ;;  %v2054_v41 = vmul.f32 %v2049_v52, %v8797_v39 }
 0x279   : > { %v2409_v63 = vrot.slane %v2390_v20, 3  ;;  %v2482_v15 = vrot.slane %v2463_v44, 3  ;;  %v2055_v7 = vsel %vm587_vm1, %v2051_v0, 0.0  ;;  %v2062_v25 = vsel %vm587_vm1, %v2052_v53, 0.0  ;;  %v2245_v57 = vld [vmem:[#allocation4 + $0xc3] sm:$0x1] }
 0x27a   : > { %v2555_v23 = vrot.slane %v2536_v47, 3  ;;  %v2192_v30 = vrot.slane %v2172_v1, 2  ;;  %v2069_v16 = vsel %vm587_vm1, %v2053_v35, 0.0  ;;  %v2124_v14 = vmul.f32 %v2122_v59, %v8786_v42  ;;  %v2318_v12 = vld [vmem:[#allocation4 + $0xc4] sm:$0x1] }
 0x27b   : > { %v2191_v49 = vsel %vm1598_vm6, %v2190_v33, %v2189_v54  ;;  %v2264_v18 = vsel %vm1598_vm6, %v2263_v19, %v2262_v17  ;;  %v2391_v58 = vld [vmem:[#allocation4 + $0xc5] sm:$0x1]  ;;  %v2125_v52 = vmul.f32 %v2122_v59, %v8791_v27  ;;  %v2126_v32 = vmul.f32 %v2122_v59, %v8794_v56  ;;  %v2173_v46 = vld [vmem:[#allocation4 + $0xe2] sm:$0x1]  ;;  %v2464_v19 = vld [vmem:[#allocation4 + $0xc6] sm:$0x1] }
 0x27c   : > { %v2056_v37 = vrot.slane %v2055_v7, 4  ;;  %v2063_v3 = vrot.slane %v2062_v25, 4  ;;  %v2076_v40 = vsel %vm587_vm1, %v2054_v41, 0.0  ;;  %v2127_v11 = vmul.f32 %v2122_v59, %v8797_v39  ;;  %v2537_v47 = vld [vmem:[#allocation4 + $0xc7] sm:$0x1] }
 0x27d   : > { %v2337_v4 = vsel %vm1598_vm6, %v2336_v6, %v2335_v60  ;;  %v2410_v13 = vsel %vm1598_vm6, %v2409_v63, %v2408_v22  ;;  %v2265_v0 = vrot.slane %v2245_v57, 2  ;;  %v2070_v53 = vrot.slane %v2069_v16, 4  ;;  %v2246_v63 = vld [vmem:[#allocation4 + $0xe3] sm:$0x1] }
 0x27e   : > { %v2338_v54 = vrot.slane %v2318_v12, 2  ;;  %v2411_v17 = vrot.slane %v2391_v58, 2  ;;  %v2128_v20 = vsel %vm587_vm1, %v2124_v14, 0.0  ;;  %v2194_v44 = vrot.slane %v2173_v46, 1 }
 0x27f   : > { %v2483_v35 = vsel %vm1598_vm6, %v2482_v15, %v2481_v26  ;;  %v2193_v33 = vsel %vm1601_vm7, %v2192_v30, %v2191_v49  ;;  %v2077_v1 = vrot.slane %v2076_v40, 4  ;;  %v2135_v59 = vsel %vm587_vm1, %v2125_v52, 0.0 }
 0x280   : > { %v2057_v41 = vadd.f32 %v2056_v37, %v2055_v7  ;;  %v2064_v60 = vadd.f32 %v2063_v3, %v2062_v25  ;;  %v2142_v22 = vsel %vm587_vm1, %v2126_v32, 0.0  ;;  %v2149_v6 = vsel %vm587_vm1, %v2127_v11, 0.0 }
 0x281   : > { %v2556_v57 = vsel %vm1598_vm6, %v2555_v23, %v2554_v9  ;;  %v2266_v14 = vsel %vm1601_vm7, %v2265_v0, %v2264_v18  ;;  %v2071_v12 = vadd.f32 %v2070_v53, %v2069_v16  ;;  %v2129_v26 = vrot.slane %v2128_v20, 4  ;;  %v9235_v0 = vld [vmem:[#allocation4 + $0xe4] sm:$0x1] }
 0x282   : > { %v2484_v15 = vrot.slane %v2464_v19, 2  ;;  %v2557_v30 = vrot.slane %v2537_v47, 2  ;;  %v2136_v49 = vrot.slane %v2135_v59, 4  ;;  %v2195_v58 = vsel %vm1604_vm8, %v2194_v44, %v2193_v33 }
 0x283   : > { %v2078_v46 = vadd.f32 %v2077_v1, %v2076_v40  ;;  %v2143_v52 = vrot.slane %v2142_v22, 4  ;;  %v2150_v7 = vrot.slane %v2149_v6, 4  ;;  %v2267_v25 = vrot.slane %v2246_v63, 1 }
 0x284   : > { %v9228_v32 = vsel %vm1601_vm7, %v2338_v54, %v2337_v4  ;;  %v9231_v37 = vsel %vm1601_vm7, %v2411_v17, %v2410_v13  ;;  %v2058_v9 = vrot.slane %v2057_v41, 2  ;;  %v2065_v23 = vrot.slane %v2064_v60, 2 }
 0x285   : > { %v2072_v18 = vrot.slane %v2071_v12, 2  ;;  %v2130_v16 = vadd.f32 %v2129_v26, %v2128_v20  ;;  %v2197_v3 = vmul.f32 %v2195_v58, %v8786_v42  ;;  %v2198_v11 = vmul.f32 %v2195_v58, %v8791_v27 }
 0x286   : > { %v9238_v40 = vsel %vm1601_vm7, %v2484_v15, %v2483_v35  ;;  %v2137_v53 = vadd.f32 %v2136_v49, %v2135_v59  ;;  %v2199_v4 = vmul.f32 %v2195_v58, %v8794_v56  ;;  %v2200_v54 = vmul.f32 %v2195_v58, %v8797_v39 }
 0x287   : > { %v2079_v13 = vrot.slane %v2078_v46, 2  ;;  %v2144_v17 = vadd.f32 %v2143_v52, %v2142_v22  ;;  %v2151_v44 = vadd.f32 %v2150_v7, %v2149_v6  ;;  %v2268_v33 = vsel %vm1604_vm8, %v2267_v25, %v2266_v14  ;;  %v9252_v14 = vld [vmem:[#allocation4 + $0xe5] sm:$0x1] }
 0x288   : > { %v9244_v20 = vsel %vm1601_vm7, %v2557_v30, %v2556_v57  ;;  %v2059_v19 = vadd.f32 %v2058_v9, %v2057_v41  ;;  %v2066_v47 = vadd.f32 %v2065_v23, %v2064_v60  ;;  %v2340_v1 = vrot.slane %v9235_v0, 1 }
 0x289   : > { %v2073_v63 = vadd.f32 %v2072_v18, %v2071_v12  ;;  %v2131_v35 = vrot.slane %v2130_v16, 2  ;;  %v2201_v59 = vsel %vm587_vm1, %v2197_v3, 0.0  ;;  %v2208_v26 = vsel %vm587_vm1, %v2198_v11, 0.0 }
 0x28a   : > { %v2138_v15 = vrot.slane %v2137_v53, 2  ;;  %v2215_v49 = vsel %vm587_vm1, %v2199_v4, 0.0  ;;  %v2222_v22 = vsel %vm587_vm1, %v2200_v54, 0.0  ;;  %v2270_v6 = vmul.f32 %v2268_v33, %v8786_v42 }
 0x28b   : > { %v2080_v57 = vadd.f32 %v2079_v13, %v2078_v46  ;;  %v2145_v41 = vrot.slane %v2144_v17, 2  ;;  %v2152_v60 = vrot.slane %v2151_v44, 2  ;;  %v2271_v30 = vmul.f32 %v2268_v33, %v8791_v27 }
 0x28c   : > { %v2060_v12 = vrot.slane %v2059_v19, 1  ;;  %v2202_v58 = vrot.slane %v2201_v59, 4  ;;  %v2209_v52 = vrot.slane %v2208_v26, 4  ;;  %v2272_v7 = vmul.f32 %v2268_v33, %v8794_v56 }
 0x28d   : > { %v2067_v25 = vrot.slane %v2066_v47, 1  ;;  %v2216_v9 = vrot.slane %v2215_v49, 4  ;;  %v2223_v23 = vrot.slane %v2222_v22, 4  ;;  %v2413_v18 = vrot.slane %v9252_v14, 1 }
 0x28e   : > { %v2074_v3 = vrot.slane %v2073_v63, 1  ;;  %v2132_v11 = vadd.f32 %v2131_v35, %v2130_v16  ;;  %v2139_v0 = vadd.f32 %v2138_v15, %v2137_v53  ;;  %v2274_v4 = vsel %vm587_vm1, %v2270_v6, 0.0  ;;  %v1402_v16 = vpop.f32.mrf.mxu0 }
 0x28f   : > { %v2081_v46 = vrot.slane %v2080_v57, 1  ;;  %v2146_v54 = vadd.f32 %v2145_v41, %v2144_v17  ;;  %v2153_v13 = vadd.f32 %v2152_v60, %v2151_v44  ;;  %v2281_v34 = vsel %vm587_vm1, %v2271_v30, 0.0 }
 0x290   : > { %v9259_v29 = vadd.f32 %v2060_v12, %v2059_v19  ;;  %v2203_v31 = vadd.f32 %v2202_v58, %v2201_v59  ;;  %v2210_v51 = vadd.f32 %v2209_v52, %v2208_v26  ;;  %v2288_v43 = vsel %vm587_vm1, %v2272_v7, 0.0 }
 0x291   : > { %v2217_v55 = vadd.f32 %v2216_v9, %v2215_v49  ;;  %v2224_v48 = vadd.f32 %v2223_v23, %v2222_v22  ;;  %v2273_v14 = vmul.f32 %v2268_v33, %v8797_v39  ;;  %v2275_v2 = vrot.slane %v2274_v4, 4 }
 0x292   : > { %v9263_v53 = vadd.f32 %v2067_v25, %v2066_v47  ;;  %v2133_v35 = vrot.slane %v2132_v11, 1  ;;  %v2140_v15 = vrot.slane %v2139_v0, 1  ;;  %v2282_v17 = vrot.slane %v2281_v34, 4 }
 0x293   : > { %v9265_v44 = vadd.f32 %v2074_v3, %v2073_v63  ;;  %v9267_v6 = vadd.f32 %v2081_v46, %v2080_v57  ;;  %v2147_v19 = vrot.slane %v2146_v54, 1  ;;  %v2289_v59 = vrot.slane %v2288_v43, 4 }
 0x294   : > { %v2204_v26 = vrot.slane %v2203_v31, 2  ;;  %v2211_v41 = vrot.slane %v2210_v51, 2  ;;  %v2341_v49 = vsel %vm1604_vm8, %v2340_v1, %v9228_v32  ;;  %v1403_v33 = vadd.f32 %v1402_v16, %v8723_v24 }
 0x295   : > { %v2218_v22 = vrot.slane %v2217_v55, 2  ;;  %v2225_v60 = vrot.slane %v2224_v48, 2  ;;  %v2276_v47 = vadd.f32 %v2275_v2, %v2274_v4  ;;  %v2295_v30 = vsel %vm587_vm1, %v2273_v14, 0.0 }
 0x296   : > { %v2134_v12 = vadd.f32 %v2133_v35, %v2132_v11  ;;  %v2141_v58 = vadd.f32 %v2140_v15, %v2139_v0  ;;  %v2154_v63 = vrot.slane %v2153_v13, 1  ;;  %v2283_v52 = vadd.f32 %v2282_v17, %v2281_v34  ;;  %v1449_v17 = vpop.f32.mrf.mxu1 }
 0x297   : > { %v2290_v57 = vadd.f32 %v2289_v59, %v2288_v43  ;;  %v2343_v7 = vmul.f32 %v2341_v49, %v8786_v42  ;;  %v2344_v25 = vmul.f32 %v2341_v49, %v8791_v27  ;;  %v1412_v9 = vmax.f32 %v1403_v33, 0.0 }
 0x298   : > { %v2205_v23 = vadd.f32 %v2204_v26, %v2203_v31  ;;  %v2212_v3 = vadd.f32 %v2211_v41, %v2210_v51  ;;  %v2296_v32 = vrot.slane %v2295_v30, 4  ;;  %v2345_v1 = vmul.f32 %v2341_v49, %v8794_v56  ;;  %v2465_v41 = vld [vmem:[#allocation4 + $0xe6] sm:$0x1] }
 0x299   : > { %v2219_v46 = vadd.f32 %v2218_v22, %v2217_v55  ;;  %v2226_v16 = vadd.f32 %v2225_v60, %v2224_v48  ;;  %v2277_v2 = vrot.slane %v2276_v47, 2  ;;  %v2346_v4 = vmul.f32 %v2341_v49, %v8797_v39  ;;  %1417 = vst.msk [vmem:[#allocation4 + $0x88] sm:$0xff] %vm587_vm1, %v1412_v9  ;;  %v1496_v22 = vpop.f32.mrf.mxu2 }
 0x29a   : > { %v9278_v11 = vadd.f32 %v2147_v19, %v2146_v54  ;;  %v9280_v43 = vadd.f32 %v2154_v63, %v2153_v13  ;;  %v9283_v34 = vsel %vm1586_vm2, %v2141_v58, %v2134_v12  ;;  %v2414_v51 = vsel %vm1604_vm8, %v2413_v18, %v9231_v37 }
 0x29b   : > { %v2284_v31 = vrot.slane %v2283_v52, 2  ;;  %v2291_v0 = vrot.slane %v2290_v57, 2  ;;  %v2347_v55 = vsel %vm587_vm1, %v2343_v7, 0.0  ;;  %v2354_v48 = vsel %vm587_vm1, %v2344_v25, 0.0 }
 0x29c   : > { %10638 = vst [vmem:[#allocation52_spill] sm:$0xff] %v9278_v11  ;;  %v2206_v14 = vrot.slane %v2205_v23, 1  ;;  %v2213_v35 = vrot.slane %v2212_v3, 1  ;;  %v2297_v15 = vadd.f32 %v2296_v32, %v2295_v30  ;;  %v2361_v54 = vsel %vm587_vm1, %v2345_v1, 0.0  ;;  %v2538_v11 = vld [vmem:[#allocation4 + $0xe7] sm:$0x1] }
 0x29d   : > { %10639 = vst [vmem:[#allocation53_spill] sm:$0xff] %v9280_v43  ;;  %v2220_v13 = vrot.slane %v2219_v46, 1  ;;  %v2227_v19 = vrot.slane %v2226_v16, 1  ;;  %v2278_v59 = vadd.f32 %v2277_v2, %v2276_v47  ;;  %v2368_v26 = vsel %vm587_vm1, %v2346_v4, 0.0 }
 0x29e   : > { %v2348_v49 = vrot.slane %v2347_v55, 4  ;;  %v2355_v37 = vrot.slane %v2354_v48, 4  ;;  %v2416_v18 = vmul.f32 %v2414_v51, %v8786_v42  ;;  %v2417_v33 = vmul.f32 %v2414_v51, %v8791_v27 }
 0x29f   : > { %v2285_v60 = vadd.f32 %v2284_v31, %v2283_v52  ;;  %v9293_v12 = vadd.f32 %v2291_v0, %v2290_v57  ;;  %v2362_v30 = vrot.slane %v2361_v54, 4  ;;  %v1450_v58 = vadd.f32 %v1449_v17, %v8723_v24 }
 0x2a0   : > { %v2298_v63 = vrot.slane %v2297_v15, 2  ;;  %v2369_v7 = vrot.slane %v2368_v26, 4  ;;  %v2418_v47 = vmul.f32 %v2414_v51, %v8794_v56  ;;  %v2486_v25 = vrot.slane %v2465_v41, 1 }
 0x2a1   : > { %v9297_v9 = vadd.f32 %v2206_v14, %v2205_v23  ;;  %v9299_v32 = vadd.f32 %v2213_v35, %v2212_v3  ;;  %v9301_v1 = vadd.f32 %v2220_v13, %v2219_v46  ;;  %v1497_v2 = vadd.f32 %v1496_v22, %v8723_v24  ;;  %v1543_v23 = vpop.f32.mrf.mxu3 }
 0x2a2   : > { %v2349_v4 = vadd.f32 %v2348_v49, %v2347_v55  ;;  %v2356_v52 = vadd.f32 %v2355_v37, %v2354_v48  ;;  %v2420_v57 = vsel %vm587_vm1, %v2416_v18, 0.0  ;;  %v2427_v31 = vsel %vm587_vm1, %v2417_v33, 0.0 }
 0x2a3   : > { %v9306_v0 = vadd.f32 %v2227_v19, %v2226_v16  ;;  %v2279_v17 = vrot.slane %v2278_v59, 1  ;;  %v2363_v43 = vadd.f32 %v2362_v30, %v2361_v54  ;;  %v1459_v41 = vmax.f32 %v1450_v58, 0.0 }
 0x2a4   : > { %v2286_v14 = vrot.slane %v2285_v60, 1  ;;  %v2370_v3 = vadd.f32 %v2369_v7, %v2368_v26  ;;  %v2434_v46 = vsel %vm587_vm1, %v2418_v47, 0.0  ;;  %v2487_v35 = vsel %vm1604_vm8, %v2486_v25, %v9238_v40 }
 0x2a5   : > { %v2419_v55 = vmul.f32 %v2414_v51, %v8797_v39  ;;  %v2421_v48 = vrot.slane %v2420_v57, 4  ;;  %v2428_v13 = vrot.slane %v2427_v31, 4  ;;  %1464 = vst.msk [vmem:[#allocation4 + $0xa8] sm:$0xff] %vm587_vm1, %v1459_v41  ;;  %v1506_v16 = vmax.f32 %v1497_v2, 0.0 }
 0x2a6   : > { %v2350_v19 = vrot.slane %v2349_v4, 2  ;;  %v2357_v49 = vrot.slane %v2356_v52, 2  ;;  %v2559_v54 = vrot.slane %v2538_v11, 1  ;;  %v1544_v37 = vadd.f32 %v1543_v23, %v8723_v24 }
 0x2a7   : > { %v2299_v18 = vadd.f32 %v2298_v63, %v2297_v15  ;;  %v2364_v33 = vrot.slane %v2363_v43, 2  ;;  %v2435_v26 = vrot.slane %v2434_v46, 4  ;;  %v2489_v22 = vmul.f32 %v2487_v35, %v8786_v42  ;;  %1511 = vst.msk [vmem:[#allocation4 + $0xc8] sm:$0xff] %vm587_vm1, %v1506_v16 }
 0x2a8   : > { %v2293_v40 = vrot.slane %v9293_v12, 1  ;;  %v2371_v51 = vrot.slane %v2370_v3, 2  ;;  %v2490_v30 = vmul.f32 %v2487_v35, %v8791_v27  ;;  %v1553_v58 = vmax.f32 %v1544_v37, 0.0 }
 0x2a9   : > { %v9318_v7 = vadd.f32 %v2279_v17, %v2278_v59  ;;  %v2422_v47 = vadd.f32 %v2421_v48, %v2420_v57  ;;  %v2429_v25 = vadd.f32 %v2428_v13, %v2427_v31  ;;  %v2441_v11 = vsel %vm587_vm1, %v2419_v55, 0.0 }
 0x2aa   : > { %v9321_v24 = vadd.f32 %v2286_v14, %v2285_v60  ;;  %v2351_v15 = vadd.f32 %v2350_v19, %v2349_v4  ;;  %v2358_v63 = vadd.f32 %v2357_v49, %v2356_v52  ;;  %v2560_v2 = vsel %vm1604_vm8, %v2559_v54, %v9244_v20  ;;  %1558 = vst.msk [vmem:[#allocation4 + $0xe8] sm:$0xff] %vm587_vm1, %v1553_v58 }
 0x2ab   : > { %v2300_v41 = vrot.slane %v2299_v18, 1  ;;  %v2365_v23 = vadd.f32 %v2364_v33, %v2363_v43  ;;  %v2436_v16 = vadd.f32 %v2435_v26, %v2434_v46  ;;  %v2493_v37 = vsel %vm587_vm1, %v2489_v22, 0.0 }
 0x2ac   : > { %v9327_v59 = vadd.f32 %v2371_v51, %v2370_v3  ;;  %v2442_v57 = vrot.slane %v2441_v11, 4  ;;  %v2491_v31 = vmul.f32 %v2487_v35, %v8794_v56  ;;  %v2500_v60 = vsel %vm587_vm1, %v2490_v30, 0.0 }
 0x2ad   : > { %v2423_v17 = vrot.slane %v2422_v47, 2  ;;  %v2430_v4 = vrot.slane %v2429_v25, 2  ;;  %v2492_v52 = vmul.f32 %v2487_v35, %v8797_v39  ;;  %v2562_v20 = vmul.f32 %v2560_v2, %v8786_v42 }
 0x2ae   : > { %10640 = vst [vmem:[#allocation54_spill] sm:$0xff] %v9327_v59  ;;  %v9334_v14 = vadd.f32 %v2293_v40, %v9293_v12  ;;  %v2352_v43 = vrot.slane %v2351_v15, 1  ;;  %v2359_v46 = vrot.slane %v2358_v63, 1  ;;  %v2494_v55 = vrot.slane %v2493_v37, 4  ;;  %v3060_v40 = vld [vmem:[#allocation4 + $0x88] sm:$0x1] }
 0x2af   : > { %v9336_v48 = vadd.f32 %v2300_v41, %v2299_v18  ;;  %v2437_v3 = vrot.slane %v2436_v16, 2  ;;  %v2501_v13 = vrot.slane %v2500_v60, 4  ;;  %v2563_v19 = vmul.f32 %v2560_v2, %v8791_v27 }
 0x2b0   : > { %10641 = vst [vmem:[#allocation55_spill] sm:$0xff] %v9334_v14  ;;  %v2366_v49 = vrot.slane %v2365_v23, 1  ;;  %v2443_v33 = vadd.f32 %v2442_v57, %v2441_v11  ;;  %v2507_v35 = vsel %vm587_vm1, %v2491_v31, 0.0  ;;  %v2424_v26 = vadd.f32 %v2423_v17, %v2422_v47 }
 0x2b1   : > { %10642 = vst [vmem:[#allocation56_spill] sm:$0xff] %v9336_v48  ;;  %v9341_v42 = vadd.f32 %v2430_v4, %v2429_v25  ;;  %v2514_v12 = vsel %vm587_vm1, %v2492_v52, 0.0  ;;  %v2566_v22 = vsel %vm587_vm1, %v2562_v20, 0.0  ;;  %v9345_v18 = vadd.f32 %v2352_v43, %v2351_v15  ;;  %v3133_v25 = vld [vmem:[#allocation4 + $0x89] sm:$0x1] }
 0x2b2   : > { %v9347_v51 = vadd.f32 %v2359_v46, %v2358_v63  ;;  %v2495_v30 = vadd.f32 %v2494_v55, %v2493_v37  ;;  %v2564_v27 = vmul.f32 %v2560_v2, %v8794_v56  ;;  %v9350_v58 = vadd.f32 %v2437_v3, %v2436_v16  ;;  %v3061_v52 = vld [vmem:[#allocation4 + $0xa8] sm:$0x1]  ;;  %v3134_v55 = vld [vmem:[#allocation4 + $0xa9] sm:$0x1] }
 0x2b3   : > { %10643 = vst [vmem:[#allocation57_spill] sm:$0xff] %v9345_v18  ;;  %v2502_v11 = vadd.f32 %v2501_v13, %v2500_v60  ;;  %v2508_v41 = vrot.slane %v2507_v35, 4  ;;  %v2573_v47 = vsel %vm587_vm1, %v2563_v19, 0.0  ;;  %v9353_v57 = vadd.f32 %v2366_v49, %v2365_v23  ;;  %v3062_v56 = vld [vmem:[#allocation4 + $0xc8] sm:$0x1] }
 0x2b4   : > { %10644 = vst [vmem:[#allocation58_spill] sm:$0xff] %v9347_v51  ;;  %v2515_v31 = vrot.slane %v2514_v12, 4  ;;  %v2567_v17 = vrot.slane %v2566_v22, 4  ;;  %v3078_v4 = vrot.slane %v3060_v40, 4  ;;  %v2425_v15 = vrot.slane %v2424_v26, 1 }
 0x2b5   : > { %10645 = vst [vmem:[#allocation59_spill] sm:$0xff] %v9350_v58  ;;  %v2432_v63 = vrot.slane %v9341_v42, 1  ;;  %v2444_v20 = vrot.slane %v2443_v33, 2  ;;  %v2565_v37 = vmul.f32 %v2560_v2, %v8797_v39  ;;  %v2496_v16 = vrot.slane %v2495_v30, 2  ;;  %v3135_v49 = vld [vmem:[#allocation4 + $0xc9] sm:$0x1] }
 0x2b6   : > { %10646 = vst [vmem:[#allocation60_spill] sm:$0xff] %v9353_v57  ;;  %v2574_v43 = vrot.slane %v2573_v47, 4  ;;  %v2580_v60 = vsel %vm587_vm1, %v2564_v27, 0.0  ;;  %v3151_v46 = vrot.slane %v3133_v25, 4  ;;  %v2503_v3 = vrot.slane %v2502_v11, 2 }
 0x2b7   : > { %v2509_v13 = vadd.f32 %v2508_v41, %v2507_v35  ;;  %v3080_v19 = vrot.slane %v3061_v52, 3  ;;  %v9359_v40 = vadd.f32 %v2515_v31, %v2514_v12  ;;  %v2568_v54 = vadd.f32 %v2567_v17, %v2566_v22  ;;  %v3063_v2 = vld [vmem:[#allocation4 + $0xe8] sm:$0x1]  ;;  %v3136_v22 = vld [vmem:[#allocation4 + $0xe9] sm:$0x1] }
 0x2b8   : > { %v3079_v48 = vsel %vm1595_vm5, %v3078_v4, %v9023_v28  ;;  %v3082_v39 = vrot.slane %v3062_v56, 2  ;;  %v9363_v57 = vadd.f32 %v2444_v20, %v2443_v33  ;;  %v2581_v14 = vrot.slane %v2580_v60, 4  ;;  %v3206_v17 = vld [vmem:[#allocation4 + $0x8a] sm:$0x1]  ;;  %v3352_v56 = vld [vmem:[#allocation4 + $0x8c] sm:$0x1] }
 0x2b9   : > { %10647 = vst [vmem:[#allocation61_spill] sm:$0xff] %v9359_v40  ;;  %v9366_v27 = vsel %vm587_vm1, %v2565_v37, 0.0  ;;  %v3153_v25 = vrot.slane %v3134_v55, 3  ;;  %v9368_v23 = vadd.f32 %v2496_v16, %v2495_v30  ;;  %v2575_v35 = vadd.f32 %v2574_v43, %v2573_v47  ;;  %v3279_v30 = vld [vmem:[#allocation4 + $0x8b] sm:$0x1] }
 0x2ba   : > { %10648 = vst [vmem:[#allocation62_spill] sm:$0xff] %v9363_v57  ;;  %v3152_v12 = vsel %vm1595_vm5, %v3151_v46, %v9030_v45  ;;  %v3155_v41 = vrot.slane %v3135_v49, 2  ;;  %v9372_v31 = vadd.f32 %v2503_v3, %v2502_v11  ;;  %v2510_v28 = vrot.slane %v2509_v13, 2  ;;  %v3425_v11 = vld [vmem:[#allocation4 + $0x8d] sm:$0x1] }
 0x2bb   : > { %10649 = vst [vmem:[#allocation63_spill] sm:$0xff] %v9366_v27  ;;  %v3081_v33 = vsel %vm1598_vm6, %v3080_v19, %v3079_v48  ;;  %v3084_v4 = vrot.slane %v3063_v2, 1  ;;  %v9375_v52 = vadd.f32 %v2425_v15, %v2424_v26  ;;  %v2569_v37 = vrot.slane %v2568_v54, 2  ;;  %v3498_v43 = vld [vmem:[#allocation4 + $0x8e] sm:$0x1] }
 0x2bc   : > { %10650 = vst [vmem:[#allocation64_spill] sm:$0xff] %v9368_v23  ;;  %v3083_v47 = vsel %vm1601_vm7, %v3082_v39, %v3081_v33  ;;  %v9379_v16 = vadd.f32 %v2581_v14, %v2580_v60  ;;  %v3154_v46 = vsel %vm1598_vm6, %v3153_v25, %v3152_v12  ;;  %v3157_v55 = vrot.slane %v3136_v22, 1  ;;  %v3571_v3 = vld [vmem:[#allocation4 + $0x8f] sm:$0x1]  ;;  %v3207_v14 = vld [vmem:[#allocation4 + $0xaa] sm:$0x1] }
 0x2bd   : > { %10651 = vst [vmem:[#allocation65_spill] sm:$0xff] %v9372_v31  ;;  %v2576_v26 = vrot.slane %v2575_v35, 2  ;;  %v3224_v15 = vrot.slane %v3206_v17, 4  ;;  %v3156_v19 = vsel %vm1601_vm7, %v3155_v41, %v3154_v46  ;;  %v3297_v2 = vrot.slane %v3279_v30, 4  ;;  %v3280_v22 = vld [vmem:[#allocation4 + $0xab] sm:$0x1] }
 0x2be   : > { %10652 = vst [vmem:[#allocation66_spill] sm:$0xff] %v9375_v52  ;;  %v3370_v39 = vrot.slane %v3352_v56, 4  ;;  %v3085_v60 = vsel %vm1604_vm8, %v3084_v4, %v3083_v47  ;;  %v9388_v33 = vadd.f32 %v2432_v63, %v9341_v42  ;;  %v9390_v45 = vadd.f32 %v2510_v28, %v2509_v13  ;;  %v3208_v20 = vld [vmem:[#allocation4 + $0xca] sm:$0x1]  ;;  %v3354_v49 = vld [vmem:[#allocation4 + $0xcc] sm:$0x1] }
 0x2bf   : > { %10653 = vst [vmem:[#allocation67_spill] sm:$0xff] %v9379_v16  ;;  %v3443_v25 = vrot.slane %v3425_v11, 4  ;;  %v3516_v12 = vrot.slane %v3498_v43, 4  ;;  %v9392_v17 = vadd.f32 %v2569_v37, %v2568_v54  ;;  %v3589_v46 = vrot.slane %v3571_v3, 4  ;;  %v3353_v37 = vld [vmem:[#allocation4 + $0xac] sm:$0x1] }
 0x2c0   : > { %10654 = vst [vmem:[#allocation68_spill] sm:$0xff] %v9388_v33  ;;  %v3158_v30 = vsel %vm1604_vm8, %v3157_v55, %v3156_v19  ;;  %v9396_v56 = vadd.f32 %v2576_v26, %v2575_v35  ;;  %v3225_v4 = vsel %vm1595_vm5, %v3224_v15, %v9033_v38  ;;  %v3226_v42 = vrot.slane %v3207_v14, 3  ;;  %v3426_v43 = vld [vmem:[#allocation4 + $0xad] sm:$0x1]  ;;  %v3499_v38 = vld [vmem:[#allocation4 + $0xae] sm:$0x1] }
 0x2c1   : > { %10655 = vst [vmem:[#allocation69_spill] sm:$0xff] %v9390_v45  ;;  %v3087_v63 = vmul.f32 %v3085_v60, %v8804_v50  ;;  %v3298_v13 = vsel %vm1595_vm5, %v3297_v2, %v9051_v21  ;;  %v3371_v54 = vsel %vm1595_vm5, %v3370_v39, %v9059_v10  ;;  %v3299_v28 = vrot.slane %v3280_v22, 3  ;;  %v10658_v15 = vld [vmem:[#allocation28_spill] sm:$0xff]  ;;  %v3209_v2 = vld [vmem:[#allocation4 + $0xea] sm:$0x1] }
 0x2c2   : > { %10656 = vst [vmem:[#allocation70_spill] sm:$0xff] %v9392_v17  ;;  %v3228_v47 = vrot.slane %v3208_v20, 2  ;;  %v3444_v11 = vsel %vm1595_vm5, %v3443_v25, %v9062_v8  ;;  %v3517_v35 = vsel %vm1595_vm5, %v3516_v12, %v9065_v62  ;;  %v3160_v55 = vmul.f32 %v3158_v30, %v8804_v50  ;;  %v10659_v20 = vld [vmem:[#allocation29_spill] sm:$0xff]  ;;  %v3572_v62 = vld [vmem:[#allocation4 + $0xaf] sm:$0x1] }
 0x2c3   : > { %10657 = vst [vmem:[#allocation71_spill] sm:$0xff] %v9396_v56  ;;  %v3161_v26 = vmul.f32 %v3158_v30, %v8807_v5  ;;  %v3590_v21 = vsel %vm1595_vm5, %v3589_v46, %v9074_v61  ;;  %v3088_v10 = vmul.f32 %v3085_v60, %v8807_v5  ;;  %v3089_v3 = vmul.f32 %v3085_v60, %v10658_v15  ;;  %v3281_v46 = vld [vmem:[#allocation4 + $0xcb] sm:$0x1]  ;;  %v3573_v40 = vld [vmem:[#allocation4 + $0xcf] sm:$0x1] }
 0x2c4   : > { %v3090_v19 = vmul.f32 %v3085_v60, %v10659_v20  ;;  %v3227_v8 = vsel %vm1598_vm6, %v3226_v42, %v3225_v4  ;;  %v3372_v39 = vrot.slane %v3353_v37, 3  ;;  %v3091_v14 = vsel %vm587_vm1, %v3087_v63, 0.0 }
 0x2c5   : > { %v3162_v25 = vmul.f32 %v3158_v30, %v10658_v15  ;;  %v3300_v12 = vsel %vm1598_vm6, %v3299_v28, %v3298_v13  ;;  %v3445_v22 = vrot.slane %v3426_v43, 3  ;;  %v3518_v41 = vrot.slane %v3499_v38, 3 }
 0x2c6   : > { %v3229_v61 = vsel %vm1601_vm7, %v3228_v47, %v3227_v8  ;;  %v3163_v48 = vmul.f32 %v3158_v30, %v10659_v20  ;;  %v3164_v60 = vsel %vm587_vm1, %v3160_v55, 0.0  ;;  %v3171_v4 = vsel %vm587_vm1, %v3161_v26, 0.0  ;;  %v3427_v55 = vld [vmem:[#allocation4 + $0xcd] sm:$0x1] }
 0x2c7   : > { %v3230_v42 = vrot.slane %v3209_v2, 1  ;;  %v3092_v37 = vrot.slane %v3091_v14, 4  ;;  %v3098_v63 = vsel %vm587_vm1, %v3088_v10, 0.0  ;;  %v3105_v27 = vsel %vm587_vm1, %v3089_v3, 0.0  ;;  %v3282_v3 = vld [vmem:[#allocation4 + $0xeb] sm:$0x1] }
 0x2c8   : > { %v3112_v13 = vsel %vm587_vm1, %v3090_v19, 0.0  ;;  %v3591_v28 = vrot.slane %v3572_v62, 3  ;;  %v3301_v43 = vrot.slane %v3281_v46, 2  ;;  %v3374_v38 = vrot.slane %v3354_v49, 2 }
 0x2c9   : > { %v3178_v47 = vsel %vm587_vm1, %v3162_v25, 0.0  ;;  %v3373_v8 = vsel %vm1598_vm6, %v3372_v39, %v3371_v54  ;;  %v3446_v30 = vsel %vm1598_vm6, %v3445_v22, %v3444_v11  ;;  %v3165_v16 = vrot.slane %v3164_v60, 4  ;;  %v3500_v22 = vld [vmem:[#allocation4 + $0xce] sm:$0x1] }
 0x2ca   : > { %v3172_v26 = vrot.slane %v3171_v4, 4  ;;  %v3099_v2 = vrot.slane %v3098_v63, 4  ;;  %v3106_v56 = vrot.slane %v3105_v27, 4  ;;  %v3113_v17 = vrot.slane %v3112_v13, 4 }
 0x2cb   : > { %v3231_v10 = vsel %vm1604_vm8, %v3230_v42, %v3229_v61  ;;  %v3519_v19 = vsel %vm1598_vm6, %v3518_v41, %v3517_v35  ;;  %v3093_v62 = vadd.f32 %v3092_v37, %v3091_v14  ;;  %v3179_v46 = vrot.slane %v3178_v47, 4 }
 0x2cc   : > { %v3185_v49 = vsel %vm587_vm1, %v3163_v48, 0.0  ;;  %v3592_v25 = vsel %vm1598_vm6, %v3591_v28, %v3590_v21  ;;  %v3302_v54 = vsel %vm1601_vm7, %v3301_v43, %v3300_v12  ;;  %v9436_v11 = vsel %vm1601_vm7, %v3374_v38, %v3373_v8 }
 0x2cd   : > { %v3447_v39 = vrot.slane %v3427_v55, 2  ;;  %v3166_v45 = vadd.f32 %v3165_v16, %v3164_v60  ;;  %v3173_v31 = vadd.f32 %v3172_v26, %v3171_v4  ;;  %v3233_v61 = vmul.f32 %v3231_v10, %v8804_v50 }
 0x2ce   : > { %v3303_v42 = vrot.slane %v3282_v3, 1  ;;  %v3100_v41 = vadd.f32 %v3099_v2, %v3098_v63  ;;  %v3107_v35 = vadd.f32 %v3106_v56, %v3105_v27  ;;  %v3114_v14 = vadd.f32 %v3113_v17, %v3112_v13 }
 0x2cf   : > { %v3186_v37 = vrot.slane %v3185_v49, 4  ;;  %v3094_v48 = vrot.slane %v3093_v62, 2  ;;  %v3180_v23 = vadd.f32 %v3179_v46, %v3178_v47  ;;  %v3234_v21 = vmul.f32 %v3231_v10, %v8807_v5 }
 0x2d0   : > { %v3235_v12 = vmul.f32 %v3231_v10, %v10658_v15  ;;  %v9442_v28 = vsel %vm1601_vm7, %v3447_v39, %v3446_v30  ;;  %v3520_v43 = vrot.slane %v3500_v22, 2  ;;  %v3593_v38 = vrot.slane %v3573_v40, 2 }
 0x2d1   : > { %v3236_v16 = vmul.f32 %v3231_v10, %v10659_v20  ;;  %v3167_v60 = vrot.slane %v3166_v45, 2  ;;  %v3174_v4 = vrot.slane %v3173_v31, 2  ;;  %v3237_v63 = vsel %vm587_vm1, %v3233_v61, 0.0 }
 0x2d2   : > { %v3304_v27 = vsel %vm1604_vm8, %v3303_v42, %v3302_v54  ;;  %v3101_v17 = vrot.slane %v3100_v41, 2  ;;  %v3108_v56 = vrot.slane %v3107_v35, 2  ;;  %v3115_v13 = vrot.slane %v3114_v14, 2 }
 0x2d3   : > { %v3187_v47 = vadd.f32 %v3186_v37, %v3185_v49  ;;  %v3095_v8 = vadd.f32 %v3094_v48, %v3093_v62  ;;  %v3181_v55 = vrot.slane %v3180_v23, 2  ;;  %v3244_v26 = vsel %vm587_vm1, %v3234_v21, 0.0 }
 0x2d4   : > { %v3251_v30 = vsel %vm587_vm1, %v3235_v12, 0.0  ;;  %v3238_v2 = vrot.slane %v3237_v63, 4  ;;  %v3258_v40 = vsel %vm587_vm1, %v3236_v16, 0.0  ;;  %v3306_v10 = vmul.f32 %v3304_v27, %v8804_v50 }
 0x2d5   : > { %v3307_v3 = vmul.f32 %v3304_v27, %v8807_v5  ;;  %v9453_v46 = vsel %vm1601_vm7, %v3520_v43, %v3519_v19  ;;  %v9456_v54 = vsel %vm1601_vm7, %v3593_v38, %v3592_v25  ;;  %v3168_v49 = vadd.f32 %v3167_v60, %v3166_v45  ;;  %v3355_v43 = vld [vmem:[#allocation4 + $0xec] sm:$0x1] }
 0x2d6   : > { %v3175_v62 = vadd.f32 %v3174_v4, %v3173_v31  ;;  %v3102_v39 = vadd.f32 %v3101_v17, %v3100_v41  ;;  %v3109_v22 = vadd.f32 %v3108_v56, %v3107_v35  ;;  %v3245_v61 = vrot.slane %v3244_v26, 4 }
 0x2d7   : > { %v3252_v42 = vrot.slane %v3251_v30, 4  ;;  %v3096_v37 = vrot.slane %v3095_v8, 1  ;;  %v3116_v48 = vadd.f32 %v3115_v13, %v3114_v14  ;;  %v3188_v21 = vrot.slane %v3187_v47, 2 }
 0x2d8   : > { %v3259_v12 = vrot.slane %v3258_v40, 4  ;;  %v3182_v16 = vadd.f32 %v3181_v55, %v3180_v23  ;;  %v3239_v33 = vadd.f32 %v3238_v2, %v3237_v63  ;;  %v3310_v52 = vsel %vm587_vm1, %v3306_v10, 0.0 }
 0x2d9   : > { %v3317_v19 = vsel %vm587_vm1, %v3307_v3, 0.0  ;;  %v3169_v57 = vrot.slane %v3168_v49, 1  ;;  %v3176_v25 = vrot.slane %v3175_v62, 1  ;;  %v3308_v45 = vmul.f32 %v3304_v27, %v10658_v15 }
 0x2da   : > { %v3309_v31 = vmul.f32 %v3304_v27, %v10659_v20  ;;  %v3103_v41 = vrot.slane %v3102_v39, 1  ;;  %v3110_v35 = vrot.slane %v3109_v22, 1  ;;  %v3246_v38 = vadd.f32 %v3245_v61, %v3244_v26 }
 0x2db   : > { %v3253_v60 = vadd.f32 %v3252_v42, %v3251_v30  ;;  %v3260_v14 = vadd.f32 %v3259_v12, %v3258_v40  ;;  %v3311_v4 = vrot.slane %v3310_v52, 4  ;;  %v3318_v17 = vrot.slane %v3317_v19, 4  ;;  %v3428_v42 = vld [vmem:[#allocation4 + $0xed] sm:$0x1] }
 0x2dc   : > { %v3376_v23 = vrot.slane %v3355_v43, 1  ;;  %v3117_v63 = vrot.slane %v3116_v48, 1  ;;  %v3183_v56 = vrot.slane %v3182_v16, 1  ;;  %v3189_v13 = vadd.f32 %v3188_v21, %v3187_v47 }
 0x2dd   : > { %v3240_v55 = vrot.slane %v3239_v33, 2  ;;  %v3170_v2 = vadd.f32 %v3169_v57, %v3168_v49  ;;  %v3177_v10 = vadd.f32 %v3176_v25, %v3175_v62  ;;  %v3324_v3 = vsel %vm587_vm1, %v3308_v45, 0.0 }
 0x2de   : > { %v3331_v58 = vsel %vm587_vm1, %v3309_v31, 0.0  ;;  %v3097_v51 = vadd.f32 %v3096_v37, %v3095_v8  ;;  %v3104_v27 = vadd.f32 %v3103_v41, %v3102_v39  ;;  %v3247_v18 = vrot.slane %v3246_v38, 2 }
 0x2df   : > { %v3254_v59 = vrot.slane %v3253_v60, 2  ;;  %v3261_v26 = vrot.slane %v3260_v14, 2  ;;  %v3312_v30 = vadd.f32 %v3311_v4, %v3310_v52  ;;  %v3319_v40 = vadd.f32 %v3318_v17, %v3317_v19 }
 0x2e0   : > { %v3377_v61 = vsel %vm1604_vm8, %v3376_v23, %v9436_v11  ;;  %v9466_v12 = vadd.f32 %v3110_v35, %v3109_v22  ;;  %v3241_v47 = vadd.f32 %v3240_v55, %v3239_v33  ;;  %v3325_v57 = vrot.slane %v3324_v3, 4 }
 0x2e1   : > { %v3332_v49 = vrot.slane %v3331_v58, 4  ;;  %v9468_v62 = vadd.f32 %v3117_v63, %v3116_v48  ;;  %v3184_v21 = vadd.f32 %v3183_v56, %v3182_v16  ;;  %v3190_v43 = vrot.slane %v3189_v13, 1  ;;  %v3501_v56 = vld [vmem:[#allocation4 + $0xee] sm:$0x1] }
 0x2e2   : > { %10660 = vst [vmem:[#allocation28_spill] sm:$0xff] %v9466_v12  ;;  %v3196_v8 = vsel %vm1586_vm2, %v3177_v10, %v3170_v2  ;;  %v3248_v39 = vadd.f32 %v3247_v18, %v3246_v38  ;;  %v3255_v37 = vadd.f32 %v3254_v59, %v3253_v60  ;;  %v3379_v52 = vmul.f32 %v3377_v61, %v8804_v50  ;;  %v1405_v38 = vpop.f32.mrf.mxu0  ;;  %v10664_v10 = vld [vmem:[#allocation27_spill] sm:$0xff] }
 0x2e3   : > { %10661 = vst [vmem:[#allocation29_spill] sm:$0xff] %v9468_v62  ;;  %v3449_v19 = vrot.slane %v3428_v42, 1  ;;  %v3262_v25 = vadd.f32 %v3261_v26, %v3260_v14  ;;  %v3313_v45 = vrot.slane %v3312_v30, 2  ;;  %v3320_v11 = vrot.slane %v3319_v40, 2 }
 0x2e4   : > { %v3380_v22 = vmul.f32 %v3377_v61, %v8807_v5  ;;  %v9474_v33 = vsel %vm1586_vm2, %v3104_v27, %v3097_v51  ;;  %v3242_v31 = vrot.slane %v3241_v47, 1  ;;  %v3326_v48 = vadd.f32 %v3325_v57, %v3324_v3 }
 0x2e5   : > { %v3333_v41 = vadd.f32 %v3332_v49, %v3331_v58  ;;  %v9476_v16 = vadd.f32 %v3190_v43, %v3189_v13  ;;  %v9479_v35 = vsel %vm1589_vm3, %v3184_v21, %v3196_v8  ;;  %v3381_v59 = vmul.f32 %v3377_v61, %v10658_v15 }
 0x2e6   : > { %10663 = vst [vmem:[#allocation73_spill] sm:$0xff] %v9479_v35  ;;  %v3382_v18 = vmul.f32 %v3377_v61, %v10659_v20  ;;  %v3249_v60 = vrot.slane %v3248_v39, 1  ;;  %v3256_v14 = vrot.slane %v3255_v37, 1  ;;  %v3383_v4 = vsel %vm587_vm1, %v3379_v52, 0.0 }
 0x2e7   : > { %10662 = vst [vmem:[#allocation72_spill] sm:$0xff] %v9476_v16  ;;  %v3450_v51 = vsel %vm1604_vm8, %v3449_v19, %v9442_v28  ;;  %v3263_v17 = vrot.slane %v3262_v25, 1  ;;  %v3314_v23 = vadd.f32 %v3313_v45, %v3312_v30  ;;  %v3321_v58 = vadd.f32 %v3320_v11, %v3319_v40  ;;  %v3574_v11 = vld [vmem:[#allocation4 + $0xef] sm:$0x1] }
 0x2e8   : > { %v3390_v63 = vsel %vm587_vm1, %v3380_v22, 0.0  ;;  %v3243_v13 = vadd.f32 %v3242_v31, %v3241_v47  ;;  %v3327_v55 = vrot.slane %v3326_v48, 2  ;;  %v3334_v2 = vrot.slane %v3333_v41, 2  ;;  %v1452_v22 = vpop.f32.mrf.mxu1 }
 0x2e9   : > { %v1406_v3 = vadd.f32 %v1405_v38, %v10664_v10  ;;  %v3384_v27 = vrot.slane %v3383_v4, 4  ;;  %v3397_v26 = vsel %vm587_vm1, %v3381_v59, 0.0  ;;  %v3404_v61 = vsel %vm587_vm1, %v3382_v18, 0.0 }
 0x2ea   : > { %v3452_v42 = vmul.f32 %v3450_v51, %v8804_v50  ;;  %v3250_v57 = vadd.f32 %v3249_v60, %v3248_v39  ;;  %v9491_v28 = vadd.f32 %v3256_v14, %v3255_v37  ;;  %v3391_v30 = vrot.slane %v3390_v63, 4 }
 0x2eb   : > { %v3522_v40 = vrot.slane %v3501_v56, 1  ;;  %v9493_v49 = vadd.f32 %v3263_v17, %v3262_v25  ;;  %v3315_v21 = vrot.slane %v3314_v23, 1  ;;  %v3453_v47 = vmul.f32 %v3450_v51, %v8807_v5 }
 0x2ec   : > { %10665 = vst [vmem:[#allocation27_spill] sm:$0xff] %v9491_v28  ;;  %v1413_v43 = vmax.f32 %v1406_v3, 0.0  ;;  %v3322_v8 = vrot.slane %v3321_v58, 1  ;;  %v3398_v52 = vrot.slane %v3397_v26, 4  ;;  %v3405_v19 = vrot.slane %v3404_v61, 4 }
 0x2ed   : > { %10666 = vst [vmem:[#allocation74_spill] sm:$0xff] %v9493_v49  ;;  %v3454_v45 = vmul.f32 %v3450_v51, %v10658_v15  ;;  %v3328_v31 = vadd.f32 %v3327_v55, %v3326_v48  ;;  %v3335_v59 = vadd.f32 %v3334_v2, %v3333_v41  ;;  %v3385_v39 = vadd.f32 %v3384_v27, %v3383_v4 }
 0x2ee   : > { %v3456_v37 = vsel %vm587_vm1, %v3452_v42, 0.0  ;;  %1418 = vst.msk [vmem:[#allocation4 + $0x90] sm:$0xff] %vm587_vm1, %v1413_v43  ;;  %v9500_v25 = vsel %vm1586_vm2, %v3250_v57, %v3243_v13  ;;  %v3392_v18 = vadd.f32 %v3391_v30, %v3390_v63  ;;  %v3455_v38 = vmul.f32 %v3450_v51, %v10659_v20 }
 0x2ef   : > { %10667 = vst [vmem:[#allocation75_spill] sm:$0xff] %v9500_v25  ;;  %v3523_v60 = vsel %vm1604_vm8, %v3522_v40, %v9453_v46  ;;  %v9505_v14 = vadd.f32 %v3315_v21, %v3314_v23  ;;  %v3463_v17 = vsel %vm587_vm1, %v3453_v47, 0.0  ;;  %v3595_v48 = vrot.slane %v3574_v11, 1 }
 0x2f0   : > { %v1453_v41 = vadd.f32 %v1452_v22, %v10664_v10  ;;  %v3399_v4 = vadd.f32 %v3398_v52, %v3397_v26  ;;  %v3406_v56 = vadd.f32 %v3405_v19, %v3404_v61  ;;  %v3457_v55 = vrot.slane %v3456_v37, 4 }
 0x2f1   : > { %10668 = vst [vmem:[#allocation76_spill] sm:$0xff] %v9505_v14  ;;  %v3470_v2 = vsel %vm587_vm1, %v3454_v45, 0.0  ;;  %v9510_v13 = vadd.f32 %v3322_v8, %v3321_v58  ;;  %v3386_v63 = vrot.slane %v3385_v39, 2  ;;  %v3525_v51 = vmul.f32 %v3523_v60, %v8804_v50 }
 0x2f2   : > { %v3526_v3 = vmul.f32 %v3523_v60, %v8807_v5  ;;  %v3393_v46 = vrot.slane %v3392_v18, 2  ;;  %v3464_v23 = vrot.slane %v3463_v17, 4  ;;  %v3477_v27 = vsel %vm587_vm1, %v3455_v38, 0.0 }
 0x2f3   : > { %10669 = vst [vmem:[#allocation77_spill] sm:$0xff] %v9510_v13  ;;  %v3527_v42 = vmul.f32 %v3523_v60, %v10658_v15  ;;  %v3329_v57 = vrot.slane %v3328_v31, 1  ;;  %v3471_v30 = vrot.slane %v3470_v2, 4  ;;  %v3596_v26 = vsel %vm1604_vm8, %v3595_v48, %v9456_v54 }
 0x2f4   : > { %v1460_v61 = vmax.f32 %v1453_v41, 0.0  ;;  %v3336_v40 = vrot.slane %v3335_v59, 1  ;;  %v3400_v58 = vrot.slane %v3399_v4, 2  ;;  %v3407_v21 = vrot.slane %v3406_v56, 2 }
 0x2f5   : > { %v3458_v47 = vadd.f32 %v3457_v55, %v3456_v37  ;;  %v3387_v43 = vadd.f32 %v3386_v63, %v3385_v39  ;;  %v3478_v8 = vrot.slane %v3477_v27, 4  ;;  %v3529_v52 = vsel %vm587_vm1, %v3525_v51, 0.0 }
 0x2f6   : > { %v3536_v19 = vsel %vm587_vm1, %v3526_v3, 0.0  ;;  %v3394_v45 = vadd.f32 %v3393_v46, %v3392_v18  ;;  %v3465_v11 = vadd.f32 %v3464_v23, %v3463_v17  ;;  %v3543_v22 = vsel %vm587_vm1, %v3527_v42, 0.0  ;;  %1465 = vst.msk [vmem:[#allocation4 + $0xb0] sm:$0xff] %vm587_vm1, %v1460_v61  ;;  %v1499_v18 = vpop.f32.mrf.mxu2 }
 0x2f7   : > { %v3598_v38 = vmul.f32 %v3596_v26, %v8804_v50  ;;  %v9522_v13 = vadd.f32 %v3329_v57, %v3328_v31  ;;  %v3472_v54 = vadd.f32 %v3471_v30, %v3470_v2  ;;  %v3528_v48 = vmul.f32 %v3523_v60, %v10659_v20  ;;  %v1546_v50 = vpop.f32.mrf.mxu3 }
 0x2f8   : > { %v3599_v41 = vmul.f32 %v3596_v26, %v8807_v5  ;;  %v9527_v39 = vadd.f32 %v3336_v40, %v3335_v59  ;;  %v3401_v37 = vadd.f32 %v3400_v58, %v3399_v4  ;;  %v3530_v55 = vrot.slane %v3529_v52, 4 }
 0x2f9   : > { %10670 = vst [vmem:[#allocation78_spill] sm:$0xff] %v9522_v13  ;;  %v3537_v63 = vrot.slane %v3536_v19, 4  ;;  %v3408_v17 = vadd.f32 %v3407_v21, %v3406_v56  ;;  %v3459_v51 = vrot.slane %v3458_v47, 2  ;;  %v3479_v3 = vadd.f32 %v3478_v8, %v3477_v27 }
 0x2fa   : > { %10671 = vst [vmem:[#allocation79_spill] sm:$0xff] %v9527_v39  ;;  %v3544_v46 = vrot.slane %v3543_v22, 4  ;;  %v3388_v31 = vrot.slane %v3387_v43, 1  ;;  %v3395_v23 = vrot.slane %v3394_v45, 1  ;;  %v3466_v2 = vrot.slane %v3465_v11, 2 }
 0x2fb   : > { %v3602_v60 = vsel %vm587_vm1, %v3598_v38, 0.0  ;;  %v3473_v42 = vrot.slane %v3472_v54, 2  ;;  %v3550_v5 = vsel %vm587_vm1, %v3528_v48, 0.0  ;;  %v3609_v59 = vsel %vm587_vm1, %v3599_v41, 0.0 }
 0x2fc   : > { %v1500_v4 = vadd.f32 %v1499_v18, %v10664_v10  ;;  %v3531_v57 = vadd.f32 %v3530_v55, %v3529_v52  ;;  %v3538_v30 = vadd.f32 %v3537_v63, %v3536_v19  ;;  %v3600_v56 = vmul.f32 %v3596_v26, %v10658_v15  ;;  %v4096_v52 = vld [vmem:[#allocation4 + $0x90] sm:$0x1] }
 0x2fd   : > { %v1547_v27 = vadd.f32 %v1546_v50, %v10664_v10  ;;  %v3480_v61 = vrot.slane %v3479_v3, 2  ;;  %v3545_v40 = vadd.f32 %v3544_v46, %v3543_v22  ;;  %v3603_v58 = vrot.slane %v3602_v60, 4 }
 0x2fe   : > { %v1507_v21 = vmax.f32 %v1500_v4, 0.0  ;;  %v3402_v8 = vrot.slane %v3401_v37, 1  ;;  %v3409_v39 = vrot.slane %v3408_v17, 1  ;;  %v3460_v38 = vadd.f32 %v3459_v51, %v3458_v47 }
 0x2ff   : > { %v3610_v13 = vrot.slane %v3609_v59, 4  ;;  %v3467_v14 = vadd.f32 %v3466_v2, %v3465_v11  ;;  %v9535_v48 = vadd.f32 %v3473_v42, %v3472_v54  ;;  %v3551_v41 = vrot.slane %v3550_v5, 4 }
 0x300   : > { %v3601_v18 = vmul.f32 %v3596_v26, %v10659_v20  ;;  %1512 = vst.msk [vmem:[#allocation4 + $0xd0] sm:$0xff] %vm587_vm1, %v1507_v21  ;;  %v3532_v15 = vrot.slane %v3531_v57, 2  ;;  %v3539_v19 = vrot.slane %v3538_v30, 2  ;;  %v3616_v10 = vsel %vm587_vm1, %v3600_v56, 0.0  ;;  %v4097_v26 = vld [vmem:[#allocation4 + $0xb0] sm:$0x1] }
 0x301   : > { %v1554_v22 = vmax.f32 %v1547_v27, 0.0  ;;  %v9540_v55 = vadd.f32 %v3388_v31, %v3387_v43  ;;  %v9542_v63 = vadd.f32 %v3480_v61, %v3479_v3  ;;  %v3546_v47 = vrot.slane %v3545_v40, 2  ;;  %v4169_v43 = vld [vmem:[#allocation4 + $0x91] sm:$0x1] }
 0x302   : > { %v3604_v51 = vadd.f32 %v3603_v58, %v3602_v60  ;;  %v9544_v11 = vadd.f32 %v3395_v23, %v3394_v45  ;;  %v9546_v54 = vadd.f32 %v3402_v8, %v3401_v37  ;;  %v3611_v46 = vadd.f32 %v3610_v13, %v3609_v59  ;;  %v4170_v58 = vld [vmem:[#allocation4 + $0xb1] sm:$0x1] }
 0x303   : > { %10672 = vst [vmem:[#allocation80_spill] sm:$0xff] %v9540_v55  ;;  %v4114_v20 = vrot.slane %v4096_v52, 4  ;;  %v3461_v50 = vrot.slane %v3460_v38, 1  ;;  %v3468_v2 = vrot.slane %v3467_v14, 1  ;;  %v9549_v42 = vadd.f32 %v3551_v41, %v3550_v5 }
 0x304   : > { %10673 = vst [vmem:[#allocation81_spill] sm:$0xff] %v9542_v63  ;;  %v3617_v4 = vrot.slane %v3616_v10, 4  ;;  %v3475_v3 = vrot.slane %v9535_v48, 1  ;;  %v3533_v31 = vadd.f32 %v3532_v15, %v3531_v57  ;;  %v3540_v56 = vadd.f32 %v3539_v19, %v3538_v30  ;;  %v4242_v15 = vld [vmem:[#allocation4 + $0x92] sm:$0x1] }
 0x305   : > { %10674 = vst [vmem:[#allocation82_spill] sm:$0xff] %v9544_v11  ;;  %v3623_v45 = vsel %vm587_vm1, %v3601_v18, 0.0  ;;  %v9554_v23 = vadd.f32 %v3546_v47, %v3545_v40  ;;  %v3605_v13 = vrot.slane %v3604_v51, 2  ;;  %v4116_v60 = vrot.slane %v4097_v26, 3  ;;  %v4315_v19 = vld [vmem:[#allocation4 + $0x93] sm:$0x1] }
 0x306   : > { %10675 = vst [vmem:[#allocation83_spill] sm:$0xff] %v9546_v54  ;;  %v9556_v59 = vadd.f32 %v3409_v39, %v3408_v17  ;;  %v3612_v27 = vrot.slane %v3611_v46, 2  ;;  %v4115_v5 = vsel %vm1595_vm5, %v4114_v20, %v9108_v36  ;;  %v4187_v61 = vrot.slane %v4169_v43, 4  ;;  %v4388_v47 = vld [vmem:[#allocation4 + $0x94] sm:$0x1]  ;;  %v10684_v43 = vld [vmem:[#allocation37_spill] sm:$0xff] }
 0x307   : > { %1559 = vst.msk [vmem:[#allocation4 + $0xf0] sm:$0xff] %vm587_vm1, %v1554_v22  ;;  %v4098_v21 = vld [vmem:[#allocation4 + $0xd0] sm:$0x1]  ;;  %v9561_v30 = vadd.f32 %v3617_v4, %v3616_v10  ;;  %v3624_v8 = vrot.slane %v3623_v45, 4  ;;  %v4171_v18 = vld [vmem:[#allocation4 + $0xd1] sm:$0x1]  ;;  %v9563_v40 = vadd.f32 %v3461_v50, %v3460_v38  ;;  %v9565_v52 = vadd.f32 %v3468_v2, %v3467_v14 }
 0x308   : > { %10676 = vst [vmem:[#allocation84_spill] sm:$0xff] %v9549_v42  ;;  %v4118_v41 = vrot.slane %v4098_v21, 2  ;;  %v3534_v39 = vrot.slane %v3533_v31, 1  ;;  %v3541_v17 = vrot.slane %v3540_v56, 1  ;;  %v9568_v22 = vadd.f32 %v3605_v13, %v3604_v51  ;;  %v4461_v20 = vld [vmem:[#allocation4 + $0x95] sm:$0x1] }
 0x309   : > { %10677 = vst [vmem:[#allocation85_spill] sm:$0xff] %v9554_v23  ;;  %v4117_v10 = vsel %vm1598_vm6, %v4116_v60, %v4115_v5  ;;  %v4189_v26 = vrot.slane %v4170_v58, 3  ;;  %v9571_v4 = vadd.f32 %v3612_v27, %v3611_v46  ;;  %v4188_v38 = vsel %vm1595_vm5, %v4187_v61, %v10684_v43  ;;  %v4534_v14 = vld [vmem:[#allocation4 + $0x96] sm:$0x1]  ;;  %v4607_v5 = vld [vmem:[#allocation4 + $0x97] sm:$0x1] }
 0x30a   : > { %10678 = vst [vmem:[#allocation86_spill] sm:$0xff] %v9556_v59  ;;  %v4119_v50 = vsel %vm1601_vm7, %v4118_v41, %v4117_v10  ;;  %v4191_v2 = vrot.slane %v4171_v18, 2  ;;  %v4260_v36 = vrot.slane %v4242_v15, 4  ;;  %v4333_v51 = vrot.slane %v4315_v19, 4  ;;  %v4243_v61 = vld [vmem:[#allocation4 + $0xb2] sm:$0x1] }
 0x30b   : > { %10679 = vst [vmem:[#allocation87_spill] sm:$0xff] %v9561_v30  ;;  %v9578_v42 = vadd.f32 %v3475_v3, %v9535_v48  ;;  %v9580_v60 = vadd.f32 %v3624_v8, %v3623_v45  ;;  %v4406_v46 = vrot.slane %v4388_v47, 4  ;;  %v4479_v27 = vrot.slane %v4461_v20, 4  ;;  %v4316_v18 = vld [vmem:[#allocation4 + $0xb3] sm:$0x1]  ;;  %v10689_v20 = vld [vmem:[#allocation38_spill] sm:$0xff] }
 0x30c   : > { %10680 = vst [vmem:[#allocation88_spill] sm:$0xff] %v9563_v40  ;;  %v4552_v58 = vrot.slane %v4534_v14, 4  ;;  %v4190_v41 = vsel %vm1598_vm6, %v4189_v26, %v4188_v38  ;;  %v9584_v15 = vadd.f32 %v3534_v39, %v3533_v31  ;;  %v4389_v3 = vld [vmem:[#allocation4 + $0xb4] sm:$0x1]  ;;  %v4462_v45 = vld [vmem:[#allocation4 + $0xb5] sm:$0x1]  ;;  %v9589_v47 = vadd.f32 %v3541_v17, %v3540_v56 }
 0x30d   : > { %10681 = vst [vmem:[#allocation89_spill] sm:$0xff] %v9565_v52  ;;  %v4192_v8 = vsel %vm1601_vm7, %v4191_v2, %v4190_v41  ;;  %v4261_v14 = vsel %vm1595_vm5, %v4260_v36, %v10689_v20  ;;  %v4625_v26 = vrot.slane %v4607_v5, 4  ;;  %v4262_v38 = vrot.slane %v4243_v61, 3  ;;  %v10691_v39 = vld [vmem:[#allocation40_spill] sm:$0xff]  ;;  %v10692_v48 = vld [vmem:[#allocation30_spill] sm:$0xff] }
 0x30e   : > { %10682 = vst [vmem:[#allocation90_spill] sm:$0xff] %v9568_v22  ;;  %v4099_v21 = vld [vmem:[#allocation4 + $0xf0] sm:$0x1]  ;;  %v4172_v37 = vld [vmem:[#allocation4 + $0xf1] sm:$0x1]  ;;  %v4335_v57 = vrot.slane %v4316_v18, 3 }
 0x30f   : > { %10683 = vst [vmem:[#allocation91_spill] sm:$0xff] %v9571_v4  ;;  %v4120_v13 = vrot.slane %v4099_v21, 1  ;;  %v4193_v43 = vrot.slane %v4172_v37, 1  ;;  %v4535_v21 = vld [vmem:[#allocation4 + $0xb6] sm:$0x1]  ;;  %v4408_v17 = vrot.slane %v4389_v3, 3 }
 0x310   : > { %10685 = vst [vmem:[#allocation37_spill] sm:$0xff] %v9578_v42  ;;  %v10690_v37 = vld [vmem:[#allocation39_spill] sm:$0xff]  ;;  %v4481_v2 = vrot.slane %v4462_v45, 3  ;;  %v10694_v5 = vld [vmem:[#allocation42_spill] sm:$0xff]  ;;  %v4554_v20 = vrot.slane %v4535_v21, 3  ;;  %v10697_v22 = vld [vmem:[#allocation25_spill] sm:$0xff] }
 0x311   : > { %10686 = vst [vmem:[#allocation92_spill] sm:$0xff] %v9580_v60  ;;  %v4121_v10 = vsel %vm1604_vm8, %v4120_v13, %v4119_v50  ;;  %v4244_v50 = vld [vmem:[#allocation4 + $0xd2] sm:$0x1]  ;;  %v4334_v31 = vsel %vm1595_vm5, %v4333_v51, %v10690_v37  ;;  %v4407_v13 = vsel %vm1595_vm5, %v4406_v46, %v10691_v39  ;;  %v10693_v60 = vld [vmem:[#allocation41_spill] sm:$0xff]  ;;  %v4608_v41 = vld [vmem:[#allocation4 + $0xb7] sm:$0x1]  ;;  %v4194_v36 = vsel %vm1604_vm8, %v4193_v43, %v4192_v8 }
 0x312   : > { %10687 = vst [vmem:[#allocation93_spill] sm:$0xff] %v9584_v15  ;;  %v4123_v19 = vmul.f32 %v4121_v10, %v10692_v48  ;;  %v4480_v56 = vsel %vm1595_vm5, %v4479_v27, %v10693_v60  ;;  %v4553_v61 = vsel %vm1595_vm5, %v4552_v58, %v10694_v5  ;;  %v4264_v30 = vrot.slane %v4244_v50, 2  ;;  %v4317_v51 = vld [vmem:[#allocation4 + $0xd3] sm:$0x1]  ;;  %v10698_v27 = vld [vmem:[#allocation32_spill] sm:$0xff] }
 0x313   : > { %10688 = vst [vmem:[#allocation94_spill] sm:$0xff] %v9589_v47  ;;  %v10695_v37 = vld [vmem:[#allocation31_spill] sm:$0xff]  ;;  %v4263_v39 = vsel %vm1598_vm6, %v4262_v38, %v4261_v14  ;;  %v4125_v60 = vmul.f32 %v4121_v10, %v10697_v22  ;;  %v4126_v3 = vmul.f32 %v4121_v10, %v10698_v27  ;;  %v4336_v43 = vsel %vm1598_vm6, %v4335_v57, %v4334_v31 }
 0x314   : > { %v4124_v4 = vmul.f32 %v4121_v10, %v10695_v37  ;;  %v10696_v46 = vld [vmem:[#allocation43_spill] sm:$0xff]  ;;  %v4627_v8 = vrot.slane %v4608_v41, 3  ;;  %v4127_v58 = vsel %vm587_vm1, %v4123_v19, 0.0  ;;  %v4196_v21 = vmul.f32 %v4194_v36, %v10692_v48 }
 0x315   : > { %v4626_v18 = vsel %vm1595_vm5, %v4625_v26, %v10696_v46  ;;  %v4245_v45 = vld [vmem:[#allocation4 + $0xf2] sm:$0x1]  ;;  %v4409_v50 = vsel %vm1598_vm6, %v4408_v17, %v4407_v13  ;;  %v4482_v5 = vsel %vm1598_vm6, %v4481_v2, %v4480_v56  ;;  %v4337_v47 = vrot.slane %v4317_v51, 2  ;;  %v4390_v26 = vld [vmem:[#allocation4 + $0xd4] sm:$0x1] }
 0x316   : > { %v4463_v46 = vld [vmem:[#allocation4 + $0xd5] sm:$0x1]  ;;  %v4197_v14 = vmul.f32 %v4194_v36, %v10695_v37  ;;  %v4555_v38 = vsel %vm1598_vm6, %v4554_v20, %v4553_v61  ;;  %v4265_v10 = vsel %vm1601_vm7, %v4264_v30, %v4263_v39  ;;  %v4536_v15 = vld [vmem:[#allocation4 + $0xd6] sm:$0x1]  ;;  %v4134_v57 = vsel %vm587_vm1, %v4124_v4, 0.0 }
 0x317   : > { %v4266_v31 = vrot.slane %v4245_v45, 1  ;;  %v4128_v19 = vrot.slane %v4127_v58, 4  ;;  %v4141_v41 = vsel %vm587_vm1, %v4125_v60, 0.0  ;;  %v4148_v13 = vsel %vm587_vm1, %v4126_v3, 0.0  ;;  %v4609_v23 = vld [vmem:[#allocation4 + $0xd7] sm:$0x1] }
 0x318   : > { %v4198_v56 = vmul.f32 %v4194_v36, %v10697_v22  ;;  %v4628_v17 = vsel %vm1598_vm6, %v4627_v8, %v4626_v18  ;;  %v4410_v2 = vrot.slane %v4390_v26, 2  ;;  %v4483_v51 = vrot.slane %v4463_v46, 2  ;;  %v4318_v45 = vld [vmem:[#allocation4 + $0xf3] sm:$0x1] }
 0x319   : > { %v4200_v61 = vsel %vm587_vm1, %v4196_v21, 0.0  ;;  %v4338_v30 = vsel %vm1601_vm7, %v4337_v47, %v4336_v43  ;;  %v4556_v20 = vrot.slane %v4536_v15, 2  ;;  %v4135_v39 = vrot.slane %v4134_v57, 4 }
 0x31a   : > { %v4207_v4 = vsel %vm587_vm1, %v4197_v14, 0.0  ;;  %v4142_v42 = vrot.slane %v4141_v41, 4  ;;  %v4149_v60 = vrot.slane %v4148_v13, 4  ;;  %v4199_v3 = vmul.f32 %v4194_v36, %v10698_v27 }
 0x31b   : > { %v4267_v59 = vsel %vm1604_vm8, %v4266_v31, %v4265_v10  ;;  %v4629_v52 = vrot.slane %v4609_v23, 2  ;;  %v4129_v18 = vadd.f32 %v4128_v19, %v4127_v58  ;;  %v4201_v8 = vrot.slane %v4200_v61, 4  ;;  %v4391_v10 = vld [vmem:[#allocation4 + $0xf4] sm:$0x1] }
 0x31c   : > { %v4214_v26 = vsel %vm587_vm1, %v4198_v56, 0.0  ;;  %v4411_v21 = vsel %vm1601_vm7, %v4410_v2, %v4409_v50  ;;  %v9630_v47 = vsel %vm1601_vm7, %v4483_v51, %v4482_v5  ;;  %v4208_v15 = vrot.slane %v4207_v4, 4 }
 0x31d   : > { %v4339_v43 = vrot.slane %v4318_v45, 1  ;;  %v4136_v46 = vadd.f32 %v4135_v39, %v4134_v57  ;;  %v4269_v14 = vmul.f32 %v4267_v59, %v10692_v48  ;;  %v4270_v40 = vmul.f32 %v4267_v59, %v10695_v37 }
 0x31e   : > { %v4271_v36 = vmul.f32 %v4267_v59, %v10697_v22  ;;  %v4143_v23 = vadd.f32 %v4142_v42, %v4141_v41  ;;  %v4150_v58 = vadd.f32 %v4149_v60, %v4148_v13  ;;  %v4215_v31 = vrot.slane %v4214_v26, 4 }
 0x31f   : > { %v4221_v19 = vsel %vm587_vm1, %v4199_v3, 0.0  ;;  %v4130_v56 = vrot.slane %v4129_v18, 2  ;;  %v4202_v50 = vadd.f32 %v4201_v8, %v4200_v61  ;;  %v4272_v5 = vmul.f32 %v4267_v59, %v10698_v27 }
 0x320   : > { %v4273_v2 = vsel %vm587_vm1, %v4269_v14, 0.0  ;;  %v9639_v57 = vsel %vm1601_vm7, %v4556_v20, %v4555_v38  ;;  %v4209_v51 = vadd.f32 %v4208_v15, %v4207_v4  ;;  %v4280_v39 = vsel %vm587_vm1, %v4270_v40, 0.0 }
 0x321   : > { %v4412_v45 = vrot.slane %v4391_v10, 1  ;;  %v4137_v54 = vrot.slane %v4136_v46, 2  ;;  %v4274_v63 = vrot.slane %v4273_v2, 4  ;;  %v4287_v42 = vsel %vm587_vm1, %v4271_v36, 0.0 }
 0x322   : > { %v4340_v41 = vsel %vm1604_vm8, %v4339_v43, %v4338_v30  ;;  %v4144_v13 = vrot.slane %v4143_v23, 2  ;;  %v4216_v60 = vadd.f32 %v4215_v31, %v4214_v26  ;;  %v4222_v61 = vrot.slane %v4221_v19, 4 }
 0x323   : > { %v4294_v59 = vsel %vm587_vm1, %v4272_v5, 0.0  ;;  %v4131_v3 = vadd.f32 %v4130_v56, %v4129_v18  ;;  %v4151_v8 = vrot.slane %v4150_v58, 2  ;;  %v4203_v14 = vrot.slane %v4202_v50, 2 }
 0x324   : > { %v4281_v38 = vrot.slane %v4280_v39, 4  ;;  %v9646_v20 = vsel %vm1601_vm7, %v4629_v52, %v4628_v17  ;;  %v4210_v40 = vrot.slane %v4209_v51, 2  ;;  %v4288_v4 = vrot.slane %v4287_v42, 4 }
 0x325   : > { %v4342_v15 = vmul.f32 %v4340_v41, %v10692_v48  ;;  %v4275_v10 = vadd.f32 %v4274_v63, %v4273_v2  ;;  %v4295_v36 = vrot.slane %v4294_v59, 4  ;;  %v4343_v30 = vmul.f32 %v4340_v41, %v10695_v37 }
 0x326   : > { %v9651_v26 = vsel %vm1604_vm8, %v4412_v45, %v4411_v21  ;;  %v4138_v43 = vadd.f32 %v4137_v54, %v4136_v46  ;;  %v4145_v31 = vadd.f32 %v4144_v13, %v4143_v23  ;;  %v4217_v18 = vrot.slane %v4216_v60, 2 }
 0x327   : > { %v4223_v56 = vadd.f32 %v4222_v61, %v4221_v19  ;;  %v4132_v5 = vrot.slane %v4131_v3, 1  ;;  %v4152_v11 = vadd.f32 %v4151_v8, %v4150_v58  ;;  %v4204_v55 = vadd.f32 %v4203_v14, %v4202_v50 }
 0x328   : > { %v4282_v52 = vadd.f32 %v4281_v38, %v4280_v39  ;;  %v4211_v17 = vadd.f32 %v4210_v40, %v4209_v51  ;;  %v4289_v49 = vadd.f32 %v4288_v4, %v4287_v42  ;;  %v4344_v28 = vmul.f32 %v4340_v41, %v10697_v22 }
 0x329   : > { %v4346_v63 = vsel %vm587_vm1, %v4342_v15, 0.0  ;;  %v4276_v2 = vrot.slane %v4275_v10, 2  ;;  %v4296_v25 = vadd.f32 %v4295_v36, %v4294_v59  ;;  %v4345_v62 = vmul.f32 %v4340_v41, %v10698_v27  ;;  %v4464_v15 = vld [vmem:[#allocation4 + $0xf5] sm:$0x1] }
 0x32a   : > { %v4353_v21 = vsel %vm587_vm1, %v4343_v30, 0.0  ;;  %v4139_v54 = vrot.slane %v4138_v43, 1  ;;  %v4146_v46 = vrot.slane %v4145_v31, 1  ;;  %v4218_v23 = vadd.f32 %v4217_v18, %v4216_v60 }
 0x32b   : > { %v4224_v19 = vrot.slane %v4223_v56, 2  ;;  %v4133_v45 = vadd.f32 %v4132_v5, %v4131_v3  ;;  %v4153_v58 = vrot.slane %v4152_v11, 1  ;;  %v4283_v50 = vrot.slane %v4282_v52, 2 }
 0x32c   : > { %v4347_v39 = vrot.slane %v4346_v63, 4  ;;  %v4205_v51 = vrot.slane %v4204_v55, 1  ;;  %v4212_v42 = vrot.slane %v4211_v17, 1  ;;  %v4354_v13 = vrot.slane %v4353_v21, 4 }
 0x32d   : > { %v4360_v61 = vsel %vm587_vm1, %v4344_v28, 0.0  ;;  %v4277_v8 = vadd.f32 %v4276_v2, %v4275_v10  ;;  %v4290_v14 = vrot.slane %v4289_v49, 2  ;;  %v4297_v59 = vrot.slane %v4296_v25, 2 }
 0x32e   : > { %v4367_v41 = vsel %vm587_vm1, %v4345_v62, 0.0  ;;  %v4140_v38 = vadd.f32 %v4139_v54, %v4138_v43  ;;  %v9659_v40 = vadd.f32 %v4146_v46, %v4145_v31  ;;  %v4219_v4 = vrot.slane %v4218_v23, 1 }
 0x32f   : > { %v4225_v60 = vadd.f32 %v4224_v19, %v4223_v56  ;;  %v4284_v3 = vadd.f32 %v4283_v50, %v4282_v52  ;;  %v4348_v36 = vadd.f32 %v4347_v39, %v4346_v63  ;;  %v4361_v30 = vrot.slane %v4360_v61, 4 }
 0x330   : > { %v4415_v18 = vmul.f32 %v9651_v26, %v10692_v48  ;;  %v4206_v5 = vadd.f32 %v4205_v51, %v4204_v55  ;;  %v4213_v16 = vadd.f32 %v4212_v42, %v4211_v17  ;;  %v4355_v28 = vadd.f32 %v4354_v13, %v4353_v21 }
 0x331   : > { %v4368_v10 = vrot.slane %v4367_v41, 4  ;;  %v4278_v2 = vrot.slane %v4277_v8, 1  ;;  %v4291_v35 = vadd.f32 %v4290_v14, %v4289_v49  ;;  %v4298_v12 = vadd.f32 %v4297_v59, %v4296_v25 }
 0x332   : > { %v4485_v62 = vrot.slane %v4464_v15, 1  ;;  %v9663_v43 = vadd.f32 %v4153_v58, %v4152_v11  ;;  %v9666_v31 = vsel %vm1586_vm2, %v4140_v38, %v4133_v45  ;;  %v4226_v56 = vrot.slane %v4225_v60, 1  ;;  %v4537_v15 = vld [vmem:[#allocation4 + $0xf6] sm:$0x1] }
 0x333   : > { %v4416_v52 = vmul.f32 %v9651_v26, %v10695_v37  ;;  %v4285_v63 = vrot.slane %v4284_v3, 1  ;;  %v4349_v54 = vrot.slane %v4348_v36, 2  ;;  %v4362_v46 = vadd.f32 %v4361_v30, %v4360_v61 }
 0x334   : > { %v4419_v55 = vsel %vm587_vm1, %v4415_v18, 0.0  ;;  %v4220_v17 = vadd.f32 %v4219_v4, %v4218_v23  ;;  %v4356_v21 = vrot.slane %v4355_v28, 2  ;;  %v4369_v19 = vadd.f32 %v4368_v10, %v4367_v41 }
 0x335   : > { %v4486_v49 = vsel %vm1604_vm8, %v4485_v62, %v9630_v47  ;;  %v4232_v25 = vsel %vm1586_vm2, %v4213_v16, %v4206_v5  ;;  %v4279_v11 = vadd.f32 %v4278_v2, %v4277_v8  ;;  %v4292_v45 = vrot.slane %v4291_v35, 1 }
 0x336   : > { %v4299_v58 = vrot.slane %v4298_v12, 1  ;;  %v4417_v50 = vmul.f32 %v9651_v26, %v10697_v22  ;;  %v4418_v39 = vmul.f32 %v9651_v26, %v10698_v27  ;;  %v4420_v51 = vrot.slane %v4419_v55, 4 }
 0x337   : > { %v4426_v42 = vsel %vm587_vm1, %v4416_v52, 0.0  ;;  %v4286_v23 = vadd.f32 %v4285_v63, %v4284_v3  ;;  %v4350_v13 = vadd.f32 %v4349_v54, %v4348_v36  ;;  %v4363_v61 = vrot.slane %v4362_v46, 2 }
 0x338   : > { %v4488_v14 = vmul.f32 %v4486_v49, %v10692_v48  ;;  %v9680_v47 = vadd.f32 %v4226_v56, %v4225_v60  ;;  %v4357_v16 = vadd.f32 %v4356_v21, %v4355_v28  ;;  %v4370_v8 = vrot.slane %v4369_v19, 2  ;;  %v4610_v56 = vld [vmem:[#allocation4 + $0xf7] sm:$0x1] }
 0x339   : > { %v4489_v59 = vmul.f32 %v4486_v49, %v10695_v37  ;;  %v9684_v41 = vsel %vm1589_vm3, %v4220_v17, %v4232_v25  ;;  %v9686_v38 = vadd.f32 %v4292_v45, %v4291_v35  ;;  %v9688_v26 = vadd.f32 %v4299_v58, %v4298_v12 }
 0x33a   : > { %v4427_v4 = vrot.slane %v4426_v42, 4  ;;  %v4421_v3 = vadd.f32 %v4420_v51, %v4419_v55  ;;  %v4433_v36 = vsel %vm587_vm1, %v4417_v50, 0.0  ;;  %v4440_v30 = vsel %vm587_vm1, %v4418_v39, 0.0 }
 0x33b   : > { %10699 = vst [vmem:[#allocation38_spill] sm:$0xff] %v9686_v38  ;;  %v4490_v60 = vmul.f32 %v4486_v49, %v10697_v22  ;;  %v9694_v18 = vsel %vm1586_vm2, %v4286_v23, %v4279_v11  ;;  %v4351_v5 = vrot.slane %v4350_v13, 1  ;;  %v4364_v28 = vadd.f32 %v4363_v61, %v4362_v46 }
 0x33c   : > { %10700 = vst [vmem:[#allocation39_spill] sm:$0xff] %v9688_v26  ;;  %v4492_v10 = vsel %vm587_vm1, %v4488_v14, 0.0  ;;  %v4358_v35 = vrot.slane %v4357_v16, 1  ;;  %v4371_v2 = vadd.f32 %v4370_v8, %v4369_v19  ;;  %v4499_v12 = vsel %vm587_vm1, %v4489_v59, 0.0 }
 0x33d   : > { %v4558_v62 = vrot.slane %v4537_v15, 1  ;;  %v4428_v52 = vadd.f32 %v4427_v4, %v4426_v42  ;;  %v4434_v63 = vrot.slane %v4433_v36, 4  ;;  %v4441_v54 = vrot.slane %v4440_v30, 4 }
 0x33e   : > { %v4491_v55 = vmul.f32 %v4486_v49, %v10698_v27  ;;  %v4422_v17 = vrot.slane %v4421_v3, 2  ;;  %v4493_v21 = vrot.slane %v4492_v10, 4  ;;  %v4506_v25 = vsel %vm587_vm1, %v4490_v60, 0.0 }
 0x33f   : > { %v4559_v46 = vsel %vm1604_vm8, %v4558_v62, %v9639_v57  ;;  %v4500_v11 = vrot.slane %v4499_v12, 4  ;;  %v4631_v58 = vrot.slane %v4610_v56, 1  ;;  %v9704_v50 = vadd.f32 %v4351_v5, %v4350_v13 }
 0x340   : > { %v4561_v45 = vmul.f32 %v4559_v46, %v10692_v48  ;;  %v4562_v19 = vmul.f32 %v4559_v46, %v10695_v37  ;;  %v4365_v39 = vrot.slane %v4364_v28, 1  ;;  %v4372_v51 = vrot.slane %v4371_v2, 1 }
 0x341   : > { %10701 = vst [vmem:[#allocation40_spill] sm:$0xff] %v9704_v50  ;;  %v4563_v42 = vmul.f32 %v4559_v46, %v10697_v22  ;;  %v9707_v49 = vadd.f32 %v4358_v35, %v4357_v16  ;;  %v4429_v23 = vrot.slane %v4428_v52, 2  ;;  %v4435_v61 = vadd.f32 %v4434_v63, %v4433_v36  ;;  %v1502_v50 = vpop.f32.mrf.mxu2 }
 0x342   : > { %v4513_v14 = vsel %vm587_vm1, %v4491_v55, 0.0  ;;  %v9710_v8 = vadd.f32 %v4422_v17, %v4421_v3  ;;  %v4442_v57 = vadd.f32 %v4441_v54, %v4440_v30  ;;  %v4507_v59 = vrot.slane %v4506_v25, 4 }
 0x343   : > { %10702 = vst [vmem:[#allocation30_spill] sm:$0xff] %v9707_v49  ;;  %v4565_v4 = vsel %vm587_vm1, %v4561_v45, 0.0  ;;  %v4494_v15 = vadd.f32 %v4493_v21, %v4492_v10  ;;  %v4501_v60 = vadd.f32 %v4500_v11, %v4499_v12  ;;  %v4572_v13 = vsel %vm587_vm1, %v4562_v19, 0.0 }
 0x344   : > { %v4632_v5 = vsel %vm1604_vm8, %v4631_v58, %v9646_v20  ;;  %v4514_v62 = vrot.slane %v4513_v14, 4  ;;  %v4579_v16 = vsel %vm587_vm1, %v4563_v42, 0.0  ;;  %v9719_v3 = vadd.f32 %v4365_v39, %v4364_v28  ;;  %v10705_v42 = vld [vmem:[#allocation33_spill] sm:$0xff] }
 0x345   : > { %v4634_v36 = vmul.f32 %v4632_v5, %v10692_v48  ;;  %v4635_v35 = vmul.f32 %v4632_v5, %v10695_v37  ;;  %v9721_v30 = vadd.f32 %v4372_v51, %v4371_v2  ;;  %v4564_v56 = vmul.f32 %v4559_v46, %v10698_v27  ;;  %v1408_v48 = vpop.f32.mrf.mxu0 }
 0x346   : > { %10703 = vst [vmem:[#allocation41_spill] sm:$0xff] %v9719_v3  ;;  %v4566_v10 = vrot.slane %v4565_v4, 4  ;;  %v4436_v12 = vrot.slane %v4435_v61, 2  ;;  %v4508_v63 = vadd.f32 %v4507_v59, %v4506_v25  ;;  %v4573_v54 = vrot.slane %v4572_v13, 4  ;;  %v1455_v59 = vpop.f32.mrf.mxu1 }
 0x347   : > { %10704 = vst [vmem:[#allocation42_spill] sm:$0xff] %v9721_v30  ;;  %v4638_v55 = vsel %vm587_vm1, %v4634_v36, 0.0  ;;  %v9725_v20 = vadd.f32 %v4429_v23, %v4428_v52  ;;  %v4443_v17 = vrot.slane %v4442_v57, 2  ;;  %v4495_v21 = vrot.slane %v4494_v15, 2 }
 0x348   : > { %v4580_v11 = vrot.slane %v4579_v16, 4  ;;  %v4424_v37 = vrot.slane %v9710_v8, 1  ;;  %v4502_v28 = vrot.slane %v4501_v60, 2  ;;  %v4515_v45 = vadd.f32 %v4514_v62, %v4513_v14  ;;  %v1549_v14 = vpop.f32.mrf.mxu3 }
 0x349   : > { %v4645_v2 = vsel %vm587_vm1, %v4635_v35, 0.0  ;;  %v4567_v19 = vadd.f32 %v4566_v10, %v4565_v4  ;;  %v4586_v46 = vsel %vm587_vm1, %v4564_v56, 0.0  ;;  %v4636_v25 = vmul.f32 %v4632_v5, %v10697_v22 }
 0x34a   : > { %v4639_v58 = vrot.slane %v4638_v55, 4  ;;  %v4437_v39 = vadd.f32 %v4436_v12, %v4435_v61  ;;  %v4509_v51 = vrot.slane %v4508_v63, 2  ;;  %v4574_v52 = vadd.f32 %v4573_v54, %v4572_v13 }
 0x34b   : > { %v1409_v23 = vadd.f32 %v1408_v48, %v10705_v42  ;;  %v4444_v36 = vadd.f32 %v4443_v17, %v4442_v57  ;;  %v4496_v30 = vadd.f32 %v4495_v21, %v4494_v15  ;;  %v4581_v3 = vadd.f32 %v4580_v11, %v4579_v16 }
 0x34c   : > { %v4646_v49 = vrot.slane %v4645_v2, 4  ;;  %v4503_v62 = vadd.f32 %v4502_v28, %v4501_v60  ;;  %v4516_v35 = vrot.slane %v4515_v45, 2  ;;  %v4587_v4 = vrot.slane %v4586_v46, 4 }
 0x34d   : > { %v1414_v10 = vmax.f32 %v1409_v23, 0.0  ;;  %v4568_v56 = vrot.slane %v4567_v19, 2  ;;  %v4640_v26 = vadd.f32 %v4639_v58, %v4638_v55  ;;  %v4652_v22 = vsel %vm587_vm1, %v4636_v25, 0.0 }
 0x34e   : > { %v1456_v61 = vadd.f32 %v1455_v59, %v10705_v42  ;;  %v4510_v13 = vadd.f32 %v4509_v51, %v4508_v63  ;;  %v4575_v12 = vrot.slane %v4574_v52, 2  ;;  %v1503_v57 = vadd.f32 %v1502_v50, %v10705_v42 }
 0x34f   : > { %1419 = vst.msk [vmem:[#allocation4 + $0x98] sm:$0xff] %vm587_vm1, %v1414_v10  ;;  %v1550_v15 = vadd.f32 %v1549_v14, %v10705_v42  ;;  %v4582_v16 = vrot.slane %v4581_v3, 2  ;;  %v4637_v60 = vmul.f32 %v4632_v5, %v10698_v27  ;;  %v4647_v54 = vadd.f32 %v4646_v49, %v4645_v2 }
 0x350   : > { %v1461_v17 = vmax.f32 %v1456_v61, 0.0  ;;  %v9738_v21 = vadd.f32 %v4516_v35, %v4515_v45  ;;  %v4653_v55 = vrot.slane %v4652_v22, 4  ;;  %v1508_v11 = vmax.f32 %v1503_v57, 0.0 }
 0x351   : > { %v1555_v48 = vmax.f32 %v1550_v15, 0.0  ;;  %v4431_v28 = vrot.slane %v9725_v20, 1  ;;  %v4569_v63 = vadd.f32 %v4568_v56, %v4567_v19  ;;  %v9741_v25 = vadd.f32 %v4587_v4, %v4586_v46 }
 0x352   : > { %10706 = vst [vmem:[#allocation31_spill] sm:$0xff] %v9738_v21  ;;  %v4641_v58 = vrot.slane %v4640_v26, 2  ;;  %v9745_v50 = vadd.f32 %v4424_v37, %v9710_v8  ;;  %v4438_v51 = vrot.slane %v4437_v39, 1  ;;  %v4445_v27 = vrot.slane %v4444_v36, 1 }
 0x353   : > { %10707 = vst [vmem:[#allocation43_spill] sm:$0xff] %v9741_v25  ;;  %v4576_v49 = vadd.f32 %v4575_v12, %v4574_v52  ;;  %v4497_v5 = vrot.slane %v4496_v30, 1  ;;  %v9748_v45 = vadd.f32 %v4582_v16, %v4581_v3  ;;  %v4648_v2 = vrot.slane %v4647_v54, 2 }
 0x354   : > { %1466 = vst.msk [vmem:[#allocation4 + $0xb8] sm:$0xff] %vm587_vm1, %v1461_v17  ;;  %v4659_v42 = vsel %vm587_vm1, %v4637_v60, 0.0  ;;  %v4504_v19 = vrot.slane %v4503_v62, 1  ;;  %v4511_v46 = vrot.slane %v4510_v13, 1  ;;  %v9753_v59 = vadd.f32 %v4653_v55, %v4652_v22 }
 0x355   : > { %10708 = vst [vmem:[#allocation25_spill] sm:$0xff] %v9745_v50  ;;  %v9756_v8 = vadd.f32 %v4431_v28, %v9725_v20  ;;  %v4570_v37 = vrot.slane %v4569_v63, 1  ;;  %v9759_v14 = vadd.f32 %v4641_v58, %v4640_v26  ;;  %v9761_v4 = vadd.f32 %v4438_v51, %v4437_v39 }
 0x356   : > { %1513 = vst.msk [vmem:[#allocation4 + $0xd8] sm:$0xff] %vm587_vm1, %v1508_v11  ;;  %v5132_v3 = vld [vmem:[#allocation4 + $0x98] sm:$0x1]  ;;  %v5205_v35 = vld [vmem:[#allocation4 + $0x99] sm:$0x1]  ;;  %v9763_v10 = vadd.f32 %v4445_v27, %v4444_v36  ;;  %v4577_v56 = vrot.slane %v4576_v49, 1  ;;  %v9765_v22 = vadd.f32 %v4497_v5, %v4496_v30  ;;  %v9768_v15 = vadd.f32 %v4648_v2, %v4647_v54 }
 0x357   : > { %10709 = vst [vmem:[#allocation32_spill] sm:$0xff] %v9748_v45  ;;  %v4660_v61 = vrot.slane %v4659_v42, 4  ;;  %v5278_v12 = vld [vmem:[#allocation4 + $0x9a] sm:$0x1]  ;;  %v5351_v57 = vld [vmem:[#allocation4 + $0x9b] sm:$0x1]  ;;  %v9770_v17 = vadd.f32 %v4504_v19, %v4503_v62  ;;  %v9772_v55 = vadd.f32 %v4511_v46, %v4510_v13  ;;  %v9776_v54 = vadd.f32 %v4570_v37, %v4569_v63 }
 0x358   : > { %1560 = vst.msk [vmem:[#allocation4 + $0xf8] sm:$0xff] %vm587_vm1, %v1555_v48  ;;  %v5150_v16 = vrot.slane %v5132_v3, 4  ;;  %v5424_v60 = vld [vmem:[#allocation4 + $0x9c] sm:$0x1]  ;;  %v5497_v26 = vld [vmem:[#allocation4 + $0x9d] sm:$0x1]  ;;  %v9780_v46 = vadd.f32 %v4577_v56, %v4576_v49 }
 0x359   : > { %10710 = vst [vmem:[#allocation33_spill] sm:$0xff] %v9753_v59  ;;  %v5223_v36 = vrot.slane %v5205_v35, 4  ;;  %v5570_v11 = vld [vmem:[#allocation4 + $0x9e] sm:$0x1]  ;;  %v5643_v48 = vld [vmem:[#allocation4 + $0x9f] sm:$0x1]  ;;  %v9778_v5 = vadd.f32 %v4660_v61, %v4659_v42 }
 0x35a   : > { %10711 = vst [vmem:[#allocation95_spill] sm:$0xff] %v9756_v8  ;;  %v5296_v30 = vrot.slane %v5278_v12, 4  ;;  %v5369_v58 = vrot.slane %v5351_v57, 4  ;;  %v5442_v51 = vrot.slane %v5424_v60, 4  ;;  %v5515_v2 = vrot.slane %v5497_v26, 4  ;;  %v10722_v35 = vld [vmem:[#allocation44_spill] sm:$0xff] }
 0x35b   : > { %10712 = vst [vmem:[#allocation96_spill] sm:$0xff] %v9759_v14  ;;  %v5133_v27 = vld [vmem:[#allocation4 + $0xb8] sm:$0x1]  ;;  %v5588_v62 = vrot.slane %v5570_v11, 4  ;;  %v5206_v19 = vld [vmem:[#allocation4 + $0xb9] sm:$0x1]  ;;  %v5151_v39 = vsel %vm1595_vm5, %v5150_v16, %v10722_v35 }
 0x35c   : > { %10713 = vst [vmem:[#allocation97_spill] sm:$0xff] %v9761_v4  ;;  %v5279_v13 = vld [vmem:[#allocation4 + $0xba] sm:$0x1]  ;;  %v5661_v28 = vrot.slane %v5643_v48, 4  ;;  %v5352_v12 = vld [vmem:[#allocation4 + $0xbb] sm:$0x1] }
 0x35d   : > { %10714 = vst [vmem:[#allocation98_spill] sm:$0xff] %v9763_v10  ;;  %v5425_v57 = vld [vmem:[#allocation4 + $0xbc] sm:$0x1]  ;;  %v10723_v60 = vld [vmem:[#allocation45_spill] sm:$0xff]  ;;  %v5152_v37 = vrot.slane %v5133_v27, 3  ;;  %v5225_v42 = vrot.slane %v5206_v19, 3 }
 0x35e   : > { %10715 = vst [vmem:[#allocation99_spill] sm:$0xff] %v9765_v22  ;;  %v5224_v63 = vsel %vm1595_vm5, %v5223_v36, %v10723_v60  ;;  %v5298_v61 = vrot.slane %v5279_v13, 3  ;;  %v5498_v26 = vld [vmem:[#allocation4 + $0xbd] sm:$0x1]  ;;  %v10724_v11 = vld [vmem:[#allocation46_spill] sm:$0xff]  ;;  %v10725_v49 = vld [vmem:[#allocation47_spill] sm:$0xff] }
 0x35f   : > { %10716 = vst [vmem:[#allocation100_spill] sm:$0xff] %v9768_v15  ;;  %v5297_v52 = vsel %vm1595_vm5, %v5296_v30, %v10724_v11  ;;  %v5370_v56 = vsel %vm1595_vm5, %v5369_v58, %v10725_v49  ;;  %v5371_v3 = vrot.slane %v5352_v12, 3  ;;  %v5444_v20 = vrot.slane %v5425_v57, 3  ;;  %v5571_v23 = vld [vmem:[#allocation4 + $0xbe] sm:$0x1]  ;;  %v10728_v27 = vld [vmem:[#allocation50_spill] sm:$0xff] }
 0x360   : > { %10717 = vst [vmem:[#allocation101_spill] sm:$0xff] %v9770_v17  ;;  %v5644_v16 = vld [vmem:[#allocation4 + $0xbf] sm:$0x1]  ;;  %v5589_v19 = vsel %vm1595_vm5, %v5588_v62, %v10728_v27  ;;  %v5517_v13 = vrot.slane %v5498_v26, 3  ;;  %v5134_v60 = vld [vmem:[#allocation4 + $0xd8] sm:$0x1]  ;;  %v5153_v15 = vsel %vm1598_vm6, %v5152_v37, %v5151_v39  ;;  %v5299_v62 = vsel %vm1598_vm6, %v5298_v61, %v5297_v52 }
 0x361   : > { %10718 = vst [vmem:[#allocation102_spill] sm:$0xff] %v9772_v55  ;;  %v10726_v48 = vld [vmem:[#allocation48_spill] sm:$0xff]  ;;  %v10729_v30 = vld [vmem:[#allocation51_spill] sm:$0xff]  ;;  %v5590_v58 = vrot.slane %v5571_v23, 3  ;;  %v5663_v12 = vrot.slane %v5644_v16, 3  ;;  %v5154_v57 = vrot.slane %v5134_v60, 2  ;;  %v5372_v26 = vsel %vm1598_vm6, %v5371_v3, %v5370_v56 }
 0x362   : > { %10719 = vst [vmem:[#allocation103_spill] sm:$0xff] %v9776_v54  ;;  %v5443_v35 = vsel %vm1595_vm5, %v5442_v51, %v10726_v48  ;;  %v5207_v59 = vld [vmem:[#allocation4 + $0xd9] sm:$0x1]  ;;  %v5662_v11 = vsel %vm1595_vm5, %v5661_v28, %v10729_v30  ;;  %v5280_v49 = vld [vmem:[#allocation4 + $0xda] sm:$0x1]  ;;  %v5226_v51 = vsel %vm1598_vm6, %v5225_v42, %v5224_v63 }
 0x363   : > { %10720 = vst [vmem:[#allocation104_spill] sm:$0xff] %v9778_v5  ;;  %v10727_v5 = vld [vmem:[#allocation49_spill] sm:$0xff]  ;;  %v5227_v48 = vrot.slane %v5207_v59, 2  ;;  %v5300_v14 = vrot.slane %v5280_v49, 2  ;;  %v5445_v27 = vsel %vm1598_vm6, %v5444_v20, %v5443_v35  ;;  %v5499_v28 = vld [vmem:[#allocation4 + $0xdd] sm:$0x1]  ;;  %v5591_v59 = vsel %vm1598_vm6, %v5590_v58, %v5589_v19 }
 0x364   : > { %10721 = vst [vmem:[#allocation105_spill] sm:$0xff] %v9780_v46  ;;  %v5516_v36 = vsel %vm1595_vm5, %v5515_v2, %v10727_v5  ;;  %v5353_v5 = vld [vmem:[#allocation4 + $0xdb] sm:$0x1]  ;;  %v5426_v2 = vld [vmem:[#allocation4 + $0xdc] sm:$0x1]  ;;  %v5519_v30 = vrot.slane %v5499_v28, 2  ;;  %v5664_v63 = vsel %vm1598_vm6, %v5663_v12, %v5662_v11  ;;  %v5155_v42 = vsel %vm1601_vm7, %v5154_v57, %v5153_v15 }
 0x365   : > { %v5373_v46 = vrot.slane %v5353_v5, 2  ;;  %v5572_v23 = vld [vmem:[#allocation4 + $0xde] sm:$0x1]  ;;  %v5518_v16 = vsel %vm1598_vm6, %v5517_v13, %v5516_v36  ;;  %v5446_v60 = vrot.slane %v5426_v2, 2  ;;  %v5645_v37 = vld [vmem:[#allocation4 + $0xdf] sm:$0x1]  ;;  %v5228_v20 = vsel %vm1601_vm7, %v5227_v48, %v5226_v51 }
 0x366   : > { %v5592_v39 = vrot.slane %v5572_v23, 2  ;;  %v5665_v52 = vrot.slane %v5645_v37, 2  ;;  %v5135_v61 = vld [vmem:[#allocation4 + $0xf8] sm:$0x1]  ;;  %v5208_v3 = vld [vmem:[#allocation4 + $0xf9] sm:$0x1]  ;;  %v5301_v56 = vsel %vm1601_vm7, %v5300_v14, %v5299_v62  ;;  %v9815_v15 = vsel %vm1601_vm7, %v5519_v30, %v5518_v16 }
 0x367   : > { %v5374_v35 = vsel %vm1601_vm7, %v5373_v46, %v5372_v26  ;;  %v5156_v36 = vrot.slane %v5135_v61, 1  ;;  %v5281_v13 = vld [vmem:[#allocation4 + $0xfa] sm:$0x1]  ;;  %v5354_v49 = vld [vmem:[#allocation4 + $0xfb] sm:$0x1]  ;;  %v9812_v5 = vsel %vm1601_vm7, %v5446_v60, %v5445_v27  ;;  %v5229_v19 = vrot.slane %v5208_v3, 1 }
 0x368   : > { %v5302_v58 = vrot.slane %v5281_v13, 1  ;;  %v5375_v11 = vrot.slane %v5354_v49, 1  ;;  %v5427_v12 = vld [vmem:[#allocation4 + $0xfc] sm:$0x1]  ;;  %v9818_v57 = vsel %vm1601_vm7, %v5592_v39, %v5591_v59  ;;  %v9821_v14 = vsel %vm1601_vm7, %v5665_v52, %v5664_v63  ;;  %v10730_v51 = vld [vmem:[#allocation26_spill] sm:$0xff]  ;;  %v10732_v26 = vld [vmem:[#allocation35_spill] sm:$0xff] }
 0x369   : > { %v5157_v46 = vsel %vm1604_vm8, %v5156_v36, %v5155_v42  ;;  %v10731_v2 = vld [vmem:[#allocation34_spill] sm:$0xff]  ;;  %v10733_v28 = vld [vmem:[#allocation36_spill] sm:$0xff]  ;;  %v5230_v60 = vsel %vm1604_vm8, %v5229_v19, %v5228_v20  ;;  %v5448_v39 = vrot.slane %v5427_v12, 1 }
 0x36a   : > { %v5159_v48 = vmul.f32 %v5157_v46, %v10730_v51  ;;  %v5160_v62 = vmul.f32 %v5157_v46, %v10731_v2  ;;  %v5161_v27 = vmul.f32 %v5157_v46, %v10732_v26  ;;  %v5162_v23 = vmul.f32 %v5157_v46, %v10733_v28 }
 0x36b   : > { %v9830_v16 = vsel %vm1604_vm8, %v5302_v58, %v5301_v56  ;;  %v9833_v30 = vsel %vm1604_vm8, %v5375_v11, %v5374_v35  ;;  %v5232_v20 = vmul.f32 %v5230_v60, %v10730_v51  ;;  %v5233_v56 = vmul.f32 %v5230_v60, %v10731_v2 }
 0x36c   : > { %v5163_v37 = vsel %vm587_vm1, %v5159_v48, 0.0  ;;  %v5170_v59 = vsel %vm587_vm1, %v5160_v62, 0.0  ;;  %v5177_v63 = vsel %vm587_vm1, %v5161_v27, 0.0  ;;  %v5184_v42 = vsel %vm587_vm1, %v5162_v23, 0.0 }
 0x36d   : > { %v5164_v52 = vrot.slane %v5163_v37, 4  ;;  %v5171_v61 = vrot.slane %v5170_v59, 4  ;;  %v5178_v3 = vrot.slane %v5177_v63, 4  ;;  %v5185_v36 = vrot.slane %v5184_v42, 4 }
 0x36e   : > { %v5234_v35 = vmul.f32 %v5230_v60, %v10732_v26  ;;  %v5235_v13 = vmul.f32 %v5230_v60, %v10733_v28  ;;  %v5236_v12 = vsel %vm587_vm1, %v5232_v20, 0.0  ;;  %v5243_v46 = vsel %vm587_vm1, %v5233_v56, 0.0 }
 0x36f   : > { %v5165_v49 = vadd.f32 %v5164_v52, %v5163_v37  ;;  %v5172_v19 = vadd.f32 %v5171_v61, %v5170_v59  ;;  %v5179_v58 = vadd.f32 %v5178_v3, %v5177_v63  ;;  %v5186_v11 = vadd.f32 %v5185_v36, %v5184_v42 }
 0x370   : > { %v5250_v48 = vsel %vm587_vm1, %v5234_v35, 0.0  ;;  %v5257_v62 = vsel %vm587_vm1, %v5235_v13, 0.0  ;;  %v5237_v55 = vrot.slane %v5236_v12, 4  ;;  %v5244_v45 = vrot.slane %v5243_v46, 4 }
 0x371   : > { %v5166_v27 = vrot.slane %v5165_v49, 2  ;;  %v5173_v23 = vrot.slane %v5172_v19, 2  ;;  %v5180_v54 = vrot.slane %v5179_v58, 2  ;;  %v5187_v25 = vrot.slane %v5186_v11, 2 }
 0x372   : > { %v5251_v17 = vrot.slane %v5250_v48, 4  ;;  %v5258_v60 = vrot.slane %v5257_v62, 4  ;;  %v5238_v52 = vadd.f32 %v5237_v55, %v5236_v12  ;;  %v5245_v61 = vadd.f32 %v5244_v45, %v5243_v46 }
 0x373   : > { %v5167_v37 = vadd.f32 %v5166_v27, %v5165_v49  ;;  %v5174_v59 = vadd.f32 %v5173_v23, %v5172_v19  ;;  %v5181_v63 = vadd.f32 %v5180_v54, %v5179_v58  ;;  %v5188_v42 = vadd.f32 %v5187_v25, %v5186_v11 }
 0x374   : > { %v5252_v3 = vadd.f32 %v5251_v17, %v5250_v48  ;;  %v5259_v36 = vadd.f32 %v5258_v60, %v5257_v62  ;;  %v5239_v22 = vrot.slane %v5238_v52, 2  ;;  %v5246_v10 = vrot.slane %v5245_v61, 2 }
 0x375   : > { %v5168_v20 = vrot.slane %v5167_v37, 1  ;;  %v5175_v56 = vrot.slane %v5174_v59, 1  ;;  %v5182_v35 = vrot.slane %v5181_v63, 1  ;;  %v5189_v13 = vrot.slane %v5188_v42, 1 }
 0x376   : > { %v5253_v21 = vrot.slane %v5252_v3, 2  ;;  %v5260_v4 = vrot.slane %v5259_v36, 2  ;;  %v9851_v54 = vsel %vm1604_vm8, %v5448_v39, %v9812_v5  ;;  %v5240_v25 = vadd.f32 %v5239_v22, %v5238_v52 }
 0x377   : > { %v5169_v8 = vadd.f32 %v5168_v20, %v5167_v37  ;;  %v5176_v50 = vadd.f32 %v5175_v56, %v5174_v59  ;;  %v9847_v38 = vadd.f32 %v5182_v35, %v5181_v63  ;;  %v5247_v45 = vadd.f32 %v5246_v10, %v5245_v61 }
 0x378   : > { %v5254_v17 = vadd.f32 %v5253_v21, %v5252_v3  ;;  %v5261_v55 = vadd.f32 %v5260_v4, %v5259_v36  ;;  %v9853_v49 = vadd.f32 %v5189_v13, %v5188_v42  ;;  %v5305_v19 = vmul.f32 %v9830_v16, %v10730_v51 }
 0x379   : > { %v5306_v58 = vmul.f32 %v9830_v16, %v10731_v2  ;;  %v5307_v11 = vmul.f32 %v9830_v16, %v10732_v26  ;;  %v5241_v12 = vrot.slane %v5240_v25, 1  ;;  %v5248_v46 = vrot.slane %v5247_v45, 1 }
 0x37a   : > { %v5255_v48 = vrot.slane %v5254_v17, 1  ;;  %v5262_v5 = vrot.slane %v5261_v55, 1  ;;  %v5308_v10 = vmul.f32 %v9830_v16, %v10733_v28  ;;  %v5309_v21 = vsel %vm587_vm1, %v5305_v19, 0.0 }
 0x37b   : > { %v5316_v4 = vsel %vm587_vm1, %v5306_v58, 0.0  ;;  %v5323_v22 = vsel %vm587_vm1, %v5307_v11, 0.0  ;;  %v9867_v39 = vsel %vm1586_vm2, %v5176_v50, %v5169_v8  ;;  %v5242_v62 = vadd.f32 %v5241_v12, %v5240_v25 }
 0x37c   : > { %v5249_v27 = vadd.f32 %v5248_v46, %v5247_v45  ;;  %v5256_v23 = vadd.f32 %v5255_v48, %v5254_v17  ;;  %v5310_v60 = vrot.slane %v5309_v21, 4  ;;  %v5317_v37 = vrot.slane %v5316_v4, 4 }
 0x37d   : > { %v5324_v59 = vrot.slane %v5323_v22, 4  ;;  %v5330_v63 = vsel %vm587_vm1, %v5308_v10, 0.0  ;;  %v9870_v42 = vadd.f32 %v5262_v5, %v5261_v55  ;;  %v5378_v52 = vmul.f32 %v9833_v30, %v10730_v51 }
 0x37e   : > { %v5331_v16 = vrot.slane %v5330_v63, 4  ;;  %v5379_v61 = vmul.f32 %v9833_v30, %v10731_v2  ;;  %v5268_v50 = vsel %vm1586_vm2, %v5249_v27, %v5242_v62  ;;  %v5311_v8 = vadd.f32 %v5310_v60, %v5309_v21 }
 0x37f   : > { %10734 = vst [vmem:[#allocation44_spill] sm:$0xff] %v9870_v42  ;;  %v5318_v3 = vadd.f32 %v5317_v37, %v5316_v4  ;;  %v5325_v36 = vadd.f32 %v5324_v59, %v5323_v22  ;;  %v5380_v56 = vmul.f32 %v9833_v30, %v10732_v26  ;;  %v5381_v35 = vmul.f32 %v9833_v30, %v10733_v28 }
 0x380   : > { %v5332_v20 = vadd.f32 %v5331_v16, %v5330_v63  ;;  %v5382_v13 = vsel %vm587_vm1, %v5378_v52, 0.0  ;;  %v5312_v25 = vrot.slane %v5311_v8, 2  ;;  %v5389_v58 = vsel %vm587_vm1, %v5379_v61, 0.0 }
 0x381   : > { %v5319_v45 = vrot.slane %v5318_v3, 2  ;;  %v5326_v17 = vrot.slane %v5325_v36, 2  ;;  %v5383_v55 = vrot.slane %v5382_v13, 4  ;;  %v5396_v11 = vsel %vm587_vm1, %v5380_v56, 0.0 }
 0x382   : > { %v5333_v19 = vrot.slane %v5332_v20, 2  ;;  %v5403_v12 = vsel %vm587_vm1, %v5381_v35, 0.0  ;;  %v5313_v46 = vadd.f32 %v5312_v25, %v5311_v8  ;;  %v5390_v4 = vrot.slane %v5389_v58, 4 }
 0x383   : > { %v5320_v48 = vadd.f32 %v5319_v45, %v5318_v3  ;;  %v5327_v5 = vadd.f32 %v5326_v17, %v5325_v36  ;;  %v5384_v10 = vadd.f32 %v5383_v55, %v5382_v13  ;;  %v5397_v30 = vrot.slane %v5396_v11, 4 }
 0x384   : > { %v5334_v21 = vadd.f32 %v5333_v19, %v5332_v20  ;;  %v5404_v22 = vrot.slane %v5403_v12, 4  ;;  %v5314_v62 = vrot.slane %v5313_v46, 1  ;;  %v5391_v63 = vadd.f32 %v5390_v4, %v5389_v58 }
 0x385   : > { %v5321_v27 = vrot.slane %v5320_v48, 1  ;;  %v5328_v60 = vrot.slane %v5327_v5, 1  ;;  %v5385_v37 = vrot.slane %v5384_v10, 2  ;;  %v5398_v16 = vadd.f32 %v5397_v30, %v5396_v11  ;;  %v5500_v11 = vld [vmem:[#allocation4 + $0xfd] sm:$0x1] }
 0x386   : > { %v5335_v59 = vrot.slane %v5334_v21, 1  ;;  %v5405_v52 = vadd.f32 %v5404_v22, %v5403_v12  ;;  %v9886_v61 = vsel %vm1589_vm3, %v5256_v23, %v5268_v50  ;;  %v5315_v56 = vadd.f32 %v5314_v62, %v5313_v46 }
 0x387   : > { %10735 = vst [vmem:[#allocation45_spill] sm:$0xff] %v9886_v61  ;;  %v5322_v8 = vadd.f32 %v5321_v27, %v5320_v48  ;;  %v5386_v3 = vadd.f32 %v5385_v37, %v5384_v10  ;;  %v9888_v36 = vadd.f32 %v5328_v60, %v5327_v5  ;;  %v5392_v20 = vrot.slane %v5391_v63, 2 }
 0x388   : > { %v5399_v35 = vrot.slane %v5398_v16, 2  ;;  %v5406_v13 = vrot.slane %v5405_v52, 2  ;;  %v9890_v25 = vadd.f32 %v5335_v59, %v5334_v21  ;;  %v5451_v17 = vmul.f32 %v9851_v54, %v10730_v51 }
 0x389   : > { %v5387_v45 = vrot.slane %v5386_v3, 1  ;;  %v5452_v55 = vmul.f32 %v9851_v54, %v10731_v2  ;;  %v5393_v19 = vadd.f32 %v5392_v20, %v5391_v63  ;;  %v5453_v58 = vmul.f32 %v9851_v54, %v10732_v26 }
 0x38a   : > { %10736 = vst [vmem:[#allocation46_spill] sm:$0xff] %v9890_v25  ;;  %v5400_v23 = vadd.f32 %v5399_v35, %v5398_v16  ;;  %v5407_v50 = vadd.f32 %v5406_v13, %v5405_v52  ;;  %v9899_v12 = vsel %vm1586_vm2, %v5322_v8, %v5315_v56  ;;  %v5454_v46 = vmul.f32 %v9851_v54, %v10733_v28 }
 0x38b   : > { %v5455_v48 = vsel %vm587_vm1, %v5451_v17, 0.0  ;;  %v5462_v5 = vsel %vm587_vm1, %v5452_v55, 0.0  ;;  %v9905_v10 = vadd.f32 %v5387_v45, %v5386_v3  ;;  %v5394_v21 = vrot.slane %v5393_v19, 1 }
 0x38c   : > { %v5401_v4 = vrot.slane %v5400_v23, 1  ;;  %v5456_v30 = vrot.slane %v5455_v48, 4  ;;  %v5463_v22 = vrot.slane %v5462_v5, 4  ;;  %v5469_v62 = vsel %vm587_vm1, %v5453_v58, 0.0 }
 0x38d   : > { %10737 = vst [vmem:[#allocation47_spill] sm:$0xff] %v9905_v10  ;;  %v5476_v27 = vsel %vm587_vm1, %v5454_v46, 0.0  ;;  %v5521_v60 = vrot.slane %v5500_v11, 1  ;;  %v9909_v37 = vadd.f32 %v5394_v21, %v5393_v19  ;;  %v5408_v54 = vrot.slane %v5407_v50, 1 }
 0x38e   : > { %v9911_v59 = vadd.f32 %v5401_v4, %v5400_v23  ;;  %v5457_v63 = vadd.f32 %v5456_v30, %v5455_v48  ;;  %v5464_v16 = vadd.f32 %v5463_v22, %v5462_v5  ;;  %v5470_v52 = vrot.slane %v5469_v62, 4 }
 0x38f   : > { %10738 = vst [vmem:[#allocation48_spill] sm:$0xff] %v9909_v37  ;;  %v5477_v56 = vrot.slane %v5476_v27, 4  ;;  %v5522_v8 = vsel %vm1604_vm8, %v5521_v60, %v9815_v15 }
 0x390   : > { %10739 = vst [vmem:[#allocation49_spill] sm:$0xff] %v9911_v59  ;;  %v5458_v3 = vrot.slane %v5457_v63, 2  ;;  %v5524_v20 = vmul.f32 %v5522_v8, %v10730_v51  ;;  %v5525_v35 = vmul.f32 %v5522_v8, %v10731_v2  ;;  %v5526_v13 = vmul.f32 %v5522_v8, %v10732_v26 }
 0x391   : > { %v5465_v45 = vrot.slane %v5464_v16, 2  ;;  %v5471_v17 = vadd.f32 %v5470_v52, %v5469_v62  ;;  %v5478_v55 = vadd.f32 %v5477_v56, %v5476_v27  ;;  %v5527_v19 = vmul.f32 %v5522_v8, %v10733_v28 }
 0x392   : > { %v5459_v23 = vadd.f32 %v5458_v3, %v5457_v63  ;;  %v5528_v58 = vsel %vm587_vm1, %v5524_v20, 0.0  ;;  %v5535_v11 = vsel %vm587_vm1, %v5525_v35, 0.0  ;;  %v5542_v46 = vsel %vm587_vm1, %v5526_v13, 0.0  ;;  %v5573_v63 = vld [vmem:[#allocation4 + $0xfe] sm:$0x1] }
 0x393   : > { %v5466_v15 = vadd.f32 %v5465_v45, %v5464_v16  ;;  %v5472_v48 = vrot.slane %v5471_v17, 2  ;;  %v5479_v5 = vrot.slane %v5478_v55, 2  ;;  %v5529_v21 = vrot.slane %v5528_v58, 4  ;;  %v5646_v13 = vld [vmem:[#allocation4 + $0xff] sm:$0x1] }
 0x394   : > { %v5460_v4 = vrot.slane %v5459_v23, 1  ;;  %v5536_v30 = vrot.slane %v5535_v11, 4  ;;  %v5543_v22 = vrot.slane %v5542_v46, 4  ;;  %v5549_v60 = vsel %vm587_vm1, %v5527_v19, 0.0 }
 0x395   : > { %v5467_v62 = vrot.slane %v5466_v15, 1  ;;  %v5473_v27 = vadd.f32 %v5472_v48, %v5471_v17  ;;  %v5480_v52 = vadd.f32 %v5479_v5, %v5478_v55  ;;  %v5530_v56 = vadd.f32 %v5529_v21, %v5528_v58 }
 0x396   : > { %v9923_v8 = vadd.f32 %v5408_v54, %v5407_v50  ;;  %v5537_v3 = vadd.f32 %v5536_v30, %v5535_v11  ;;  %v5544_v20 = vadd.f32 %v5543_v22, %v5542_v46  ;;  %v5550_v35 = vrot.slane %v5549_v60, 4 }
 0x397   : > { %v9925_v16 = vadd.f32 %v5460_v4, %v5459_v23  ;;  %v5474_v45 = vrot.slane %v5473_v27, 1  ;;  %v5481_v59 = vrot.slane %v5480_v52, 1  ;;  %v5531_v37 = vrot.slane %v5530_v56, 2 }
 0x398   : > { %v5538_v10 = vrot.slane %v5537_v3, 2  ;;  %v5545_v25 = vrot.slane %v5544_v20, 2  ;;  %v5551_v42 = vadd.f32 %v5550_v35, %v5549_v60  ;;  %v5594_v19 = vrot.slane %v5573_v63, 1 }
 0x399   : > { %v9927_v61 = vadd.f32 %v5467_v62, %v5466_v15  ;;  %v9929_v17 = vadd.f32 %v5474_v45, %v5473_v27  ;;  %v5532_v55 = vadd.f32 %v5531_v37, %v5530_v56  ;;  %v5667_v50 = vrot.slane %v5646_v13, 1 }
 0x39a   : > { %v5539_v54 = vadd.f32 %v5538_v10, %v5537_v3  ;;  %v5546_v58 = vadd.f32 %v5545_v25, %v5544_v20  ;;  %v5552_v11 = vrot.slane %v5551_v42, 2  ;;  %v5595_v23 = vsel %vm1604_vm8, %v5594_v19, %v9818_v57 }
 0x39b   : > { %v5533_v46 = vrot.slane %v5532_v55, 1  ;;  %v5597_v48 = vmul.f32 %v5595_v23, %v10730_v51  ;;  %v5598_v5 = vmul.f32 %v5595_v23, %v10731_v2  ;;  %v5599_v21 = vmul.f32 %v5595_v23, %v10732_v26 }
 0x39c   : > { %v9936_v4 = vadd.f32 %v5481_v59, %v5480_v52  ;;  %v5540_v15 = vrot.slane %v5539_v54, 1  ;;  %v5547_v30 = vrot.slane %v5546_v58, 1  ;;  %v5600_v37 = vmul.f32 %v5595_v23, %v10733_v28 }
 0x39d   : > { %v9939_v22 = vadd.f32 %v5552_v11, %v5551_v42  ;;  %v5601_v25 = vsel %vm587_vm1, %v5597_v48, 0.0  ;;  %v5608_v10 = vsel %vm587_vm1, %v5598_v5, 0.0  ;;  %v5615_v57 = vsel %vm587_vm1, %v5599_v21, 0.0 }
 0x39e   : > { %v9944_v60 = vadd.f32 %v5533_v46, %v5532_v55  ;;  %v9946_v62 = vadd.f32 %v5540_v15, %v5539_v54  ;;  %v9948_v27 = vadd.f32 %v5547_v30, %v5546_v58  ;;  %v5602_v59 = vrot.slane %v5601_v25, 4 }
 0x39f   : > { %v5609_v52 = vrot.slane %v5608_v10, 4  ;;  %v5616_v56 = vrot.slane %v5615_v57, 4  ;;  %v5622_v63 = vsel %vm587_vm1, %v5600_v37, 0.0  ;;  %v5668_v42 = vsel %vm1604_vm8, %v5667_v50, %v9821_v14 }
 0x3a0   : > { %v5603_v3 = vadd.f32 %v5602_v59, %v5601_v25  ;;  %v5623_v20 = vrot.slane %v5622_v63, 4  ;;  %v5670_v35 = vmul.f32 %v5668_v42, %v10730_v51  ;;  %v5671_v13 = vmul.f32 %v5668_v42, %v10731_v2 }
 0x3a1   : > { %v5610_v45 = vadd.f32 %v5609_v52, %v5608_v10  ;;  %v5617_v19 = vadd.f32 %v5616_v56, %v5615_v57  ;;  %v5672_v55 = vmul.f32 %v5668_v42, %v10732_v26  ;;  %v5673_v54 = vmul.f32 %v5668_v42, %v10733_v28 }
 0x3a2   : > { %v5604_v58 = vrot.slane %v5603_v3, 2  ;;  %v9957_v11 = vadd.f32 %v5623_v20, %v5622_v63  ;;  %v5674_v23 = vsel %vm587_vm1, %v5670_v35, 0.0  ;;  %v5681_v46 = vsel %vm587_vm1, %v5671_v13, 0.0 }
 0x3a3   : > { %v5611_v14 = vrot.slane %v5610_v45, 2  ;;  %v5618_v50 = vrot.slane %v5617_v19, 2  ;;  %v5675_v48 = vrot.slane %v5674_v23, 4  ;;  %v5682_v5 = vrot.slane %v5681_v46, 4 }
 0x3a4   : > { %v5554_v51 = vrot.slane %v9939_v22, 1  ;;  %v5605_v2 = vadd.f32 %v5604_v58, %v5603_v3  ;;  %v5688_v21 = vsel %vm587_vm1, %v5672_v55, 0.0  ;;  %v5695_v26 = vsel %vm587_vm1, %v5673_v54, 0.0  ;;  %v10740_v54 = vld [vmem:[#allocation52_spill] sm:$0xff] }
 0x3a5   : > { %v5612_v15 = vadd.f32 %v5611_v14, %v5610_v45  ;;  %v9964_v28 = vadd.f32 %v5618_v50, %v5617_v19  ;;  %v5676_v30 = vadd.f32 %v5675_v48, %v5674_v23  ;;  %v5683_v37 = vadd.f32 %v5682_v5, %v5681_v46  ;;  %v10741_v14 = vld [vmem:[#allocation53_spill] sm:$0xff] }
 0x3a6   : > { %v5606_v25 = vrot.slane %v5605_v2, 1  ;;  %v5689_v10 = vrot.slane %v5688_v21, 4  ;;  %v5696_v57 = vrot.slane %v5695_v26, 4  ;;  %v2087_v59 = vsel %vm1586_vm2, %v9263_v53, %v9259_v29 }
 0x3a7   : > { %v5613_v52 = vrot.slane %v5612_v15, 1  ;;  %v5625_v56 = vrot.slane %v9957_v11, 2  ;;  %v5677_v63 = vrot.slane %v5676_v30, 2  ;;  %v5684_v42 = vrot.slane %v5683_v37, 2 }
 0x3a8   : > { %v9970_v3 = vadd.f32 %v5606_v25, %v5605_v2  ;;  %v5620_v20 = vrot.slane %v9964_v28, 1  ;;  %v9973_v35 = vadd.f32 %v5689_v10, %v5688_v21  ;;  %v2088_v13 = vsel %vm1589_vm3, %v9265_v44, %v2087_v59  ;;  %v10744_v2 = vld [vmem:[#allocation57_spill] sm:$0xff]  ;;  %v10745_v21 = vld [vmem:[#allocation58_spill] sm:$0xff] }
 0x3a9   : > { %v9977_v45 = vadd.f32 %v5613_v52, %v5612_v15  ;;  %v9979_v19 = vadd.f32 %v5677_v63, %v5676_v30  ;;  %v9981_v55 = vadd.f32 %v5696_v57, %v5695_v26  ;;  %v2089_v29 = vsel %vm1592_vm4, %v9267_v6, %v2088_v13  ;;  %v10747_v30 = vld [vmem:[#allocation60_spill] sm:$0xff]  ;;  %v10752_v63 = vld [vmem:[#allocation66_spill] sm:$0xff] }
 0x3aa   : > { %v9985_v53 = vadd.f32 %v5684_v42, %v5683_v37  ;;  %v2161_v58 = vsel %vm1589_vm3, %v10740_v54, %v9283_v34  ;;  %v2233_v44 = vsel %vm1586_vm2, %v9299_v32, %v9297_v9  ;;  %v5691_v46 = vrot.slane %v9973_v35, 2  ;;  %2092 = vst.msk [vmem:[#allocation5] sm:$0xf] %vm2091_vm9, %v2089_v29  ;;  %v10742_v32 = vld [vmem:[#allocation54_spill] sm:$0xff]  ;;  %v10748_v37 = vld [vmem:[#allocation59_spill] sm:$0xff]  ;;  %v10751_v57 = vld [vmem:[#allocation56_spill] sm:$0xff] }
 0x3ab   : > { %v5679_v23 = vrot.slane %v9979_v19, 1  ;;  %v2162_v6 = vsel %vm1592_vm4, %v10741_v14, %v2161_v58  ;;  %v2234_v50 = vsel %vm1589_vm3, %v9301_v1, %v2233_v44  ;;  %v2306_v9 = vsel %vm1586_vm2, %v9321_v24, %v9318_v7  ;;  %v10746_v1 = vld [vmem:[#allocation55_spill] sm:$0xff]  ;;  %v10750_v24 = vld [vmem:[#allocation62_spill] sm:$0xff]  ;;  %v10753_v42 = vld [vmem:[#allocation68_spill] sm:$0xff] }
 0x3ac   : > { %2165 = vst.msk [vmem:[#allocation5 + $0x4] sm:$0xf] %vm2091_vm9, %v2162_v6  ;;  %v2235_v34 = vsel %vm1592_vm4, %v9306_v0, %v2234_v50  ;;  %v10743_v48 = vrot.slane %v10742_v32, 1  ;;  %v2379_v26 = vsel %vm1586_vm2, %v10745_v21, %v10744_v2  ;;  %v2307_v15 = vsel %vm1589_vm3, %v10746_v1, %v2306_v9  ;;  %v10754_v29 = vld [vmem:[#allocation64_spill] sm:$0xff]  ;;  %v10756_v6 = vld [vmem:[#allocation65_spill] sm:$0xff]  ;;  %v10761_v21 = vld [vmem:[#allocation70_spill] sm:$0xff] }
 0x3ad   : > { %2238 = vst.msk [vmem:[#allocation5 + $0x8] sm:$0xf] %vm2091_vm9, %v2235_v34  ;;  %v2380_v0 = vsel %vm1589_vm3, %v10747_v30, %v2379_v26  ;;  %v10749_v25 = vrot.slane %v10748_v37, 1  ;;  %v2446_v10 = vrot.slane %v10750_v24, 1  ;;  %v2308_v59 = vsel %vm1592_vm4, %v10751_v57, %v2307_v15  ;;  %v10758_v9 = vld [vmem:[#allocation69_spill] sm:$0xff]  ;;  %v10762_v1 = vld [vmem:[#allocation71_spill] sm:$0xff] }
 0x3ae   : > { %v2374_v5 = vadd.f32 %v10743_v48, %v10742_v32  ;;  %v2452_v13 = vsel %vm1586_vm2, %v10753_v42, %v10752_v63  ;;  %v10755_v54 = vrot.slane %v10754_v29, 1  ;;  %2311 = vst.msk [vmem:[#allocation5 + $0xc] sm:$0xf] %vm2091_vm9, %v2308_v59  ;;  %v10757_v50 = vrot.slane %v10756_v6, 1  ;;  %v10759_v48 = vld [vmem:[#allocation61_spill] sm:$0xff]  ;;  %v10763_v30 = vld [vmem:[#allocation67_spill] sm:$0xff] }
 0x3af   : > { %v2440_v7 = vadd.f32 %v10749_v25, %v10748_v37  ;;  %v2447_v44 = vadd.f32 %v2446_v10, %v10750_v24  ;;  %v2512_v32 = vrot.slane %v10758_v9, 1  ;;  %v2571_v26 = vrot.slane %v10761_v21, 1  ;;  %v10765_v10 = vld [vmem:[#allocation63_spill] sm:$0xff] }
 0x3b0   : > { %v2381_v52 = vsel %vm1592_vm4, %v2374_v5, %v2380_v0  ;;  %v2499_v58 = vadd.f32 %v10755_v54, %v10754_v29  ;;  %v2506_v34 = vadd.f32 %v10757_v50, %v10756_v6  ;;  %v10760_v5 = vrot.slane %v10759_v48, 2  ;;  %v10767_v6 = vld [vmem:[#allocation28_spill] sm:$0xff]  ;;  %v10768_v50 = vld [vmem:[#allocation73_spill] sm:$0xff] }
 0x3b1   : > { %v2453_v14 = vsel %vm1589_vm3, %v2440_v7, %v2452_v13  ;;  %2384 = vst.msk [vmem:[#allocation5 + $0x10] sm:$0xf] %vm2091_vm9, %v2381_v52  ;;  %v2578_v15 = vrot.slane %v10762_v1, 1  ;;  %v10764_v0 = vrot.slane %v10763_v30, 2  ;;  %v2513_v7 = vadd.f32 %v2512_v32, %v10758_v9 }
 0x3b2   : > { %v2518_v2 = vadd.f32 %v10760_v5, %v10759_v48  ;;  %v2454_v25 = vsel %vm1592_vm4, %v2447_v44, %v2453_v14  ;;  %v2525_v24 = vsel %vm1586_vm2, %v2506_v34, %v2499_v58  ;;  %v10766_v57 = vrot.slane %v10765_v10, 4  ;;  %v6289_v44 = vld [vmem:[#allocation5 + $0x3] sm:$0x1]  ;;  %v10769_v34 = vld [vmem:[#allocation72_spill] sm:$0xff] }
 0x3b3   : > { %v2584_v37 = vadd.f32 %v10764_v0, %v10763_v30  ;;  %2457 = vst.msk [vmem:[#allocation5 + $0x14] sm:$0xf] %vm2091_vm9, %v2454_v25  ;;  %v2572_v63 = vadd.f32 %v2571_v26, %v10761_v21  ;;  %v2579_v42 = vadd.f32 %v2578_v15, %v10762_v1  ;;  %v2526_v29 = vsel %vm1589_vm3, %v2513_v7, %v2525_v24  ;;  %v6290_v14 = vld [vmem:[#allocation5 + $0x7] sm:$0x1]  ;;  %v6100_v1 = vld [vmem:[#allocation5 + $0x6] sm:$0x1] }
 0x3b4   : > { %v2589_v59 = vadd.f32 %v10766_v57, %v10765_v10  ;;  %v2519_v52 = vrot.slane %v2518_v2, 1  ;;  %v3124_v58 = vsel %vm1589_vm3, %v10767_v6, %v9474_v33  ;;  %v10062_v9 = vsel %vm1592_vm4, %v10769_v34, %v10768_v50  ;;  %v6291_v21 = vld [vmem:[#allocation5 + $0xb] sm:$0x1]  ;;  %v6099_v0 = vld [vmem:[#allocation5 + $0x2] sm:$0x1] }
 0x3b5   : > { %v2585_v13 = vrot.slane %v2584_v37, 1  ;;  %v2598_v5 = vsel %vm1586_vm2, %v2579_v42, %v2572_v63  ;;  %v6353_v26 = vrot.slane %v6290_v14, 7  ;;  %v6355_v30 = vrot.slane %v6291_v21, 6  ;;  %v6101_v25 = vld [vmem:[#allocation5 + $0xa] sm:$0x1]  ;;  %v10770_v24 = vld [vmem:[#allocation29_spill] sm:$0xff] }
 0x3b6   : > { %v2590_v54 = vrot.slane %v2589_v59, 2  ;;  %v2520_v32 = vadd.f32 %v2519_v52, %v2518_v2  ;;  %v6163_v7 = vrot.slane %v6100_v1, 7  ;;  %v3125_v33 = vsel %vm1592_vm4, %v10770_v24, %v3124_v58  ;;  %v6292_v6 = vld [vmem:[#allocation5 + $0xf] sm:$0x1]  ;;  %v5717_v34 = vld [vmem:[#allocation5] sm:$0x1] }
 0x3b7   : > { %v2586_v48 = vadd.f32 %v2585_v13, %v2584_v37  ;;  %v6354_v2 = vsel %vm1586_vm2, %v6353_v26, %v6289_v44  ;;  %v6102_v37 = vld [vmem:[#allocation5 + $0xe] sm:$0x1]  ;;  %v6165_v52 = vrot.slane %v6101_v25, 6  ;;  %v6357_v13 = vrot.slane %v6292_v6, 5  ;;  %v10772_v44 = vld [vmem:[#allocation27_spill] sm:$0xff] }
 0x3b8   : > { %v2591_v15 = vadd.f32 %v2590_v54, %v2589_v59  ;;  %v2527_v10 = vsel %vm1592_vm4, %v2520_v32, %v2526_v29  ;;  %v6293_v59 = vld [vmem:[#allocation5 + $0x13] sm:$0x1]  ;;  %v6356_v42 = vsel %vm1589_vm3, %v6355_v30, %v6354_v2  ;;  %v6164_v54 = vsel %vm1586_vm2, %v6163_v7, %v6099_v0  ;;  %v6103_v58 = vld [vmem:[#allocation5 + $0x12] sm:$0x1]  ;;  %v5718_v32 = vld [vmem:[#allocation5 + $0x4] sm:$0x1] }
 0x3b9   : > { %v2599_v57 = vsel %vm1589_vm3, %v2586_v48, %v2598_v5  ;;  %2530 = vst.msk [vmem:[#allocation5 + $0x18] sm:$0xf] %vm2091_vm9, %v2527_v10  ;;  %v6359_v14 = vrot.slane %v6293_v59, 4  ;;  %v6166_v29 = vsel %vm1589_vm3, %v6165_v52, %v6164_v54  ;;  %v6167_v50 = vrot.slane %v6102_v37, 5  ;;  %v10771_v48 = vld [vmem:[#allocation75_spill] sm:$0xff] }
 0x3ba   : > { %v2592_v63 = vrot.slane %v2591_v15, 1  ;;  %v3270_v5 = vsel %vm1589_vm3, %v10772_v44, %v10771_v48  ;;  %v6294_v26 = vld [vmem:[#allocation5 + $0x17] sm:$0x1]  ;;  %v6358_v1 = vsel %vm1592_vm4, %v6357_v13, %v6356_v42  ;;  %v6104_v25 = vld [vmem:[#allocation5 + $0x16] sm:$0x1]  ;;  %v6169_v30 = vrot.slane %v6103_v58, 4 }
 0x3bb   : > { %v5784_v24 = vrot.slane %v5718_v32, 7  ;;  %v6360_v0 = vsel %vm1595_vm5, %v6359_v14, %v6358_v1  ;;  %v6361_v7 = vrot.slane %v6294_v26, 3  ;;  %v6168_v10 = vsel %vm1592_vm4, %v6167_v50, %v6166_v29  ;;  %v5719_v2 = vld [vmem:[#allocation5 + $0x8] sm:$0x1]  ;;  %v5720_v37 = vld [vmem:[#allocation5 + $0xc] sm:$0x1] }
 0x3bc   : > { %v2593_v21 = vadd.f32 %v2592_v63, %v2591_v15  ;;  %v6171_v6 = vrot.slane %v6104_v25, 3  ;;  %v6170_v59 = vsel %vm1595_vm5, %v6169_v30, %v6168_v10  ;;  %v5721_v54 = vld [vmem:[#allocation5 + $0x10] sm:$0x1]  ;;  %v5722_v15 = vld [vmem:[#allocation5 + $0x14] sm:$0x1]  ;;  %v5786_v42 = vrot.slane %v5719_v2, 6 }
 0x3bd   : > { %v5785_v63 = vsel %vm1586_vm2, %v5784_v24, %v5717_v34  ;;  %v6362_v13 = vsel %vm1598_vm6, %v6361_v7, %v6360_v0  ;;  %v5788_v58 = vrot.slane %v5720_v37, 5  ;;  %v5790_v29 = vrot.slane %v5721_v54, 4  ;;  %3128 = vst.msk [vmem:[#allocation5 + $0x20] sm:$0xf] %vm2091_vm9, %v3125_v33  ;;  %v10774_v44 = vld [vmem:[#allocation76_spill] sm:$0xff]  ;;  %v10776_v24 = vld [vmem:[#allocation78_spill] sm:$0xff] }
 0x3be   : > { %v2600_v52 = vsel %vm1592_vm4, %v2593_v21, %v2599_v57  ;;  %v6172_v14 = vsel %vm1598_vm6, %v6171_v6, %v6170_v59  ;;  %v5787_v50 = vsel %vm1589_vm3, %v5786_v42, %v5785_v63  ;;  %v5792_v32 = vrot.slane %v5722_v15, 3  ;;  %v10773_v57 = vld [vmem:[#allocation74_spill] sm:$0xff]  ;;  %v10775_v21 = vld [vmem:[#allocation77_spill] sm:$0xff]  ;;  %v10777_v7 = vld [vmem:[#allocation80_spill] sm:$0xff]  ;;  %3201 = vst.msk [vmem:[#allocation5 + $0x24] sm:$0xf] %vm2091_vm9, %v10062_v9 }
 0x3bf   : > { %2603 = vst.msk [vmem:[#allocation5 + $0x1c] sm:$0xf] %vm2091_vm9, %v2600_v52  ;;  %v3271_v48 = vsel %vm1592_vm4, %v10773_v57, %v3270_v5  ;;  %v3342_v34 = vsel %vm1586_vm2, %v10775_v21, %v10774_v44  ;;  %v5789_v30 = vsel %vm1592_vm4, %v5788_v58, %v5787_v50  ;;  %v10778_v10 = vld [vmem:[#allocation82_spill] sm:$0xff]  ;;  %v10779_v33 = vld [vmem:[#allocation81_spill] sm:$0xff]  ;;  %v10781_v63 = vld [vmem:[#allocation79_spill] sm:$0xff] }
 0x3c0   : > { %v6295_v26 = vld [vmem:[#allocation5 + $0x1b] sm:$0x1]  ;;  %v6105_v1 = vld [vmem:[#allocation5 + $0x1a] sm:$0x1]  ;;  %v5723_v25 = vld [vmem:[#allocation5 + $0x18] sm:$0x1]  ;;  %v3343_v0 = vsel %vm1589_vm3, %v10776_v24, %v3342_v34  ;;  %v3415_v6 = vsel %vm1586_vm2, %v10778_v10, %v10777_v7  ;;  %v5791_v59 = vsel %vm1595_vm5, %v5790_v29, %v5789_v30 }
 0x3c1   : > { %v10780_v2 = vrot.slane %v10779_v33, 1  ;;  %v6363_v37 = vrot.slane %v6295_v26, 2  ;;  %v6173_v52 = vrot.slane %v6105_v1, 2  ;;  %v5794_v54 = vrot.slane %v5723_v25, 2  ;;  %3274 = vst.msk [vmem:[#allocation5 + $0x28] sm:$0xf] %vm2091_vm9, %v3271_v48 }
 0x3c2   : > { %v5793_v15 = vsel %vm1598_vm6, %v5792_v32, %v5791_v59  ;;  %v3344_v42 = vsel %vm1592_vm4, %v10781_v63, %v3343_v0  ;;  %v10782_v58 = vld [vmem:[#allocation83_spill] sm:$0xff]  ;;  %v10783_v57 = vld [vmem:[#allocation88_spill] sm:$0xff]  ;;  %v10784_v44 = vld [vmem:[#allocation89_spill] sm:$0xff] }
 0x3c3   : > { %v3483_v5 = vadd.f32 %v10780_v2, %v10779_v33  ;;  %v3416_v50 = vsel %vm1589_vm3, %v10782_v58, %v3415_v6  ;;  %v3488_v21 = vsel %vm1586_vm2, %v10784_v44, %v10783_v57  ;;  %v6364_v29 = vsel %vm1601_vm7, %v6363_v37, %v6362_v13  ;;  %3347 = vst.msk [vmem:[#allocation5 + $0x2c] sm:$0xf] %vm2091_vm9, %v3344_v42  ;;  %v10785_v32 = vld [vmem:[#allocation86_spill] sm:$0xff]  ;;  %v10786_v26 = vld [vmem:[#allocation37_spill] sm:$0xff]  ;;  %v10789_v0 = vld [vmem:[#allocation84_spill] sm:$0xff] }
 0x3c4   : > { %v6174_v34 = vsel %vm1601_vm7, %v6173_v52, %v6172_v14  ;;  %v5795_v9 = vsel %vm1601_vm7, %v5794_v54, %v5793_v15  ;;  %v3417_v48 = vsel %vm1592_vm4, %v10785_v32, %v3416_v50  ;;  %v3489_v1 = vsel %vm1589_vm3, %v10786_v26, %v3488_v21  ;;  %v10787_v25 = vld [vmem:[#allocation85_spill] sm:$0xff]  ;;  %v10792_v10 = vld [vmem:[#allocation94_spill] sm:$0xff]  ;;  %v10795_v63 = vld [vmem:[#allocation91_spill] sm:$0xff] }
 0x3c5   : > { %3420 = vst.msk [vmem:[#allocation5 + $0x30] sm:$0xf] %vm2091_vm9, %v3417_v48  ;;  %v10788_v30 = vrot.slane %v10787_v25, 1  ;;  %v10790_v13 = vrot.slane %v10789_v0, 2  ;;  %v10791_v7 = vld [vmem:[#allocation93_spill] sm:$0xff]  ;;  %v3490_v52 = vsel %vm1592_vm4, %v3483_v5, %v3489_v1  ;;  %v10793_v59 = vld [vmem:[#allocation90_spill] sm:$0xff] }
 0x3c6   : > { %v3561_v6 = vsel %vm1586_vm2, %v10792_v10, %v10791_v7  ;;  %v6296_v33 = vld [vmem:[#allocation5 + $0x1f] sm:$0x1]  ;;  %v6106_v2 = vld [vmem:[#allocation5 + $0x1e] sm:$0x1]  ;;  %v5724_v37 = vld [vmem:[#allocation5 + $0x1c] sm:$0x1] }
 0x3c7   : > { %v3549_v24 = vadd.f32 %v10788_v30, %v10787_v25  ;;  %v3554_v14 = vadd.f32 %v10790_v13, %v10789_v0  ;;  %v10794_v54 = vrot.slane %v10793_v59, 1  ;;  %v10796_v42 = vrot.slane %v10795_v63, 1  ;;  %v10797_v50 = vld [vmem:[#allocation87_spill] sm:$0xff]  ;;  %3493 = vst.msk [vmem:[#allocation5 + $0x34] sm:$0xf] %vm2091_vm9, %v3490_v52  ;;  %v10799_v25 = vld [vmem:[#allocation92_spill] sm:$0xff] }
 0x3c8   : > { %v10798_v57 = vrot.slane %v10797_v50, 2  ;;  %v6365_v21 = vrot.slane %v6296_v33, 1  ;;  %v6175_v32 = vrot.slane %v6106_v2, 1  ;;  %v5796_v48 = vrot.slane %v5724_v37, 1  ;;  %v6297_v33 = vld [vmem:[#allocation5 + $0x23] sm:$0x1] }
 0x3c9   : > { %v3608_v15 = vadd.f32 %v10794_v54, %v10793_v59  ;;  %v3615_v58 = vadd.f32 %v10796_v42, %v10795_v63  ;;  %v3555_v26 = vrot.slane %v3554_v14, 1  ;;  %v3562_v5 = vsel %vm1589_vm3, %v3549_v24, %v3561_v6  ;;  %v6298_v2 = vld [vmem:[#allocation5 + $0x27] sm:$0x1]  ;;  %v6108_v37 = vld [vmem:[#allocation5 + $0x26] sm:$0x1] }
 0x3ca   : > { %v3620_v44 = vadd.f32 %v10798_v57, %v10797_v50  ;;  %v3626_v30 = vrot.slane %v10799_v25, 2  ;;  %v6366_v13 = vsel %vm1604_vm8, %v6365_v21, %v6364_v29  ;;  %v6176_v7 = vsel %vm1604_vm8, %v6175_v32, %v6174_v34  ;;  %v6299_v6 = vld [vmem:[#allocation5 + $0x2b] sm:$0x1]  ;;  %v6107_v63 = vld [vmem:[#allocation5 + $0x22] sm:$0x1] }
 0x3cb   : > { %v3634_v0 = vsel %vm1586_vm2, %v3615_v58, %v3608_v15  ;;  %v5797_v10 = vsel %vm1604_vm8, %v5796_v48, %v5795_v9  ;;  %v3556_v59 = vadd.f32 %v3555_v26, %v3554_v14  ;;  %6413 = vxpose.xlu1.b32.start [1/4] (short) (narrow) %v6366_v13, 16  ;;  %6223 = vxpose.xlu0.b32.start [1/4] (short) (narrow) %v6176_v7, 16  ;;  %v6367_v54 = vrot.slane %v6298_v2, 7  ;;  %v6300_v15 = vld [vmem:[#allocation5 + $0x2f] sm:$0x1] }
 0x3cc   : > { %v3621_v1 = vrot.slane %v3620_v44, 1  ;;  %v3627_v24 = vadd.f32 %v3626_v30, %v10799_v25  ;;  %v6177_v42 = vrot.slane %v6108_v37, 7  ;;  %5844 = vxpose.xlu2.b32.start [1/4] (short) (narrow) %v5797_v10, 16  ;;  %v6369_v34 = vrot.slane %v6299_v6, 6  ;;  %v6109_v58 = vld [vmem:[#allocation5 + $0x2a] sm:$0x1] }
 0x3cd   : > { %v3563_v29 = vsel %vm1592_vm4, %v3556_v59, %v3562_v5  ;;  %v4160_v9 = vsel %vm1589_vm3, %v9659_v40, %v9666_v31  ;;  %v4234_v14 = vsel %vm1592_vm4, %v9680_v47, %v9684_v41  ;;  %v6368_v21 = vsel %vm1586_vm2, %v6367_v54, %v6297_v33  ;;  %v6110_v5 = vld [vmem:[#allocation5 + $0x2e] sm:$0x1]  ;;  %v5726_v2 = vld [vmem:[#allocation5 + $0x24] sm:$0x1]  ;;  %v5727_v37 = vld [vmem:[#allocation5 + $0x28] sm:$0x1] }
 0x3ce   : > { %v3622_v52 = vadd.f32 %v3621_v1, %v3620_v44  ;;  %3566 = vst.msk [vmem:[#allocation5 + $0x38] sm:$0xf] %vm2091_vm9, %v3563_v29  ;;  %v3628_v50 = vrot.slane %v3627_v24, 1  ;;  %v6301_v44 = vld [vmem:[#allocation5 + $0x33] sm:$0x1]  ;;  %v6371_v32 = vrot.slane %v6300_v15, 5  ;;  %v6370_v48 = vsel %vm1589_vm3, %v6369_v34, %v6368_v21 }
 0x3cf   : > { %v6373_v26 = vrot.slane %v6301_v44, 4  ;;  %v6111_v1 = vld [vmem:[#allocation5 + $0x32] sm:$0x1]  ;;  %v6178_v40 = vsel %vm1586_vm2, %v6177_v42, %v6107_v63  ;;  %v6179_v31 = vrot.slane %v6109_v58, 6  ;;  %v6302_v30 = vld [vmem:[#allocation5 + $0x37] sm:$0x1]  ;;  %v4161_v42 = vsel %vm1592_vm4, %v9663_v43, %v4160_v9 }
 0x3d0   : > { %v3635_v57 = vsel %vm1589_vm3, %v3622_v52, %v3634_v0  ;;  %v3629_v25 = vadd.f32 %v3628_v50, %v3627_v24  ;;  %v6372_v47 = vsel %vm1592_vm4, %v6371_v32, %v6370_v48  ;;  %v6112_v41 = vld [vmem:[#allocation5 + $0x36] sm:$0x1]  ;;  %v6181_v13 = vrot.slane %v6110_v5, 5  ;;  %v5728_v54 = vld [vmem:[#allocation5 + $0x2c] sm:$0x1] }
 0x3d1   : > { %v6183_v7 = vrot.slane %v6111_v1, 4  ;;  %v6374_v0 = vsel %vm1595_vm5, %v6373_v26, %v6372_v47  ;;  %v6375_v10 = vrot.slane %v6302_v30, 3  ;;  %v6180_v59 = vsel %vm1589_vm3, %v6179_v31, %v6178_v40  ;;  %v5729_v24 = vld [vmem:[#allocation5 + $0x30] sm:$0x1]  ;;  %v5730_v63 = vld [vmem:[#allocation5 + $0x34] sm:$0x1] }
 0x3d2   : > { %v6185_v33 = vrot.slane %v6112_v41, 3  ;;  %v3636_v52 = vsel %vm1592_vm4, %v3629_v25, %v3635_v57  ;;  %v6182_v6 = vsel %vm1592_vm4, %v6181_v13, %v6180_v59  ;;  %v10800_v29 = vld [vmem:[#allocation38_spill] sm:$0xff]  ;;  %v5725_v50 = vld [vmem:[#allocation5 + $0x20] sm:$0x1]  ;;  %v5798_v57 = vrot.slane %v5726_v2, 7  ;;  %v10801_v1 = vld [vmem:[#allocation39_spill] sm:$0xff] }
 0x3d3   : > { %v4306_v15 = vsel %vm1589_vm3, %v10800_v29, %v9694_v18  ;;  %3639 = vst.msk [vmem:[#allocation5 + $0x3c] sm:$0xf] %vm2091_vm9, %v3636_v52  ;;  %v6376_v34 = vsel %vm1598_vm6, %v6375_v10, %v6374_v0  ;;  %v6184_v58 = vsel %vm1595_vm5, %v6183_v7, %v6182_v6  ;;  %v5800_v44 = vrot.slane %v5727_v37, 6  ;;  %v10802_v31 = vld [vmem:[#allocation40_spill] sm:$0xff]  ;;  %v10803_v25 = vld [vmem:[#allocation30_spill] sm:$0xff]  ;;  %v10804_v47 = vld [vmem:[#allocation25_spill] sm:$0xff] }
 0x3d4   : > { %v6186_v21 = vsel %vm1598_vm6, %v6185_v33, %v6184_v58  ;;  %v5802_v32 = vrot.slane %v5728_v54, 5  ;;  %v5804_v48 = vrot.slane %v5729_v24, 4  ;;  %v5806_v26 = vrot.slane %v5730_v63, 3  ;;  %4164 = vst.msk [vmem:[#allocation5 + $0x40] sm:$0xf] %vm2091_vm9, %v4161_v42  ;;  %v10805_v41 = vld [vmem:[#allocation95_spill] sm:$0xff] }
 0x3d5   : > { %v6303_v43 = vld [vmem:[#allocation5 + $0x3b] sm:$0x1]  ;;  %v6113_v9 = vld [vmem:[#allocation5 + $0x3a] sm:$0x1]  ;;  %v5731_v5 = vld [vmem:[#allocation5 + $0x38] sm:$0x1]  ;;  %v5799_v18 = vsel %vm1586_vm2, %v5798_v57, %v5725_v50  ;;  %v4307_v40 = vsel %vm1592_vm4, %v10801_v1, %v4306_v15  ;;  %v4378_v30 = vsel %vm1586_vm2, %v10803_v25, %v10802_v31  ;;  %v4451_v13 = vsel %vm1586_vm2, %v10805_v41, %v10804_v47 }
 0x3d6   : > { %v6377_v7 = vrot.slane %v6303_v43, 2  ;;  %v6187_v0 = vrot.slane %v6113_v9, 2  ;;  %v5801_v10 = vsel %vm1589_vm3, %v5800_v44, %v5799_v18  ;;  %v5808_v59 = vrot.slane %v5731_v5, 2  ;;  %4237 = vst.msk [vmem:[#allocation5 + $0x44] sm:$0xf] %vm2091_vm9, %v4234_v14  ;;  %v10806_v2 = vld [vmem:[#allocation41_spill] sm:$0xff] }
 0x3d7   : > { %v5803_v33 = vsel %vm1592_vm4, %v5802_v32, %v5801_v10  ;;  %4310 = vst.msk [vmem:[#allocation5 + $0x48] sm:$0xf] %vm2091_vm9, %v4307_v40  ;;  %v4379_v37 = vsel %vm1589_vm3, %v10806_v2, %v4378_v30  ;;  %v10807_v52 = vld [vmem:[#allocation97_spill] sm:$0xff]  ;;  %v10808_v54 = vld [vmem:[#allocation31_spill] sm:$0xff]  ;;  %v10810_v15 = vld [vmem:[#allocation42_spill] sm:$0xff] }
 0x3d8   : > { %v4452_v6 = vsel %vm1589_vm3, %v10807_v52, %v4451_v13  ;;  %v10809_v24 = vrot.slane %v10808_v54, 1  ;;  %v6378_v42 = vsel %vm1601_vm7, %v6377_v7, %v6376_v34  ;;  %v6188_v29 = vsel %vm1601_vm7, %v6187_v0, %v6186_v21  ;;  %v10811_v57 = vld [vmem:[#allocation98_spill] sm:$0xff]  ;;  %v10812_v32 = vld [vmem:[#allocation99_spill] sm:$0xff]  ;;  %v10813_v43 = vld [vmem:[#allocation101_spill] sm:$0xff] }
 0x3d9   : > { %v5805_v14 = vsel %vm1595_vm5, %v5804_v48, %v5803_v33  ;;  %v4380_v58 = vsel %vm1592_vm4, %v10810_v15, %v4379_v37  ;;  %v4453_v44 = vsel %vm1592_vm4, %v10811_v57, %v4452_v6  ;;  %v4524_v9 = vsel %vm1586_vm2, %v10813_v43, %v10812_v32  ;;  %v10814_v5 = vld [vmem:[#allocation32_spill] sm:$0xff]  ;;  %v10816_v31 = vld [vmem:[#allocation102_spill] sm:$0xff]  ;;  %v10817_v25 = vld [vmem:[#allocation43_spill] sm:$0xff] }
 0x3da   : > { %v4519_v63 = vadd.f32 %v10809_v24, %v10808_v54  ;;  %v5807_v50 = vsel %vm1598_vm6, %v5806_v26, %v5805_v14  ;;  %4383 = vst.msk [vmem:[#allocation5 + $0x4c] sm:$0xf] %vm2091_vm9, %v4380_v58  ;;  %v10815_v34 = vrot.slane %v10814_v5, 1  ;;  %v6304_v18 = vld [vmem:[#allocation5 + $0x3f] sm:$0x1]  ;;  %v4525_v26 = vsel %vm1589_vm3, %v10816_v31, %v4524_v9  ;;  %v10819_v41 = vld [vmem:[#allocation103_spill] sm:$0xff] }
 0x3db   : > { %v6114_v48 = vld [vmem:[#allocation5 + $0x3e] sm:$0x1]  ;;  %v5732_v1 = vld [vmem:[#allocation5 + $0x3c] sm:$0x1]  ;;  %v5809_v40 = vsel %vm1601_vm7, %v5808_v59, %v5807_v50  ;;  %v10818_v30 = vrot.slane %v10817_v25, 2  ;;  %v10820_v13 = vld [vmem:[#allocation105_spill] sm:$0xff] }
 0x3dc   : > { %v4585_v21 = vadd.f32 %v10815_v34, %v10814_v5  ;;  %v4597_v7 = vsel %vm1586_vm2, %v10820_v13, %v10819_v41  ;;  %v6379_v0 = vrot.slane %v6304_v18, 1  ;;  %v6189_v10 = vrot.slane %v6114_v48, 1  ;;  %4456 = vst.msk [vmem:[#allocation5 + $0x50] sm:$0xf] %vm2091_vm9, %v4453_v44  ;;  %v10821_v52 = vld [vmem:[#allocation96_spill] sm:$0xff] }
 0x3dd   : > { %v4590_v47 = vadd.f32 %v10818_v30, %v10817_v25  ;;  %v5810_v33 = vrot.slane %v5732_v1, 1  ;;  %v4526_v2 = vsel %vm1592_vm4, %v4519_v63, %v4525_v26  ;;  %v10822_v6 = vrot.slane %v10821_v52, 1  ;;  %v10823_v24 = vld [vmem:[#allocation100_spill] sm:$0xff]  ;;  %v10825_v63 = vld [vmem:[#allocation33_spill] sm:$0xff] }
 0x3de   : > { %4529 = vst.msk [vmem:[#allocation5 + $0x54] sm:$0xf] %vm2091_vm9, %v4526_v2  ;;  %v4598_v37 = vsel %vm1589_vm3, %v4585_v21, %v4597_v7  ;;  %v10824_v14 = vrot.slane %v10823_v24, 1  ;;  %v6380_v58 = vsel %vm1604_vm8, %v6379_v0, %v6378_v42  ;;  %v6190_v50 = vsel %vm1604_vm8, %v6189_v10, %v6188_v29  ;;  %v6305_v43 = vld [vmem:[#allocation5 + $0x43] sm:$0x1]  ;;  %v10827_v21 = vld [vmem:[#allocation104_spill] sm:$0xff] }
 0x3df   : > { %v4591_v59 = vrot.slane %v4590_v47, 1  ;;  %v4644_v54 = vadd.f32 %v10822_v6, %v10821_v52  ;;  %v5811_v57 = vsel %vm1604_vm8, %v5810_v33, %v5809_v40  ;;  %v10826_v44 = vrot.slane %v10825_v63, 2  ;;  %v6306_v9 = vld [vmem:[#allocation5 + $0x47] sm:$0x1]  ;;  %v6116_v5 = vld [vmem:[#allocation5 + $0x46] sm:$0x1] }
 0x3e0   : > { %v4651_v15 = vadd.f32 %v10824_v14, %v10823_v24  ;;  %6414 = vxpose.xlu1.b32.cont [2/4] (short) (narrow) %v6380_v58, 16  ;;  %6224 = vxpose.xlu0.b32.cont [2/4] (short) (narrow) %v6190_v50, 16  ;;  %v4662_v18 = vrot.slane %v10827_v21, 2  ;;  %v6307_v1 = vld [vmem:[#allocation5 + $0x4b] sm:$0x1]  ;;  %v6381_v42 = vrot.slane %v6306_v9, 7  ;;  %v5196_v30 = vsel %vm1589_vm3, %v9847_v38, %v9867_v39 }
 0x3e1   : > { %v4656_v32 = vadd.f32 %v10826_v44, %v10825_v63  ;;  %v4592_v34 = vadd.f32 %v4591_v59, %v4590_v47  ;;  %v6115_v31 = vld [vmem:[#allocation5 + $0x42] sm:$0x1]  ;;  %5845 = vxpose.xlu2.b32.cont [2/4] (short) (narrow) %v5811_v57, 16  ;;  %v6383_v40 = vrot.slane %v6307_v1, 6  ;;  %v6117_v26 = vld [vmem:[#allocation5 + $0x4a] sm:$0x1]  ;;  %v5197_v24 = vsel %vm1592_vm4, %v9853_v49, %v5196_v30 }
 0x3e2   : > { %v4670_v48 = vsel %vm1586_vm2, %v4651_v15, %v4644_v54  ;;  %v6191_v25 = vrot.slane %v6116_v5, 7  ;;  %v4663_v47 = vadd.f32 %v4662_v18, %v10827_v21  ;;  %v6308_v13 = vld [vmem:[#allocation5 + $0x4f] sm:$0x1]  ;;  %v6382_v7 = vsel %vm1586_vm2, %v6381_v42, %v6305_v43  ;;  %v6118_v0 = vld [vmem:[#allocation5 + $0x4e] sm:$0x1]  ;;  %v10828_v30 = vld [vmem:[#allocation45_spill] sm:$0xff] }
 0x3e3   : > { %v4657_v29 = vrot.slane %v4656_v32, 1  ;;  %v4599_v41 = vsel %vm1592_vm4, %v4592_v34, %v4598_v37  ;;  %v6193_v10 = vrot.slane %v6117_v26, 6  ;;  %v6384_v2 = vsel %vm1589_vm3, %v6383_v40, %v6382_v7  ;;  %v6309_v54 = vld [vmem:[#allocation5 + $0x53] sm:$0x1]  ;;  %v6119_v38 = vld [vmem:[#allocation5 + $0x52] sm:$0x1] }
 0x3e4   : > { %4602 = vst.msk [vmem:[#allocation5 + $0x58] sm:$0xf] %vm2091_vm9, %v4599_v41  ;;  %v6385_v59 = vrot.slane %v6308_v13, 5  ;;  %v6192_v52 = vsel %vm1586_vm2, %v6191_v25, %v6115_v31  ;;  %v4664_v6 = vrot.slane %v4663_v47, 1  ;;  %v6195_v37 = vrot.slane %v6118_v0, 5  ;;  %v10829_v41 = vld [vmem:[#allocation44_spill] sm:$0xff] }
 0x3e5   : > { %v4658_v33 = vadd.f32 %v4657_v29, %v4656_v32  ;;  %v6194_v39 = vsel %vm1589_vm3, %v6193_v10, %v6192_v52  ;;  %v6310_v15 = vld [vmem:[#allocation5 + $0x57] sm:$0x1]  ;;  %v6387_v50 = vrot.slane %v6309_v54, 4  ;;  %v6120_v57 = vld [vmem:[#allocation5 + $0x56] sm:$0x1]  ;;  %v6197_v63 = vrot.slane %v6119_v38, 4 }
 0x3e6   : > { %v6386_v58 = vsel %vm1592_vm4, %v6385_v59, %v6384_v2  ;;  %v5686_v44 = vrot.slane %v9985_v53, 1  ;;  %v4665_v32 = vadd.f32 %v4664_v6, %v4663_v47  ;;  %v6389_v43 = vrot.slane %v6310_v15, 3  ;;  %v5734_v5 = vld [vmem:[#allocation5 + $0x44] sm:$0x1]  ;;  %v5735_v34 = vld [vmem:[#allocation5 + $0x48] sm:$0x1] }
 0x3e7   : > { %v4671_v14 = vsel %vm1589_vm3, %v4658_v33, %v4670_v48  ;;  %v6196_v9 = vsel %vm1592_vm4, %v6195_v37, %v6194_v39  ;;  %v6388_v21 = vsel %vm1595_vm5, %v6387_v50, %v6386_v58  ;;  %v6199_v18 = vrot.slane %v6120_v57, 3  ;;  %v5733_v48 = vld [vmem:[#allocation5 + $0x40] sm:$0x1]  ;;  %v5736_v1 = vld [vmem:[#allocation5 + $0x4c] sm:$0x1]  ;;  %v10831_v6 = vld [vmem:[#allocation47_spill] sm:$0xff] }
 0x3e8   : > { %v6198_v49 = vsel %vm1595_vm5, %v6197_v63, %v6196_v9  ;;  %v5737_v42 = vld [vmem:[#allocation5 + $0x50] sm:$0x1]  ;;  %v5342_v31 = vsel %vm1589_vm3, %v9888_v36, %v9899_v12  ;;  %v4672_v29 = vsel %vm1592_vm4, %v4665_v32, %v4671_v14  ;;  %v6390_v40 = vsel %vm1598_vm6, %v6389_v43, %v6388_v21  ;;  %v5738_v26 = vld [vmem:[#allocation5 + $0x54] sm:$0x1]  ;;  %5200 = vst.msk [vmem:[#allocation5 + $0x60] sm:$0xf] %vm2091_vm9, %v5197_v24 }
 0x3e9   : > { %v5812_v25 = vrot.slane %v5734_v5, 7  ;;  %v5270_v47 = vsel %vm1592_vm4, %v10829_v41, %v10828_v30  ;;  %4675 = vst.msk [vmem:[#allocation5 + $0x5c] sm:$0xf] %vm2091_vm9, %v4672_v29  ;;  %v6200_v13 = vsel %vm1598_vm6, %v6199_v18, %v6198_v49  ;;  %v5814_v7 = vrot.slane %v5735_v34, 6  ;;  %v10830_v59 = vld [vmem:[#allocation46_spill] sm:$0xff]  ;;  %v10832_v54 = vld [vmem:[#allocation48_spill] sm:$0xff] }
 0x3ea   : > { %v5816_v0 = vrot.slane %v5736_v1, 5  ;;  %v5818_v10 = vrot.slane %v5737_v42, 4  ;;  %v5343_v52 = vsel %vm1592_vm4, %v10830_v59, %v5342_v31  ;;  %v5414_v38 = vsel %vm1586_vm2, %v10832_v54, %v10831_v6  ;;  %5273 = vst.msk [vmem:[#allocation5 + $0x64] sm:$0xf] %vm2091_vm9, %v5270_v47  ;;  %v10833_v57 = vld [vmem:[#allocation49_spill] sm:$0xff] }
 0x3eb   : > { %v6311_v36 = vld [vmem:[#allocation5 + $0x5b] sm:$0x1]  ;;  %v6121_v12 = vld [vmem:[#allocation5 + $0x5a] sm:$0x1]  ;;  %v5739_v33 = vld [vmem:[#allocation5 + $0x58] sm:$0x1]  ;;  %v5813_v2 = vsel %vm1586_vm2, %v5812_v25, %v5733_v48  ;;  %v5487_v39 = vsel %vm1586_vm2, %v9927_v61, %v9925_v16  ;;  %v5415_v63 = vsel %vm1589_vm3, %v10833_v57, %v5414_v38  ;;  %v5555_v9 = vadd.f32 %v5554_v51, %v9939_v22 }
 0x3ec   : > { %v6391_v37 = vrot.slane %v6311_v36, 2  ;;  %v6201_v24 = vrot.slane %v6121_v12, 2  ;;  %v5815_v14 = vsel %vm1589_vm3, %v5814_v7, %v5813_v2  ;;  %v5820_v15 = vrot.slane %v5738_v26, 3  ;;  %5346 = vst.msk [vmem:[#allocation5 + $0x68] sm:$0xf] %vm2091_vm9, %v5343_v52 }
 0x3ed   : > { %v5817_v58 = vsel %vm1592_vm4, %v5816_v0, %v5815_v14  ;;  %v5822_v50 = vrot.slane %v5739_v33, 2  ;;  %v5488_v32 = vsel %vm1589_vm3, %v9929_v17, %v5487_v39  ;;  %v5416_v43 = vsel %vm1592_vm4, %v9923_v8, %v5415_v63 }
 0x3ee   : > { %v6392_v61 = vsel %vm1601_vm7, %v6391_v37, %v6390_v40  ;;  %v5819_v16 = vsel %vm1595_vm5, %v5818_v10, %v5817_v58  ;;  %5419 = vst.msk [vmem:[#allocation5 + $0x6c] sm:$0xf] %vm2091_vm9, %v5416_v43  ;;  %v5489_v34 = vsel %vm1592_vm4, %v9936_v4, %v5488_v32  ;;  %v5560_v17 = vsel %vm1586_vm2, %v9946_v62, %v9944_v60  ;;  %v10324_v40 = vld [vmem:[#allocation5 + $0x5] sm:$0x1] }
 0x3ef   : > { %v5821_v5 = vsel %vm1598_vm6, %v5820_v15, %v5819_v16  ;;  %v5621_v21 = vadd.f32 %v5620_v20, %v9964_v28  ;;  %v6202_v8 = vsel %vm1601_vm7, %v6201_v24, %v6200_v13  ;;  %5492 = vst.msk [vmem:[#allocation5 + $0x70] sm:$0xf] %vm2091_vm9, %v5489_v34  ;;  %v5561_v22 = vsel %vm1589_vm3, %v9948_v27, %v5560_v17  ;;  %v6313_v26 = vld [vmem:[#allocation5 + $0x63] sm:$0x1]  ;;  %v6123_v13 = vld [vmem:[#allocation5 + $0x62] sm:$0x1] }
 0x3f0   : > { %v5626_v51 = vadd.f32 %v5625_v56, %v9957_v11  ;;  %v5633_v4 = vsel %vm1586_vm2, %v9977_v45, %v9970_v3  ;;  %v6312_v60 = vld [vmem:[#allocation5 + $0x5f] sm:$0x1]  ;;  %v6122_v62 = vld [vmem:[#allocation5 + $0x5e] sm:$0x1]  ;;  %v5740_v49 = vld [vmem:[#allocation5 + $0x5c] sm:$0x1]  ;;  %v5823_v28 = vsel %vm1601_vm7, %v5822_v50, %v5821_v5  ;;  %v5562_v20 = vsel %vm1592_vm4, %v5555_v9, %v5561_v22 }
 0x3f1   : > { %v5680_v18 = vadd.f32 %v5679_v23, %v9979_v19  ;;  %v5687_v27 = vadd.f32 %v5686_v44, %v9985_v53  ;;  %v6393_v48 = vrot.slane %v6312_v60, 1  ;;  %v6203_v1 = vrot.slane %v6122_v62, 1  ;;  %5565 = vst.msk [vmem:[#allocation5 + $0x74] sm:$0xf] %vm2091_vm9, %v5562_v20  ;;  %v6314_v31 = vld [vmem:[#allocation5 + $0x67] sm:$0x1] }
 0x3f2   : > { %v5824_v11 = vrot.slane %v5740_v49, 1  ;;  %v5627_v56 = vrot.slane %v5626_v51, 1  ;;  %v5634_v3 = vsel %vm1589_vm3, %v5621_v21, %v5633_v4  ;;  %v5692_v45 = vadd.f32 %v5691_v46, %v9973_v35  ;;  %v6124_v29 = vld [vmem:[#allocation5 + $0x66] sm:$0x1]  ;;  %v5742_v37 = vld [vmem:[#allocation5 + $0x64] sm:$0x1] }
 0x3f3   : > { %v5698_v42 = vrot.slane %v9981_v55, 2  ;;  %v6394_v19 = vsel %vm1604_vm8, %v6393_v48, %v6392_v61  ;;  %v6204_v53 = vsel %vm1604_vm8, %v6203_v1, %v6202_v8  ;;  %v6315_v25 = vld [vmem:[#allocation5 + $0x6b] sm:$0x1]  ;;  %v6125_v30 = vld [vmem:[#allocation5 + $0x6a] sm:$0x1]  ;;  %v6395_v46 = vrot.slane %v6314_v31, 7 }
 0x3f4   : > { %v5825_v23 = vsel %vm1604_vm8, %v5824_v11, %v5823_v28  ;;  %v5628_v44 = vadd.f32 %v5627_v56, %v5626_v51  ;;  %6415 = vxpose.xlu1.b32.cont [3/4] (short) (narrow) %v6394_v19, 16  ;;  %6225 = vxpose.xlu0.b32.cont [3/4] (short) (narrow) %v6204_v53, 16  ;;  %v5693_v41 = vrot.slane %v5692_v45, 1  ;;  %v6397_v47 = vrot.slane %v6315_v25, 6  ;;  %v5743_v43 = vld [vmem:[#allocation5 + $0x68] sm:$0x1] }
 0x3f5   : > { %v5699_v35 = vadd.f32 %v5698_v42, %v9981_v55  ;;  %5846 = vxpose.xlu2.b32.cont [3/4] (short) (narrow) %v5825_v23, 16  ;;  %v5706_v0 = vsel %vm1586_vm2, %v5687_v27, %v5680_v18  ;;  %v6316_v10 = vld [vmem:[#allocation5 + $0x6f] sm:$0x1]  ;;  %v6126_v36 = vld [vmem:[#allocation5 + $0x6e] sm:$0x1]  ;;  %v6205_v12 = vrot.slane %v6124_v29, 7  ;;  %v6396_v52 = vsel %vm1586_vm2, %v6395_v46, %v6313_v26 }
 0x3f6   : > { %v5635_v7 = vsel %vm1592_vm4, %v5628_v44, %v5634_v3  ;;  %v5694_v33 = vadd.f32 %v5693_v41, %v5692_v45  ;;  %v6317_v59 = vld [vmem:[#allocation5 + $0x73] sm:$0x1]  ;;  %v6399_v6 = vrot.slane %v6316_v10, 5  ;;  %v6398_v55 = vsel %vm1589_vm3, %v6397_v47, %v6396_v52  ;;  %v6127_v54 = vld [vmem:[#allocation5 + $0x72] sm:$0x1] }
 0x3f7   : > { %5638 = vst.msk [vmem:[#allocation5 + $0x78] sm:$0xf] %vm2091_vm9, %v5635_v7  ;;  %v5700_v2 = vrot.slane %v5699_v35, 1  ;;  %v6206_v38 = vsel %vm1586_vm2, %v6205_v12, %v6123_v13  ;;  %v6207_v39 = vrot.slane %v6125_v30, 6  ;;  %v5973_v24 = vrot.slane %v10324_v40, 7 }
 0x3f8   : > { %v5707_v15 = vsel %vm1589_vm3, %v5694_v33, %v5706_v0  ;;  %v6318_v58 = vld [vmem:[#allocation5 + $0x77] sm:$0x1]  ;;  %v6400_v50 = vsel %vm1592_vm4, %v6399_v6, %v6398_v55  ;;  %v6128_v57 = vld [vmem:[#allocation5 + $0x76] sm:$0x1]  ;;  %v6209_v63 = vrot.slane %v6126_v36, 5  ;;  %v6401_v32 = vrot.slane %v6317_v59, 4 }
 0x3f9   : > { %v5701_v14 = vadd.f32 %v5700_v2, %v5699_v35  ;;  %v6403_v61 = vrot.slane %v6318_v58, 3  ;;  %v6208_v16 = vsel %vm1589_vm3, %v6207_v39, %v6206_v38  ;;  %v5744_v9 = vld [vmem:[#allocation5 + $0x6c] sm:$0x1]  ;;  %v6211_v17 = vrot.slane %v6127_v54, 4  ;;  %v5741_v21 = vld [vmem:[#allocation5 + $0x60] sm:$0x1] }
 0x3fa   : > { %v6210_v34 = vsel %vm1592_vm4, %v6209_v63, %v6208_v16  ;;  %v5745_v8 = vld [vmem:[#allocation5 + $0x70] sm:$0x1]  ;;  %v5826_v22 = vrot.slane %v5742_v37, 7  ;;  %v6402_v51 = vsel %vm1595_vm5, %v6401_v32, %v6400_v50  ;;  %v6213_v4 = vrot.slane %v6128_v57, 3  ;;  %v5746_v60 = vld [vmem:[#allocation5 + $0x74] sm:$0x1] }
 0x3fb   : > { %v5708_v5 = vsel %vm1592_vm4, %v5701_v14, %v5707_v15  ;;  %v5828_v62 = vrot.slane %v5743_v43, 6  ;;  %v5909_v49 = vld [vmem:[#allocation5 + $0x1] sm:$0x1]  ;;  %v6212_v28 = vsel %vm1595_vm5, %v6211_v17, %v6210_v34  ;;  %v5830_v18 = vrot.slane %v5744_v9, 5  ;;  %v5911_v48 = vld [vmem:[#allocation5 + $0x9] sm:$0x1] }
 0x3fc   : > { %5711 = vst.msk [vmem:[#allocation5 + $0x7c] sm:$0xf] %vm2091_vm9, %v5708_v5  ;;  %v5827_v20 = vsel %vm1586_vm2, %v5826_v22, %v5741_v21  ;;  %v5832_v27 = vrot.slane %v5745_v8, 4  ;;  %v5912_v1 = vld [vmem:[#allocation5 + $0xd] sm:$0x1]  ;;  %v6404_v42 = vsel %vm1598_vm6, %v6403_v61, %v6402_v51  ;;  %v5834_v29 = vrot.slane %v5746_v60, 3 }
 0x3fd   : > { %v5829_v45 = vsel %vm1589_vm3, %v5828_v62, %v5827_v20  ;;  %v5913_v40 = vld [vmem:[#allocation5 + $0x11] sm:$0x1]  ;;  %v5974_v19 = vsel %vm1586_vm2, %v5973_v24, %v5909_v49  ;;  %v6214_v23 = vsel %vm1598_vm6, %v6213_v4, %v6212_v28  ;;  %v5975_v26 = vrot.slane %v5911_v48, 6  ;;  %v5914_v35 = vld [vmem:[#allocation5 + $0x15] sm:$0x1]  ;;  %v5715_v22 = vld [vmem:[#allocation12 + $0x18] sm:$0xff] }
 0x3fe   : > { %v6319_v11 = vld [vmem:[#allocation5 + $0x7b] sm:$0x1]  ;;  %v6129_v56 = vld [vmem:[#allocation5 + $0x7a] sm:$0x1]  ;;  %v5747_v3 = vld [vmem:[#allocation5 + $0x78] sm:$0x1]  ;;  %v5831_v31 = vsel %vm1592_vm4, %v5830_v18, %v5829_v45  ;;  %6273 = vmatpush.msrb.mxu2 %v5715_v22  ;;  %6463 = vmatpush.msrb.mxu3 %v5715_v22 }
 0x3ff   : > { %v6405_v53 = vrot.slane %v6319_v11, 2  ;;  %v5833_v44 = vsel %vm1595_vm5, %v5832_v27, %v5831_v31  ;;  %v6215_v25 = vrot.slane %v6129_v56, 2  ;;  %v5836_v41 = vrot.slane %v5747_v3, 2  ;;  %v5918_v7 = vld [vmem:[#allocation5 + $0x25] sm:$0x1]  ;;  %v5714_v51 = vld [vmem:[#allocation12 + $0x10] sm:$0xff]  ;;  %5894 = vmatpush.msrb.mxu0 %v5715_v22  ;;  %6083 = vmatpush.msrb.mxu1 %v5715_v22 }
 0x400   : > { %v5835_v30 = vsel %vm1598_vm6, %v5834_v29, %v5833_v44  ;;  %v5977_v46 = vrot.slane %v5912_v1, 5  ;;  %v5976_v47 = vsel %vm1589_vm3, %v5975_v26, %v5974_v19  ;;  %v5979_v13 = vrot.slane %v5913_v40, 4  ;;  %v5919_v0 = vld [vmem:[#allocation5 + $0x29] sm:$0x1]  ;;  %v5920_v39 = vld [vmem:[#allocation5 + $0x2d] sm:$0x1]  ;;  %6274 = vmatpush.msrb.mxu2 %v5714_v51  ;;  %6464 = vmatpush.msrb.mxu3 %v5714_v51 }
 0x401   : > { %v6406_v36 = vsel %vm1601_vm7, %v6405_v53, %v6404_v42  ;;  %v6216_v33 = vsel %vm1601_vm7, %v6215_v25, %v6214_v23  ;;  %v5837_v59 = vsel %vm1601_vm7, %v5836_v41, %v5835_v30  ;;  %v5987_v37 = vrot.slane %v5918_v7, 7  ;;  %v5926_v14 = vld [vmem:[#allocation5 + $0x45] sm:$0x1]  ;;  %v5915_v57 = vld [vmem:[#allocation5 + $0x19] sm:$0x1]  ;;  %v5713_v18 = vld [vmem:[#allocation12 + $0x8] sm:$0xff]  ;;  %5895 = vmatpush.msrb.mxu0 %v5714_v51  ;;  %6084 = vmatpush.msrb.mxu1 %v5714_v51 }
 0x402   : > { %v5978_v52 = vsel %vm1592_vm4, %v5977_v46, %v5976_v47  ;;  %v5989_v24 = vrot.slane %v5919_v0, 6  ;;  %v5981_v63 = vrot.slane %v5914_v35, 3  ;;  %v5917_v32 = vld [vmem:[#allocation5 + $0x21] sm:$0x1]  ;;  %v5921_v61 = vld [vmem:[#allocation5 + $0x31] sm:$0x1]  ;;  %6275 = vmatpush.msrb.mxu2 %v5713_v18  ;;  %6465 = vmatpush.msrb.mxu3 %v5713_v18 }
 0x403   : > { %v6320_v10 = vld [vmem:[#allocation5 + $0x7f] sm:$0x1]  ;;  %v6130_v12 = vld [vmem:[#allocation5 + $0x7e] sm:$0x1]  ;;  %v5748_v2 = vld [vmem:[#allocation5 + $0x7c] sm:$0x1]  ;;  %v5980_v38 = vsel %vm1595_vm5, %v5979_v13, %v5978_v52  ;;  %v5988_v16 = vsel %vm1586_vm2, %v5987_v37, %v5917_v32  ;;  %5896 = vmatpush.msrb.mxu0 %v5713_v18  ;;  %6085 = vmatpush.msrb.mxu1 %v5713_v18 }
 0x404   : > { %v6407_v6 = vrot.slane %v6320_v10, 1  ;;  %v6217_v55 = vrot.slane %v6130_v12, 1  ;;  %v5838_v54 = vrot.slane %v5748_v2, 1  ;;  %v5982_v43 = vsel %vm1598_vm6, %v5981_v63, %v5980_v38  ;;  %v5927_v34 = vld [vmem:[#allocation5 + $0x49] sm:$0x1]  ;;  %v5712_v3 = vld [vmem:[#allocation12] sm:$0xff] }
 0x405   : > { %v5990_v9 = vsel %vm1589_vm3, %v5989_v24, %v5988_v16  ;;  %v5991_v5 = vrot.slane %v5920_v39, 5  ;;  %v6001_v17 = vrot.slane %v5926_v14, 7  ;;  %v5916_v21 = vld [vmem:[#allocation5 + $0x1d] sm:$0x1]  ;;  %v5983_v8 = vrot.slane %v5915_v57, 2  ;;  %6276 = vmatpush.msrb.mxu2 %v5712_v3  ;;  %6466 = vmatpush.msrb.mxu3 %v5712_v3 }
 0x406   : > { %v6408_v15 = vsel %vm1604_vm8, %v6407_v6, %v6406_v36  ;;  %v6218_v58 = vsel %vm1604_vm8, %v6217_v55, %v6216_v33  ;;  %v5839_v50 = vsel %vm1604_vm8, %v5838_v54, %v5837_v59  ;;  %v5922_v4 = vld [vmem:[#allocation5 + $0x35] sm:$0x1]  ;;  %v5993_v49 = vrot.slane %v5921_v61, 4  ;;  %v5925_v28 = vld [vmem:[#allocation5 + $0x41] sm:$0x1]  ;;  %5897 = vmatpush.msrb.mxu0 %v5712_v3  ;;  %6086 = vmatpush.msrb.mxu1 %v5712_v3 }
 0x407   : > { %6416 = vxpose.xlu1.b32.end [4/4] (short) (narrow) %v6408_v15, 16  ;;  %6226 = vxpose.xlu0.b32.end [4/4] (short) (narrow) %v6218_v58, 16  ;;  %v5992_v60 = vsel %vm1592_vm4, %v5991_v5, %v5990_v9  ;;  %v5984_v62 = vsel %vm1601_vm7, %v5983_v8, %v5982_v43  ;;  %v6003_v20 = vrot.slane %v5927_v34, 6  ;;  %v5985_v27 = vrot.slane %v5916_v21, 1  ;;  %v5928_v11 = vld [vmem:[#allocation5 + $0x4d] sm:$0x1] }
 0x408   : > { %5847 = vxpose.xlu2.b32.end [4/4] (short) (narrow) %v5839_v50, 16  ;;  %v6002_v48 = vsel %vm1586_vm2, %v6001_v17, %v5925_v28  ;;  %v5994_v1 = vsel %vm1595_vm5, %v5993_v49, %v5992_v60  ;;  %v5934_v56 = vld [vmem:[#allocation5 + $0x65] sm:$0x1]  ;;  %v5923_v42 = vld [vmem:[#allocation5 + $0x39] sm:$0x1]  ;;  %v5995_v31 = vrot.slane %v5922_v4, 3 }
 0x409   : > { %v5986_v45 = vsel %vm1604_vm8, %v5985_v27, %v5984_v62  ;;  %v6004_v29 = vsel %vm1589_vm3, %v6003_v20, %v6002_v48  ;;  %v5929_v19 = vld [vmem:[#allocation5 + $0x51] sm:$0x1]  ;;  %v6005_v53 = vrot.slane %v5928_v11, 5  ;;  %v5935_v23 = vld [vmem:[#allocation5 + $0x69] sm:$0x1]  ;;  %v6015_v44 = vrot.slane %v5934_v56, 7 }
 0x40a   : > { %v5996_v40 = vsel %vm1598_vm6, %v5995_v31, %v5994_v1  ;;  %v5924_v26 = vld [vmem:[#allocation5 + $0x3d] sm:$0x1]  ;;  %v5997_v25 = vrot.slane %v5923_v42, 2  ;;  %v5930_v35 = vld [vmem:[#allocation5 + $0x55] sm:$0x1]  ;;  %v6007_v46 = vrot.slane %v5929_v19, 4 }
 0x40b   : > { %v6006_v30 = vsel %vm1592_vm4, %v6005_v53, %v6004_v29  ;;  %v5933_v47 = vld [vmem:[#allocation5 + $0x61] sm:$0x1]  ;;  %v6017_v13 = vrot.slane %v5935_v23, 6  ;;  %v5999_v7 = vrot.slane %v5924_v26, 1  ;;  %v5936_v36 = vld [vmem:[#allocation5 + $0x6d] sm:$0x1] }
 0x40c   : > { %v5998_v41 = vsel %vm1601_vm7, %v5997_v25, %v5996_v40  ;;  %v6016_v0 = vsel %vm1586_vm2, %v6015_v44, %v5933_v47  ;;  %v6008_v10 = vsel %vm1595_vm5, %v6007_v46, %v6006_v30  ;;  %v5931_v33 = vld [vmem:[#allocation5 + $0x59] sm:$0x1]  ;;  %v6009_v2 = vrot.slane %v5930_v35, 3  ;;  %v5937_v6 = vld [vmem:[#allocation5 + $0x71] sm:$0x1] }
 0x40d   : > { %v6000_v12 = vsel %vm1604_vm8, %v5999_v7, %v5998_v41  ;;  %v6018_v59 = vsel %vm1589_vm3, %v6017_v13, %v6016_v0  ;;  %v6019_v55 = vrot.slane %v5936_v36, 5  ;;  %v5932_v54 = vld [vmem:[#allocation5 + $0x5d] sm:$0x1]  ;;  %v6011_v38 = vrot.slane %v5931_v33, 2  ;;  %v5938_v24 = vld [vmem:[#allocation5 + $0x75] sm:$0x1] }
 0x40e   : > { %v6010_v52 = vsel %vm1598_vm6, %v6009_v2, %v6008_v10  ;;  %v6021_v14 = vrot.slane %v5937_v6, 4  ;;  %v6013_v15 = vrot.slane %v5932_v54, 1  ;;  %v5939_v57 = vld [vmem:[#allocation5 + $0x79] sm:$0x1]  ;;  %v6023_v63 = vrot.slane %v5938_v24, 3 }
 0x40f   : > { %6033 = vxpose.xlu0.b32.start [1/4] (short) (narrow) %v5986_v45, 16  ;;  %v6020_v39 = vsel %vm1592_vm4, %v6019_v55, %v6018_v59  ;;  %v6012_v37 = vsel %vm1601_vm7, %v6011_v38, %v6010_v52  ;;  %v5940_v61 = vld [vmem:[#allocation5 + $0x7d] sm:$0x1]  ;;  %v6025_v16 = vrot.slane %v5939_v57, 2  ;;  %v7021_v62 = vld [vmem:[%s10834_s28] ss:$0 sm:$0xff] }
 0x410   : > { %v6022_v58 = vsel %vm1595_vm5, %v6021_v14, %v6020_v39  ;;  %v6014_v50 = vsel %vm1604_vm8, %v6013_v15, %v6012_v37  ;;  %v6027_v9 = vrot.slane %v5940_v61, 1 }
 0x411   : > { %v6024_v32 = vsel %vm1598_vm6, %v6023_v63, %v6022_v58 }
 0x412   : > { %v6026_v43 = vsel %vm1601_vm7, %v6025_v16, %v6024_v32 }
 0x413   : > { %v6028_v5 = vsel %vm1604_vm8, %v6027_v9, %v6026_v43 }
 0x417   : > { %6034 = vxpose.xlu0.b32.cont [2/4] (short) (narrow) %v6000_v12, 16 }
 0x41f   : > { %6035 = vxpose.xlu0.b32.cont [3/4] (short) (narrow) %v6014_v50, 16 }
 0x427   : > { %6036 = vxpose.xlu0.b32.end [4/4] (short) (narrow) %v6028_v5, 16 }
 0x489   : > { %v5860_v21 = vpop.trf.xlu2 }
 0x48a   : > { %6794 = vmatmul.msk.f32.vlgmr.msrb.gmra.mxu0 %vm535_vm0, %v5860_v21 }
 0x491   : > { %v5861_v51 = vpop.trf.xlu2 }
 0x492   : > { %6795 = vmatmul.msk.f32.gmra.mxu0 %vm535_vm0, %v5861_v51 }
 0x493   : > { %v6239_v34 = vpop.trf.xlu0  ;;  %v6429_v17 = vpop.trf.xlu1 }
 0x494   : > { %6800 = vmatmul.msk.f32.vlgmr.msrb.gmra.mxu2 %vm535_vm0, %v6239_v34  ;;  %6804 = vmatmul.msk.f32.vlgmr.msrb.gmra.mxu3 %vm535_vm0, %v6429_v17 }
 0x49b   : > { %v6240_v8 = vpop.trf.xlu0  ;;  %v6430_v22 = vpop.trf.xlu1 }
 0x49c   : > { %6801 = vmatmul.msk.f32.gmra.mxu2 %vm535_vm0, %v6240_v8  ;;  %6805 = vmatmul.msk.f32.gmra.mxu3 %vm535_vm0, %v6430_v22 }
 0x4b3   : > { %v6049_v4 = vpop.trf.xlu0 }
 0x4b4   : > { %6796 = vmatmul.msk.f32.vlgmr.msrb.gmra.mxu1 %vm535_vm0, %v6049_v4 }
 0x4bb   : > { %v6050_v60 = vpop.trf.xlu0 }
 0x4bc   : > { %6797 = vmatmul.msk.f32.gmra.mxu1 %vm535_vm0, %v6050_v60 }
 0x507   : > { %v5899_v49 = vpop.f32.mrf.mxu0 }
 0x508   : > { %v5900_v28 = vadd.f32 %v7021_v62, %v5899_v49 }
 0x50a   : > { %v5905_v20 = vmax.f32 %v5900_v28, 0.0 }
 0x50c   : > { %5907 = vst.msk [vmem:[%s10399_s10] sm:$0xff] %vm535_vm0, %v5905_v20 }
 0x50f   : > { %v5902_v3 = vpop.f32.mrf.mxu0 }
 0x510   : > { %v5903_v45 = vadd.f32 %v7021_v62, %v5902_v3 }
 0x512   : > { %v5906_v42 = vmax.f32 %v5903_v45, 0.0 }
 0x514   : > { %5908 = vst.msk [vmem:[%s10399_s10 + $0x8] sm:$0xff] %vm535_vm0, %v5906_v42 }
 0x517   : > { %v6278_v18 = vpop.f32.mrf.mxu2  ;;  %v6468_v27 = vpop.f32.mrf.mxu3 }
 0x518   : > { %v6279_v48 = vadd.f32 %v7021_v62, %v6278_v18  ;;  %v6469_v1 = vadd.f32 %v7021_v62, %v6468_v27 }
 0x51a   : > { %v6284_v11 = vmax.f32 %v6279_v48, 0.0  ;;  %v6474_v56 = vmax.f32 %v6469_v1, 0.0 }
 0x51c   : > { %6802 = vst.msk [vmem:[%s10399_s10 + $0x20] sm:$0xff] %vm535_vm0, %v6284_v11 }
 0x51d   : > { %6806 = vst.msk [vmem:[%s10399_s10 + $0x30] sm:$0xff] %vm535_vm0, %v6474_v56 }
 0x51f   : > { %v6281_v31 = vpop.f32.mrf.mxu2  ;;  %v6471_v29 = vpop.f32.mrf.mxu3 }
 0x520   : > { %v6282_v40 = vadd.f32 %v7021_v62, %v6281_v31  ;;  %v6472_v19 = vadd.f32 %v7021_v62, %v6471_v29 }
 0x522   : > { %v6285_v53 = vmax.f32 %v6282_v40, 0.0  ;;  %v6475_v23 = vmax.f32 %v6472_v19, 0.0 }
 0x524   : > { %6803 = vst.msk [vmem:[%s10399_s10 + $0x28] sm:$0xff] %vm535_vm0, %v6285_v53 }
 0x525   : > { %6807 = vst.msk [vmem:[%s10399_s10 + $0x38] sm:$0xff] %vm535_vm0, %v6475_v23 }
 0x531   : > { %v6088_v44 = vpop.f32.mrf.mxu1 }
 0x532   : > { %v6089_v26 = vadd.f32 %v7021_v62, %v6088_v44 }
 0x534   : > { %v6094_v25 = vmax.f32 %v6089_v26, 0.0 }
 0x536   : > { %6798 = vst.msk [vmem:[%s10399_s10 + $0x10] sm:$0xff] %vm535_vm0, %v6094_v25 }
 0x539   : > { %v6091_v30 = vpop.f32.mrf.mxu1 }
 0x53a   : > { %v6092_v41 = vadd.f32 %v7021_v62, %v6091_v30 }
 0x53c   : > { %v6095_v35 = vmax.f32 %v6092_v41, 0.0 }
 0x53e   : > { %6799 = vst.msk [vmem:[%s10399_s10 + $0x18] sm:$0xff] %vm535_vm0, %v6095_v35 }
 0x53f   : > { %7233 = shalt.err (!%p7230_p4)
}
 0x540   : > { %s7286_s17 = smov 128   ;;  %s7287_s19 = smov 8  }
 0x541   : > { %6827 = dma.vmem_to_hbm [thread:$0]  (%p7446_p11), %s6493_s9, 1024, %s6495_s26, %s6480_s24, %s7286_s17, %s7286_s17, %s7287_s19  }
 0x542 PF: > { %s10837_s12 = sld [smem:[#allocation19_spill]]  ;;  %p10839_p10 = scmp.ge.s32.totalorder %s7280_s20, 2 }
 0x544   : > { %p6844_p13 = pnand %p10839_p10, %p7450_p12 }
 0x546   : > { %p6845_p0 = pneg %p6844_p13 }
 0x548   : > { %s6509_s10 = sand.u32 1, %s10837_s12  }
 0x549   : > { %s6510_s16 = scalar_lea.sflag [#allocation8], %s6509_s10 }
 0x54a   : > { %7263 = dma.done.wait (%p6845_p0), %s6510_s16, 1024  }
 0x54b   : > { %7265 = vsyncadd (%p6845_p0), %s6510_s16, 4294966272  ;;  %s10840_s20 = sld [smem:[#allocation21_spill]]  ;;  %s10843_s17 = smov %s7272_s18 }
 0x54c   : > { %s10841_s22 = sld [smem:[#allocation20_spill]] }
 0x54d   : > { %s10842_s19 = sld [smem:[#allocation22_spill]] }
 0x551   : > { %p28_p6 = scmp.ge.s32.totalorder %s10840_s20, 4  }
 0x552   : > { %s10844_s18 = smov %s10841_s22 }
 0x553   :  { %30 = sbr.rel (!%p28_p6) target bundleno = 15 (0xf), region = 205 }
 0x558   :  { %6516 = vsyncpa [#allocation7], 1 }
 0x559   :  { %6518 = vsyncpa [#allocation7 + $0x1], 1 }
 0x55a   :  { %6519 = vsyncpa [#allocation10], 1 }
 0x55b   :  { %6521 = vsyncpa [#allocation10 + $0x1], 1 }
 0x55c   :  { %6522 = vsyncpa [#allocation13], 1 }
 0x55d   :  { %6523 = vsyncpa [#allocation8], 1 }
 0x55e   :  { %6525 = vsyncpa [#allocation8 + $0x1], 1 }

</bundles_post_ra>
